<compile_context>
chip_gen: v7x
topology: tpu7x:2x2x1
jax: 0.10.0
libtpu: 0.0.40
codegen_flags: <defaults>
</compile_context>

<pallas_src>
import jax
import jax.numpy as jnp
from jax import lax
from jax.experimental import pallas as pl
from jax.experimental.pallas import tpu as pltpu


# ---- CNNLstm architecture constants (module defaults, small demo sizes) ----
IMG_H = 16
IMG_W = 16
KSIZE = 3            # Conv2d kernel_size
OUT_CH = 16          # Conv2d out_channels
N_CLASSES = 8
LSTM_HIDDEN = 128
FC_HIDDEN = 64

CONV_H = IMG_H - KSIZE + 1            # 14
CONV_W = IMG_W - KSIZE + 1            # 14
POOL_H = CONV_H // 2                  # 7
POOL_W = CONV_W // 2                  # 7
FLAT_DIM = OUT_CH * POOL_H * POOL_W   # 784 = LSTM input size
GATES = 4 * LSTM_HIDDEN               # 512 (PyTorch gate order i, f, g, o)
GATES_KEPT = 3 * LSTM_HIDDEN          # 384 (f-gate dead: c0 = 0, seq_len = 1)

BB = 128                              # batch lanes per grid step (lane aligned)
PATCH_ROWS = 16                       # im2col block rows (14 padded to a tile)
HALF_ROWS = OUT_CH * POOL_H           # 112 rows of the height-pooled map


def _sigmoid(z):                      # reference implementation only
    return 1.0 / (1.0 + jnp.exp(-z))


# --------------------------------------------------------------------------
# Kernel: one 128-lane batch block, whole forward pass.  Pipeline runs
# "transposed" (features on sublanes, batch on lanes) so every matmul is a
# canonical 2-D A[M,K]@B[K,N] MXU op with a 128-aligned N.
# --------------------------------------------------------------------------
def _cnn_lstm_kernel(x_ref, wblk_ref, bconv_ref, w1_ref, b1_ref, w2_ref,
                     b2_ref, wf1_ref, bf1_ref, wf2_ref, bf2_ref, out_ref,
                     patch_scr):
    H = LSTM_HIDDEN

    def sig(z):                       # sigmoid via the EUP tanh path
        return 0.5 * jnp.tanh(0.5 * z) + 0.5

    # ---------------- Conv2d(1, OUT_CH, 3) + ReLU ---------------------------
    # x_ref: [IMG_H, IMG_W*BB] bf16, lane = image_col*BB + batch.
    # im2col block k = di*KSIZE+dj lives at sublane-aligned offset k*16; the
    # 2 pad rows per block are zeroed every step (their wblk columns are zero
    # too, but 0 * uninitialized-NaN would still poison the accumulation).
    zpad = jnp.zeros((PATCH_ROWS - CONV_H, CONV_W * BB), jnp.bfloat16)
    for k in range(KSIZE * KSIZE):
        di, dj = divmod(k, KSIZE)
        r0 = k * PATCH_ROWS
        patch_scr[r0:r0 + CONV_H, :] = x_ref[di:di + CONV_H,
                                             dj * BB:dj * BB + CONV_W * BB]
        patch_scr[r0 + CONV_H:r0 + PATCH_ROWS, :] = zpad
    # Block-diagonal conv weights -> all 16 channels in one bf16 MXU matmul.
    y = jnp.dot(wblk_ref[...], patch_scr[...],
                preferred_element_type=jnp.float32)        # [224, 14*BB]
    y = jnp.maximum(y + bconv_ref[...], 0.0).astype(jnp.bfloat16)

    # ---------------- MaxPool2d(2, 2) ---------------------------------------
    # Conv rows are pre-permuted to (even rows | odd rows), so height pooling
    # is one aligned elementwise max; width pooling + the stride-2 column
    # subsample are fused into the LSTM-0 contraction loop below.
    hp = jnp.maximum(y[:HALF_ROWS, :], y[HALF_ROWS:, :])   # [112, 14*BB]
    # TODO(synk): Dropout(0.3) in the CNN / between LSTM layers / FC head is
    # identity here (inference forward); training-mode dropout RNG not done.

    # ---------------- LSTM layer 0 (seq_len = 1, h0 = c0 = 0) ---------------
    # Gates kept transposed [3H, BB]; the forget gate is dropped (it only
    # multiplies c0 = 0) and W_hh contributes only its bias (h0 = 0).
    g1 = jnp.zeros((GATES_KEPT, BB), jnp.float32)
    for pj in range(POOL_W):
        c0 = 2 * pj * BB
        blk = jnp.maximum(hp[:, c0:c0 + BB], hp[:, c0 + BB:c0 + 2 * BB])
        # (On v7x this accumulation could use the MRB via matmul_push_rhs /
        #  matmul_acc_lhs / matmul_pop; plain dot+add is kept for portability.)
        g1 = g1 + jnp.dot(w1_ref[pj], blk, preferred_element_type=jnp.float32)
    g1 = g1 + b1_ref[...]                                   # [384, BB]
    i1 = sig(g1[0:H, :])
    c1 = i1 * jnp.tanh(g1[H:2 * H, :])
    o1 = sig(g1[2 * H:3 * H, :])
    h1 = o1 * jnp.tanh(c1)                                  # [H, BB]

    # ---------------- LSTM layer 1 -------------------------------------------
    g2 = jnp.dot(w2_ref[...], h1.astype(jnp.bfloat16),
                 preferred_element_type=jnp.float32) + b2_ref[...]
    i2 = sig(g2[0:H, :])
    c2 = i2 * jnp.tanh(g2[H:2 * H, :])
    o2 = sig(g2[2 * H:3 * H, :])
    h2 = o2 * jnp.tanh(c2)                                  # [H, BB]

    # ---------------- FC head + softmax --------------------------------------
    z = jnp.maximum(jnp.dot(wf1_ref[...], h2.astype(jnp.bfloat16),
                            preferred_element_type=jnp.float32)
                    + bf1_ref[...], 0.0)                    # [64, BB]
    logits = jnp.dot(wf2_ref[...], z.astype(jnp.bfloat16),
                     preferred_element_type=jnp.float32) + bf2_ref[...]
    m = jnp.max(logits, axis=0, keepdims=True)              # XLU reduce
    e = jnp.exp(logits - m)
    s = jnp.sum(e, axis=0, keepdims=True)
    out_ref[...] = e * pl.reciprocal(s, approx=True)        # [C, BB]


# --------------------------------------------------------------------------
# Parameter preparation (once, at init — batch independent) and forward.
# --------------------------------------------------------------------------
def prepare_kernel_params(params):
    """One-time re-layout of PyTorch-style params into kernel layouts."""
    f32, bf16 = jnp.float32, jnp.bfloat16

    # Conv as one matmul: block matrix kron(w9, I_14); K padded 126 -> 144 so
    # each im2col block starts on a sublane-tile-aligned row; output rows
    # permuted to (even conv rows | odd conv rows) so the MaxPool height
    # reduction is a single aligned elementwise max in-kernel.
    w9 = params["conv_w"].reshape(OUT_CH, KSIZE * KSIZE).astype(f32)
    eye_pad = jnp.pad(jnp.eye(CONV_H, dtype=f32),
                      ((0, 0), (0, PATCH_ROWS - CONV_H)))           # [14, 16]
    wblk = jnp.einsum("ok,ic->oikc", w9, eye_pad).reshape(
        OUT_CH * CONV_H, KSIZE * KSIZE * PATCH_ROWS)                # [224, 144]
    bconv = jnp.repeat(params["conv_b"].astype(f32), CONV_H)        # [224]
    oc = jnp.arange(OUT_CH)
    pi = jnp.arange(POOL_H)
    even_rows = (oc[:, None] * CONV_H + 2 * pi[None, :]).reshape(-1)  # [112]
    perm = jnp.concatenate([even_rows, even_rows + 1])                # [224]
    wblk = wblk[perm].astype(bf16)
    bconv = bconv[perm].reshape(OUT_CH * CONV_H, 1)

    # PyTorch LSTM gate order is (i, f, g, o); drop the dead f rows.
    keep = jnp.concatenate([jnp.arange(LSTM_HIDDEN),
                            jnp.arange(2 * LSTM_HIDDEN, 4 * LSTM_HIDDEN)])
    # LSTM-0 input weights regrouped per pooled column pj (PyTorch flatten
    # order oc, pi, pj) so each 128-lane column block contracts with one slab;
    # the stride-2 width subsample of MaxPool is thereby folded into w1.
    w1 = params["w_ih_l0"][keep].reshape(GATES_KEPT, OUT_CH, POOL_H, POOL_W)
    w1 = jnp.transpose(w1, (3, 0, 1, 2)).reshape(
        POOL_W, GATES_KEPT, OUT_CH * POOL_H).astype(bf16)           # [7,384,112]
    b1 = (params["b_ih_l0"] + params["b_hh_l0"])[keep].reshape(
        GATES_KEPT, 1).astype(f32)
    w2 = params["w_ih_l1"][keep].astype(bf16)                        # [384, 128]
    b2 = (params["b_ih_l1"] + params["b_hh_l1"])[keep].reshape(
        GATES_KEPT, 1).astype(f32)
    wf1 = params["fc1_w"].astype(bf16)
    bf1 = params["fc1_b"].reshape(FC_HIDDEN, 1).astype(f32)
    wf2 = params["fc2_w"].astype(bf16)
    bf2 = params["fc2_b"].reshape(N_CLASSES, 1).astype(f32)
    return dict(wblk=wblk, bconv=bconv, w1=w1, b1=b1, w2=w2, b2=b2,
                wf1=wf1, bf1=bf1, wf2=wf2, bf2=bf2)


def cnn_lstm_forward(x, prep):
    """x: [B, 1, IMG_H, IMG_W] float32 -> softmax probabilities [B, N_CLASSES]."""
    B = x.shape[0]
    nblk = pl.cdiv(B, BB)
    pb = nblk * BB
    # Layout plumbing only: pad batch to a 128-lane multiple; image rows on
    # sublanes, (image column, batch-within-block) on lanes, one slab/block.
    x3 = jnp.pad(x.reshape(B, IMG_H, IMG_W).astype(jnp.float32),
                 ((0, pb - B), (0, 0), (0, 0)))
    xb = x3.reshape(nblk, BB, IMG_H, IMG_W).transpose(0, 2, 3, 1).reshape(
        nblk, IMG_H, IMG_W * BB).astype(jnp.bfloat16)

    weights = (prep["wblk"], prep["bconv"], prep["w1"], prep["b1"],
               prep["w2"], prep["b2"], prep["wf1"], prep["bf1"],
               prep["wf2"], prep["bf2"])
    # Weights are block-invariant: full-array blocks with a constant index map
    # (no per-step re-DMA).
    w_specs = [pl.BlockSpec(w.shape, lambda n, _r=w.ndim: (0,) * _r)
               for w in weights]

    out_t = pl.pallas_call(
        _cnn_lstm_kernel,
        out_shape=jax.ShapeDtypeStruct((N_CLASSES, pb), jnp.float32),
        grid=(nblk,),
        in_specs=[pl.BlockSpec((None, IMG_H, IMG_W * BB),
                               lambda n: (n, 0, 0))] + w_specs,
        out_specs=pl.BlockSpec((N_CLASSES, BB), lambda n: (0, n)),
        scratch_shapes=[pltpu.VMEM(
            (KSIZE * KSIZE * PATCH_ROWS, CONV_W * BB), jnp.bfloat16)],
        compiler_params=pltpu.CompilerParams(
            dimension_semantics=("parallel",)),
    )(xb, *weights)
    return out_t[:, :B].T                                  # [B, C]


# --------------------------------------------------------------------------
# Pure-JAX reference (eval mode, f32 HIGHEST) and demo.
# --------------------------------------------------------------------------
def cnn_lstm_reference(x, params):
    hp = lax.Precision.HIGHEST
    y = lax.conv_general_dilated(
        x, params["conv_w"], window_strides=(1, 1), padding="VALID",
        dimension_numbers=("NCHW", "OIHW", "NCHW"), precision=hp)
    y = jnp.maximum(y + params["conv_b"][None, :, None, None], 0.0)
    y = lax.reduce_window(y, -jnp.inf, lax.max, (1, 1, 2, 2), (1, 1, 2, 2),
                          "VALID")
    feat = y.reshape(y.shape[0], -1)                              # [B, 784]

    def lstm_cell(inp, w_ih, b_ih, b_hh):                         # zero (h, c)
        g = jnp.dot(inp, w_ih.T, precision=hp) + b_ih + b_hh
        i, f, gg, o = jnp.split(g, 4, axis=1)
        c = _sigmoid(i) * jnp.tanh(gg)
        return _sigmoid(o) * jnp.tanh(c)

    h1 = lstm_cell(feat, params["w_ih_l0"], params["b_ih_l0"], params["b_hh_l0"])
    h2 = lstm_cell(h1, params["w_ih_l1"], params["b_ih_l1"], params["b_hh_l1"])
    z = jnp.maximum(jnp.dot(h2, params["fc1_w"].T, precision=hp)
                    + params["fc1_b"], 0.0)
    logits = jnp.dot(z, params["fc2_w"].T, precision=hp) + params["fc2_b"]
    return jax.nn.softmax(logits, axis=1)


def init_params(key):
    """Random parameters in native PyTorch layouts (torch-style uniform init)."""
    ks = jax.random.split(key, 14)

    def u(k, shape, fan_in):
        b = 1.0 / jnp.sqrt(jnp.float32(fan_in))
        return jax.random.uniform(k, shape, minval=-b, maxval=b,
                                  dtype=jnp.float32)

    return {
        "conv_w": u(ks[0], (OUT_CH, 1, KSIZE, KSIZE), KSIZE * KSIZE),
        "conv_b": u(ks[1], (OUT_CH,), KSIZE * KSIZE),
        "w_ih_l0": u(ks[2], (GATES, FLAT_DIM), LSTM_HIDDEN),
        "w_hh_l0": u(ks[3], (GATES, LSTM_HIDDEN), LSTM_HIDDEN),  # unused (h0=0)
        "b_ih_l0": u(ks[4], (GATES,), LSTM_HIDDEN),
        "b_hh_l0": u(ks[5], (GATES,), LSTM_HIDDEN),
        "w_ih_l1": u(ks[6], (GATES, LSTM_HIDDEN), LSTM_HIDDEN),
        "w_hh_l1": u(ks[7], (GATES, LSTM_HIDDEN), LSTM_HIDDEN),  # unused (h0=0)
        "b_ih_l1": u(ks[8], (GATES,), LSTM_HIDDEN),
        "b_hh_l1": u(ks[9], (GATES,), LSTM_HIDDEN),
        "fc1_w": u(ks[10], (FC_HIDDEN, LSTM_HIDDEN), LSTM_HIDDEN),
        "fc1_b": u(ks[11], (FC_HIDDEN,), LSTM_HIDDEN),
        "fc2_w": u(ks[12], (N_CLASSES, FC_HIDDEN), FC_HIDDEN),
        "fc2_b": u(ks[13], (N_CLASSES,), FC_HIDDEN),
    }


if __name__ == "__main__":
    key = jax.random.PRNGKey(0)
    pkey, xkey = jax.random.split(key)
    B = 2

    params = init_params(pkey)
    x = jax.random.normal(xkey, (B, 1, IMG_H, IMG_W), dtype=jnp.float32)

    prep = prepare_kernel_params(params)   # once, at init; batch independent
    fwd = jax.jit(cnn_lstm_forward)
    out = jax.block_until_ready(fwd(x, prep))

    ref = cnn_lstm_reference(x, params)
    assert out.shape == (B, N_CLASSES)
    # approx EUP reciprocal in the softmax -> rows sum to 1 within ~1e-3
    assert jnp.allclose(jnp.sum(out, axis=1), 1.0, atol=1e-2)
    err = float(jnp.max(jnp.abs(out - ref)))
    # bf16 MXU operands vs. f32 HIGHEST reference -> relaxed tolerance
    assert jnp.allclose(out, ref, atol=2e-2, rtol=2e-2), f"max abs err {err}"
    print("KERNEL_OK")
</pallas_src>

<mosaic_0001>
module attributes {stable_mosaic.version = 11 : i64} {
  func.func @_cnn_lstm_kernel(%arg0: i32, %arg1: memref<1x16x2048xbf16, #tpu.memory_space<vmem>>, %arg2: memref<224x144xbf16, #tpu.memory_space<vmem>>, %arg3: memref<224x1xf32, #tpu.memory_space<vmem>>, %arg4: memref<7x384x112xbf16, #tpu.memory_space<vmem>>, %arg5: memref<384x1xf32, #tpu.memory_space<vmem>>, %arg6: memref<384x128xbf16, #tpu.memory_space<vmem>>, %arg7: memref<384x1xf32, #tpu.memory_space<vmem>>, %arg8: memref<64x128xbf16, #tpu.memory_space<vmem>>, %arg9: memref<64x1xf32, #tpu.memory_space<vmem>>, %arg10: memref<8x64xbf16, #tpu.memory_space<vmem>>, %arg11: memref<8x1xf32, #tpu.memory_space<vmem>>, %arg12: memref<8x128xf32, #tpu.memory_space<vmem>>, %arg13: memref<144x1792xbf16, #tpu.memory_space<vmem>>) attributes {dimension_semantics = [#tpu.dimension_semantics<parallel>], iteration_bounds = array<i64: 1>, scalar_prefetch = 0 : i64, scratch_operands = 1 : i64, tpu.core_type = #tpu.core_type<tc>, window_params = [{transform_indices = @transform_0, window_bounds = array<i64: 1, 16, 2048>}, {pipeline_mode = #tpu.pipeline_mode<synchronous>, transform_indices = @transform_1, window_bounds = array<i64: 224, 144>}, {pipeline_mode = #tpu.pipeline_mode<synchronous>, transform_indices = @transform_2, window_bounds = array<i64: 224, 1>}, {pipeline_mode = #tpu.pipeline_mode<synchronous>, transform_indices = @transform_3, window_bounds = array<i64: 7, 384, 112>}, {pipeline_mode = #tpu.pipeline_mode<synchronous>, transform_indices = @transform_4, window_bounds = array<i64: 384, 1>}, {pipeline_mode = #tpu.pipeline_mode<synchronous>, transform_indices = @transform_5, window_bounds = array<i64: 384, 128>}, {pipeline_mode = #tpu.pipeline_mode<synchronous>, transform_indices = @transform_6, window_bounds = array<i64: 384, 1>}, {pipeline_mode = #tpu.pipeline_mode<synchronous>, transform_indices = @transform_7, window_bounds = array<i64: 64, 128>}, {pipeline_mode = #tpu.pipeline_mode<synchronous>, transform_indices = @transform_8, window_bounds = array<i64: 64, 1>}, {pipeline_mode = #tpu.pipeline_mode<synchronous>, transform_indices = @transform_9, window_bounds = array<i64: 8, 64>}, {pipeline_mode = #tpu.pipeline_mode<synchronous>, transform_indices = @transform_10, window_bounds = array<i64: 8, 1>}, {transform_indices = @transform_11, window_bounds = array<i64: 8, 128>}]} {
    %cst = arith.constant 0.000000e+00 : bf16
    %0 = vector.broadcast %cst : bf16 to vector<2x1792xbf16>
    %c0 = arith.constant 0 : index
    %c0_0 = arith.constant 0 : index
    %c0_1 = arith.constant 0 : index
    %1 = vector.load %arg1[%c0, %c0_0, %c0_1] : memref<1x16x2048xbf16, #tpu.memory_space<vmem>>, vector<1x14x1792xbf16>
    %2 = vector.shape_cast %1 : vector<1x14x1792xbf16> to vector<14x1792xbf16>
    %c0_2 = arith.constant 0 : index
    %c0_3 = arith.constant 0 : index
    %3 = vector.load %arg13[%c0_2, %c0_3] : memref<144x1792xbf16, #tpu.memory_space<vmem>>, vector<14x1792xbf16>
    tpu.vector_store %arg13[%c0_2, %c0_3], %2 {strides = array<i32>} : memref<144x1792xbf16, #tpu.memory_space<vmem>>, vector<14x1792xbf16>,
    %c14 = arith.constant 14 : index
    %c0_4 = arith.constant 0 : index
    %4 = vector.load %arg13[%c14, %c0_4] : memref<144x1792xbf16, #tpu.memory_space<vmem>>, vector<2x1792xbf16>
    tpu.vector_store %arg13[%c14, %c0_4], %0 {strides = array<i32>} : memref<144x1792xbf16, #tpu.memory_space<vmem>>, vector<2x1792xbf16>,
    %c0_5 = arith.constant 0 : index
    %c0_6 = arith.constant 0 : index
    %c128 = arith.constant 128 : index
    %5 = vector.load %arg1[%c0_5, %c0_6, %c128] : memref<1x16x2048xbf16, #tpu.memory_space<vmem>>, vector<1x14x1792xbf16>
    %6 = vector.shape_cast %5 : vector<1x14x1792xbf16> to vector<14x1792xbf16>
    %c16 = arith.constant 16 : index
    %c0_7 = arith.constant 0 : index
    %7 = vector.load %arg13[%c16, %c0_7] : memref<144x1792xbf16, #tpu.memory_space<vmem>>, vector<14x1792xbf16>
    tpu.vector_store %arg13[%c16, %c0_7], %6 {strides = array<i32>} : memref<144x1792xbf16, #tpu.memory_space<vmem>>, vector<14x1792xbf16>,
    %c30 = arith.constant 30 : index
    %c0_8 = arith.constant 0 : index
    %8 = vector.load %arg13[%c30, %c0_8] : memref<144x1792xbf16, #tpu.memory_space<vmem>>, vector<2x1792xbf16>
    tpu.vector_store %arg13[%c30, %c0_8], %0 {strides = array<i32>} : memref<144x1792xbf16, #tpu.memory_space<vmem>>, vector<2x1792xbf16>,
    %c0_9 = arith.constant 0 : index
    %c0_10 = arith.constant 0 : index
    %c256 = arith.constant 256 : index
    %9 = vector.load %arg1[%c0_9, %c0_10, %c256] : memref<1x16x2048xbf16, #tpu.memory_space<vmem>>, vector<1x14x1792xbf16>
    %10 = vector.shape_cast %9 : vector<1x14x1792xbf16> to vector<14x1792xbf16>
    %c32 = arith.constant 32 : index
    %c0_11 = arith.constant 0 : index
    %11 = vector.load %arg13[%c32, %c0_11] : memref<144x1792xbf16, #tpu.memory_space<vmem>>, vector<14x1792xbf16>
    tpu.vector_store %arg13[%c32, %c0_11], %10 {strides = array<i32>} : memref<144x1792xbf16, #tpu.memory_space<vmem>>, vector<14x1792xbf16>,
    %c46 = arith.constant 46 : index
    %c0_12 = arith.constant 0 : index
    %12 = vector.load %arg13[%c46, %c0_12] : memref<144x1792xbf16, #tpu.memory_space<vmem>>, vector<2x1792xbf16>
    tpu.vector_store %arg13[%c46, %c0_12], %0 {strides = array<i32>} : memref<144x1792xbf16, #tpu.memory_space<vmem>>, vector<2x1792xbf16>,
    %c0_13 = arith.constant 0 : index
    %c1 = arith.constant 1 : index
    %c0_14 = arith.constant 0 : index
    %13 = vector.load %arg1[%c0_13, %c1, %c0_14] : memref<1x16x2048xbf16, #tpu.memory_space<vmem>>, vector<1x14x1792xbf16>
    %14 = vector.shape_cast %13 : vector<1x14x1792xbf16> to vector<14x1792xbf16>
    %c48 = arith.constant 48 : index
    %c0_15 = arith.constant 0 : index
    %15 = vector.load %arg13[%c48, %c0_15] : memref<144x1792xbf16, #tpu.memory_space<vmem>>, vector<14x1792xbf16>
    tpu.vector_store %arg13[%c48, %c0_15], %14 {strides = array<i32>} : memref<144x1792xbf16, #tpu.memory_space<vmem>>, vector<14x1792xbf16>,
    %c62 = arith.constant 62 : index
    %c0_16 = arith.constant 0 : index
    %16 = vector.load %arg13[%c62, %c0_16] : memref<144x1792xbf16, #tpu.memory_space<vmem>>, vector<2x1792xbf16>
    tpu.vector_store %arg13[%c62, %c0_16], %0 {strides = array<i32>} : memref<144x1792xbf16, #tpu.memory_space<vmem>>, vector<2x1792xbf16>,
    %c0_17 = arith.constant 0 : index
    %c1_18 = arith.constant 1 : index
    %c128_19 = arith.constant 128 : index
    %17 = vector.load %arg1[%c0_17, %c1_18, %c128_19] : memref<1x16x2048xbf16, #tpu.memory_space<vmem>>, vector<1x14x1792xbf16>
    %18 = vector.shape_cast %17 : vector<1x14x1792xbf16> to vector<14x1792xbf16>
    %c64 = arith.constant 64 : index
    %c0_20 = arith.constant 0 : index
    %19 = vector.load %arg13[%c64, %c0_20] : memref<144x1792xbf16, #tpu.memory_space<vmem>>, vector<14x1792xbf16>
    tpu.vector_store %arg13[%c64, %c0_20], %18 {strides = array<i32>} : memref<144x1792xbf16, #tpu.memory_space<vmem>>, vector<14x1792xbf16>,
    %c78 = arith.constant 78 : index
    %c0_21 = arith.constant 0 : index
    %20 = vector.load %arg13[%c78, %c0_21] : memref<144x1792xbf16, #tpu.memory_space<vmem>>, vector<2x1792xbf16>
    tpu.vector_store %arg13[%c78, %c0_21], %0 {strides = array<i32>} : memref<144x1792xbf16, #tpu.memory_space<vmem>>, vector<2x1792xbf16>,
    %c0_22 = arith.constant 0 : index
    %c1_23 = arith.constant 1 : index
    %c256_24 = arith.constant 256 : index
    %21 = vector.load %arg1[%c0_22, %c1_23, %c256_24] : memref<1x16x2048xbf16, #tpu.memory_space<vmem>>, vector<1x14x1792xbf16>
    %22 = vector.shape_cast %21 : vector<1x14x1792xbf16> to vector<14x1792xbf16>
    %c80 = arith.constant 80 : index
    %c0_25 = arith.constant 0 : index
    %23 = vector.load %arg13[%c80, %c0_25] : memref<144x1792xbf16, #tpu.memory_space<vmem>>, vector<14x1792xbf16>
    tpu.vector_store %arg13[%c80, %c0_25], %22 {strides = array<i32>} : memref<144x1792xbf16, #tpu.memory_space<vmem>>, vector<14x1792xbf16>,
    %c94 = arith.constant 94 : index
    %c0_26 = arith.constant 0 : index
    %24 = vector.load %arg13[%c94, %c0_26] : memref<144x1792xbf16, #tpu.memory_space<vmem>>, vector<2x1792xbf16>
    tpu.vector_store %arg13[%c94, %c0_26], %0 {strides = array<i32>} : memref<144x1792xbf16, #tpu.memory_space<vmem>>, vector<2x1792xbf16>,
    %c0_27 = arith.constant 0 : index
    %c2 = arith.constant 2 : index
    %c0_28 = arith.constant 0 : index
    %25 = vector.load %arg1[%c0_27, %c2, %c0_28] : memref<1x16x2048xbf16, #tpu.memory_space<vmem>>, vector<1x14x1792xbf16>
    %26 = vector.shape_cast %25 : vector<1x14x1792xbf16> to vector<14x1792xbf16>
    %c96 = arith.constant 96 : index
    %c0_29 = arith.constant 0 : index
    %27 = vector.load %arg13[%c96, %c0_29] : memref<144x1792xbf16, #tpu.memory_space<vmem>>, vector<14x1792xbf16>
    tpu.vector_store %arg13[%c96, %c0_29], %26 {strides = array<i32>} : memref<144x1792xbf16, #tpu.memory_space<vmem>>, vector<14x1792xbf16>,
    %c110 = arith.constant 110 : index
    %c0_30 = arith.constant 0 : index
    %28 = vector.load %arg13[%c110, %c0_30] : memref<144x1792xbf16, #tpu.memory_space<vmem>>, vector<2x1792xbf16>
    tpu.vector_store %arg13[%c110, %c0_30], %0 {strides = array<i32>} : memref<144x1792xbf16, #tpu.memory_space<vmem>>, vector<2x1792xbf16>,
    %c0_31 = arith.constant 0 : index
    %c2_32 = arith.constant 2 : index
    %c128_33 = arith.constant 128 : index
    %29 = vector.load %arg1[%c0_31, %c2_32, %c128_33] : memref<1x16x2048xbf16, #tpu.memory_space<vmem>>, vector<1x14x1792xbf16>
    %30 = vector.shape_cast %29 : vector<1x14x1792xbf16> to vector<14x1792xbf16>
    %c112 = arith.constant 112 : index
    %c0_34 = arith.constant 0 : index
    %31 = vector.load %arg13[%c112, %c0_34] : memref<144x1792xbf16, #tpu.memory_space<vmem>>, vector<14x1792xbf16>
    tpu.vector_store %arg13[%c112, %c0_34], %30 {strides = array<i32>} : memref<144x1792xbf16, #tpu.memory_space<vmem>>, vector<14x1792xbf16>,
    %c126 = arith.constant 126 : index
    %c0_35 = arith.constant 0 : index
    %32 = vector.load %arg13[%c126, %c0_35] : memref<144x1792xbf16, #tpu.memory_space<vmem>>, vector<2x1792xbf16>
    tpu.vector_store %arg13[%c126, %c0_35], %0 {strides = array<i32>} : memref<144x1792xbf16, #tpu.memory_space<vmem>>, vector<2x1792xbf16>,
    %c0_36 = arith.constant 0 : index
    %c2_37 = arith.constant 2 : index
    %c256_38 = arith.constant 256 : index
    %33 = vector.load %arg1[%c0_36, %c2_37, %c256_38] : memref<1x16x2048xbf16, #tpu.memory_space<vmem>>, vector<1x14x1792xbf16>
    %34 = vector.shape_cast %33 : vector<1x14x1792xbf16> to vector<14x1792xbf16>
    %c128_39 = arith.constant 128 : index
    %c0_40 = arith.constant 0 : index
    %35 = vector.load %arg13[%c128_39, %c0_40] : memref<144x1792xbf16, #tpu.memory_space<vmem>>, vector<14x1792xbf16>
    tpu.vector_store %arg13[%c128_39, %c0_40], %34 {strides = array<i32>} : memref<144x1792xbf16, #tpu.memory_space<vmem>>, vector<14x1792xbf16>,
    %c142 = arith.constant 142 : index
    %c0_41 = arith.constant 0 : index
    %36 = vector.load %arg13[%c142, %c0_41] : memref<144x1792xbf16, #tpu.memory_space<vmem>>, vector<2x1792xbf16>
    tpu.vector_store %arg13[%c142, %c0_41], %0 {strides = array<i32>} : memref<144x1792xbf16, #tpu.memory_space<vmem>>, vector<2x1792xbf16>,
    %c0_42 = arith.constant 0 : index
    %c0_43 = arith.constant 0 : index
    %37 = vector.load %arg2[%c0_42, %c0_43] : memref<224x144xbf16, #tpu.memory_space<vmem>>, vector<224x144xbf16>
    %c0_44 = arith.constant 0 : index
    %c0_45 = arith.constant 0 : index
    %38 = vector.load %arg13[%c0_44, %c0_45] : memref<144x1792xbf16, #tpu.memory_space<vmem>>, vector<144x1792xbf16>
    %cst_46 = arith.constant dense<0.000000e+00> : vector<224x1792xf32>
    %39 = tpu.matmul %37, %38, %cst_46 {dimension_numbers = #tpu.dot_dimension_numbers<[1], [0], [0], [1], [0, 0, 1, 1], [], []>} : vector<224x144xbf16>, vector<144x1792xbf16>, vector<224x1792xf32> -> vector<224x1792xf32>
    %c0_47 = arith.constant 0 : index
    %c0_48 = arith.constant 0 : index
    %40 = vector.load %arg3[%c0_47, %c0_48] : memref<224x1xf32, #tpu.memory_space<vmem>>, vector<224x1xf32>
    %41 = vector.broadcast %40 : vector<224x1xf32> to vector<224x1792xf32>
    %42 = arith.addf %39, %41 : vector<224x1792xf32>
    %cst_49 = arith.constant 0.000000e+00 : f32
    %43 = vector.broadcast %cst_49 : f32 to vector<224x1792xf32>
    %44 = arith.maximumf %42, %43 : vector<224x1792xf32>
    %45 = arith.truncf %44 : vector<224x1792xf32> to vector<224x1792xbf16>
    %46 = vector.extract_strided_slice %45 {offsets = [0, 0], sizes = [112, 1792], strides = [1, 1]} : vector<224x1792xbf16> to vector<112x1792xbf16>
    %47 = vector.extract_strided_slice %45 {offsets = [112, 0], sizes = [112, 1792], strides = [1, 1]} : vector<224x1792xbf16> to vector<112x1792xbf16>
    %48 = arith.maximumf %46, %47 : vector<112x1792xbf16>
    %cst_50 = arith.constant 0.000000e+00 : f32
    %49 = vector.broadcast %cst_50 : f32 to vector<384x128xf32>
    %50 = vector.extract_strided_slice %48 {offsets = [0, 0], sizes = [112, 128], strides = [1, 1]} : vector<112x1792xbf16> to vector<112x128xbf16>
    %51 = vector.extract_strided_slice %48 {offsets = [0, 128], sizes = [112, 128], strides = [1, 1]} : vector<112x1792xbf16> to vector<112x128xbf16>
    %52 = arith.maximumf %50, %51 : vector<112x128xbf16>
    %c0_51 = arith.constant 0 : index
    %c0_52 = arith.constant 0 : index
    %c0_53 = arith.constant 0 : index
    %53 = vector.load %arg4[%c0_51, %c0_52, %c0_53] : memref<7x384x112xbf16, #tpu.memory_space<vmem>>, vector<1x384x112xbf16>
    %54 = vector.shape_cast %53 : vector<1x384x112xbf16> to vector<384x112xbf16>
    %cst_54 = arith.constant dense<0.000000e+00> : vector<384x128xf32>
    %55 = tpu.matmul %54, %52, %cst_54 {dimension_numbers = #tpu.dot_dimension_numbers<[1], [0], [0], [1], [0, 0, 1, 1], [], []>} : vector<384x112xbf16>, vector<112x128xbf16>, vector<384x128xf32> -> vector<384x128xf32>
    %56 = arith.addf %49, %55 : vector<384x128xf32>
    %57 = vector.extract_strided_slice %48 {offsets = [0, 256], sizes = [112, 128], strides = [1, 1]} : vector<112x1792xbf16> to vector<112x128xbf16>
    %58 = vector.extract_strided_slice %48 {offsets = [0, 384], sizes = [112, 128], strides = [1, 1]} : vector<112x1792xbf16> to vector<112x128xbf16>
    %59 = arith.maximumf %57, %58 : vector<112x128xbf16>
    %c1_55 = arith.constant 1 : index
    %c0_56 = arith.constant 0 : index
    %c0_57 = arith.constant 0 : index
    %60 = vector.load %arg4[%c1_55, %c0_56, %c0_57] : memref<7x384x112xbf16, #tpu.memory_space<vmem>>, vector<1x384x112xbf16>
    %61 = vector.shape_cast %60 : vector<1x384x112xbf16> to vector<384x112xbf16>
    %cst_58 = arith.constant dense<0.000000e+00> : vector<384x128xf32>
    %62 = tpu.matmul %61, %59, %cst_58 {dimension_numbers = #tpu.dot_dimension_numbers<[1], [0], [0], [1], [0, 0, 1, 1], [], []>} : vector<384x112xbf16>, vector<112x128xbf16>, vector<384x128xf32> -> vector<384x128xf32>
    %63 = arith.addf %56, %62 : vector<384x128xf32>
    %64 = vector.extract_strided_slice %48 {offsets = [0, 512], sizes = [112, 128], strides = [1, 1]} : vector<112x1792xbf16> to vector<112x128xbf16>
    %65 = vector.extract_strided_slice %48 {offsets = [0, 640], sizes = [112, 128], strides = [1, 1]} : vector<112x1792xbf16> to vector<112x128xbf16>
    %66 = arith.maximumf %64, %65 : vector<112x128xbf16>
    %c2_59 = arith.constant 2 : index
    %c0_60 = arith.constant 0 : index
    %c0_61 = arith.constant 0 : index
    %67 = vector.load %arg4[%c2_59, %c0_60, %c0_61] : memref<7x384x112xbf16, #tpu.memory_space<vmem>>, vector<1x384x112xbf16>
    %68 = vector.shape_cast %67 : vector<1x384x112xbf16> to vector<384x112xbf16>
    %cst_62 = arith.constant dense<0.000000e+00> : vector<384x128xf32>
    %69 = tpu.matmul %68, %66, %cst_62 {dimension_numbers = #tpu.dot_dimension_numbers<[1], [0], [0], [1], [0, 0, 1, 1], [], []>} : vector<384x112xbf16>, vector<112x128xbf16>, vector<384x128xf32> -> vector<384x128xf32>
    %70 = arith.addf %63, %69 : vector<384x128xf32>
    %71 = vector.extract_strided_slice %48 {offsets = [0, 768], sizes = [112, 128], strides = [1, 1]} : vector<112x1792xbf16> to vector<112x128xbf16>
    %72 = vector.extract_strided_slice %48 {offsets = [0, 896], sizes = [112, 128], strides = [1, 1]} : vector<112x1792xbf16> to vector<112x128xbf16>
    %73 = arith.maximumf %71, %72 : vector<112x128xbf16>
    %c3 = arith.constant 3 : index
    %c0_63 = arith.constant 0 : index
    %c0_64 = arith.constant 0 : index
    %74 = vector.load %arg4[%c3, %c0_63, %c0_64] : memref<7x384x112xbf16, #tpu.memory_space<vmem>>, vector<1x384x112xbf16>
    %75 = vector.shape_cast %74 : vector<1x384x112xbf16> to vector<384x112xbf16>
    %cst_65 = arith.constant dense<0.000000e+00> : vector<384x128xf32>
    %76 = tpu.matmul %75, %73, %cst_65 {dimension_numbers = #tpu.dot_dimension_numbers<[1], [0], [0], [1], [0, 0, 1, 1], [], []>} : vector<384x112xbf16>, vector<112x128xbf16>, vector<384x128xf32> -> vector<384x128xf32>
    %77 = arith.addf %70, %76 : vector<384x128xf32>
    %78 = vector.extract_strided_slice %48 {offsets = [0, 1024], sizes = [112, 128], strides = [1, 1]} : vector<112x1792xbf16> to vector<112x128xbf16>
    %79 = vector.extract_strided_slice %48 {offsets = [0, 1152], sizes = [112, 128], strides = [1, 1]} : vector<112x1792xbf16> to vector<112x128xbf16>
    %80 = arith.maximumf %78, %79 : vector<112x128xbf16>
    %c4 = arith.constant 4 : index
    %c0_66 = arith.constant 0 : index
    %c0_67 = arith.constant 0 : index
    %81 = vector.load %arg4[%c4, %c0_66, %c0_67] : memref<7x384x112xbf16, #tpu.memory_space<vmem>>, vector<1x384x112xbf16>
    %82 = vector.shape_cast %81 : vector<1x384x112xbf16> to vector<384x112xbf16>
    %cst_68 = arith.constant dense<0.000000e+00> : vector<384x128xf32>
    %83 = tpu.matmul %82, %80, %cst_68 {dimension_numbers = #tpu.dot_dimension_numbers<[1], [0], [0], [1], [0, 0, 1, 1], [], []>} : vector<384x112xbf16>, vector<112x128xbf16>, vector<384x128xf32> -> vector<384x128xf32>
    %84 = arith.addf %77, %83 : vector<384x128xf32>
    %85 = vector.extract_strided_slice %48 {offsets = [0, 1280], sizes = [112, 128], strides = [1, 1]} : vector<112x1792xbf16> to vector<112x128xbf16>
    %86 = vector.extract_strided_slice %48 {offsets = [0, 1408], sizes = [112, 128], strides = [1, 1]} : vector<112x1792xbf16> to vector<112x128xbf16>
    %87 = arith.maximumf %85, %86 : vector<112x128xbf16>
    %c5 = arith.constant 5 : index
    %c0_69 = arith.constant 0 : index
    %c0_70 = arith.constant 0 : index
    %88 = vector.load %arg4[%c5, %c0_69, %c0_70] : memref<7x384x112xbf16, #tpu.memory_space<vmem>>, vector<1x384x112xbf16>
    %89 = vector.shape_cast %88 : vector<1x384x112xbf16> to vector<384x112xbf16>
    %cst_71 = arith.constant dense<0.000000e+00> : vector<384x128xf32>
    %90 = tpu.matmul %89, %87, %cst_71 {dimension_numbers = #tpu.dot_dimension_numbers<[1], [0], [0], [1], [0, 0, 1, 1], [], []>} : vector<384x112xbf16>, vector<112x128xbf16>, vector<384x128xf32> -> vector<384x128xf32>
    %91 = arith.addf %84, %90 : vector<384x128xf32>
    %92 = vector.extract_strided_slice %48 {offsets = [0, 1536], sizes = [112, 128], strides = [1, 1]} : vector<112x1792xbf16> to vector<112x128xbf16>
    %93 = vector.extract_strided_slice %48 {offsets = [0, 1664], sizes = [112, 128], strides = [1, 1]} : vector<112x1792xbf16> to vector<112x128xbf16>
    %94 = arith.maximumf %92, %93 : vector<112x128xbf16>
    %c6 = arith.constant 6 : index
    %c0_72 = arith.constant 0 : index
    %c0_73 = arith.constant 0 : index
    %95 = vector.load %arg4[%c6, %c0_72, %c0_73] : memref<7x384x112xbf16, #tpu.memory_space<vmem>>, vector<1x384x112xbf16>
    %96 = vector.shape_cast %95 : vector<1x384x112xbf16> to vector<384x112xbf16>
    %cst_74 = arith.constant dense<0.000000e+00> : vector<384x128xf32>
    %97 = tpu.matmul %96, %94, %cst_74 {dimension_numbers = #tpu.dot_dimension_numbers<[1], [0], [0], [1], [0, 0, 1, 1], [], []>} : vector<384x112xbf16>, vector<112x128xbf16>, vector<384x128xf32> -> vector<384x128xf32>
    %98 = arith.addf %91, %97 : vector<384x128xf32>
    %c0_75 = arith.constant 0 : index
    %c0_76 = arith.constant 0 : index
    %99 = vector.load %arg5[%c0_75, %c0_76] : memref<384x1xf32, #tpu.memory_space<vmem>>, vector<384x1xf32>
    %100 = vector.broadcast %99 : vector<384x1xf32> to vector<384x128xf32>
    %101 = arith.addf %98, %100 : vector<384x128xf32>
    %102 = vector.extract_strided_slice %101 {offsets = [0, 0], sizes = [128, 128], strides = [1, 1]} : vector<384x128xf32> to vector<128x128xf32>
    %cst_77 = arith.constant 5.000000e-01 : f32
    %103 = vector.broadcast %cst_77 : f32 to vector<128x128xf32>
    %104 = arith.mulf %103, %102 : vector<128x128xf32>
    %105 = math.tanh %104 : vector<128x128xf32>
    %cst_78 = arith.constant 5.000000e-01 : f32
    %106 = vector.broadcast %cst_78 : f32 to vector<128x128xf32>
    %107 = arith.mulf %106, %105 : vector<128x128xf32>
    %cst_79 = arith.constant 5.000000e-01 : f32
    %108 = vector.broadcast %cst_79 : f32 to vector<128x128xf32>
    %109 = arith.addf %107, %108 : vector<128x128xf32>
    %110 = vector.extract_strided_slice %101 {offsets = [128, 0], sizes = [128, 128], strides = [1, 1]} : vector<384x128xf32> to vector<128x128xf32>
    %111 = math.tanh %110 : vector<128x128xf32>
    %112 = arith.mulf %109, %111 : vector<128x128xf32>
    %113 = vector.extract_strided_slice %101 {offsets = [256, 0], sizes = [128, 128], strides = [1, 1]} : vector<384x128xf32> to vector<128x128xf32>
    %cst_80 = arith.constant 5.000000e-01 : f32
    %114 = vector.broadcast %cst_80 : f32 to vector<128x128xf32>
    %115 = arith.mulf %114, %113 : vector<128x128xf32>
    %116 = math.tanh %115 : vector<128x128xf32>
    %cst_81 = arith.constant 5.000000e-01 : f32
    %117 = vector.broadcast %cst_81 : f32 to vector<128x128xf32>
    %118 = arith.mulf %117, %116 : vector<128x128xf32>
    %cst_82 = arith.constant 5.000000e-01 : f32
    %119 = vector.broadcast %cst_82 : f32 to vector<128x128xf32>
    %120 = arith.addf %118, %119 : vector<128x128xf32>
    %121 = math.tanh %112 : vector<128x128xf32>
    %122 = arith.mulf %120, %121 : vector<128x128xf32>
    %c0_83 = arith.constant 0 : index
    %c0_84 = arith.constant 0 : index
    %123 = vector.load %arg6[%c0_83, %c0_84] : memref<384x128xbf16, #tpu.memory_space<vmem>>, vector<384x128xbf16>
    %124 = arith.truncf %122 : vector<128x128xf32> to vector<128x128xbf16>
    %cst_85 = arith.constant dense<0.000000e+00> : vector<384x128xf32>
    %125 = tpu.matmul %123, %124, %cst_85 {dimension_numbers = #tpu.dot_dimension_numbers<[1], [0], [0], [1], [0, 0, 1, 1], [], []>} : vector<384x128xbf16>, vector<128x128xbf16>, vector<384x128xf32> -> vector<384x128xf32>
    %c0_86 = arith.constant 0 : index
    %c0_87 = arith.constant 0 : index
    %126 = vector.load %arg7[%c0_86, %c0_87] : memref<384x1xf32, #tpu.memory_space<vmem>>, vector<384x1xf32>
    %127 = vector.broadcast %126 : vector<384x1xf32> to vector<384x128xf32>
    %128 = arith.addf %125, %127 : vector<384x128xf32>
    %129 = vector.extract_strided_slice %128 {offsets = [0, 0], sizes = [128, 128], strides = [1, 1]} : vector<384x128xf32> to vector<128x128xf32>
    %cst_88 = arith.constant 5.000000e-01 : f32
    %130 = vector.broadcast %cst_88 : f32 to vector<128x128xf32>
    %131 = arith.mulf %130, %129 : vector<128x128xf32>
    %132 = math.tanh %131 : vector<128x128xf32>
    %cst_89 = arith.constant 5.000000e-01 : f32
    %133 = vector.broadcast %cst_89 : f32 to vector<128x128xf32>
    %134 = arith.mulf %133, %132 : vector<128x128xf32>
    %cst_90 = arith.constant 5.000000e-01 : f32
    %135 = vector.broadcast %cst_90 : f32 to vector<128x128xf32>
    %136 = arith.addf %134, %135 : vector<128x128xf32>
    %137 = vector.extract_strided_slice %128 {offsets = [128, 0], sizes = [128, 128], strides = [1, 1]} : vector<384x128xf32> to vector<128x128xf32>
    %138 = math.tanh %137 : vector<128x128xf32>
    %139 = arith.mulf %136, %138 : vector<128x128xf32>
    %140 = vector.extract_strided_slice %128 {offsets = [256, 0], sizes = [128, 128], strides = [1, 1]} : vector<384x128xf32> to vector<128x128xf32>
    %cst_91 = arith.constant 5.000000e-01 : f32
    %141 = vector.broadcast %cst_91 : f32 to vector<128x128xf32>
    %142 = arith.mulf %141, %140 : vector<128x128xf32>
    %143 = math.tanh %142 : vector<128x128xf32>
    %cst_92 = arith.constant 5.000000e-01 : f32
    %144 = vector.broadcast %cst_92 : f32 to vector<128x128xf32>
    %145 = arith.mulf %144, %143 : vector<128x128xf32>
    %cst_93 = arith.constant 5.000000e-01 : f32
    %146 = vector.broadcast %cst_93 : f32 to vector<128x128xf32>
    %147 = arith.addf %145, %146 : vector<128x128xf32>
    %148 = math.tanh %139 : vector<128x128xf32>
    %149 = arith.mulf %147, %148 : vector<128x128xf32>
    %c0_94 = arith.constant 0 : index
    %c0_95 = arith.constant 0 : index
    %150 = vector.load %arg8[%c0_94, %c0_95] : memref<64x128xbf16, #tpu.memory_space<vmem>>, vector<64x128xbf16>
    %151 = arith.truncf %149 : vector<128x128xf32> to vector<128x128xbf16>
    %cst_96 = arith.constant dense<0.000000e+00> : vector<64x128xf32>
    %152 = tpu.matmul %150, %151, %cst_96 {dimension_numbers = #tpu.dot_dimension_numbers<[1], [0], [0], [1], [0, 0, 1, 1], [], []>} : vector<64x128xbf16>, vector<128x128xbf16>, vector<64x128xf32> -> vector<64x128xf32>
    %c0_97 = arith.constant 0 : index
    %c0_98 = arith.constant 0 : index
    %153 = vector.load %arg9[%c0_97, %c0_98] : memref<64x1xf32, #tpu.memory_space<vmem>>, vector<64x1xf32>
    %154 = vector.broadcast %153 : vector<64x1xf32> to vector<64x128xf32>
    %155 = arith.addf %152, %154 : vector<64x128xf32>
    %cst_99 = arith.constant 0.000000e+00 : f32
    %156 = vector.broadcast %cst_99 : f32 to vector<64x128xf32>
    %157 = arith.maximumf %155, %156 : vector<64x128xf32>
    %c0_100 = arith.constant 0 : index
    %c0_101 = arith.constant 0 : index
    %158 = vector.load %arg10[%c0_100, %c0_101] : memref<8x64xbf16, #tpu.memory_space<vmem>>, vector<8x64xbf16>
    %159 = arith.truncf %157 : vector<64x128xf32> to vector<64x128xbf16>
    %cst_102 = arith.constant dense<0.000000e+00> : vector<8x128xf32>
    %160 = tpu.matmul %158, %159, %cst_102 {dimension_numbers = #tpu.dot_dimension_numbers<[1], [0], [0], [1], [0, 0, 1, 1], [], []>} : vector<8x64xbf16>, vector<64x128xbf16>, vector<8x128xf32> -> vector<8x128xf32>
    %c0_103 = arith.constant 0 : index
    %c0_104 = arith.constant 0 : index
    %161 = vector.load %arg11[%c0_103, %c0_104] : memref<8x1xf32, #tpu.memory_space<vmem>>, vector<8x1xf32>
    %162 = vector.broadcast %161 : vector<8x1xf32> to vector<8x128xf32>
    %163 = arith.addf %160, %162 : vector<8x128xf32>
    %cst_105 = arith.constant dense<0xFF800000> : vector<128xf32>
    %164 = vector.multi_reduction <maximumf>, %163, %cst_105 [0] : vector<8x128xf32> to vector<128xf32>
    %165 = vector.shape_cast %164 : vector<128xf32> to vector<1x128xf32>
    %166 = vector.broadcast %165 : vector<1x128xf32> to vector<8x128xf32>
    %167 = arith.subf %163, %166 : vector<8x128xf32>
    %168 = math.exp %167 : vector<8x128xf32>
    %cst_106 = arith.constant dense<0.000000e+00> : vector<128xf32>
    %169 = vector.multi_reduction <add>, %168, %cst_106 [0] : vector<8x128xf32> to vector<128xf32>
    %170 = vector.shape_cast %169 : vector<128xf32> to vector<1x128xf32>
    %171 = tpu.reciprocal %170 {approx = true} : vector<1x128xf32> -> vector<1x128xf32>
    %172 = vector.broadcast %171 : vector<1x128xf32> to vector<8x128xf32>
    %173 = arith.mulf %168, %172 : vector<8x128xf32>
    %c0_107 = arith.constant 0 : index
    %c0_108 = arith.constant 0 : index
    %174 = vector.load %arg12[%c0_107, %c0_108] : memref<8x128xf32, #tpu.memory_space<vmem>>, vector<8x128xf32>
    tpu.vector_store %arg12[%c0_107, %c0_108], %173 {strides = array<i32>} : memref<8x128xf32, #tpu.memory_space<vmem>>, vector<8x128xf32>,
    return
  }
  func.func @transform_0(%arg0: i32) -> (i32, i32, i32) {
    %c0_i32 = arith.constant 0 : i32
    %c0_i32_0 = arith.constant 0 : i32
    %c0_i32_1 = arith.constant 0 : i32
    return %arg0, %c0_i32, %c0_i32_0 : i32, i32, i32
  }
  func.func @transform_1(%arg0: i32) -> (i32, i32) {
    %c0_i32 = arith.constant 0 : i32
    %c0_i32_0 = arith.constant 0 : i32
    %c0_i32_1 = arith.constant 0 : i32
    return %c0_i32, %c0_i32_0 : i32, i32
  }
  func.func @transform_2(%arg0: i32) -> (i32, i32) {
    %c0_i32 = arith.constant 0 : i32
    %c0_i32_0 = arith.constant 0 : i32
    %c0_i32_1 = arith.constant 0 : i32
    return %c0_i32, %c0_i32_0 : i32, i32
  }
  func.func @transform_3(%arg0: i32) -> (i32, i32, i32) {
    %c0_i32 = arith.constant 0 : i32
    %c0_i32_0 = arith.constant 0 : i32
    %c0_i32_1 = arith.constant 0 : i32
    %c0_i32_2 = arith.constant 0 : i32
    return %c0_i32, %c0_i32_0, %c0_i32_1 : i32, i32, i32
  }
  func.func @transform_4(%arg0: i32) -> (i32, i32) {
    %c0_i32 = arith.constant 0 : i32
    %c0_i32_0 = arith.constant 0 : i32
    %c0_i32_1 = arith.constant 0 : i32
    return %c0_i32, %c0_i32_0 : i32, i32
  }
  func.func @transform_5(%arg0: i32) -> (i32, i32) {
    %c0_i32 = arith.constant 0 : i32
    %c0_i32_0 = arith.constant 0 : i32
    %c0_i32_1 = arith.constant 0 : i32
    return %c0_i32, %c0_i32_0 : i32, i32
  }
  func.func @transform_6(%arg0: i32) -> (i32, i32) {
    %c0_i32 = arith.constant 0 : i32
    %c0_i32_0 = arith.constant 0 : i32
    %c0_i32_1 = arith.constant 0 : i32
    return %c0_i32, %c0_i32_0 : i32, i32
  }
  func.func @transform_7(%arg0: i32) -> (i32, i32) {
    %c0_i32 = arith.constant 0 : i32
    %c0_i32_0 = arith.constant 0 : i32
    %c0_i32_1 = arith.constant 0 : i32
    return %c0_i32, %c0_i32_0 : i32, i32
  }
  func.func @transform_8(%arg0: i32) -> (i32, i32) {
    %c0_i32 = arith.constant 0 : i32
    %c0_i32_0 = arith.constant 0 : i32
    %c0_i32_1 = arith.constant 0 : i32
    return %c0_i32, %c0_i32_0 : i32, i32
  }
  func.func @transform_9(%arg0: i32) -> (i32, i32) {
    %c0_i32 = arith.constant 0 : i32
    %c0_i32_0 = arith.constant 0 : i32
    %c0_i32_1 = arith.constant 0 : i32
    return %c0_i32, %c0_i32_0 : i32, i32
  }
  func.func @transform_10(%arg0: i32) -> (i32, i32) {
    %c0_i32 = arith.constant 0 : i32
    %c0_i32_0 = arith.constant 0 : i32
    %c0_i32_1 = arith.constant 0 : i32
    return %c0_i32, %c0_i32_0 : i32, i32
  }
  func.func @transform_11(%arg0: i32) -> (i32, i32) {
    %c0_i32 = arith.constant 0 : i32
    %c0_i32_0 = arith.constant 0 : i32
    return %c0_i32, %arg0 : i32, i32
  }
}

</mosaic_0001>

<bundles_post_ra>
// kernel: cnn_lstm_forward.1
= control target key start
LH: loop header
LB: loop body
LE: loop exit
PB: predicated region body
PF: predicated region fallthrough
CT: control target
= control target key end

     0   :  { %v11573_v2 = vmov 0   ;;  %vm1831_vm0 = vcmask 130048   ;;  %vm4002_vm1 = vcmask 916480   ;;  %vm11575_vm2 = vmmov 0   ;;  %s15210_s0 = inlined_call_operand.vmem [shape: bf16[1,16,2048], index: 0, kind: input, shape index: {}]   ;;  %s15211_s2 = inlined_call_operand.vmem [shape: f32[224,1], index: 2, kind: input, shape index: {}]   ;;  %s15212_s1 = inlined_call_operand.vmem [shape: bf16[224,144], index: 1, kind: input, shape index: {}]   ;;  %s15213_s4 = inlined_call_operand.vmem [shape: f32[384,1], index: 4, kind: input, shape index: {}]   ;;  %s15214_s6 = inlined_call_operand.vmem [shape: f32[384,1], index: 6, kind: input, shape index: {}]   ;;  %s15215_s8 = inlined_call_operand.vmem [shape: f32[64,1], index: 8, kind: input, shape index: {}]   ;;  %s15216_s10 = inlined_call_operand.vmem [shape: f32[8,1], index: 10, kind: input, shape index: {}]   ;;  %s15217_s3 = inlined_call_operand.vmem [shape: bf16[7,384,112], index: 3, kind: input, shape index: {}]   ;;  %s15218_s5 = inlined_call_operand.vmem [shape: bf16[384,128], index: 5, kind: input, shape index: {}]   ;;  %s15219_s7 = inlined_call_operand.vmem [shape: bf16[64,128], index: 7, kind: input, shape index: {}]   ;;  %s15220_s9 = inlined_call_operand.vmem [shape: bf16[8,64], index: 9, kind: input, shape index: {}]   ;;  %s15221_s11 = inlined_call_operand.vmem [shape: f32[8,128], index: 11, kind: output, shape index: {}]  }
   0x1   :  { %v11639_v0 = vld [vmem:[%s15210_s0] sm:$0xff]  ;;  %138 = vst [vmem:[#allocation2 + $0x8] sm:$0x80] %v11573_v2  ;;  %137 = vst [vmem:[#allocation2] sm:$0x80] %v11573_v2  ;;  %10989 = vset.pattern.permute.xlu0 %v11573_v2  ;;  %10990 = vset.pattern.permute.xlu1 %v11573_v2  ;;  %v11787_v7 = vld [vmem:[%s15210_s0 + $0x8] sm:$0xff] }
   0x2   :  { %v11644_v1 = vld [vmem:[%s15210_s0 + $0x40] sm:$0x77]  ;;  %139 = vst [vmem:[#allocation2 + $0x10] sm:$0x80] %v11573_v2  ;;  %140 = vst [vmem:[#allocation2 + $0x18] sm:$0x80] %v11573_v2 }
   0x3   :  { %141 = vst [vmem:[#allocation2 + $0x20] sm:$0x80] %v11573_v2  ;;  %142 = vst [vmem:[#allocation2 + $0x28] sm:$0x80] %v11573_v2  ;;  %v151_v3 = vld [vmem:[%s15210_s0 + $0x4] sm:$0xff]  ;;  %v8994_v4 = vcombine.high %v11639_v0, %v11644_v1  ;;  %v8993_v5 = vcombine.low %v11639_v0, %v11644_v1  ;;  %v1551_v22 = vld [vmem:[%s15211_s2 + $0x70] sm:$0xff] }
   0x4   :  { %143 = vst [vmem:[#allocation2 + $0x30] sm:$0x80] %v11573_v2  ;;  %144 = vst [vmem:[#allocation2 + $0x38] sm:$0x80] %v11573_v2  ;;  %v158_v6 = vld [vmem:[%s15210_s0 + $0x44] sm:$0x77]  ;;  %1637 = vperm.xlu1 %10990, %v1551_v22  }
   0x5   :  { %145 = vst [vmem:[#allocation2 + $0x40] sm:$0x80] %v11573_v2  ;;  %146 = vst [vmem:[#allocation2 + $0x48] sm:$0x80] %v11573_v2  ;;  %v270_v8 = vld [vmem:[%s15210_s0 + $0x48] sm:$0x77]  ;;  %v9008_v9 = vcombine.high %v151_v3, %v158_v6  ;;  %v9007_v10 = vcombine.low %v151_v3, %v158_v6 }
   0x6   :  { %147 = vst [vmem:[#allocation2 + $0x50] sm:$0x80] %v11573_v2  ;;  %148 = vst [vmem:[#allocation2 + $0x58] sm:$0x80] %v11573_v2  ;;  %v9022_v11 = vcombine.high %v11787_v7, %v270_v8  ;;  %v9021_v12 = vcombine.low %v11787_v7, %v270_v8  ;;  %v382_v13 = vld [vmem:[%s15210_s0 + $0x40] sm:$0xff]  ;;  %v11805_v15 = vld [vmem:[%s15210_s0 + $0x48] sm:$0xff] }
   0x7   :  { %149 = vst [vmem:[#allocation2 + $0x60] sm:$0x80] %v11573_v2  ;;  %150 = vst [vmem:[#allocation2 + $0x68] sm:$0x80] %v11573_v2  ;;  %v11800_v14 = vld [vmem:[%s15210_s0 + $0x44] sm:$0xff]  ;;  %v9036_v16 = vcombine.high %v11639_v0, %v382_v13  ;;  %v9035_v17 = vcombine.low %v11639_v0, %v382_v13  ;;  %v9064_v23 = vcombine.high %v11787_v7, %v11805_v15  ;;  %v1552_v32 = vld [vmem:[%s15211_s2 + $0x78] sm:$0xff] }
   0x8   :  { %249 = vst [vmem:[#allocation2 + $0x70] sm:$0x80] %v11573_v2  ;;  %250 = vst [vmem:[#allocation2 + $0x78] sm:$0x80] %v11573_v2  ;;  %v9050_v18 = vcombine.high %v151_v3, %v11800_v14  ;;  %v9049_v19 = vcombine.low %v151_v3, %v11800_v14  ;;  %v1537_v20 = vld [vmem:[%s15211_s2] sm:$0xff]  ;;  %v9063_v24 = vcombine.low %v11787_v7, %v11805_v15  ;;  %v1538_v31 = vld [vmem:[%s15211_s2 + $0x8] sm:$0xff]  ;;  %1642 = vperm.xlu1 %10990, %v1552_v32  }
   0x9   :  { %251 = vst [vmem:[#allocation2 + $0x80] sm:$0x80] %v11573_v2  ;;  %252 = vst [vmem:[#allocation2 + $0x88] sm:$0x80] %v11573_v2  ;;  %v1005_v21 = vld [vmem:[%s15210_s0] sm:$0xee]  ;;  %1567 = vperm.xlu0 %10989, %v1537_v20  }
   0xa   :  { %253 = vst [vmem:[#allocation2 + $0x90] sm:$0x80] %v11573_v2  ;;  %254 = vst [vmem:[#allocation2 + $0x98] sm:$0x80] %v11573_v2  ;;  %v9078_v25 = vcombine.high %v1005_v21, %v382_v13  ;;  %v9077_v26 = vcombine.low %v1005_v21, %v382_v13  ;;  %v453_v27 = vshrl.u32 %v9036_v16, 16  ;;  %v455_v28 = vshll.u32 %v9036_v16, 16 }
   0xb   :  { %255 = vst [vmem:[#allocation2 + $0xa0] sm:$0x80] %v11573_v2  ;;  %256 = vst [vmem:[#allocation2 + $0xa8] sm:$0x80] %v11573_v2  ;;  %v446_v29 = vshrl.u32 %v9035_v17, 16  ;;  %v448_v30 = vshll.u32 %v9035_v17, 16 }
   0xc   :  { %257 = vst [vmem:[#allocation2 + $0xb0] sm:$0x80] %v11573_v2  ;;  %258 = vst [vmem:[#allocation2 + $0xb8] sm:$0x80] %v11573_v2  ;;  %v663_v33 = vshrl.u32 %v9050_v18, 16  ;;  %v665_v34 = vshll.u32 %v9050_v18, 16 }
   0xd   :  { %259 = vst [vmem:[#allocation2 + $0xc0] sm:$0x80] %v11573_v2  ;;  %260 = vst [vmem:[#allocation2 + $0xc8] sm:$0x80] %v11573_v2  ;;  %v656_v35 = vshrl.u32 %v9049_v19, 16  ;;  %v658_v36 = vshll.u32 %v9049_v19, 16  ;;  %1572 = vperm.xlu0 %10989, %v1538_v31  }
   0xe   :  { %261 = vst [vmem:[#allocation2 + $0xd0] sm:$0x80] %v11573_v2  ;;  %262 = vst [vmem:[#allocation2 + $0xd8] sm:$0x80] %v11573_v2  ;;  %v1131_v37 = vld [vmem:[%s15210_s0 + $0x4] sm:$0xee] }
   0xf   :  { %361 = vst [vmem:[#allocation2 + $0xe0] sm:$0x80] %v11573_v2  ;;  %362 = vst [vmem:[#allocation2 + $0xe8] sm:$0x80] %v11573_v2  ;;  %v1257_v38 = vld [vmem:[%s15210_s0 + $0x8] sm:$0xee]  ;;  %v9092_v62 = vcombine.high %v1131_v37, %v11800_v14  ;;  %v9091_v63 = vcombine.low %v1131_v37, %v11800_v14 }
  0x10   :  { %363 = vst [vmem:[#allocation2 + $0xf0] sm:$0x80] %v11573_v2  ;;  %364 = vst [vmem:[#allocation2 + $0xf8] sm:$0x80] %v11573_v2  ;;  %v457_v39 = vrot.slane %v455_v28, 1  ;;  %v450_v40 = vrot.slane %v448_v30, 1  ;;  %v9106_v0 = vcombine.high %v1257_v38, %v11805_v15 }
  0x11   :  { %365 = vst [vmem:[#allocation2 + $0x100] sm:$0x80] %v11573_v2  ;;  %366 = vst [vmem:[#allocation2 + $0x108] sm:$0x80] %v11573_v2  ;;  %v873_v41 = vshrl.u32 %v9064_v23, 16  ;;  %v875_v42 = vshll.u32 %v9064_v23, 16 }
  0x12   :  { %367 = vst [vmem:[#allocation2 + $0x110] sm:$0x80] %v11573_v2  ;;  %368 = vst [vmem:[#allocation2 + $0x118] sm:$0x80] %v11573_v2  ;;  %v667_v43 = vrot.slane %v665_v34, 1  ;;  %v660_v44 = vrot.slane %v658_v36, 1  ;;  %v458_v47 = vor.u32 %v457_v39, %v453_v27  ;;  %v451_v48 = vor.u32 %v450_v40, %v446_v29 }
  0x13   :  { %369 = vst [vmem:[#allocation2 + $0x120] sm:$0x80] %v11573_v2  ;;  %370 = vst [vmem:[#allocation2 + $0x128] sm:$0x80] %v11573_v2  ;;  %v866_v45 = vshrl.u32 %v9063_v24, 16  ;;  %v868_v46 = vshll.u32 %v9063_v24, 16 }
  0x14   :  { %371 = vst [vmem:[#allocation2 + $0x130] sm:$0x80] %v11573_v2  ;;  %372 = vst [vmem:[#allocation2 + $0x138] sm:$0x80] %v11573_v2  ;;  %v877_v49 = vrot.slane %v875_v42, 1  ;;  %v1076_v50 = vrot.slane %v9078_v25, 1  ;;  %v668_v55 = vor.u32 %v667_v43, %v663_v33  ;;  %v661_v56 = vor.u32 %v660_v44, %v656_v35 }
  0x15   :  { %373 = vst [vmem:[#allocation2 + $0x140] sm:$0x80] %v11573_v2  ;;  %374 = vst [vmem:[#allocation2 + $0x148] sm:$0x80] %v11573_v2  ;;  %v1539_v51 = vld [vmem:[%s15211_s2 + $0x10] sm:$0xff]  ;;  %v1540_v52 = vld [vmem:[%s15211_s2 + $0x18] sm:$0xff] }
  0x16   :  { %571 = vst [vmem:[#allocation2 + $0x150] sm:$0x80] %v11573_v2  ;;  %572 = vst [vmem:[#allocation2 + $0x158] sm:$0x80] %v11573_v2  ;;  %v870_v57 = vrot.slane %v868_v46, 1  ;;  %v1075_v58 = vrot.slane %v9077_v26, 1  ;;  %v878_v61 = vor.u32 %v877_v49, %v873_v41  ;;  %1577 = vperm.xlu0 %10989, %v1539_v51   ;;  %1582 = vperm.xlu1 %10990, %v1540_v52  }
  0x17   :  { %573 = vst [vmem:[#allocation2 + $0x160] sm:$0x80] %v11573_v2  ;;  %574 = vst [vmem:[#allocation2 + $0x168] sm:$0x80] %v11573_v2  ;;  %v10991_v59 = vld [vmem:[%s15212_s1 + $0x4] ss:$8 sps:$4 sm:$0xff]  }
  0x18   :  { %575 = vst [vmem:[#allocation2 + $0x170] sm:$0x80] %v11573_v2  ;;  %576 = vst [vmem:[#allocation2 + $0x178] sm:$0x80] %v11573_v2  ;;  %v871_v1 = vor.u32 %v870_v57, %v866_v45  ;;  %v1553_v3 = vld [vmem:[%s15211_s2 + $0x80] sm:$0xff]  ;;  %v1201_v6 = vrot.slane %v9091_v63, 1  ;;  %9147 = vmatprep.mubr.msk.bf16.mxu0 %vm1831_vm0, %v10991_v59  ;;  %9217 = vmatprep.mubr.msk.bf16.mxu1 %vm1831_vm0, %v10991_v59 }
  0x19   :  { %577 = vst [vmem:[#allocation2 + $0x180] sm:$0x80] %v11573_v2  ;;  %578 = vst [vmem:[#allocation2 + $0x188] sm:$0x80] %v11573_v2  ;;  %v1328_v8 = vrot.slane %v9106_v0, 1  ;;  %v1541_v13 = vld [vmem:[%s15211_s2 + $0x20] sm:$0xff] }
  0x1a   :  { %579 = vst [vmem:[#allocation2 + $0x190] sm:$0x80] %v11573_v2  ;;  %580 = vst [vmem:[#allocation2 + $0x198] sm:$0x80] %v11573_v2  ;;  %1647 = vperm.xlu0 %10989, %v1553_v3   ;;  %v1542_v16 = vld [vmem:[%s15211_s2 + $0x28] sm:$0xff]  ;;  %v1555_v18 = vld [vmem:[%s15211_s2 + $0x90] sm:$0xff] }
  0x1b   :  { %581 = vst [vmem:[#allocation2 + $0x1a0] sm:$0x80] %v11573_v2  ;;  %582 = vst [vmem:[#allocation2 + $0x1a8] sm:$0x80] %v11573_v2  ;;  %v1556_v20 = vld [vmem:[%s15211_s2 + $0x98] sm:$0xff]  ;;  %v44_v21 = vld [vmem:[%s15210_s0 + $0x28] sm:$0xff] }
  0x1c   :  { %583 = vst [vmem:[#allocation2 + $0x1b0] sm:$0x80] %v11573_v2  ;;  %584 = vst [vmem:[#allocation2 + $0x1b8] sm:$0x80] %v11573_v2  ;;  %v1543_v22 = vld [vmem:[%s15211_s2 + $0x30] sm:$0xff]  ;;  %v1544_v23 = vld [vmem:[%s15211_s2 + $0x38] sm:$0xff] }
  0x1d   :  { %781 = vst [vmem:[#allocation2 + $0x1c0] sm:$0x80] %v11573_v2  ;;  %782 = vst [vmem:[#allocation2 + $0x1c8] sm:$0x80] %v11573_v2  ;;  %v51_v24 = vld [vmem:[%s15210_s0 + $0x68] sm:$0x77] }
  0x1e   :  { %783 = vst [vmem:[#allocation2 + $0x1d0] sm:$0x80] %v11573_v2  ;;  %784 = vst [vmem:[#allocation2 + $0x1d8] sm:$0x80] %v11573_v2  ;;  %1587 = vperm.xlu0 %10989, %v1541_v13   ;;  %v9004_v26 = vcombine.high %v44_v21, %v51_v24  ;;  %v9003_v27 = vcombine.low %v44_v21, %v51_v24  ;;  %v156_v28 = vld [vmem:[%s15210_s0 + $0x2c] sm:$0xff]  ;;  %v1557_v34 = vld [vmem:[%s15211_s2 + $0xa0] sm:$0xff] }
  0x1f   :  { %785 = vst [vmem:[#allocation2 + $0x1e0] sm:$0x80] %v11573_v2  ;;  %786 = vst [vmem:[#allocation2 + $0x1e8] sm:$0x80] %v11573_v2  ;;  %v163_v29 = vld [vmem:[%s15210_s0 + $0x6c] sm:$0x77] }
  0x20   :  { %787 = vst [vmem:[#allocation2 + $0x1f0] sm:$0x80] %v11573_v2  ;;  %788 = vst [vmem:[#allocation2 + $0x1f8] sm:$0x80] %v11573_v2  ;;  %v9018_v31 = vcombine.high %v156_v28, %v163_v29  ;;  %v9017_v32 = vcombine.low %v156_v28, %v163_v29  ;;  %v268_v33 = vld [vmem:[%s15210_s0 + $0x30] sm:$0xff]  ;;  %v1558_v37 = vld [vmem:[%s15211_s2 + $0xa8] sm:$0xff] }
  0x21   :  { %789 = vst [vmem:[#allocation2 + $0x200] sm:$0x80] %v11573_v2  ;;  %790 = vst [vmem:[#allocation2 + $0x208] sm:$0x80] %v11573_v2  ;;  %v275_v35 = vld [vmem:[%s15210_s0 + $0x70] sm:$0x77] }
  0x22   :  { %791 = vst [vmem:[#allocation2 + $0x210] sm:$0x80] %v11573_v2  ;;  %792 = vst [vmem:[#allocation2 + $0x218] sm:$0x80] %v11573_v2  ;;  %1657 = vperm.xlu0 %10989, %v1555_v18   ;;  %v9031_v39 = vcombine.low %v268_v33, %v275_v35  ;;  %v11902_v40 = vld [vmem:[%s15210_s0 + $0x68] sm:$0xff]  ;;  %v1545_v45 = vld [vmem:[%s15211_s2 + $0x40] sm:$0xff] }
  0x23   :  { %793 = vst [vmem:[#allocation2 + $0x220] sm:$0x80] %v11573_v2  ;;  %794 = vst [vmem:[#allocation2 + $0x228] sm:$0x80] %v11573_v2  ;;  %v9046_v42 = vcombine.high %v44_v21, %v11902_v40  ;;  %v9045_v43 = vcombine.low %v44_v21, %v11902_v40  ;;  %v11909_v44 = vld [vmem:[%s15210_s0 + $0x6c] sm:$0xff]  ;;  %vm8927_vm3 = vcmask 523264  }
  0x24   :  { %991 = vst [vmem:[#allocation2 + $0x230] sm:$0x80] %v11573_v2  ;;  %992 = vst [vmem:[#allocation2 + $0x238] sm:$0x80] %v11573_v2  ;;  %v1546_v52 = vld [vmem:[%s15211_s2 + $0x48] sm:$0xff]  ;;  %v1559_v3 = vld [vmem:[%s15211_s2 + $0xb0] sm:$0xff] }
  0x25   :  { %993 = vst [vmem:[#allocation2 + $0x240] sm:$0x80] %v11573_v2  ;;  %994 = vst [vmem:[#allocation2 + $0x248] sm:$0x80] %v11573_v2  ;;  %v523_v46 = vshrl.u32 %v9046_v42, 16  ;;  %v518_v49 = vshll.u32 %v9045_v43, 16 }
  0x26   :  { %995 = vst [vmem:[#allocation2 + $0x250] sm:$0x80] %v11573_v2  ;;  %996 = vst [vmem:[#allocation2 + $0x258] sm:$0x80] %v11573_v2  ;;  %1597 = vperm.xlu0 %10989, %v1543_v22  }
  0x27   :  { %997 = vst [vmem:[#allocation2 + $0x260] sm:$0x80] %v11573_v2  ;;  %998 = vst [vmem:[#allocation2 + $0x268] sm:$0x80] %v11573_v2  ;;  %v520_v59 = vrot.slane %v518_v49, 1 }
  0x28   :  { %999 = vst [vmem:[#allocation2 + $0x270] sm:$0x80] %v11573_v2  ;;  %1000 = vst [vmem:[#allocation2 + $0x278] sm:$0x80] %v11573_v2 }
  0x29   :  { %1001 = vst [vmem:[#allocation2 + $0x280] sm:$0x80] %v11573_v2  ;;  %1002 = vst [vmem:[#allocation2 + $0x288] sm:$0x80] %v11573_v2 }
  0x2a   :  { %1003 = vst [vmem:[#allocation2 + $0x290] sm:$0x80] %v11573_v2  ;;  %1004 = vst [vmem:[#allocation2 + $0x298] sm:$0x80] %v11573_v2  ;;  %1667 = vperm.xlu0 %10989, %v1557_v34  }
  0x2b   :  { %1117 = vst [vmem:[#allocation2 + $0x2a0] sm:$0x80] %v11573_v2  ;;  %1118 = vst [vmem:[#allocation2 + $0x2a8] sm:$0x80] %v11573_v2 }
  0x2c   :  { %1119 = vst [vmem:[#allocation2 + $0x2b0] sm:$0x80] %v11573_v2  ;;  %1120 = vst [vmem:[#allocation2 + $0x2b8] sm:$0x80] %v11573_v2 }
  0x2d   :  { %1121 = vst [vmem:[#allocation2 + $0x2c0] sm:$0x80] %v11573_v2  ;;  %1122 = vst [vmem:[#allocation2 + $0x2c8] sm:$0x80] %v11573_v2 }
  0x2e   :  { %1123 = vst [vmem:[#allocation2 + $0x2d0] sm:$0x80] %v11573_v2  ;;  %1124 = vst [vmem:[#allocation2 + $0x2d8] sm:$0x80] %v11573_v2  ;;  %1607 = vperm.xlu0 %10989, %v1545_v45  }
  0x2f   :  { %1125 = vst [vmem:[#allocation2 + $0x2e0] sm:$0x80] %v11573_v2  ;;  %1126 = vst [vmem:[#allocation2 + $0x2e8] sm:$0x80] %v11573_v2 }
  0x30   :  { %1127 = vst [vmem:[#allocation2 + $0x2f0] sm:$0x80] %v11573_v2  ;;  %1128 = vst [vmem:[#allocation2 + $0x2f8] sm:$0x80] %v11573_v2 }
  0x31   :  { %1129 = vst [vmem:[#allocation2 + $0x300] sm:$0x80] %v11573_v2  ;;  %1130 = vst [vmem:[#allocation2 + $0x308] sm:$0x80] %v11573_v2 }
  0x32   :  { %1243 = vst [vmem:[#allocation2 + $0x310] sm:$0x80] %v11573_v2  ;;  %1244 = vst [vmem:[#allocation2 + $0x318] sm:$0x80] %v11573_v2  ;;  %1677 = vperm.xlu0 %10989, %v1559_v3   ;;  %v12011_v3 = vld [vmem:[%s15210_s0 + $0x10] sm:$0xff] }
  0x33   :  { %1245 = vst [vmem:[#allocation2 + $0x320] sm:$0x80] %v11573_v2  ;;  %1246 = vst [vmem:[#allocation2 + $0x328] sm:$0x80] %v11573_v2 }
  0x34   :  { %1247 = vst [vmem:[#allocation2 + $0x330] sm:$0x80] %v11573_v2  ;;  %1248 = vst [vmem:[#allocation2 + $0x338] sm:$0x80] %v11573_v2 }
  0x35   :  { %1249 = vst [vmem:[#allocation2 + $0x340] sm:$0x80] %v11573_v2  ;;  %1250 = vst [vmem:[#allocation2 + $0x348] sm:$0x80] %v11573_v2 }
  0x36   :  { %1251 = vst [vmem:[#allocation2 + $0x350] sm:$0x80] %v11573_v2  ;;  %1252 = vst [vmem:[#allocation2 + $0x358] sm:$0x80] %v11573_v2 }
  0x37   :  { %1253 = vst [vmem:[#allocation2 + $0x360] sm:$0x80] %v11573_v2  ;;  %1254 = vst [vmem:[#allocation2 + $0x368] sm:$0x80] %v11573_v2 }
  0x38   :  { %1255 = vst [vmem:[#allocation2 + $0x370] sm:$0x80] %v11573_v2  ;;  %1256 = vst [vmem:[#allocation2 + $0x378] sm:$0x80] %v11573_v2 }
  0x39   :  { %1369 = vst [vmem:[#allocation2 + $0x380] sm:$0x80] %v11573_v2  ;;  %1370 = vst [vmem:[#allocation2 + $0x388] sm:$0x80] %v11573_v2 }
  0x3a   :  { %1371 = vst [vmem:[#allocation2 + $0x390] sm:$0x80] %v11573_v2  ;;  %1372 = vst [vmem:[#allocation2 + $0x398] sm:$0x80] %v11573_v2 }
  0x3b   :  { %1373 = vst [vmem:[#allocation2 + $0x3a0] sm:$0x80] %v11573_v2  ;;  %1374 = vst [vmem:[#allocation2 + $0x3a8] sm:$0x80] %v11573_v2 }
  0x3c   :  { %1375 = vst [vmem:[#allocation2 + $0x3b0] sm:$0x80] %v11573_v2  ;;  %1376 = vst [vmem:[#allocation2 + $0x3b8] sm:$0x80] %v11573_v2 }
  0x3d   :  { %1377 = vst [vmem:[#allocation2 + $0x3c0] sm:$0x80] %v11573_v2  ;;  %1378 = vst [vmem:[#allocation2 + $0x3c8] sm:$0x80] %v11573_v2 }
  0x3e   :  { %1379 = vst [vmem:[#allocation2 + $0x3d0] sm:$0x80] %v11573_v2  ;;  %1380 = vst [vmem:[#allocation2 + $0x3d8] sm:$0x80] %v11573_v2 }
  0x3f   :  { %1381 = vst [vmem:[#allocation2 + $0x3e0] sm:$0x80] %v11573_v2  ;;  %1382 = vst [vmem:[#allocation2 + $0x3e8] sm:$0x80] %v11573_v2  ;;  %v9105_v2 = vcombine.low %v1257_v38, %v11805_v15  ;;  %v9032_v38 = vcombine.high %v268_v33, %v275_v35  ;;  %v1262_v35 = vld [vmem:[%s15210_s0 + $0x30] sm:$0xee] }
  0x40   :  { %124 = vst [vmem:[#allocation2 + $0x8] sm:$0x7f] %v8994_v4  ;;  %123 = vst [vmem:[#allocation2] sm:$0x7f] %v8993_v5  ;;  %v1202_v5 = vrot.slane %v9092_v62, 1 }
  0x41   :  { %236 = vst [vmem:[#allocation2 + $0x78] sm:$0x7f] %v9008_v9  ;;  %235 = vst [vmem:[#allocation2 + $0x70] sm:$0x7f] %v9007_v10  ;;  %v1327_v10 = vrot.slane %v9105_v2, 1 }
  0x42   :  { %348 = vst [vmem:[#allocation2 + $0xe8] sm:$0x7f] %v9022_v11  ;;  %347 = vst [vmem:[#allocation2 + $0xe0] sm:$0x7f] %v9021_v12  ;;  %v1554_v11 = vld [vmem:[%s15211_s2 + $0x88] sm:$0xff] }
  0x43   :  { %558 = vst [vmem:[#allocation2 + $0x158] sm:$0x7f] %v458_v47  ;;  %557 = vst [vmem:[#allocation2 + $0x150] sm:$0x7f] %v451_v48  ;;  %1652 = vperm.xlu1 %10990, %v1554_v11   ;;  %v525_v47 = vshll.u32 %v9046_v42, 16  ;;  %v516_v48 = vshrl.u32 %v9045_v43, 16 }
  0x44   :  { %1104 = vst [vmem:[#allocation2 + $0x2a8] sm:$0x7f] %v1076_v50  ;;  %768 = vst [vmem:[#allocation2 + $0x1c8] sm:$0x7f] %v668_v55  ;;  %v11917_v50 = vld [vmem:[%s15210_s0 + $0x70] sm:$0xff] }
  0x45   :  { %767 = vst [vmem:[#allocation2 + $0x1c0] sm:$0x7f] %v661_v56  ;;  %1103 = vst [vmem:[#allocation2 + $0x2a0] sm:$0x7f] %v1075_v58  ;;  %v9074_v55 = vcombine.high %v268_v33, %v11917_v50  ;;  %v527_v58 = vrot.slane %v525_v47, 1 }
  0x46   :  { %978 = vst [vmem:[#allocation2 + $0x238] sm:$0x7f] %v878_v61  ;;  %560 = vst [vmem:[#allocation2 + $0x168] sm:$0x7f] %v878_v61  ;;  %v11961_v43 = vld [vmem:[%s15212_s1 + $0x14] ss:$8 sps:$4 sm:$0xff]  }
  0x47   :  { %v1412_v53 = vld [vmem:[#allocation2 + $0x8] sm:$0xff]  ;;  %v1411_v54 = vld [vmem:[#allocation2] sm:$0xff]  ;;  %977 = vst [vmem:[#allocation2 + $0x230] sm:$0x7f] %v871_v1  ;;  %559 = vst [vmem:[#allocation2 + $0x160] sm:$0x7f] %v871_v1  ;;  %1592 = vperm.xlu1 %10990, %v1542_v16  }
  0x48   :  { %1874 = vmatprep.subr.bf16.mxu0 %v1412_v53  ;;  %v1426_v60 = vld [vmem:[#allocation2 + $0x78] sm:$0xff]  ;;  %v1425_v4 = vld [vmem:[#allocation2 + $0x70] sm:$0xff]  ;;  %1230 = vst [vmem:[#allocation2 + $0x318] sm:$0x7f] %v1202_v5  ;;  %1229 = vst [vmem:[#allocation2 + $0x310] sm:$0x7f] %v1201_v6  ;;  %v9060_v53 = vcombine.high %v156_v28, %v11909_v44  ;;  %v528_v5 = vor.u32 %v527_v58, %v523_v46  ;;  %v521_v6 = vor.u32 %v520_v59, %v516_v48 }
  0x49   :  { %1875 = vmatpush1.bf16.msra.mxu0 %v1411_v54  ;;  %v1440_v9 = vld [vmem:[#allocation2 + $0xe8] sm:$0xff]  ;;  %1356 = vst [vmem:[#allocation2 + $0x388] sm:$0x7f] %v1328_v8  ;;  %1355 = vst [vmem:[#allocation2 + $0x380] sm:$0x7f] %v1327_v10  ;;  %v1439_v12 = vld [vmem:[#allocation2 + $0xe0] sm:$0xff]  ;;  %v9059_v54 = vcombine.low %v156_v28, %v11909_v44 }
  0x4a   :  { %1876 = vmatprep.subr.bf16.mxu0 %v1426_v60  ;;  %v1454_v14 = vld [vmem:[#allocation2 + $0x158] sm:$0xff]  ;;  %v1453_v17 = vld [vmem:[#allocation2 + $0x150] sm:$0xff]  ;;  %134 = vst [vmem:[#allocation2 + $0x58] sm:$0x7f] %v9004_v26  ;;  %133 = vst [vmem:[#allocation2 + $0x50] sm:$0x7f] %v9003_v27  ;;  %v9073_v60 = vcombine.low %v268_v33, %v11917_v50 }
  0x4b   :  { %v1468_v19 = vld [vmem:[#allocation2 + $0x1c8] sm:$0xff]  ;;  %1662 = vperm.xlu1 %10990, %v1556_v20   ;;  %246 = vst [vmem:[#allocation2 + $0xc8] sm:$0x7f] %v9018_v31  ;;  %245 = vst [vmem:[#allocation2 + $0xc0] sm:$0x7f] %v9017_v32  ;;  %v733_v62 = vshrl.u32 %v9060_v53, 16 }
  0x4c   :  { %v1467_v25 = vld [vmem:[#allocation2 + $0x1c0] sm:$0xff]  ;;  %v1496_v41 = vld [vmem:[#allocation2 + $0x2a8] sm:$0xff]  ;;  %358 = vst [vmem:[#allocation2 + $0x138] sm:$0x7f] %v9032_v38  ;;  %357 = vst [vmem:[#allocation2 + $0x130] sm:$0x7f] %v9031_v39  ;;  %v9116_v39 = vcombine.high %v1262_v35, %v11917_v50 }
  0x4d   :  { %1877 = vmatpush1.bf16.msra.mxu0 %v1425_v4  ;;  %v1482_v30 = vld [vmem:[#allocation2 + $0x238] sm:$0xff]  ;;  %v1495_v51 = vld [vmem:[#allocation2 + $0x2a0] sm:$0xff]  ;;  %v735_v63 = vshll.u32 %v9060_v53, 16  ;;  %v726_v0 = vshrl.u32 %v9059_v54, 16  ;;  %v728_v1 = vshll.u32 %v9059_v54, 16  ;;  %v943_v8 = vshrl.u32 %v9074_v55, 16 }
  0x4e   :  { %1878 = vmatprep.subr.bf16.mxu0 %v1440_v9  ;;  %v1481_v36 = vld [vmem:[#allocation2 + $0x230] sm:$0xff]  ;;  %v945_v9 = vshll.u32 %v9074_v55, 16  ;;  %v938_v13 = vshll.u32 %v9073_v60, 16  ;;  %568 = vst [vmem:[#allocation2 + $0x1a8] sm:$0x7f] %v528_v5  ;;  %v1561_v46 = vld [vmem:[%s15211_s2 + $0xc0] sm:$0xff] }
  0x4f   :  { %1602 = vperm.xlu1 %10990, %v1544_v23   ;;  %v1510_v56 = vld [vmem:[#allocation2 + $0x318] sm:$0xff]  ;;  %v1509_v2 = vld [vmem:[#allocation2 + $0x310] sm:$0xff]  ;;  %v737_v10 = vrot.slane %v735_v63, 1  ;;  %v730_v11 = vrot.slane %v728_v1, 1  ;;  %567 = vst [vmem:[#allocation2 + $0x1a0] sm:$0x7f] %v521_v6 }
  0x50   :  { %v1524_v16 = vld [vmem:[#allocation2 + $0x388] sm:$0xff]  ;;  %v947_v18 = vrot.slane %v945_v9, 1  ;;  %v940_v24 = vrot.slane %v938_v13, 1  ;;  %v1523_v31 = vld [vmem:[#allocation2 + $0x380] sm:$0xff]  ;;  %v1547_v32 = vld [vmem:[%s15211_s2 + $0x50] sm:$0xff] }
  0x51   :  { %1879 = vmatpush1.bf16.msra.mxu0 %v1439_v12  ;;  %v1422_v57 = vld [vmem:[#allocation2 + $0x58] sm:$0xff]  ;;  %v1421_v61 = vld [vmem:[#allocation2 + $0x50] sm:$0xff]  ;;  %v936_v12 = vshrl.u32 %v9073_v60, 16  ;;  %v738_v22 = vor.u32 %v737_v10, %v733_v62  ;;  %v731_v23 = vor.u32 %v730_v11, %v726_v0  ;;  %1617 = vperm.xlu0 %10989, %v1547_v32   ;;  %v1562_v48 = vld [vmem:[%s15211_s2 + $0xc8] sm:$0xff] }
  0x52   :  { %1880 = vmatprep.subr.bf16.mxu0 %v1454_v14  ;;  %2739 = vmatprep.subr.bf16.mxu1 %v1422_v57  ;;  %v1436_v4 = vld [vmem:[#allocation2 + $0xc8] sm:$0xff]  ;;  %v1435_v21 = vld [vmem:[#allocation2 + $0xc0] sm:$0xff]  ;;  %v948_v27 = vor.u32 %v947_v18, %v943_v8  ;;  %v11981_v53 = vld [vmem:[%s15212_s1 + $0x10] ss:$8 sps:$4 sm:$0xff]  }
  0x53   :  { %1672 = vperm.xlu1 %10990, %v1558_v37   ;;  %v1010_v14 = vld [vmem:[%s15210_s0 + $0x28] sm:$0xee]  ;;  %2740 = vmatpush1.bf16.msra.mxu1 %v1421_v61  ;;  %v1450_v26 = vld [vmem:[#allocation2 + $0x138] sm:$0xff]  ;;  %778 = vst [vmem:[#allocation2 + $0x218] sm:$0x7f] %v738_v22  ;;  %v941_v33 = vor.u32 %v940_v24, %v936_v12  ;;  %v1563_v60 = vld [vmem:[%s15211_s2 + $0xd0] sm:$0xff] }
  0x54   :  { %v9087_v20 = vcombine.low %v1010_v14, %v11902_v40  ;;  %2741 = vmatprep.subr.bf16.mxu1 %v1436_v4  ;;  %777 = vst [vmem:[#allocation2 + $0x210] sm:$0x7f] %v731_v23  ;;  %v1548_v37 = vld [vmem:[%s15211_s2 + $0x58] sm:$0xff]  ;;  %988 = vst [vmem:[#allocation2 + $0x288] sm:$0x7f] %v948_v27  ;;  %v152_v62 = vld [vmem:[%s15210_s0 + $0xc] sm:$0xff] }
  0x55   :  { %1881 = vmatpush1.bf16.msra.mxu0 %v1453_v17  ;;  %v1560_v17 = vld [vmem:[%s15211_s2 + $0xb8] sm:$0xff]  ;;  %987 = vst [vmem:[#allocation2 + $0x280] sm:$0x7f] %v941_v33  ;;  %v1464_v47 = vld [vmem:[#allocation2 + $0x1a8] sm:$0xff]  ;;  %1687 = vperm.xlu0 %10989, %v1561_v46   ;;  %v271_v4 = vld [vmem:[%s15210_s0 + $0x50] sm:$0x77] }
  0x56   :  { %1882 = vmatprep.subr.bf16.mxu0 %v1468_v19  ;;  %v9088_v19 = vcombine.high %v1010_v14, %v11902_v40  ;;  %v1085_v29 = vrot.slane %v9087_v20, 1  ;;  %v9115_v40 = vcombine.low %v1262_v35, %v11917_v50  ;;  %v1463_v49 = vld [vmem:[#allocation2 + $0x1a0] sm:$0xff]  ;;  %v47_v55 = vld [vmem:[%s15210_s0 + $0x48] sm:$0x77]  ;;  %v1564_v61 = vld [vmem:[%s15211_s2 + $0xd8] sm:$0xff]  ;;  %v9024_v6 = vcombine.high %v12011_v3, %v271_v4 }
  0x57   :  { %1612 = vperm.xlu1 %10990, %v1546_v52   ;;  %2742 = vmatpush1.bf16.msra.mxu1 %v1435_v21  ;;  %v1550_v52 = vld [vmem:[%s15211_s2 + $0x68] sm:$0xff]  ;;  %v8996_v58 = vcombine.high %v11787_v7, %v47_v55  ;;  %v8995_v59 = vcombine.low %v11787_v7, %v47_v55  ;;  %v7322_v5 = vld [vmem:[%s15213_s4] sm:$0xff]  ;;  %v9023_v8 = vcombine.low %v12011_v3, %v271_v4  ;;  %v12032_v12 = vld [vmem:[%s15212_s1 + $0x34] ss:$8 sps:$4 sm:$0xff]  }
  0x58   :  { %v1086_v28 = vrot.slane %v9088_v19, 1  ;;  %1113 = vst [vmem:[#allocation2 + $0x2f0] sm:$0x7f] %v1085_v29  ;;  %2743 = vmatprep.subr.bf16.mxu1 %v1450_v26  ;;  %v1337_v45 = vrot.slane %v9115_v40, 1  ;;  %v159_v63 = vld [vmem:[%s15210_s0 + $0x4c] sm:$0x77] }
  0x59   :  { %1883 = vmatpush1.bf16.msra.mxu0 %v1467_v25  ;;  %v1136_v25 = vld [vmem:[%s15210_s0 + $0x2c] sm:$0xee]  ;;  %126 = vst [vmem:[#allocation2 + $0x18] sm:$0x7f] %v8996_v58  ;;  %125 = vst [vmem:[#allocation2 + $0x10] sm:$0x7f] %v8995_v59  ;;  %v9010_v1 = vcombine.high %v152_v62, %v159_v63 }
  0x5a   :  { %1884 = vmatprep.subr.bf16.mxu0 %v1482_v30  ;;  %v9102_v30 = vcombine.high %v1136_v25, %v11909_v44  ;;  %v9101_v34 = vcombine.low %v1136_v25, %v11909_v44  ;;  %1114 = vst [vmem:[#allocation2 + $0x2f8] sm:$0x7f] %v1086_v28  ;;  %v1338_v44 = vrot.slane %v9116_v39, 1  ;;  %1365 = vst [vmem:[#allocation2 + $0x3d0] sm:$0x7f] %v1337_v45  ;;  %v1478_v50 = vld [vmem:[#allocation2 + $0x218] sm:$0xff] }
  0x5b   :  { %1682 = vperm.xlu1 %10990, %v1560_v17   ;;  %v1477_v54 = vld [vmem:[#allocation2 + $0x210] sm:$0xff]  ;;  %v1492_v57 = vld [vmem:[#allocation2 + $0x288] sm:$0xff]  ;;  %238 = vst [vmem:[#allocation2 + $0x88] sm:$0x7f] %v9010_v1  ;;  %350 = vst [vmem:[#allocation2 + $0xf8] sm:$0x7f] %v9024_v6 }
  0x5c   :  { %v1212_v38 = vrot.slane %v9102_v30, 1  ;;  %v1211_v42 = vrot.slane %v9101_v34, 1  ;;  %1366 = vst [vmem:[#allocation2 + $0x3d8] sm:$0x7f] %v1338_v44  ;;  %v1491_v7 = vld [vmem:[#allocation2 + $0x280] sm:$0xff]  ;;  %v7323_v9 = vld [vmem:[%s15213_s4 + $0x8] sm:$0xff] }
  0x5d   :  { %1885 = vmatpush1.bf16.msra.mxu0 %v1481_v36  ;;  %v11951_v36 = vld [vmem:[%s15212_s1] ss:$8 sps:$4 sm:$0xff]   ;;  %349 = vst [vmem:[#allocation2 + $0xf0] sm:$0x7f] %v9023_v8  ;;  %v12037_v14 = vld [vmem:[%s15210_s0 + $0x4c] sm:$0xff]  ;;  %v7325_v20 = vld [vmem:[%s15213_s4 + $0x18] sm:$0xff] }
  0x5e   :  { %1886 = vmatprep.subr.bf16.mxu0 %v1496_v41  ;;  %v1449_v41 = vld [vmem:[#allocation2 + $0x130] sm:$0xff]  ;;  %1240 = vst [vmem:[#allocation2 + $0x368] sm:$0x7f] %v1212_v38  ;;  %1239 = vst [vmem:[#allocation2 + $0x360] sm:$0x7f] %v1211_v42  ;;  %v9052_v18 = vcombine.high %v152_v62, %v12037_v14  ;;  %v9051_v19 = vcombine.low %v152_v62, %v12037_v14  ;;  %v7338_v33 = vld [vmem:[%s15213_s4 + $0x80] sm:$0xff] }
  0x5f   :  { %1622 = vperm.xlu1 %10990, %v1548_v37   ;;  %2744 = vmatpush1.bf16.msra.mxu1 %v1449_v41  ;;  %v12027_v10 = vld [vmem:[%s15212_s1 + $0x20] ss:$8 sps:$4 sm:$0xff]   ;;  %v1505_v11 = vld [vmem:[#allocation2 + $0x2f0] sm:$0xff] }
  0x60   :  { %2745 = vmatprep.subr.bf16.mxu1 %v1464_v47  ;;  %v1414_v17 = vld [vmem:[#allocation2 + $0x18] sm:$0xff]  ;;  %v1413_v21 = vld [vmem:[#allocation2 + $0x10] sm:$0xff]  ;;  %v677_v23 = vshrl.u32 %v9052_v18, 16  ;;  %v679_v24 = vshll.u32 %v9052_v18, 16  ;;  %v670_v25 = vshrl.u32 %v9051_v19, 16  ;;  %v672_v26 = vshll.u32 %v9051_v19, 16 }
  0x61   :  { %1887 = vmatpush1.bf16.msra.mxu0 %v1495_v51  ;;  %v1549_v51 = vld [vmem:[%s15211_s2 + $0x60] sm:$0xff]  ;;  %v1506_v0 = vld [vmem:[#allocation2 + $0x2f8] sm:$0xff]  ;;  %v12051_v27 = vld [vmem:[%s15210_s0 + $0x50] sm:$0xff] }
  0x62   :  { %1888 = vmatprep.subr.bf16.mxu0 %v1510_v56  ;;  %v11989_v56 = vld [vmem:[%s15212_s1 + $0x24] ss:$8 sps:$4 sm:$0xff]   ;;  %1627 = vperm.xlu0 %10989, %v1549_v51   ;;  %v9066_v29 = vcombine.high %v12011_v3, %v12051_v27  ;;  %v9065_v30 = vcombine.low %v12011_v3, %v12051_v27  ;;  %v12065_v32 = vld [vmem:[%s15212_s1 + $0x30] ss:$8 sps:$4 sm:$0xff]   ;;  %v681_v37 = vrot.slane %v679_v24, 1  ;;  %v674_v38 = vrot.slane %v672_v26, 1 }
  0x63   :  { %1692 = vperm.xlu1 %10990, %v1562_v48   ;;  %2746 = vmatpush1.bf16.msra.mxu1 %v1463_v49  ;;  %v1534_v28 = vld [vmem:[#allocation2 + $0x3d8] sm:$0xff]  ;;  %v7339_v34 = vld [vmem:[%s15213_s4 + $0x88] sm:$0xff]  ;;  %v1533_v41 = vld [vmem:[#allocation2 + $0x3d0] sm:$0xff] }
  0x64   :  { %2747 = vmatprep.subr.bf16.mxu1 %v1478_v50  ;;  %v1428_v35 = vld [vmem:[#allocation2 + $0x88] sm:$0xff]  ;;  %v887_v44 = vshrl.u32 %v9066_v29, 16  ;;  %v889_v45 = vshll.u32 %v9066_v29, 16  ;;  %v880_v46 = vshrl.u32 %v9065_v30, 16  ;;  %v882_v47 = vshll.u32 %v9065_v30, 16  ;;  %v1442_v48 = vld [vmem:[#allocation2 + $0xf8] sm:$0xff] }
  0x65   :  { %1889 = vmatpush1.bf16.msra.mxu0 %v1509_v2  ;;  %v9009_v2 = vcombine.low %v152_v62, %v159_v63  ;;  %v1520_v13 = vld [vmem:[#allocation2 + $0x368] sm:$0xff]  ;;  %v1519_v22 = vld [vmem:[#allocation2 + $0x360] sm:$0xff]  ;;  %v682_v49 = vor.u32 %v681_v37, %v677_v23  ;;  %v675_v50 = vor.u32 %v674_v38, %v670_v25  ;;  %v1441_v1 = vld [vmem:[#allocation2 + $0xf0] sm:$0xff] }
  0x66   :  { %1890 = vmatprep.subr.bf16.mxu0 %v1524_v16  ;;  %1697 = vperm.xlu0 %10989, %v1563_v60   ;;  %v7324_v16 = vld [vmem:[%s15213_s4 + $0x10] sm:$0xff]  ;;  %v884_v55 = vrot.slane %v882_v47, 1  ;;  %v7326_v58 = vld [vmem:[%s15213_s4 + $0x20] sm:$0xff]  ;;  %v7327_v62 = vld [vmem:[%s15213_s4 + $0x28] sm:$0xff] }
  0x67   :  { %1632 = vperm.xlu1 %10990, %v1550_v52   ;;  %2748 = vmatpush1.bf16.msra.mxu1 %v1477_v54  ;;  %237 = vst [vmem:[#allocation2 + $0x80] sm:$0x7f] %v9009_v2  ;;  %v12078_v54 = vld [vmem:[%s15212_s1 + $0x44] ss:$8 sps:$4 sm:$0xff]   ;;  %770 = vst [vmem:[#allocation2 + $0x1d8] sm:$0x7f] %v682_v49 }
  0x68   :  { %2749 = vmatprep.subr.bf16.mxu1 %v1492_v57  ;;  %v1132_v57 = vld [vmem:[%s15210_s0 + $0xc] sm:$0xee]  ;;  %769 = vst [vmem:[#allocation2 + $0x1d0] sm:$0x7f] %v675_v50  ;;  %v885_v63 = vor.u32 %v884_v55, %v880_v46  ;;  %v7354_v23 = vld [vmem:[%s15213_s4 + $0x100] sm:$0xff]  ;;  %v7345_v49 = vld [vmem:[%s15213_s4 + $0xb8] sm:$0xff] }
  0x69   :  { %1891 = vmatpush1.bf16.msra.mxu0 %v1523_v31  ;;  %v1006_v31 = vld [vmem:[%s15210_s0 + $0x8] sm:$0xee]  ;;  %v9094_v59 = vcombine.high %v1132_v57, %v12037_v14  ;;  %v9093_v60 = vcombine.low %v1132_v57, %v12037_v14  ;;  %v7328_v19 = vld [vmem:[%s15213_s4 + $0x30] sm:$0xff]  ;;  %v7342_v30 = vld [vmem:[%s15213_s4 + $0xa0] sm:$0xff] }
  0x6a   :  { %7372 = vperm.xlu0 %10989, %v7322_v5   ;;  %2047 = vmatprep.subr.bf16.mxu0 %v1414_v17  ;;  %v9080_v39 = vcombine.high %v1006_v31, %v11805_v15  ;;  %v9079_v40 = vcombine.low %v1006_v31, %v11805_v15  ;;  %v891_v15 = vrot.slane %v889_v45, 1  ;;  %v1456_v6 = vld [vmem:[#allocation2 + $0x168] sm:$0xff]  ;;  %979 = vst [vmem:[#allocation2 + $0x240] sm:$0x7f] %v885_v63  ;;  %561 = vst [vmem:[#allocation2 + $0x170] sm:$0x7f] %v885_v63 }
  0x6b   :  { %1702 = vperm.xlu1 %10990, %v1564_v61   ;;  %2750 = vmatpush1.bf16.msra.mxu1 %v1491_v7  ;;  %v1258_v61 = vld [vmem:[%s15210_s0 + $0x10] sm:$0xee]  ;;  %v1204_v2 = vrot.slane %v9094_v59, 1  ;;  %v1203_v4 = vrot.slane %v9093_v60, 1  ;;  %v12111_v14 = vld [vmem:[%s15212_s1 + $0x40] ss:$8 sps:$4 sm:$0xff]  }
  0x6c   :  { %1907 = vmatmul.mubr.bf16.vlgmr.msra.gmra.mrb[0].mxu0 %v11951_v36  ;;  %2751 = vmatprep.subr.bf16.mxu1 %v1506_v0  ;;  %v1078_v51 = vrot.slane %v9080_v39, 1  ;;  %v1077_v52 = vrot.slane %v9079_v40, 1  ;;  %v892_v7 = vor.u32 %v891_v15, %v887_v44  ;;  %v9108_v0 = vcombine.high %v1258_v61, %v12051_v27  ;;  %v12116_v17 = vld [vmem:[%s15212_s1 + $0x54] ss:$8 sps:$4 sm:$0xff]   ;;  %v7355_v24 = vld [vmem:[%s15213_s4 + $0x108] sm:$0xff] }
  0x6d   :  { %9148 = vmatprep.mubr.msk.bf16.mxu0 %vm1831_vm0, %v11961_v43  ;;  %2048 = vmatpush1.bf16.msra.mxu0 %v1413_v21  ;;  %v9107_v5 = vcombine.low %v1258_v61, %v12051_v27  ;;  %1232 = vst [vmem:[#allocation2 + $0x328] sm:$0x7f] %v1204_v2  ;;  %1231 = vst [vmem:[#allocation2 + $0x320] sm:$0x7f] %v1203_v4  ;;  %v12139_v25 = vld [vmem:[%s15212_s1 + $0x50] ss:$8 sps:$4 sm:$0xff]  }
  0x6e   :  { %7382 = vperm.xlu0 %10989, %v7324_v16   ;;  %2049 = vmatprep.subr.bf16.mxu0 %v1428_v35  ;;  %v1427_v42 = vld [vmem:[#allocation2 + $0x80] sm:$0xff]  ;;  %1106 = vst [vmem:[#allocation2 + $0x2b8] sm:$0x7f] %v1078_v51  ;;  %1105 = vst [vmem:[#allocation2 + $0x2b0] sm:$0x7f] %v1077_v52  ;;  %v1330_v8 = vrot.slane %v9108_v0, 1 }
  0x6f   :  { %7377 = vperm.xlu1 %10990, %v7323_v9   ;;  %2752 = vmatpush1.bf16.msra.mxu1 %v1505_v11  ;;  %980 = vst [vmem:[#allocation2 + $0x248] sm:$0x7f] %v892_v7  ;;  %562 = vst [vmem:[#allocation2 + $0x178] sm:$0x7f] %v892_v7  ;;  %v7340_v9 = vld [vmem:[%s15213_s4 + $0x90] sm:$0xff]  ;;  %v1329_v11 = vrot.slane %v9107_v5, 1 }
  0x70   :  { %2753 = vmatprep.subr.bf16.mxu1 %v1520_v13  ;;  %v7341_v13 = vld [vmem:[%s15213_s4 + $0x98] sm:$0xff]  ;;  %1358 = vst [vmem:[#allocation2 + $0x398] sm:$0x7f] %v1330_v8  ;;  %v1455_v16 = vld [vmem:[#allocation2 + $0x160] sm:$0xff]  ;;  %v1469_v21 = vld [vmem:[#allocation2 + $0x1d0] sm:$0xff] }
  0x71   :  { %2050 = vmatpush1.bf16.msra.mxu0 %v1427_v42  ;;  %1357 = vst [vmem:[#allocation2 + $0x390] sm:$0x7f] %v1329_v11  ;;  %v1470_v18 = vld [vmem:[#allocation2 + $0x1d8] sm:$0xff]  ;;  %v1483_v26 = vld [vmem:[#allocation2 + $0x240] sm:$0xff]  ;;  %v7343_v31 = vld [vmem:[%s15213_s4 + $0xa8] sm:$0xff] }
  0x72   :  { %7452 = vperm.xlu0 %10989, %v7338_v33   ;;  %2051 = vmatprep.subr.bf16.mxu0 %v1442_v48  ;;  %v7330_v35 = vld [vmem:[%s15213_s4 + $0x40] sm:$0xff]  ;;  %v7331_v37 = vld [vmem:[%s15213_s4 + $0x48] sm:$0xff]  ;;  %v12172_v40 = vld [vmem:[%s15212_s1 + $0x74] ss:$8 sps:$4 sm:$0xff]  }
  0x73   :  { %7387 = vperm.xlu1 %10990, %v7325_v20   ;;  %2754 = vmatpush1.bf16.msra.mxu1 %v1519_v22  ;;  %v7329_v20 = vld [vmem:[%s15213_s4 + $0x38] sm:$0xff]  ;;  %v12167_v38 = vld [vmem:[%s15212_s1 + $0x60] ss:$8 sps:$4 sm:$0xff]   ;;  %v7356_v42 = vld [vmem:[%s15213_s4 + $0x110] sm:$0xff] }
  0x74   :  { %1917 = vmatmul.mubr.bf16.gmra.mrb[4].mxu0 %v11981_v53  ;;  %2755 = vmatprep.subr.bf16.mxu1 %v1534_v28  ;;  %v12144_v28 = vld [vmem:[%s15212_s1 + $0x64] ss:$8 sps:$4 sm:$0xff]   ;;  %v7357_v44 = vld [vmem:[%s15213_s4 + $0x118] sm:$0xff]  ;;  %v48_v46 = vld [vmem:[%s15210_s0 + $0x50] sm:$0x77] }
  0x75   :  { %9149 = vmatprep.mubr.msk.bf16.mxu0 %vm1831_vm0, %v11989_v56  ;;  %2052 = vmatpush1.bf16.msra.mxu0 %v1441_v1  ;;  %v1498_v29 = vld [vmem:[#allocation2 + $0x2b8] sm:$0xff]  ;;  %v1497_v33 = vld [vmem:[#allocation2 + $0x2b0] sm:$0xff]  ;;  %v1511_v39 = vld [vmem:[#allocation2 + $0x320] sm:$0xff]  ;;  %v8998_v48 = vcombine.high %v12011_v3, %v48_v46  ;;  %v8997_v50 = vcombine.low %v12011_v3, %v48_v46 }
  0x76   :  { %7392 = vperm.xlu0 %10989, %v7326_v58   ;;  %2053 = vmatprep.subr.bf16.mxu0 %v1456_v6  ;;  %v1484_v22 = vld [vmem:[#allocation2 + $0x248] sm:$0xff]  ;;  %v7344_v47 = vld [vmem:[%s15213_s4 + $0xb0] sm:$0xff]  ;;  %v7333_v58 = vld [vmem:[%s15213_s4 + $0x58] sm:$0xff] }
  0x77   :  { %7457 = vperm.xlu1 %10990, %v7339_v34   ;;  %2756 = vmatpush1.bf16.msra.mxu1 %v1533_v41  ;;  %v1512_v34 = vld [vmem:[#allocation2 + $0x328] sm:$0xff]  ;;  %v1526_v41 = vld [vmem:[#allocation2 + $0x398] sm:$0xff]  ;;  %128 = vst [vmem:[#allocation2 + $0x28] sm:$0x7f] %v8998_v48  ;;  %127 = vst [vmem:[#allocation2 + $0x20] sm:$0x7f] %v8997_v50 }
  0x78   :  { %v1525_v45 = vld [vmem:[#allocation2 + $0x390] sm:$0xff]  ;;  %v12205_v52 = vld [vmem:[%s15212_s1 + $0x84] ss:$8 sps:$4 sm:$0xff]   ;;  %v12225_v60 = vld [vmem:[%s15210_s0 + $0x18] sm:$0xff] }
  0x79   :  { %2054 = vmatpush1.bf16.msra.mxu0 %v1455_v16  ;;  %v12200_v51 = vld [vmem:[%s15212_s1 + $0x70] ss:$8 sps:$4 sm:$0xff]   ;;  %v7359_v63 = vld [vmem:[%s15213_s4 + $0x128] sm:$0xff]  ;;  %v12255_v6 = vld [vmem:[%s15212_s1 + $0x94] ss:$8 sps:$4 sm:$0xff]  }
  0x7a   :  { %2772 = vmatmul.mubr.bf16.vlgmr.msra.gmra.mrb[0].mxu1 %v11951_v36  ;;  %7462 = vperm.xlu0 %10989, %v7340_v9   ;;  %v153_v15 = vld [vmem:[%s15210_s0 + $0x14] sm:$0xff]  ;;  %v12249_v4 = vld [vmem:[%s15212_s1 + $0x80] ss:$8 sps:$4 sm:$0xff]  }
  0x7b   :  { %7397 = vperm.xlu1 %10990, %v7327_v62   ;;  %9218 = vmatprep.mubr.msk.bf16.mxu1 %vm1831_vm0, %v11961_v43  ;;  %v160_v3 = vld [vmem:[%s15210_s0 + $0x54] sm:$0x77]  ;;  %v7358_v62 = vld [vmem:[%s15213_s4 + $0x120] sm:$0xff] }
  0x7c   :  { %1927 = vmatmul.mubr.bf16.gmra.mrb[8].mxu0 %v12027_v10  ;;  %2055 = vmatprep.subr.bf16.mxu0 %v1470_v18  ;;  %v7332_v55 = vld [vmem:[%s15213_s4 + $0x50] sm:$0xff]  ;;  %v9012_v57 = vcombine.high %v153_v15, %v160_v3  ;;  %v9011_v59 = vcombine.low %v153_v15, %v160_v3  ;;  %v272_v61 = vld [vmem:[%s15210_s0 + $0x58] sm:$0x77]  ;;  %v7346_v9 = vld [vmem:[%s15213_s4 + $0xc0] sm:$0xff] }
  0x7d   :  { %9150 = vmatprep.mubr.msk.bf16.mxu0 %vm1831_vm0, %v12032_v12  ;;  %2056 = vmatpush1.bf16.msra.mxu0 %v1469_v21  ;;  %v9026_v7 = vcombine.high %v12225_v60, %v272_v61  ;;  %v9025_v1 = vcombine.low %v12225_v60, %v272_v61  ;;  %v12244_v2 = vld [vmem:[%s15210_s0 + $0x54] sm:$0xff] }
  0x7e   :  { %7402 = vperm.xlu0 %10989, %v7328_v19   ;;  %2057 = vmatprep.subr.bf16.mxu0 %v1484_v22  ;;  %240 = vst [vmem:[#allocation2 + $0x98] sm:$0x7f] %v9012_v57  ;;  %239 = vst [vmem:[#allocation2 + $0x90] sm:$0x7f] %v9011_v59  ;;  %v1416_v0 = vld [vmem:[#allocation2 + $0x28] sm:$0xff]  ;;  %v9054_v5 = vcombine.high %v153_v15, %v12244_v2  ;;  %v9053_v8 = vcombine.low %v153_v15, %v12244_v2  ;;  %v12267_v18 = vld [vmem:[%s15210_s0 + $0x58] sm:$0xff] }
  0x7f   :  { %7467 = vperm.xlu1 %10990, %v7341_v13   ;;  %352 = vst [vmem:[#allocation2 + $0x108] sm:$0x7f] %v9026_v7  ;;  %351 = vst [vmem:[#allocation2 + $0x100] sm:$0x7f] %v9025_v1  ;;  %v7347_v13 = vld [vmem:[%s15213_s4 + $0xc8] sm:$0xff]  ;;  %v9068_v21 = vcombine.high %v12225_v60, %v12267_v18  ;;  %v7348_v3 = vld [vmem:[%s15213_s4 + $0xd0] sm:$0xff] }
  0x80   :  { %v693_v11 = vshll.u32 %v9054_v5, 16  ;;  %v686_v16 = vshll.u32 %v9053_v8, 16  ;;  %v691_v19 = vshrl.u32 %v9054_v5, 16  ;;  %v684_v22 = vshrl.u32 %v9053_v8, 16  ;;  %v7349_v57 = vld [vmem:[%s15213_s4 + $0xd8] sm:$0xff] }
  0x81   :  { %2058 = vmatpush1.bf16.msra.mxu0 %v1483_v26  ;;  %v7334_v26 = vld [vmem:[%s15213_s4 + $0x60] sm:$0xff]  ;;  %v7337_v1 = vld [vmem:[%s15213_s4 + $0x78] sm:$0xff] }
  0x82   :  { %2782 = vmatmul.mubr.bf16.gmra.mrb[4].mxu1 %v11981_v53  ;;  %7532 = vperm.xlu0 %10989, %v7354_v23   ;;  %v688_v23 = vrot.slane %v686_v16, 1  ;;  %v12324_v59 = vld [vmem:[%s15212_s1 + $0xa0] ss:$8 sps:$4 sm:$0xff]   ;;  %v1259_v8 = vld [vmem:[%s15210_s0 + $0x18] sm:$0xee] }
  0x83   :  { %7407 = vperm.xlu1 %10990, %v7329_v20   ;;  %9219 = vmatprep.mubr.msk.bf16.mxu1 %vm1831_vm0, %v11989_v56  ;;  %v695_v20 = vrot.slane %v693_v11, 1  ;;  %v7362_v11 = vld [vmem:[%s15213_s4 + $0x140] sm:$0xff]  ;;  %v7363_v16 = vld [vmem:[%s15213_s4 + $0x148] sm:$0xff] }
  0x84   :  { %1937 = vmatmul.mubr.bf16.gmra.mrb[12].mxu0 %v12065_v32  ;;  %2059 = vmatprep.subr.bf16.mxu0 %v1498_v29 }
  0x85   :  { %9151 = vmatprep.mubr.msk.bf16.mxu0 %vm1831_vm0, %v12078_v54  ;;  %2060 = vmatpush1.bf16.msra.mxu0 %v1497_v33  ;;  %v696_v29 = vor.u32 %v695_v20, %v691_v19  ;;  %v689_v33 = vor.u32 %v688_v23, %v684_v22  ;;  %v12359_v20 = vld [vmem:[%s15212_s1 + $0xb0] ss:$8 sps:$4 sm:$0xff]   ;;  %v7350_v22 = vld [vmem:[%s15213_s4 + $0xe0] sm:$0xff]  ;;  %v7351_v23 = vld [vmem:[%s15213_s4 + $0xe8] sm:$0xff] }
  0x86   :  { %7472 = vperm.xlu0 %10989, %v7342_v30   ;;  %2061 = vmatprep.subr.bf16.mxu0 %v1512_v34  ;;  %v903_v30 = vshll.u32 %v9068_v21, 16 }
  0x87   :  { %7537 = vperm.xlu1 %10990, %v7355_v24   ;;  %v9067_v24 = vcombine.low %v12225_v60, %v12267_v18  ;;  %772 = vst [vmem:[#allocation2 + $0x1e8] sm:$0x7f] %v696_v29  ;;  %771 = vst [vmem:[#allocation2 + $0x1e0] sm:$0x7f] %v689_v33  ;;  %v12387_v29 = vld [vmem:[%s15212_s1 + $0xc0] ss:$8 sps:$4 sm:$0xff]  }
  0x88   :  { %v7353_v33 = vld [vmem:[%s15213_s4 + $0xf8] sm:$0xff] }
  0x89   :  { %2062 = vmatpush1.bf16.msra.mxu0 %v1511_v39  ;;  %v896_v34 = vshll.u32 %v9067_v24, 16  ;;  %v905_v39 = vrot.slane %v903_v30, 1  ;;  %v12392_v30 = vld [vmem:[%s15212_s1 + $0xd4] ss:$8 sps:$4 sm:$0xff]  }
  0x8a   :  { %2792 = vmatmul.mubr.bf16.gmra.mrb[8].mxu1 %v12027_v10  ;;  %7412 = vperm.xlu0 %10989, %v7330_v35   ;;  %v12288_v35 = vld [vmem:[%s15212_s1 + $0x90] ss:$8 sps:$4 sm:$0xff]  }
  0x8b   :  { %7477 = vperm.xlu1 %10990, %v7343_v31   ;;  %9220 = vmatprep.mubr.msk.bf16.mxu1 %vm1831_vm0, %v12032_v12  ;;  %v7335_v31 = vld [vmem:[%s15213_s4 + $0x68] sm:$0xff] }
  0x8c   :  { %1947 = vmatmul.mubr.bf16.gmra.mrb[16].mxu0 %v12111_v14  ;;  %2063 = vmatprep.subr.bf16.mxu0 %v1526_v41  ;;  %v12293_v41 = vld [vmem:[%s15212_s1 + $0xa4] ss:$8 sps:$4 sm:$0xff]  }
  0x8d   :  { %9152 = vmatprep.mubr.msk.bf16.mxu0 %vm1831_vm0, %v12116_v17  ;;  %2064 = vmatpush1.bf16.msra.mxu0 %v1525_v45  ;;  %v7360_v45 = vld [vmem:[%s15213_s4 + $0x130] sm:$0xff] }
  0x8e   :  { %7542 = vperm.xlu0 %10989, %v7356_v42   ;;  %2220 = vmatprep.subr.bf16.mxu0 %v1416_v0  ;;  %v894_v42 = vshrl.u32 %v9067_v24, 16  ;;  %v7364_v24 = vld [vmem:[%s15213_s4 + $0x150] sm:$0xff] }
  0x8f   :  { %7417 = vperm.xlu1 %10990, %v7331_v37   ;;  %v901_v37 = vshrl.u32 %v9068_v21, 16  ;;  %v12364_v21 = vld [vmem:[%s15212_s1 + $0xc4] ss:$8 sps:$4 sm:$0xff]  }
  0x91   :  { %v906_v46 = vor.u32 %v905_v39, %v901_v37  ;;  %v7367_v37 = vld [vmem:[%s15213_s4 + $0x168] sm:$0xff]  ;;  %v12415_v39 = vld [vmem:[%s15212_s1 + $0xd0] ss:$8 sps:$4 sm:$0xff]  }
  0x92   :  { %2802 = vmatmul.mubr.bf16.gmra.mrb[12].mxu1 %v12065_v32  ;;  %7482 = vperm.xlu0 %10989, %v7344_v47   ;;  %v7361_v47 = vld [vmem:[%s15213_s4 + $0x138] sm:$0xff] }
  0x93   :  { %7547 = vperm.xlu1 %10990, %v7357_v44   ;;  %9221 = vmatprep.mubr.msk.bf16.mxu1 %vm1831_vm0, %v12078_v54  ;;  %v898_v44 = vrot.slane %v896_v34, 1  ;;  %982 = vst [vmem:[#allocation2 + $0x258] sm:$0x7f] %v906_v46  ;;  %564 = vst [vmem:[#allocation2 + $0x188] sm:$0x7f] %v906_v46  ;;  %v7366_v34 = vld [vmem:[%s15213_s4 + $0x160] sm:$0xff] }
  0x94   :  { %1957 = vmatmul.mubr.bf16.gmra.mrb[20].mxu0 %v12139_v25  ;;  %v7906_v46 = vld [vmem:[%s15214_s6] sm:$0xff] }
  0x95   :  { %9153 = vmatprep.mubr.msk.bf16.mxu0 %vm1831_vm0, %v12144_v28  ;;  %v899_v48 = vor.u32 %v898_v44, %v894_v42  ;;  %v7368_v42 = vld [vmem:[%s15213_s4 + $0x170] sm:$0xff]  ;;  %v7369_v44 = vld [vmem:[%s15213_s4 + $0x178] sm:$0xff] }
  0x96   :  { %7422 = vperm.xlu0 %10989, %v7332_v55  }
  0x97   :  { %7487 = vperm.xlu1 %10990, %v7345_v49   ;;  %v1007_v49 = vld [vmem:[%s15210_s0 + $0x10] sm:$0xee]  ;;  %981 = vst [vmem:[#allocation2 + $0x250] sm:$0x7f] %v899_v48  ;;  %563 = vst [vmem:[#allocation2 + $0x180] sm:$0x7f] %v899_v48 }
  0x98   :  { %v9082_v50 = vcombine.high %v1007_v49, %v12051_v27  ;;  %v9081_v15 = vcombine.low %v1007_v49, %v12051_v27  ;;  %v1133_v27 = vld [vmem:[%s15210_s0 + $0x14] sm:$0xee] }
  0x99   :  { %v9096_v61 = vcombine.high %v1133_v27, %v12244_v2  ;;  %v9095_v7 = vcombine.low %v1133_v27, %v12244_v2  ;;  %v9110_v2 = vcombine.high %v1259_v8, %v12267_v18  ;;  %v7908_v48 = vld [vmem:[%s15214_s6 + $0x10] sm:$0xff]  ;;  %v7909_v49 = vld [vmem:[%s15214_s6 + $0x18] sm:$0xff]  ;;  %v7911_v27 = vld [vmem:[%s15214_s6 + $0x28] sm:$0xff] }
  0x9a   :  { %2812 = vmatmul.mubr.bf16.gmra.mrb[16].mxu1 %v12111_v14  ;;  %7552 = vperm.xlu0 %10989, %v7358_v62   ;;  %v1080_v55 = vrot.slane %v9082_v50, 1  ;;  %v12330_v62 = vld [vmem:[%s15212_s1 + $0xb4] ss:$8 sps:$4 sm:$0xff]   ;;  %v1415_v50 = vld [vmem:[#allocation2 + $0x20] sm:$0xff] }
  0x9b   :  { %7427 = vperm.xlu1 %10990, %v7333_v58   ;;  %9222 = vmatprep.mubr.msk.bf16.mxu1 %vm1831_vm0, %v12116_v17  ;;  %v1079_v58 = vrot.slane %v9081_v15, 1  ;;  %v1206_v0 = vrot.slane %v9096_v61, 1  ;;  %v1205_v5 = vrot.slane %v9095_v7, 1  ;;  %v1430_v15 = vld [vmem:[#allocation2 + $0x98] sm:$0xff]  ;;  %v1443_v61 = vld [vmem:[#allocation2 + $0x100] sm:$0xff] }
  0x9c   :  { %1967 = vmatmul.mubr.bf16.gmra.mrb[24].mxu0 %v12167_v38  ;;  %1108 = vst [vmem:[#allocation2 + $0x2c8] sm:$0x7f] %v1080_v55  ;;  %v7923_v55 = vld [vmem:[%s15214_s6 + $0x88] sm:$0xff]  ;;  %v1458_v7 = vld [vmem:[#allocation2 + $0x178] sm:$0xff] }
  0x9d   :  { %9154 = vmatprep.mubr.msk.bf16.mxu0 %vm1831_vm0, %v12172_v40  ;;  %1107 = vst [vmem:[#allocation2 + $0x2c0] sm:$0x7f] %v1079_v58  ;;  %1234 = vst [vmem:[#allocation2 + $0x338] sm:$0x7f] %v1206_v0  ;;  %v12461_v58 = vpop.permute.xlu0 %1567  ;;  %v7924_v0 = vld [vmem:[%s15214_s6 + $0x90] sm:$0xff] }
  0x9e   :  { %7492 = vperm.xlu0 %10989, %v7346_v9   ;;  %1233 = vst [vmem:[#allocation2 + $0x330] sm:$0x7f] %v1205_v5  ;;  %v9109_v9 = vcombine.low %v1259_v8, %v12267_v18  ;;  %v1472_v5 = vld [vmem:[#allocation2 + $0x1e8] sm:$0xff]  ;;  %v7912_v8 = vld [vmem:[%s15214_s6 + $0x30] sm:$0xff] }
  0x9f   :  { %7557 = vperm.xlu1 %10990, %v7359_v63   ;;  %v7336_v63 = vld [vmem:[%s15213_s4 + $0x70] sm:$0xff] }
  0xa0   :  { %v1331_v19 = vrot.slane %v9109_v9, 1 }
  0xa2   :  { %2822 = vmatmul.mubr.bf16.gmra.mrb[20].mxu1 %v12139_v25  ;;  %7432 = vperm.xlu0 %10989, %v7334_v26   ;;  %1359 = vst [vmem:[#allocation2 + $0x3a0] sm:$0x7f] %v1331_v19  ;;  %v7365_v26 = vld [vmem:[%s15213_s4 + $0x158] sm:$0xff] }
  0xa3   :  { %7497 = vperm.xlu1 %10990, %v7347_v13   ;;  %9223 = vmatprep.mubr.msk.bf16.mxu1 %vm1831_vm0, %v12144_v28  ;;  %v1332_v13 = vrot.slane %v9110_v2, 1  ;;  %v7913_v2 = vld [vmem:[%s15214_s6 + $0x38] sm:$0xff] }
  0xa4   :  { %1977 = vmatmul.mubr.bf16.gmra.mrb[28].mxu0 %v12200_v51 }
  0xa5   :  { %9155 = vmatprep.mubr.msk.bf16.mxu0 %vm1831_vm0, %v12205_v52  ;;  %1360 = vst [vmem:[#allocation2 + $0x3a8] sm:$0x7f] %v1332_v13  ;;  %v1486_v13 = vld [vmem:[#allocation2 + $0x258] sm:$0xff] }
  0xa6   :  { %7562 = vperm.xlu0 %10989, %v7360_v45   ;;  %v12427_v45 = vld [vmem:[%s15212_s1 + $0x4] ss:$8 sps:$4 sm:$0xff]  }
  0xa7   :  { %7437 = vperm.xlu1 %10990, %v7335_v31   ;;  %v7352_v31 = vld [vmem:[%s15213_s4 + $0xf0] sm:$0xff] }
  0xaa   :  { %2832 = vmatmul.mubr.bf16.gmra.mrb[24].mxu1 %v12167_v38  ;;  %7502 = vperm.xlu0 %10989, %v7348_v3   ;;  %v7922_v3 = vld [vmem:[%s15214_s6 + $0x80] sm:$0xff] }
  0xab   :  { %7567 = vperm.xlu1 %10990, %v7361_v47   ;;  %9224 = vmatprep.mubr.msk.bf16.mxu1 %vm1831_vm0, %v12172_v40  ;;  %v7907_v47 = vld [vmem:[%s15214_s6 + $0x8] sm:$0xff] }
  0xac   :  { %1987 = vmatmul.mubr.bf16.gmra.mrb[32].mxu0 %v12249_v4 }
  0xad   :  { %9156 = vmatprep.mubr.msk.bf16.mxu0 %vm1831_vm0, %v12255_v6 }
  0xae   :  { %7442 = vperm.xlu0 %10989, %v7336_v63   ;;  %v12469_v63 = vpop.permute.xlu1 %1637 }
  0xaf   :  { %7507 = vperm.xlu1 %10990, %v7349_v57   ;;  %v7910_v57 = vld [vmem:[%s15214_s6 + $0x20] sm:$0xff]  ;;  %15283 = vst [vmem:[#allocation3_spill] sm:$0xff] %v12469_v63 }
  0xb2   :  { %2842 = vmatmul.mubr.bf16.gmra.mrb[28].mxu1 %v12200_v51  ;;  %7572 = vperm.xlu0 %10989, %v7362_v11   ;;  %v12488_v9 = vpop.permute.xlu1 %1642  ;;  %v1471_v11 = vld [vmem:[#allocation2 + $0x1e0] sm:$0xff] }
  0xb3   :  { %7447 = vperm.xlu1 %10990, %v7337_v1   ;;  %9225 = vmatprep.mubr.msk.bf16.mxu1 %vm1831_vm0, %v12205_v52  ;;  %v12480_v1 = vpop.permute.xlu0 %1572  ;;  %15285 = vst [vmem:[#allocation5_spill] sm:$0xff] %v12488_v9 }
  0xb4   :  { %1997 = vmatmul.mubr.bf16.gmra.mrb[36].mxu0 %v12288_v35  ;;  %15284 = vst [vmem:[#allocation4_spill] sm:$0xff] %v12480_v1 }
  0xb5   :  { %9157 = vmatprep.mubr.msk.bf16.mxu0 %vm1831_vm0, %v12293_v41 }
  0xb6   :  { %7512 = vperm.xlu0 %10989, %v7350_v22   ;;  %v1485_v22 = vld [vmem:[#allocation2 + $0x250] sm:$0xff] }
  0xb7   :  { %7577 = vperm.xlu1 %10990, %v7363_v16   ;;  %v7938_v16 = vld [vmem:[%s15214_s6 + $0x100] sm:$0xff]  ;;  %v12497_v19 = vpop.permute.xlu0 %1577 }
  0xb8   :  { %15286 = vst [vmem:[#allocation6_spill] sm:$0xff] %v12497_v19 }
  0xba   :  { %2852 = vmatmul.mubr.bf16.gmra.mrb[32].mxu1 %v12249_v4  ;;  %7582 = vperm.xlu0 %10989, %v7364_v24   ;;  %v7926_v24 = vld [vmem:[%s15214_s6 + $0xa0] sm:$0xff] }
  0xbb   :  { %7517 = vperm.xlu1 %10990, %v7351_v23   ;;  %9226 = vmatprep.mubr.msk.bf16.mxu1 %vm1831_vm0, %v12255_v6  ;;  %v12502_v23 = vpop.permute.xlu1 %1582 }
  0xbc   :  { %2007 = vmatmul.mubr.bf16.gmra.mrb[40].mxu0 %v12324_v59  ;;  %15287 = vst [vmem:[#allocation7_spill] sm:$0xff] %v12502_v23 }
  0xbd   :  { %9158 = vmatprep.mubr.msk.bf16.mxu0 %vm1831_vm0, %v12330_v62 }
  0xbe   :  { %7522 = vperm.xlu0 %10989, %v7352_v31   ;;  %v1499_v31 = vld [vmem:[#allocation2 + $0x2c0] sm:$0xff] }
  0xbf   :  { %7587 = vperm.xlu1 %10990, %v7365_v26   ;;  %v7927_v26 = vld [vmem:[%s15214_s6 + $0xa8] sm:$0xff] }
  0xc2   :  { %2862 = vmatmul.mubr.bf16.gmra.mrb[36].mxu1 %v12288_v35  ;;  %7592 = vperm.xlu0 %10989, %v7366_v34   ;;  %v1514_v34 = vld [vmem:[#allocation2 + $0x338] sm:$0xff] }
  0xc3   :  { %7527 = vperm.xlu1 %10990, %v7353_v33   ;;  %9227 = vmatprep.mubr.msk.bf16.mxu1 %vm1831_vm0, %v12293_v41  ;;  %v12511_v33 = vpop.permute.xlu0 %1647 }
  0xc4   :  { %2017 = vmatmul.mubr.bf16.gmra.mrb[44].mxu0 %v12359_v20 }
  0xc5   :  { %9159 = vmatprep.mubr.msk.bf16.mxu0 %vm1831_vm0, %v12364_v21 }
  0xc6   :  { %7602 = vperm.xlu0 %10989, %v7368_v42   ;;  %v7915_v42 = vld [vmem:[%s15214_s6 + $0x48] sm:$0xff] }
  0xc7   :  { %7597 = vperm.xlu1 %10990, %v7367_v37   ;;  %v7914_v37 = vld [vmem:[%s15214_s6 + $0x40] sm:$0xff] }
  0xca   :  { %2872 = vmatmul.mubr.bf16.gmra.mrb[40].mxu1 %v12324_v59  ;;  %7956 = vperm.xlu0 %10989, %v7906_v46   ;;  %v1528_v46 = vld [vmem:[#allocation2 + $0x3a8] sm:$0xff] }
  0xcb   :  { %7607 = vperm.xlu1 %10990, %v7369_v44   ;;  %9228 = vmatprep.mubr.msk.bf16.mxu1 %vm1831_vm0, %v12330_v62  ;;  %v1513_v44 = vld [vmem:[#allocation2 + $0x330] sm:$0xff] }
  0xcc   :  { %2027 = vmatmul.mubr.bf16.gmra.mrb[48].mxu0 %v12387_v29 }
  0xcd   :  { %9160 = vmatprep.mubr.msk.bf16.mxu0 %vm1831_vm0, %v12392_v30 }
  0xce   :  { %7966 = vperm.xlu0 %10989, %v7908_v48   ;;  %v7941_v48 = vld [vmem:[%s15214_s6 + $0x118] sm:$0xff] }
  0xcf   :  { %7961 = vperm.xlu1 %10990, %v7907_v47   ;;  %v12526_v47 = vpop.permute.xlu0 %1587 }
  0xd0   :  { %15288 = vst [vmem:[#allocation8_spill] sm:$0xff] %v12526_v47 }
  0xd2   :  { %2882 = vmatmul.mubr.bf16.gmra.mrb[44].mxu1 %v12359_v20  ;;  %8036 = vperm.xlu0 %10989, %v7922_v3   ;;  %v7929_v3 = vld [vmem:[%s15214_s6 + $0xb8] sm:$0xff] }
  0xd3   :  { %7971 = vperm.xlu1 %10990, %v7909_v49   ;;  %9229 = vmatprep.mubr.msk.bf16.mxu1 %vm1831_vm0, %v12364_v21  ;;  %v1527_v49 = vld [vmem:[#allocation2 + $0x3a0] sm:$0xff] }
  0xd4   :  { %2037 = vmatmul.mubr.bf16.gmra.mrb[52].mxu0 %v12415_v39 }
  0xd5   :  { %9161 = vmatprep.mubr.msk.bf16.mxu0 %vm1831_vm0, %v12427_v45 }
  0xd6   :  { %7976 = vperm.xlu0 %10989, %v7910_v57  }
  0xd7   :  { %8041 = vperm.xlu1 %10990, %v7923_v55   ;;  %v12542_v55 = vpop.permute.xlu0 %1657 }
  0xda   :  { %2892 = vmatmul.mubr.bf16.gmra.mrb[48].mxu1 %v12387_v29  ;;  %8046 = vperm.xlu0 %10989, %v7924_v0   ;;  %v49_v0 = vld [vmem:[%s15210_s0 + $0x58] sm:$0x77] }
  0xdb   :  { %7981 = vperm.xlu1 %10990, %v7911_v27   ;;  %9230 = vmatprep.mubr.msk.bf16.mxu1 %vm1831_vm0, %v12392_v30  ;;  %v12558_v57 = vpop.permute.xlu0 %1597  ;;  %v7943_v27 = vld [vmem:[%s15214_s6 + $0x128] sm:$0xff] }
  0xdc   :  { %2080 = vmatmul.mubr.bf16.vlgmr.msra.gmra.mrb[56].mxu0 %v11951_v36  ;;  %v1429_v36 = vld [vmem:[#allocation2 + $0x90] sm:$0xff]  ;;  %15290 = vst [vmem:[#allocation10_spill] sm:$0xff] %v12558_v57 }
  0xdd   :  { %9162 = vmatprep.mubr.msk.bf16.mxu0 %vm1831_vm0, %v11961_v43  ;;  %2221 = vmatpush1.bf16.msra.mxu0 %v1415_v50  ;;  %v1444_v43 = vld [vmem:[#allocation2 + $0x108] sm:$0xff] }
  0xde   :  { %2222 = vmatprep.subr.bf16.mxu0 %v1430_v15  ;;  %7986 = vperm.xlu0 %10989, %v7912_v8   ;;  %v7928_v15 = vld [vmem:[%s15214_s6 + $0xb0] sm:$0xff] }
  0xe1   :  { %2223 = vmatpush1.bf16.msra.mxu0 %v1429_v36 }
  0xe2   :  { %2224 = vmatprep.subr.bf16.mxu0 %v1444_v43  ;;  %2902 = vmatmul.mubr.bf16.gmra.mrb[52].mxu1 %v12415_v39  ;;  %v7942_v43 = vld [vmem:[%s15214_s6 + $0x120] sm:$0xff] }
  0xe3   :  { %8116 = vperm.xlu0 %10989, %v7938_v16   ;;  %v7945_v16 = vld [vmem:[%s15214_s6 + $0x138] sm:$0xff] }
  0xe4   :  { %2090 = vmatmul.mubr.bf16.gmra.mrb[60].mxu0 %v11981_v53  ;;  %v7925_v53 = vld [vmem:[%s15214_s6 + $0x98] sm:$0xff] }
  0xe5   :  { %9163 = vmatprep.mubr.msk.bf16.mxu0 %vm1831_vm0, %v11989_v56  ;;  %2225 = vmatpush1.bf16.msra.mxu0 %v1443_v61  ;;  %v1457_v56 = vld [vmem:[#allocation2 + $0x170] sm:$0xff] }
  0xe6   :  { %2226 = vmatprep.subr.bf16.mxu0 %v1458_v7  ;;  %8051 = vperm.xlu1 %10990, %v7925_v53   ;;  %v12572_v7 = vpop.permute.xlu0 %1667  ;;  %v7918_v53 = vld [vmem:[%s15214_s6 + $0x60] sm:$0xff] }
  0xe7   :  { %8056 = vperm.xlu0 %10989, %v7926_v24  }
  0xe9   :  { %2227 = vmatpush1.bf16.msra.mxu0 %v1457_v56  ;;  %v9000_v56 = vcombine.high %v12225_v60, %v49_v0 }
  0xea   :  { %2228 = vmatprep.subr.bf16.mxu0 %v1472_v5  ;;  %7991 = vperm.xlu1 %10990, %v7913_v2   ;;  %v8999_v5 = vcombine.low %v12225_v60, %v49_v0  ;;  %v161_v2 = vld [vmem:[%s15210_s0 + $0x5c] sm:$0x77]  ;;  %v12598_v60 = vpop.permute.xlu0 %1607 }
  0xeb   :  { %7996 = vperm.xlu0 %10989, %v7914_v37   ;;  %130 = vst [vmem:[#allocation2 + $0x38] sm:$0x7f] %v9000_v56  ;;  %15293 = vst [vmem:[#allocation13_spill] sm:$0xff] %v12598_v60  ;;  %v12623_v37 = vld [vmem:[%s15210_s0 + $0x5c] sm:$0xff] }
  0xec   :  { %2100 = vmatmul.mubr.bf16.gmra.mrb[64].mxu0 %v12027_v10  ;;  %v7939_v10 = vld [vmem:[%s15214_s6 + $0x108] sm:$0xff]  ;;  %129 = vst [vmem:[#allocation2 + $0x30] sm:$0x7f] %v8999_v5 }
  0xed   :  { %9164 = vmatprep.mubr.msk.bf16.mxu0 %vm1831_vm0, %v12032_v12  ;;  %2229 = vmatpush1.bf16.msra.mxu0 %v1471_v11  ;;  %v1500_v12 = vld [vmem:[#allocation2 + $0x2c8] sm:$0xff]  ;;  %v7944_v11 = vld [vmem:[%s15214_s6 + $0x130] sm:$0xff] }
  0xee   :  { %2230 = vmatprep.subr.bf16.mxu0 %v1486_v13  ;;  %8121 = vperm.xlu1 %10990, %v7939_v10   ;;  %v7947_v5 = vld [vmem:[%s15214_s6 + $0x148] sm:$0xff] }
  0xf1   :  { %2231 = vmatpush1.bf16.msra.mxu0 %v1485_v22  ;;  %v266_v22 = vld [vmem:[%s15210_s0 + $0x20] sm:$0xff] }
  0xf2   :  { %2232 = vmatprep.subr.bf16.mxu0 %v1500_v12  ;;  %8061 = vperm.xlu1 %10990, %v7927_v26   ;;  %v273_v12 = vld [vmem:[%s15210_s0 + $0x60] sm:$0x77] }
  0xf3   :  { %v9028_v26 = vcombine.high %v266_v22, %v273_v12 }
  0xf4   :  { %2110 = vmatmul.mubr.bf16.gmra.mrb[68].mxu0 %v12065_v32  ;;  %v12521_v32 = vpop.permute.xlu1 %1652 }
  0xf5   :  { %9165 = vmatprep.mubr.msk.bf16.mxu0 %vm1831_vm0, %v12078_v54  ;;  %2233 = vmatpush1.bf16.msra.mxu0 %v1499_v31  ;;  %v7940_v54 = vld [vmem:[%s15214_s6 + $0x110] sm:$0xff]  ;;  %v1418_v31 = vld [vmem:[#allocation2 + $0x38] sm:$0xff]  ;;  %354 = vst [vmem:[#allocation2 + $0x118] sm:$0x7f] %v9028_v26 }
  0xf6   :  { %2234 = vmatprep.subr.bf16.mxu0 %v1514_v34  ;;  %8001 = vperm.xlu1 %10990, %v7915_v42   ;;  %v9027_v34 = vcombine.low %v266_v22, %v273_v12 }
  0xf7   :  { %8126 = vperm.xlu0 %10989, %v7940_v54   ;;  %v7920_v54 = vld [vmem:[%s15214_s6 + $0x70] sm:$0xff] }
  0xf8   :  { %v12534_v50 = vpop.permute.xlu1 %1592  ;;  %353 = vst [vmem:[#allocation2 + $0x110] sm:$0x7f] %v9027_v34 }
  0xf9   :  { %2235 = vmatpush1.bf16.msra.mxu0 %v1513_v44  ;;  %15289 = vst [vmem:[#allocation9_spill] sm:$0xff] %v12534_v50  ;;  %v12626_v44 = vpop.permute.xlu0 %1677 }
  0xfa   :  { %2236 = vmatprep.subr.bf16.mxu0 %v1528_v46  ;;  %8131 = vperm.xlu1 %10990, %v7941_v48   ;;  %15295 = vst [vmem:[#allocation15_spill] sm:$0xff] %v12626_v44 }
  0xfb   :  { %8066 = vperm.xlu0 %10989, %v7928_v15  }
  0xfc   :  { %2120 = vmatmul.mubr.bf16.gmra.mrb[72].mxu0 %v12111_v14  ;;  %v7916_v14 = vld [vmem:[%s15214_s6 + $0x50] sm:$0xff]  ;;  %v12550_v36 = vpop.permute.xlu1 %1662 }
  0xfd   :  { %9166 = vmatprep.mubr.msk.bf16.mxu0 %vm1831_vm0, %v12116_v17  ;;  %2237 = vmatpush1.bf16.msra.mxu0 %v1527_v49  ;;  %v7917_v17 = vld [vmem:[%s15214_s6 + $0x58] sm:$0xff] }
  0xfe   :  { %8071 = vperm.xlu1 %10990, %v7929_v3   ;;  %2393 = vmatprep.subr.bf16.mxu0 %v1418_v31  ;;  %v7921_v49 = vld [vmem:[%s15214_s6 + $0x78] sm:$0xff]  ;;  %v12638_v3 = vld [vmem:[%s15210_s0 + $0x60] sm:$0xff] }
  0xff   :  { %8006 = vperm.xlu0 %10989, %v7916_v14   ;;  %v9069_v0 = vcombine.low %v266_v22, %v12638_v3 }
 0x100   :  { %v12563_v61 = vpop.permute.xlu1 %1602 }
 0x101   :  { %15291 = vst [vmem:[#allocation11_spill] sm:$0xff] %v12563_v61 }
 0x102   :  { %8011 = vperm.xlu1 %10990, %v7917_v17  }
 0x103   :  { %8136 = vperm.xlu0 %10989, %v7942_v43  }
 0x104   :  { %2130 = vmatmul.mubr.bf16.gmra.mrb[76].mxu0 %v12139_v25  ;;  %v7930_v25 = vld [vmem:[%s15214_s6 + $0xc0] sm:$0xff]  ;;  %v12587_v8 = vpop.permute.xlu1 %1672 }
 0x105   :  { %9167 = vmatprep.mubr.msk.bf16.mxu0 %vm1831_vm0, %v12144_v28  ;;  %v7931_v28 = vld [vmem:[%s15214_s6 + $0xc8] sm:$0xff]  ;;  %15292 = vst [vmem:[#allocation12_spill] sm:$0xff] %v12587_v8 }
 0x106   :  { %8141 = vperm.xlu1 %10990, %v7943_v27   ;;  %v9070_v27 = vcombine.high %v266_v22, %v12638_v3  ;;  %v7934_v22 = vld [vmem:[%s15214_s6 + $0xe0] sm:$0xff] }
 0x107   :  { %8076 = vperm.xlu0 %10989, %v7930_v25  }
 0x108   :  { %v12612_v24 = vpop.permute.xlu1 %1612 }
 0x109   :  { %15294 = vst [vmem:[#allocation14_spill] sm:$0xff] %v12612_v24 }
 0x10a   :  { %8081 = vperm.xlu1 %10990, %v7931_v28  }
 0x10b   :  { %8016 = vperm.xlu0 %10989, %v7918_v53   ;;  %v7946_v53 = vld [vmem:[%s15214_s6 + $0x140] sm:$0xff] }
 0x10c   :  { %2140 = vmatmul.mubr.bf16.gmra.mrb[80].mxu0 %v12167_v38  ;;  %v7919_v38 = vld [vmem:[%s15214_s6 + $0x68] sm:$0xff]  ;;  %v12640_v14 = vpop.permute.xlu1 %1682 }
 0x10d   :  { %9168 = vmatprep.mubr.msk.bf16.mxu0 %vm1831_vm0, %v12172_v40  ;;  %v154_v40 = vld [vmem:[%s15210_s0 + $0x1c] sm:$0xff]  ;;  %15296 = vst [vmem:[#allocation16_spill] sm:$0xff] %v12640_v14 }
 0x10e   :  { %8021 = vperm.xlu1 %10990, %v7919_v38   ;;  %v9014_v13 = vcombine.high %v154_v40, %v161_v2  ;;  %v9013_v10 = vcombine.low %v154_v40, %v161_v2  ;;  %v9056_v42 = vcombine.high %v154_v40, %v12623_v37  ;;  %v9055_v46 = vcombine.low %v154_v40, %v12623_v37 }
 0x10f   :  { %8146 = vperm.xlu0 %10989, %v7944_v11   ;;  %v917_v38 = vshll.u32 %v9070_v27, 16  ;;  %v915_v2 = vshrl.u32 %v9070_v27, 16 }
 0x110   :  { %242 = vst [vmem:[#allocation2 + $0xa8] sm:$0x7f] %v9014_v13  ;;  %241 = vst [vmem:[#allocation2 + $0xa0] sm:$0x7f] %v9013_v10  ;;  %v707_v48 = vshll.u32 %v9056_v42, 16  ;;  %v700_v15 = vshll.u32 %v9055_v46, 16  ;;  %v12655_v10 = vpop.permute.xlu1 %1622 }
 0x111   :  { %v705_v17 = vshrl.u32 %v9056_v42, 16  ;;  %v698_v25 = vshrl.u32 %v9055_v46, 16  ;;  %v919_v11 = vrot.slane %v917_v38, 1  ;;  %v908_v13 = vshrl.u32 %v9069_v0, 16  ;;  %15298 = vst [vmem:[#allocation18_spill] sm:$0xff] %v12655_v10  ;;  %v7948_v46 = vld [vmem:[%s15214_s6 + $0x150] sm:$0xff] }
 0x112   :  { %8151 = vperm.xlu1 %10990, %v7945_v16   ;;  %v709_v43 = vrot.slane %v707_v48, 1  ;;  %v702_v28 = vrot.slane %v700_v15, 1  ;;  %v7950_v38 = vld [vmem:[%s15214_s6 + $0x160] sm:$0xff] }
 0x113   :  { %v920_v12 = vor.u32 %v919_v11, %v915_v2  ;;  %v8771_v11 = vld [vmem:[%s15215_s8] sm:$0xff] }
 0x114   :  { %2150 = vmatmul.mubr.bf16.gmra.mrb[84].mxu0 %v12200_v51  ;;  %v7932_v51 = vld [vmem:[%s15214_s6 + $0xd0] sm:$0xff]  ;;  %v710_v56 = vor.u32 %v709_v43, %v705_v17  ;;  %v703_v40 = vor.u32 %v702_v28, %v698_v25  ;;  %v7937_v25 = vld [vmem:[%s15214_s6 + $0xf8] sm:$0xff] }
 0x115   :  { %9169 = vmatprep.mubr.msk.bf16.mxu0 %vm1831_vm0, %v12205_v52  ;;  %v7933_v52 = vld [vmem:[%s15214_s6 + $0xd8] sm:$0xff]  ;;  %8086 = vperm.xlu0 %10989, %v7932_v51   ;;  %v7935_v51 = vld [vmem:[%s15214_s6 + $0xe8] sm:$0xff]  ;;  %984 = vst [vmem:[#allocation2 + $0x268] sm:$0x7f] %v920_v12  ;;  %v7936_v17 = vld [vmem:[%s15214_s6 + $0xf0] sm:$0xff] }
 0x116   :  { %8091 = vperm.xlu1 %10990, %v7933_v52   ;;  %774 = vst [vmem:[#allocation2 + $0x1f8] sm:$0x7f] %v710_v56  ;;  %773 = vst [vmem:[#allocation2 + $0x1f0] sm:$0x7f] %v703_v40  ;;  %v1008_v52 = vld [vmem:[%s15210_s0 + $0x18] sm:$0xee] }
 0x117   :  { %v9084_v31 = vcombine.high %v1008_v52, %v12267_v18  ;;  %v9083_v42 = vcombine.low %v1008_v52, %v12267_v18  ;;  %v8776_v52 = vld [vmem:[%s15215_s8 + $0x28] sm:$0xff] }
 0x119   :  { %8026 = vperm.xlu0 %10989, %v7920_v54   ;;  %v1082_v54 = vrot.slane %v9084_v31, 1  ;;  %v1081_v48 = vrot.slane %v9083_v42, 1 }
 0x11a   :  { %8031 = vperm.xlu1 %10990, %v7921_v49   ;;  %v1134_v49 = vld [vmem:[%s15210_s0 + $0x1c] sm:$0xee] }
 0x11b   :  { %1110 = vst [vmem:[#allocation2 + $0x2d8] sm:$0x7f] %v1082_v54  ;;  %v9098_v18 = vcombine.high %v1134_v49, %v12623_v37  ;;  %1109 = vst [vmem:[#allocation2 + $0x2d0] sm:$0x7f] %v1081_v48  ;;  %v9097_v15 = vcombine.low %v1134_v49, %v12623_v37  ;;  %v8777_v48 = vld [vmem:[%s15215_s8 + $0x30] sm:$0xff] }
 0x11c   :  { %2160 = vmatmul.mubr.bf16.gmra.mrb[88].mxu0 %v12249_v4  ;;  %v12650_v4 = vpop.permute.xlu0 %1617 }
 0x11d   :  { %9170 = vmatprep.mubr.msk.bf16.mxu0 %vm1831_vm0, %v12255_v6  ;;  %15297 = vst [vmem:[#allocation17_spill] sm:$0xff] %v12650_v4  ;;  %v910_v6 = vshll.u32 %v9069_v0, 16  ;;  %8156 = vperm.xlu0 %10989, %v7946_v53   ;;  %v1208_v43 = vrot.slane %v9098_v18, 1  ;;  %v1207_v28 = vrot.slane %v9097_v15, 1  ;;  %v1260_v0 = vld [vmem:[%s15210_s0 + $0x20] sm:$0xee] }
 0x11e   :  { %8161 = vperm.xlu1 %10990, %v7947_v5   ;;  %v9112_v37 = vcombine.high %v1260_v0, %v12638_v3  ;;  %v9111_v53 = vcombine.low %v1260_v0, %v12638_v3  ;;  %v7953_v3 = vld [vmem:[%s15214_s6 + $0x178] sm:$0xff] }
 0x11f   :  { %v912_v16 = vrot.slane %v910_v6, 1  ;;  %1236 = vst [vmem:[#allocation2 + $0x348] sm:$0x7f] %v1208_v43  ;;  %1235 = vst [vmem:[#allocation2 + $0x340] sm:$0x7f] %v1207_v28  ;;  %v8778_v15 = vld [vmem:[%s15215_s8 + $0x38] sm:$0xff] }
 0x120   :  { %v12668_v34 = vpop.permute.xlu0 %1687  ;;  %v1334_v5 = vrot.slane %v9112_v37, 1  ;;  %v1333_v40 = vrot.slane %v9111_v53, 1  ;;  %v8921_v53 = vld [vmem:[%s15216_s10] sm:$0xff] }
 0x121   :  { %v913_v26 = vor.u32 %v912_v16, %v908_v13  ;;  %8096 = vperm.xlu0 %10989, %v7934_v22   ;;  %v8772_v16 = vld [vmem:[%s15215_s8 + $0x8] sm:$0xff] }
 0x122   :  { %8101 = vperm.xlu1 %10990, %v7935_v51   ;;  %1362 = vst [vmem:[#allocation2 + $0x3b8] sm:$0x7f] %v1334_v5  ;;  %1361 = vst [vmem:[#allocation2 + $0x3b0] sm:$0x7f] %v1333_v40  ;;  %v8775_v51 = vld [vmem:[%s15215_s8 + $0x20] sm:$0xff] }
 0x123   :  { %983 = vst [vmem:[#allocation2 + $0x260] sm:$0x7f] %v913_v26 }
 0x124   :  { %2170 = vmatmul.mubr.bf16.gmra.mrb[92].mxu0 %v12288_v35  ;;  %v7949_v35 = vld [vmem:[%s15214_s6 + $0x158] sm:$0xff]  ;;  %v12689_v27 = vpop.permute.xlu0 %1627 }
 0x125   :  { %9171 = vmatprep.mubr.msk.bf16.mxu0 %vm1831_vm0, %v12293_v41  ;;  %v12682_v41 = vpop.permute.xlu1 %1692  ;;  %8166 = vperm.xlu0 %10989, %v7948_v46   ;;  %15299 = vst [vmem:[#allocation19_spill] sm:$0xff] %v12689_v27 }
 0x126   :  { %8171 = vperm.xlu1 %10990, %v7949_v35  }
 0x128   :  { %v12710_v6 = vpop.permute.xlu0 %1697 }
 0x129   :  { %8106 = vperm.xlu0 %10989, %v7936_v17   ;;  %v12702_v56 = vpop.permute.xlu1 %1632 }
 0x12a   :  { %15300 = vst [vmem:[#allocation20_spill] sm:$0xff] %v12702_v56  ;;  %8111 = vperm.xlu1 %10990, %v7937_v25  }
 0x12c   :  { %2180 = vmatmul.mubr.bf16.gmra.mrb[96].mxu0 %v12324_v59  ;;  %v7951_v59 = vld [vmem:[%s15214_s6 + $0x168] sm:$0xff]  ;;  %v12726_v13 = vpop.permute.xlu0 %7372 }
 0x12d   :  { %9172 = vmatprep.mubr.msk.bf16.mxu0 %vm1831_vm0, %v12330_v62  ;;  %8176 = vperm.xlu0 %10989, %v7950_v38   ;;  %v7952_v62 = vld [vmem:[%s15214_s6 + $0x170] sm:$0xff]  ;;  %v12718_v2 = vpop.permute.xlu1 %1702  ;;  %15301 = vst [vmem:[#allocation21_spill] sm:$0xff] %v12726_v13 }
 0x12e   :  { %8181 = vperm.xlu1 %10990, %v7951_v59  }
 0x130   :  { %v12740_v12 = vpop.permute.xlu0 %7382 }
 0x131   :  { %8186 = vperm.xlu0 %10989, %v7952_v62   ;;  %v12731_v22 = vpop.permute.xlu1 %7377  ;;  %15303 = vst [vmem:[#allocation23_spill] sm:$0xff] %v12740_v12 }
 0x132   :  { %8191 = vperm.xlu1 %10990, %v7953_v3   ;;  %15302 = vst [vmem:[#allocation22_spill] sm:$0xff] %v12731_v22 }
 0x134   :  { %2190 = vmatmul.mubr.bf16.gmra.mrb[100].mxu0 %v12359_v20  ;;  %v8773_v20 = vld [vmem:[%s15215_s8 + $0x10] sm:$0xff]  ;;  %v12758_v49 = vpop.permute.xlu0 %7452 }
 0x135   :  { %9173 = vmatprep.mubr.msk.bf16.mxu0 %vm1831_vm0, %v12364_v21  ;;  %8781 = vperm.xlu0 %10989, %v8771_v11   ;;  %v8774_v21 = vld [vmem:[%s15215_s8 + $0x18] sm:$0xff]  ;;  %v12750_v31 = vpop.permute.xlu1 %7387  ;;  %15305 = vst [vmem:[#allocation25_spill] sm:$0xff] %v12758_v49 }
 0x136   :  { %8786 = vperm.xlu1 %10990, %v8772_v16   ;;  %15304 = vst [vmem:[#allocation24_spill] sm:$0xff] %v12750_v31  ;;  %v1417_v16 = vld [vmem:[#allocation2 + $0x30] sm:$0xff]  ;;  %v1530_v49 = vld [vmem:[#allocation2 + $0x3b8] sm:$0xff] }
 0x138   :  { %v12777_v40 = vpop.permute.xlu0 %7392 }
 0x139   :  { %8791 = vperm.xlu0 %10989, %v8773_v20   ;;  %v12767_v0 = vpop.permute.xlu1 %7457  ;;  %15307 = vst [vmem:[#allocation27_spill] sm:$0xff] %v12777_v40 }
 0x13a   :  { %8796 = vperm.xlu1 %10990, %v8774_v21   ;;  %15306 = vst [vmem:[#allocation26_spill] sm:$0xff] %v12767_v0  ;;  %v1432_v21 = vld [vmem:[#allocation2 + $0xa8] sm:$0xff] }
 0x13c   :  { %2200 = vmatmul.mubr.bf16.gmra.mrb[104].mxu0 %v12387_v29 }
 0x13d   :  { %9174 = vmatprep.mubr.msk.bf16.mxu0 %vm1831_vm0, %v12392_v30  ;;  %8801 = vperm.xlu0 %10989, %v8775_v51  }
 0x13e   :  { %8806 = vperm.xlu1 %10990, %v8776_v52   ;;  %v11490_v52 = vld [vmem:[%s15212_s1] ss:$8 sps:$4 sm:$0xff]  }
 0x13f   :  { %v1908_v26 = vpop.f32.mrb[0].mxu0 }
 0x140   :  { %v1909_v29 = vadd.f32 %v1908_v26, %v12461_v58  ;;  %v1910_v42 = vpop.f32.mrb[1].mxu0 }
 0x141   :  { %v1911_v46 = vadd.f32 %v1910_v42, %v12461_v58  ;;  %v1912_v54 = vpop.f32.mrb[2].mxu0  ;;  %8811 = vperm.xlu0 %10989, %v8777_v48  }
 0x142   :  { %v1913_v30 = vadd.f32 %v1912_v54, %v12480_v1  ;;  %v1914_v35 = vpop.f32.mrb[3].mxu0  ;;  %v3085_v17 = vmax.f32 %v1909_v29, 0.0  ;;  %8816 = vperm.xlu1 %10990, %v8778_v15  }
 0x143   :  { %v1915_v18 = vadd.f32 %v1914_v35, %v12480_v1  ;;  %v3086_v25 = vmax.f32 %v1911_v46, 0.0  ;;  %v11491_v46 = vld [vmem:[%s15212_s1 + $0x14] ss:$8 sps:$4 sm:$0xff]  }
 0x144   :  { %v3099_v43 = vmax.f32 %v1913_v30, 0.0  ;;  %2210 = vmatmul.mubr.bf16.gmra.mrb[108].mxu0 %v12415_v39  ;;  %v1431_v30 = vld [vmem:[#allocation2 + $0xa0] sm:$0xff] }
 0x145   :  { %v3100_v28 = vmax.f32 %v1915_v18, 0.0  ;;  %9175 = vmatprep.mubr.msk.bf16.mxu0 %vm1831_vm0, %v12427_v45  ;;  %8924 = vperm.xlu0 %10989, %v8921_v53   ;;  %v1446_v18 = vld [vmem:[#allocation2 + $0x118] sm:$0xff] }
 0x146   :  { %v12769_v37 = vpack.c.bf16 %v3099_v43, %v3085_v17 }
 0x147   :  { %v12774_v38 = vpack.c.bf16 %v3100_v28, %v3086_v25  ;;  %v1918_v5 = vpop.f32.mrb[4].mxu0 }
 0x148   :  { %v1919_v39 = vadd.f32 %v1918_v5, %v12497_v19  ;;  %v1920_v59 = vpop.f32.mrb[5].mxu0  ;;  %v1445_v5 = vld [vmem:[#allocation2 + $0x110] sm:$0xff] }
 0x149   :  { %v1921_v45 = vadd.f32 %v1920_v59, %v12497_v19  ;;  %v1922_v62 = vpop.f32.mrb[6].mxu0  ;;  %v1460_v59 = vld [vmem:[#allocation2 + $0x188] sm:$0xff] }
 0x14a   :  { %v1923_v3 = vadd.f32 %v1922_v62, %v12502_v23  ;;  %v1924_v11 = vpop.f32.mrb[7].mxu0  ;;  %v3113_v51 = vmax.f32 %v1919_v39, 0.0 }
 0x14b   :  { %v1925_v20 = vadd.f32 %v1924_v11, %v12502_v23  ;;  %v3114_v29 = vmax.f32 %v1921_v45, 0.0 }
 0x14c   :  { %v3127_v26 = vmax.f32 %v1923_v3, 0.0  ;;  %2253 = vmatmul.mubr.bf16.vlgmr.msra.gmra.mrb[112].mxu0 %v11490_v52  ;;  %v11492_v3 = vld [vmem:[%s15212_s1 + $0x10] ss:$8 sps:$4 sm:$0xff]  }
 0x14d   :  { %v3128_v42 = vmax.f32 %v1925_v20, 0.0  ;;  %9176 = vmatprep.mubr.msk.bf16.mxu0 %vm1831_vm0, %v11491_v46  ;;  %2394 = vmatpush1.bf16.msra.mxu0 %v1417_v16  ;;  %v11493_v20 = vld [vmem:[%s15212_s1 + $0x24] ss:$8 sps:$4 sm:$0xff]  }
 0x14e   :  { %v12789_v54 = vpack.c.bf16 %v3127_v26, %v3113_v51  ;;  %2395 = vmatprep.subr.bf16.mxu0 %v1432_v21  ;;  %v1459_v51 = vld [vmem:[#allocation2 + $0x180] sm:$0xff] }
 0x14f   :  { %v12791_v35 = vpack.c.bf16 %v3128_v42, %v3114_v29  ;;  %v1928_v48 = vpop.f32.mrb[8].mxu0  ;;  %v1474_v29 = vld [vmem:[#allocation2 + $0x1f8] sm:$0xff] }
 0x150   :  { %v1929_v15 = vadd.f32 %v1928_v48, %v12526_v47  ;;  %v1930_v17 = vpop.f32.mrb[9].mxu0 }
 0x151   :  { %v1931_v43 = vadd.f32 %v1930_v17, %v12526_v47  ;;  %v1932_v25 = vpop.f32.mrb[10].mxu0  ;;  %2396 = vmatpush1.bf16.msra.mxu0 %v1431_v30  ;;  %v1473_v17 = vld [vmem:[#allocation2 + $0x1f0] sm:$0xff] }
 0x152   :  { %v1933_v28 = vadd.f32 %v1932_v25, %v12534_v50  ;;  %v1934_v53 = vpop.f32.mrb[11].mxu0  ;;  %2397 = vmatprep.subr.bf16.mxu0 %v1446_v18  ;;  %v3141_v45 = vmax.f32 %v1929_v15, 0.0 }
 0x153   :  { %v1935_v39 = vadd.f32 %v1934_v53, %v12534_v50  ;;  %v3142_v11 = vmax.f32 %v1931_v43, 0.0  ;;  %v2773_v43 = vpop.f32.mrb[0].mxu1 }
 0x154   :  { %v3155_v62 = vmax.f32 %v1933_v28, 0.0  ;;  %2263 = vmatmul.mubr.bf16.gmra.mrb[116].mxu0 %v11492_v3  ;;  %v1488_v28 = vld [vmem:[#allocation2 + $0x268] sm:$0xff]  ;;  %v2774_v53 = vadd.f32 %v2773_v43, %v12461_v58  ;;  %v1502_v43 = vld [vmem:[#allocation2 + $0x2d8] sm:$0xff] }
 0x155   :  { %v3156_v16 = vmax.f32 %v1935_v39, 0.0  ;;  %9177 = vmatprep.mubr.msk.bf16.mxu0 %vm1831_vm0, %v11493_v20  ;;  %2398 = vmatpush1.bf16.msra.mxu0 %v1445_v5  ;;  %v2775_v5 = vpop.f32.mrb[1].mxu1  ;;  %v11495_v20 = vld [vmem:[%s15212_s1 + $0x34] ss:$8 sps:$4 sm:$0xff]  }
 0x156   :  { %v12804_v21 = vpack.c.bf16 %v3155_v62, %v3141_v45  ;;  %2399 = vmatprep.subr.bf16.mxu0 %v1460_v59  ;;  %v11494_v45 = vld [vmem:[%s15212_s1 + $0x20] ss:$8 sps:$4 sm:$0xff]   ;;  %v2776_v62 = vadd.f32 %v2775_v5, %v12461_v58  ;;  %v2777_v3 = vpop.f32.mrb[2].mxu1 }
 0x157   :  { %v12806_v26 = vpack.c.bf16 %v3156_v16, %v3142_v11  ;;  %v1938_v52 = vpop.f32.mrb[12].mxu0 }
 0x158   :  { %v1939_v42 = vadd.f32 %v1938_v52, %v12558_v57  ;;  %v1940_v46 = vpop.f32.mrb[13].mxu0  ;;  %v2778_v52 = vadd.f32 %v2777_v3, %v12480_v1 }
 0x159   :  { %v1941_v30 = vadd.f32 %v1940_v46, %v12558_v57  ;;  %v1942_v48 = vpop.f32.mrb[14].mxu0  ;;  %2400 = vmatpush1.bf16.msra.mxu0 %v1459_v51  ;;  %v3095_v51 = vmax.f32 %v2774_v53, 0.0  ;;  %v1487_v46 = vld [vmem:[#allocation2 + $0x260] sm:$0xff] }
 0x15a   :  { %v1943_v18 = vadd.f32 %v1942_v48, %v12563_v61  ;;  %v1944_v15 = vpop.f32.mrb[15].mxu0  ;;  %2401 = vmatprep.subr.bf16.mxu0 %v1474_v29  ;;  %v3169_v39 = vmax.f32 %v1939_v42, 0.0  ;;  %v2779_v29 = vpop.f32.mrb[3].mxu1  ;;  %v3096_v48 = vmax.f32 %v2776_v62, 0.0  ;;  %v1501_v62 = vld [vmem:[#allocation2 + $0x2d0] sm:$0xff] }
 0x15b   :  { %v1945_v25 = vadd.f32 %v1944_v15, %v12563_v61  ;;  %v3170_v11 = vmax.f32 %v1941_v30, 0.0 }
 0x15c   :  { %v3183_v59 = vmax.f32 %v1943_v18, 0.0  ;;  %2273 = vmatmul.mubr.bf16.gmra.mrb[120].mxu0 %v11494_v45  ;;  %v2780_v18 = vadd.f32 %v2779_v29, %v12480_v1  ;;  %v1516_v29 = vld [vmem:[#allocation2 + $0x348] sm:$0xff] }
 0x15d   :  { %v3184_v16 = vmax.f32 %v1945_v25, 0.0  ;;  %9178 = vmatprep.mubr.msk.bf16.mxu0 %vm1831_vm0, %v11495_v20  ;;  %2402 = vmatpush1.bf16.msra.mxu0 %v1473_v17  ;;  %v3109_v25 = vmax.f32 %v2778_v52, 0.0 }
 0x15e   :  { %v12822_v42 = vpack.c.bf16 %v3183_v59, %v3169_v39  ;;  %2403 = vmatprep.subr.bf16.mxu0 %v1488_v28  ;;  %v3110_v17 = vmax.f32 %v2780_v18, 0.0 }
 0x15f   :  { %v12825_v30 = vpack.c.bf16 %v3184_v16, %v3170_v11  ;;  %v1948_v15 = vpop.f32.mrb[16].mxu0  ;;  %v12829_v39 = vpack.c.bf16 %v3109_v25, %v3095_v51  ;;  %v2783_v16 = vpop.f32.mrb[4].mxu1  ;;  %v11496_v51 = vld [vmem:[%s15212_s1 + $0x30] ss:$8 sps:$4 sm:$0xff]  }
 0x160   :  { %v1949_v5 = vadd.f32 %v1948_v15, %v12598_v60  ;;  %v1950_v45 = vpop.f32.mrb[17].mxu0  ;;  %v12832_v11 = vpack.c.bf16 %v3110_v17, %v3096_v48  ;;  %v2784_v52 = vadd.f32 %v2783_v16, %v12497_v19  ;;  %v2785_v18 = vpop.f32.mrb[5].mxu1  ;;  %v11497_v17 = vld [vmem:[%s15212_s1 + $0x44] ss:$8 sps:$4 sm:$0xff]  }
 0x161   :  { %v1951_v53 = vadd.f32 %v1950_v45, %v12598_v60  ;;  %v1952_v3 = vpop.f32.mrb[18].mxu0  ;;  %2404 = vmatpush1.bf16.msra.mxu0 %v1487_v46  ;;  %v2786_v46 = vadd.f32 %v2785_v18, %v12497_v19 }
 0x162   :  { %v1953_v28 = vadd.f32 %v1952_v3, %v12612_v24  ;;  %v1954_v59 = vpop.f32.mrb[19].mxu0  ;;  %2405 = vmatprep.subr.bf16.mxu0 %v1502_v43  ;;  %v3197_v15 = vmax.f32 %v1949_v5, 0.0  ;;  %v2787_v43 = vpop.f32.mrb[6].mxu1  ;;  %v3123_v3 = vmax.f32 %v2784_v52, 0.0 }
 0x163   :  { %v1955_v20 = vadd.f32 %v1954_v59, %v12612_v24  ;;  %v3198_v25 = vmax.f32 %v1951_v53, 0.0  ;;  %v2788_v5 = vadd.f32 %v2787_v43, %v12502_v23  ;;  %v3124_v16 = vmax.f32 %v2786_v46, 0.0 }
 0x164   :  { %v3211_v45 = vmax.f32 %v1953_v28, 0.0  ;;  %2283 = vmatmul.mubr.bf16.gmra.mrb[124].mxu0 %v11496_v51  ;;  %v2789_v28 = vpop.f32.mrb[7].mxu1  ;;  %v1515_v51 = vld [vmem:[#allocation2 + $0x340] sm:$0xff] }
 0x165   :  { %v3212_v48 = vmax.f32 %v1955_v20, 0.0  ;;  %9179 = vmatprep.mubr.msk.bf16.mxu0 %vm1831_vm0, %v11497_v17  ;;  %2406 = vmatpush1.bf16.msra.mxu0 %v1501_v62  ;;  %v2790_v18 = vadd.f32 %v2789_v28, %v12502_v23  ;;  %v3137_v0 = vmax.f32 %v2788_v5, 0.0 }
 0x166   :  { %v12845_v59 = vpack.c.bf16 %v3211_v45, %v3197_v15  ;;  %2407 = vmatprep.subr.bf16.mxu0 %v1516_v29 }
 0x167   :  { %v12848_v53 = vpack.c.bf16 %v3212_v48, %v3198_v25  ;;  %v1958_v20 = vpop.f32.mrb[20].mxu0  ;;  %v3138_v62 = vmax.f32 %v2790_v18, 0.0  ;;  %v12852_v15 = vpack.c.bf16 %v3137_v0, %v3123_v3  ;;  %v2793_v25 = vpop.f32.mrb[8].mxu1  ;;  %v1529_v48 = vld [vmem:[#allocation2 + $0x3b0] sm:$0xff]  ;;  %v11498_v0 = vld [vmem:[%s15212_s1 + $0x40] ss:$8 sps:$4 sm:$0xff]  }
 0x168   :  { %v1959_v40 = vadd.f32 %v1958_v20, %v12650_v4  ;;  %v1960_v17 = vpop.f32.mrb[21].mxu0  ;;  %v2794_v28 = vadd.f32 %v2793_v25, %v12526_v47  ;;  %v2795_v20 = vpop.f32.mrb[9].mxu1 }
 0x169   :  { %v1961_v52 = vadd.f32 %v1960_v17, %v12650_v4  ;;  %v1962_v43 = vpop.f32.mrb[22].mxu0  ;;  %2408 = vmatpush1.bf16.msra.mxu0 %v1515_v51  ;;  %v12855_v46 = vpack.c.bf16 %v3138_v62, %v3124_v16  ;;  %v2796_v3 = vadd.f32 %v2795_v20, %v12526_v47  ;;  %v2797_v51 = vpop.f32.mrb[10].mxu1 }
 0x16a   :  { %v1963_v29 = vadd.f32 %v1962_v43, %v12655_v10  ;;  %v1964_v45 = vpop.f32.mrb[23].mxu0  ;;  %2409 = vmatprep.subr.bf16.mxu0 %v1530_v49  ;;  %v3225_v18 = vmax.f32 %v1959_v40, 0.0  ;;  %v11499_v49 = vld [vmem:[%s15212_s1 + $0x54] ss:$8 sps:$4 sm:$0xff]   ;;  %v3151_v62 = vmax.f32 %v2794_v28, 0.0  ;;  %v2798_v40 = vadd.f32 %v2797_v51, %v12534_v50  ;;  %v2799_v43 = vpop.f32.mrb[11].mxu1 }
 0x16b   :  { %v1965_v5 = vadd.f32 %v1964_v45, %v12655_v10  ;;  %v3226_v16 = vmax.f32 %v1961_v52, 0.0  ;;  %v3152_v45 = vmax.f32 %v2796_v3, 0.0  ;;  %v2800_v25 = vadd.f32 %v2799_v43, %v12534_v50  ;;  %v2803_v3 = vpop.f32.mrb[12].mxu1 }
 0x16c   :  { %v3239_v22 = vmax.f32 %v1963_v29, 0.0  ;;  %2293 = vmatmul.mubr.bf16.gmra.mrb[128].mxu0 %v11498_v0 }
 0x16d   :  { %v3240_v17 = vmax.f32 %v1965_v5, 0.0  ;;  %9180 = vmatprep.mubr.msk.bf16.mxu0 %vm1831_vm0, %v11499_v49  ;;  %2410 = vmatpush1.bf16.msra.mxu0 %v1529_v48  ;;  %v3165_v5 = vmax.f32 %v2798_v40, 0.0  ;;  %v3166_v13 = vmax.f32 %v2800_v25, 0.0  ;;  %v2805_v40 = vpop.f32.mrb[13].mxu1 }
 0x16e   :  { %v12868_v29 = vpack.c.bf16 %v3239_v22, %v3225_v18  ;;  %v2807_v25 = vpop.f32.mrb[14].mxu1 }
 0x16f   :  { %v12871_v20 = vpack.c.bf16 %v3240_v17, %v3226_v16  ;;  %v1968_v52 = vpop.f32.mrb[24].mxu0  ;;  %v12875_v48 = vpack.c.bf16 %v3165_v5, %v3151_v62  ;;  %v12878_v18 = vpack.c.bf16 %v3166_v13, %v3152_v45  ;;  %v2804_v17 = vadd.f32 %v2803_v3, %v12558_v57  ;;  %v11501_v13 = vld [vmem:[%s15212_s1 + $0x64] ss:$8 sps:$4 sm:$0xff]  }
 0x170   :  { %v1969_v0 = vadd.f32 %v1968_v52, %v12689_v27  ;;  %v1970_v31 = vpop.f32.mrb[25].mxu0  ;;  %v2806_v62 = vadd.f32 %v2805_v40, %v12558_v57 }
 0x171   :  { %v1971_v49 = vadd.f32 %v1970_v31, %v12689_v27  ;;  %v1972_v28 = vpop.f32.mrb[26].mxu0  ;;  %v11500_v31 = vld [vmem:[%s15212_s1 + $0x50] ss:$8 sps:$4 sm:$0xff]   ;;  %v3179_v45 = vmax.f32 %v2804_v17, 0.0 }
 0x172   :  { %v1973_v51 = vadd.f32 %v1972_v28, %v12702_v56  ;;  %v1974_v22 = vpop.f32.mrb[27].mxu0  ;;  %v3253_v43 = vmax.f32 %v1969_v0, 0.0  ;;  %v2808_v0 = vadd.f32 %v2807_v25, %v12563_v61  ;;  %v3180_v3 = vmax.f32 %v2806_v62, 0.0 }
 0x173   :  { %v1975_v16 = vadd.f32 %v1974_v22, %v12702_v56  ;;  %v3254_v5 = vmax.f32 %v1971_v49, 0.0 }
 0x174   :  { %v3267_v52 = vmax.f32 %v1973_v51, 0.0  ;;  %2303 = vmatmul.mubr.bf16.gmra.mrb[132].mxu0 %v11500_v31  ;;  %v2809_v51 = vpop.f32.mrb[15].mxu1  ;;  %v3193_v49 = vmax.f32 %v2808_v0, 0.0 }
 0x175   :  { %v3268_v28 = vmax.f32 %v1975_v16, 0.0  ;;  %9181 = vmatprep.mubr.msk.bf16.mxu0 %vm1831_vm0, %v11501_v13  ;;  %v2810_v31 = vadd.f32 %v2809_v51, %v12563_v61  ;;  %v2813_v62 = vpop.f32.mrb[16].mxu1 }
 0x176   :  { %v12891_v22 = vpack.c.bf16 %v3267_v52, %v3253_v43  ;;  %v12898_v17 = vpack.c.bf16 %v3193_v49, %v3179_v45  ;;  %v2815_v0 = vpop.f32.mrb[17].mxu1 }
 0x177   :  { %v12894_v12 = vpack.c.bf16 %v3268_v28, %v3254_v5  ;;  %v1978_v40 = vpop.f32.mrb[28].mxu0  ;;  %v3194_v50 = vmax.f32 %v2810_v31, 0.0  ;;  %v2814_v28 = vadd.f32 %v2813_v62, %v12598_v60  ;;  %v2816_v45 = vadd.f32 %v2815_v0, %v12598_v60  ;;  %v2817_v31 = vpop.f32.mrb[18].mxu1 }
 0x178   :  { %15308 = vst [vmem:[#allocation28_spill] sm:$0xff] %v12891_v22  ;;  %v1979_v16 = vadd.f32 %v1978_v40, %v12469_v63  ;;  %v1980_v57 = vpop.f32.mrb[29].mxu0  ;;  %15310 = vst [vmem:[#allocation30_spill] sm:$0xff] %v12898_v17 }
 0x179   :  { %15309 = vst [vmem:[#allocation29_spill] sm:$0xff] %v12894_v12  ;;  %v1981_v47 = vadd.f32 %v1980_v57, %v12469_v63  ;;  %v1982_v13 = vpop.f32.mrb[30].mxu0  ;;  %v12901_v52 = vpack.c.bf16 %v3194_v50, %v3180_v3  ;;  %v11502_v57 = vld [vmem:[%s15212_s1 + $0x60] ss:$8 sps:$4 sm:$0xff]   ;;  %v11503_v50 = vld [vmem:[%s15212_s1 + $0x74] ss:$8 sps:$4 sm:$0xff]  }
 0x17a   :  { %v1983_v25 = vadd.f32 %v1982_v13, %v12488_v9  ;;  %v1984_v43 = vpop.f32.mrb[31].mxu0  ;;  %v3281_v51 = vmax.f32 %v1979_v16, 0.0  ;;  %v3207_v3 = vmax.f32 %v2814_v28, 0.0  ;;  %v2818_v16 = vadd.f32 %v2817_v31, %v12612_v24  ;;  %v43_v13 = vld [vmem:[%s15210_s0 + $0x20] sm:$0xff] }
 0x17b   :  { %15311 = vst [vmem:[#allocation31_spill] sm:$0xff] %v12901_v52  ;;  %v1985_v5 = vadd.f32 %v1984_v43, %v12488_v9  ;;  %v3282_v40 = vmax.f32 %v1981_v47, 0.0  ;;  %v2819_v47 = vpop.f32.mrb[19].mxu1  ;;  %v3208_v62 = vmax.f32 %v2816_v45, 0.0 }
 0x17c   :  { %v3295_v61 = vmax.f32 %v1983_v25, 0.0  ;;  %2313 = vmatmul.mubr.bf16.gmra.mrb[136].mxu0 %v11502_v57  ;;  %v50_v25 = vld [vmem:[%s15210_s0 + $0x60] sm:$0x77] }
 0x17d   :  { %v3296_v49 = vmax.f32 %v1985_v5, 0.0  ;;  %9182 = vmatprep.mubr.msk.bf16.mxu0 %vm1831_vm0, %v11503_v50  ;;  %v2820_v5 = vadd.f32 %v2819_v47, %v12612_v24  ;;  %v9002_v0 = vcombine.high %v43_v13, %v50_v25  ;;  %v3221_v50 = vmax.f32 %v2818_v16, 0.0 }
 0x17e   :  { %v3575_v43 = vpack.c.bf16 %v3295_v61, %v3281_v51  ;;  %v9001_v28 = vcombine.low %v43_v13, %v50_v25  ;;  %v12929_v61 = vld [vmem:[%s15210_s0 + $0x24] sm:$0xff] }
 0x17f   :  { %v3576_v57 = vpack.c.bf16 %v3296_v49, %v3282_v40  ;;  %v1988_v60 = vpop.f32.mrb[32].mxu0  ;;  %v3222_v19 = vmax.f32 %v2820_v5, 0.0  ;;  %132 = vst [vmem:[#allocation2 + $0x48] sm:$0x7f] %v9002_v0  ;;  %v12924_v12 = vpack.c.bf16 %v3221_v50, %v3207_v3  ;;  %v2823_v49 = vpop.f32.mrb[20].mxu1 }
 0x180   :  { %v1989_v31 = vadd.f32 %v1988_v60, %v12511_v33  ;;  %v1990_v23 = vpop.f32.mrb[33].mxu0  ;;  %v3673_v52 = vmax.bf16 %v3575_v43, %v12769_v37  ;;  %131 = vst [vmem:[#allocation2 + $0x40] sm:$0x7f] %v9001_v28  ;;  %v162_v60 = vld [vmem:[%s15210_s0 + $0x64] sm:$0x77]  ;;  %v2824_v25 = vadd.f32 %v2823_v49, %v12650_v4  ;;  %v2825_v43 = vpop.f32.mrb[21].mxu1 }
 0x181   :  { %v1991_v17 = vadd.f32 %v1990_v23, %v12511_v33  ;;  %v1992_v1 = vpop.f32.mrb[34].mxu0  ;;  %15312 = vst [vmem:[#allocation32_spill] sm:$0xff] %v12924_v12  ;;  %v3674_v51 = vmax.bf16 %v3576_v57, %v12774_v38  ;;  %v12936_v23 = vpack.c.bf16 %v3222_v19, %v3208_v62  ;;  %v9016_v3 = vcombine.high %v12929_v61, %v162_v60  ;;  %v12945_v38 = vld [vmem:[%s15210_s0 + $0x60] sm:$0xff]  ;;  %v11504_v19 = vld [vmem:[%s15212_s1 + $0x70] ss:$8 sps:$4 sm:$0xff]   ;;  %v2827_v62 = vpop.f32.mrb[22].mxu1 }
 0x182   :  { %v3309_v40 = vmax.f32 %v1989_v31, 0.0  ;;  %v1993_v37 = vadd.f32 %v1992_v1, %v12521_v32  ;;  %v1994_v45 = vpop.f32.mrb[35].mxu0  ;;  %v9015_v5 = vcombine.low %v12929_v61, %v162_v60  ;;  %v9044_v0 = vcombine.high %v43_v13, %v12945_v38  ;;  %v11505_v28 = vld [vmem:[%s15212_s1 + $0x84] ss:$8 sps:$4 sm:$0xff]  }
 0x183   :  { %15313 = vst [vmem:[#allocation33_spill] sm:$0xff] %v12936_v23  ;;  %v3310_v16 = vmax.f32 %v1991_v17, 0.0  ;;  %v1995_v47 = vadd.f32 %v1994_v45, %v12521_v32  ;;  %v2826_v17 = vadd.f32 %v2825_v43, %v12650_v4  ;;  %244 = vst [vmem:[#allocation2 + $0xb8] sm:$0x7f] %v9016_v3  ;;  %v12952_v57 = vmax.bf16 %v3674_v51, %v3673_v52  ;;  %v12962_v45 = vld [vmem:[%s15210_s0 + $0x28] sm:$0xff] }
 0x184   :  { %v3323_v1 = vmax.f32 %v1993_v37, 0.0  ;;  %2323 = vmatmul.mubr.bf16.gmra.mrb[140].mxu0 %v11504_v19  ;;  %v3235_v31 = vmax.f32 %v2824_v25, 0.0  ;;  %v2828_v60 = vadd.f32 %v2827_v62, %v12655_v10  ;;  %v2829_v37 = vpop.f32.mrb[23].mxu1  ;;  %243 = vst [vmem:[#allocation2 + $0xb0] sm:$0x7f] %v9015_v5  ;;  %v9043_v51 = vcombine.low %v43_v13, %v12945_v38 }
 0x185   :  { %15314 = vst [vmem:[#allocation34_spill] sm:$0xff] %v12952_v57  ;;  %v3324_v50 = vmax.f32 %v1995_v47, 0.0  ;;  %9183 = vmatprep.mubr.msk.bf16.mxu0 %vm1831_vm0, %v11505_v28  ;;  %v274_v52 = vld [vmem:[%s15210_s0 + $0x68] sm:$0x77]  ;;  %v3236_v3 = vmax.f32 %v2826_v17, 0.0  ;;  %v2830_v47 = vadd.f32 %v2829_v37, %v12655_v10  ;;  %v511_v57 = vshll.u32 %v9044_v0, 16 }
 0x186   :  { %v12968_v49 = vpack.c.bf16 %v3323_v1, %v3309_v40  ;;  %v9030_v25 = vcombine.high %v12962_v45, %v274_v52  ;;  %v3249_v19 = vmax.f32 %v2828_v60, 0.0  ;;  %v1420_v62 = vld [vmem:[#allocation2 + $0x48] sm:$0xff]  ;;  %v9029_v28 = vcombine.low %v12962_v45, %v274_v52 }
 0x187   :  { %v12972_v43 = vpack.c.bf16 %v3324_v50, %v3310_v16  ;;  %v1998_v5 = vpop.f32.mrb[36].mxu0  ;;  %v3250_v23 = vmax.f32 %v2830_v47, 0.0  ;;  %2566 = vmatprep.subr.bf16.mxu0 %v1420_v62  ;;  %v509_v13 = vshrl.u32 %v9044_v0, 16  ;;  %v504_v40 = vshll.u32 %v9043_v51, 16  ;;  %v12982_v60 = vld [vmem:[%s15210_s0 + $0x64] sm:$0xff]  ;;  %v2833_v0 = vpop.f32.mrb[24].mxu1 }
 0x188   :  { %v1999_v4 = vadd.f32 %v1998_v5, %v12542_v55  ;;  %v2000_v24 = vpop.f32.mrb[37].mxu0  ;;  %356 = vst [vmem:[#allocation2 + $0x128] sm:$0x7f] %v9030_v25  ;;  %v12977_v37 = vpack.c.bf16 %v3249_v19, %v3235_v31  ;;  %355 = vst [vmem:[#allocation2 + $0x120] sm:$0x7f] %v9029_v28  ;;  %v513_v16 = vrot.slane %v511_v57, 1  ;;  %v2834_v19 = vadd.f32 %v2833_v0, %v12689_v27 }
 0x189   :  { %v2001_v1 = vadd.f32 %v2000_v24, %v12542_v55  ;;  %v2002_v17 = vpop.f32.mrb[38].mxu0  ;;  %v502_v50 = vshrl.u32 %v9043_v51, 16  ;;  %v12985_v25 = vpack.c.bf16 %v3250_v23, %v3236_v3  ;;  %v506_v62 = vrot.slane %v504_v40, 1  ;;  %v2835_v57 = vpop.f32.mrb[25].mxu1  ;;  %v11506_v10 = vld [vmem:[%s15212_s1 + $0x80] ss:$8 sps:$4 sm:$0xff]  }
 0x18a   :  { %15315 = vst [vmem:[#allocation35_spill] sm:$0xff] %v12977_v37  ;;  %v3337_v52 = vmax.f32 %v1999_v4, 0.0  ;;  %v2003_v47 = vadd.f32 %v2002_v17, %v12550_v36  ;;  %v2004_v5 = vpop.f32.mrb[39].mxu0  ;;  %v514_v51 = vor.u32 %v513_v16, %v509_v13  ;;  %v2836_v4 = vadd.f32 %v2835_v57, %v12689_v27  ;;  %v2837_v17 = vpop.f32.mrb[26].mxu1 }
 0x18b   :  { %15316 = vst [vmem:[#allocation36_spill] sm:$0xff] %v12985_v25  ;;  %v3338_v24 = vmax.f32 %v2001_v1, 0.0  ;;  %v2005_v31 = vadd.f32 %v2004_v5, %v12550_v36  ;;  %v507_v23 = vor.u32 %v506_v62, %v502_v50  ;;  %v9058_v3 = vcombine.high %v12929_v61, %v12982_v60  ;;  %v11507_v1 = vld [vmem:[%s15212_s1 + $0x94] ss:$8 sps:$4 sm:$0xff]   ;;  %v13005_v50 = vld [vmem:[%s15210_s0 + $0x68] sm:$0xff] }
 0x18c   :  { %v3351_v28 = vmax.f32 %v2003_v47, 0.0  ;;  %2333 = vmatmul.mubr.bf16.gmra.mrb[144].mxu0 %v11506_v10  ;;  %v3263_v13 = vmax.f32 %v2834_v19, 0.0  ;;  %v2838_v16 = vadd.f32 %v2837_v17, %v12702_v56  ;;  %v2839_v47 = vpop.f32.mrb[27].mxu1  ;;  %566 = vst [vmem:[#allocation2 + $0x198] sm:$0x7f] %v514_v51  ;;  %v9057_v10 = vcombine.low %v12929_v61, %v12982_v60 }
 0x18d   :  { %v3352_v40 = vmax.f32 %v2005_v31, 0.0  ;;  %9184 = vmatprep.mubr.msk.bf16.mxu0 %vm1831_vm0, %v11507_v1  ;;  %v3264_v0 = vmax.f32 %v2836_v4, 0.0  ;;  %v2840_v62 = vadd.f32 %v2839_v47, %v12702_v56  ;;  %565 = vst [vmem:[#allocation2 + $0x190] sm:$0x7f] %v507_v23  ;;  %v719_v31 = vshrl.u32 %v9058_v3, 16 }
 0x18e   :  { %v13007_v5 = vpack.c.bf16 %v3351_v28, %v3337_v52  ;;  %v3277_v17 = vmax.f32 %v2838_v16, 0.0  ;;  %v721_v51 = vshll.u32 %v9058_v3, 16  ;;  %v712_v1 = vshrl.u32 %v9057_v10, 16 }
 0x18f   :  { %v13010_v19 = vpack.c.bf16 %v3352_v40, %v3338_v24  ;;  %v2008_v57 = vpop.f32.mrb[40].mxu0  ;;  %v3278_v25 = vmax.f32 %v2840_v62, 0.0  ;;  %v714_v37 = vshll.u32 %v9057_v10, 16  ;;  %v9072_v52 = vcombine.high %v12962_v45, %v13005_v50  ;;  %v2843_v10 = vpop.f32.mrb[28].mxu1 }
 0x190   :  { %v2009_v61 = vadd.f32 %v2008_v57, %v12572_v7  ;;  %v2010_v27 = vpop.f32.mrb[41].mxu0  ;;  %v13016_v47 = vpack.c.bf16 %v3277_v17, %v3263_v13  ;;  %v723_v23 = vrot.slane %v721_v51, 1  ;;  %v13020_v24 = vcombine.low %v12962_v45, %v13005_v50  ;;  %v2845_v13 = vpop.f32.mrb[29].mxu1  ;;  %v11508_v45 = vld [vmem:[%s15212_s1 + $0x90] ss:$8 sps:$4 sm:$0xff]  }
 0x191   :  { %v2011_v28 = vadd.f32 %v2010_v27, %v12572_v7  ;;  %v2012_v4 = vpop.f32.mrb[42].mxu0  ;;  %v13023_v57 = vpack.c.bf16 %v3278_v25, %v3264_v0  ;;  %v716_v62 = vrot.slane %v714_v37, 1  ;;  %v2844_v27 = vadd.f32 %v2843_v10, %v12469_v63  ;;  %v11509_v37 = vld [vmem:[%s15212_s1 + $0xa4] ss:$8 sps:$4 sm:$0xff]  }
 0x192   :  { %15317 = vst [vmem:[#allocation37_spill] sm:$0xff] %v13016_v47  ;;  %v3365_v3 = vmax.f32 %v2009_v61, 0.0  ;;  %v2013_v40 = vadd.f32 %v2012_v4, %v12587_v8  ;;  %v2014_v16 = vpop.f32.mrb[43].mxu0  ;;  %v724_v17 = vor.u32 %v723_v23, %v719_v31  ;;  %v2846_v61 = vadd.f32 %v2845_v13, %v12469_v63  ;;  %v2847_v4 = vpop.f32.mrb[30].mxu1 }
 0x193   :  { %15318 = vst [vmem:[#allocation38_spill] sm:$0xff] %v13023_v57  ;;  %v3366_v56 = vmax.f32 %v2011_v28, 0.0  ;;  %v2015_v12 = vadd.f32 %v2014_v16, %v12587_v8  ;;  %v717_v25 = vor.u32 %v716_v62, %v712_v1  ;;  %v929_v0 = vshrl.u32 %v9072_v52, 16  ;;  %v2849_v23 = vpop.f32.mrb[31].mxu1  ;;  %v1009_v16 = vld [vmem:[%s15210_s0 + $0x20] sm:$0xee] }
 0x194   :  { %v3379_v51 = vmax.f32 %v2013_v40, 0.0  ;;  %2343 = vmatmul.mubr.bf16.gmra.mrb[148].mxu0 %v11508_v45  ;;  %v3291_v28 = vmax.f32 %v2844_v27, 0.0  ;;  %v2848_v31 = vadd.f32 %v2847_v4, %v12488_v9  ;;  %776 = vst [vmem:[#allocation2 + $0x208] sm:$0x7f] %v724_v17  ;;  %v931_v40 = vshll.u32 %v9072_v52, 16 }
 0x195   :  { %v3380_v57 = vmax.f32 %v2015_v12, 0.0  ;;  %9185 = vmatprep.mubr.msk.bf16.mxu0 %vm1831_vm0, %v11509_v37  ;;  %v3292_v1 = vmax.f32 %v2846_v61, 0.0  ;;  %v2850_v12 = vadd.f32 %v2849_v23, %v12488_v9  ;;  %775 = vst [vmem:[#allocation2 + $0x200] sm:$0x7f] %v717_v25  ;;  %v922_v62 = vshrl.u32 %v13020_v24, 16 }
 0x196   :  { %v13039_v10 = vpack.c.bf16 %v3379_v51, %v3365_v3  ;;  %v3305_v45 = vmax.f32 %v2848_v31, 0.0  ;;  %v933_v4 = vrot.slane %v931_v40, 1  ;;  %v924_v17 = vshll.u32 %v13020_v24, 16 }
 0x197   :  { %v13043_v13 = vpack.c.bf16 %v3380_v57, %v3366_v56  ;;  %v2018_v27 = vpop.f32.mrb[44].mxu0  ;;  %v3306_v63 = vmax.f32 %v2850_v12, 0.0  ;;  %v9086_v3 = vcombine.high %v1009_v16, %v12945_v38  ;;  %v9085_v51 = vcombine.low %v1009_v16, %v12945_v38 }
 0x198   :  { %v2019_v52 = vadd.f32 %v2018_v27, %v12626_v44  ;;  %v2020_v37 = vpop.f32.mrb[45].mxu0  ;;  %v13050_v23 = vpack.c.bf16 %v3305_v45, %v3291_v28  ;;  %v934_v56 = vor.u32 %v933_v4, %v929_v0  ;;  %v926_v57 = vrot.slane %v924_v17, 1  ;;  %v2853_v27 = vpop.f32.mrb[32].mxu1  ;;  %v1135_v0 = vld [vmem:[%s15210_s0 + $0x24] sm:$0xee] }
 0x199   :  { %v2021_v61 = vadd.f32 %v2020_v37, %v12626_v44  ;;  %v2022_v25 = vpop.f32.mrb[46].mxu0  ;;  %v13053_v24 = vpack.c.bf16 %v3306_v63, %v3292_v1  ;;  %v1084_v47 = vrot.slane %v9086_v3, 1  ;;  %v2854_v16 = vadd.f32 %v2853_v27, %v12511_v33  ;;  %v2855_v28 = vpop.f32.mrb[33].mxu1  ;;  %v11510_v63 = vld [vmem:[%s15212_s1 + $0xa0] ss:$8 sps:$4 sm:$0xff]  }
 0x19a   :  { %v3393_v9 = vmax.f32 %v2019_v52, 0.0  ;;  %v2023_v31 = vadd.f32 %v2022_v25, %v12640_v14  ;;  %v2024_v40 = vpop.f32.mrb[47].mxu0  ;;  %986 = vst [vmem:[#allocation2 + $0x278] sm:$0x7f] %v934_v56  ;;  %v2856_v4 = vadd.f32 %v2855_v28, %v12511_v33  ;;  %v2857_v17 = vpop.f32.mrb[34].mxu1  ;;  %v927_v52 = vor.u32 %v926_v57, %v922_v62 }
 0x19b   :  { %v3394_v12 = vmax.f32 %v2021_v61, 0.0  ;;  %v2025_v22 = vadd.f32 %v2024_v40, %v12640_v14  ;;  %1112 = vst [vmem:[#allocation2 + $0x2e8] sm:$0x7f] %v1084_v47  ;;  %v1261_v37 = vld [vmem:[%s15210_s0 + $0x28] sm:$0xee]  ;;  %v3319_v25 = vmax.f32 %v2854_v16, 0.0  ;;  %v2858_v56 = vadd.f32 %v2857_v17, %v12521_v32 }
 0x19c   :  { %v3407_v45 = vmax.f32 %v2023_v31, 0.0  ;;  %2353 = vmatmul.mubr.bf16.gmra.mrb[152].mxu0 %v11510_v63  ;;  %v11511_v61 = vld [vmem:[%s15212_s1 + $0xb4] ss:$8 sps:$4 sm:$0xff]   ;;  %v2859_v31 = vpop.f32.mrb[35].mxu1  ;;  %v1083_v40 = vrot.slane %v9085_v51, 1  ;;  %v3320_v62 = vmax.f32 %v2856_v4, 0.0  ;;  %v9100_v57 = vcombine.high %v1135_v0, %v12982_v60 }
 0x19d   :  { %v3408_v3 = vmax.f32 %v2025_v22, 0.0  ;;  %9186 = vmatprep.mubr.msk.bf16.mxu0 %vm1831_vm0, %v11511_v61  ;;  %v2860_v47 = vadd.f32 %v2859_v31, %v12521_v32  ;;  %985 = vst [vmem:[#allocation2 + $0x270] sm:$0x7f] %v927_v52  ;;  %v3333_v63 = vmax.f32 %v2858_v56, 0.0  ;;  %v9099_v61 = vcombine.low %v1135_v0, %v12982_v60  ;;  %v2863_v38 = vpop.f32.mrb[36].mxu1 }
 0x19e   :  { %v13076_v27 = vpack.c.bf16 %v3407_v45, %v3393_v9  ;;  %1111 = vst [vmem:[#allocation2 + $0x2e0] sm:$0x7f] %v1083_v40  ;;  %v9114_v16 = vcombine.high %v1261_v37, %v13005_v50  ;;  %v1210_v45 = vrot.slane %v9100_v57, 1  ;;  %v9113_v4 = vcombine.low %v1261_v37, %v13005_v50 }
 0x19f   :  { %v13080_v22 = vpack.c.bf16 %v3408_v3, %v3394_v12  ;;  %v2028_v28 = vpop.f32.mrb[48].mxu0  ;;  %v3334_v9 = vmax.f32 %v2860_v47, 0.0  ;;  %v13087_v1 = vpack.c.bf16 %v3333_v63, %v3319_v25  ;;  %v1209_v12 = vrot.slane %v9099_v61, 1  ;;  %v2865_v25 = vpop.f32.mrb[37].mxu1 }
 0x1a0   :  { %v2029_v17 = vadd.f32 %v2028_v28, %v12668_v34  ;;  %v2030_v51 = vpop.f32.mrb[49].mxu0  ;;  %v1336_v3 = vrot.slane %v9114_v16, 1  ;;  %1238 = vst [vmem:[#allocation2 + $0x358] sm:$0x7f] %v1210_v45  ;;  %v1335_v28 = vrot.slane %v9113_v4, 1  ;;  %v2864_v37 = vadd.f32 %v2863_v38, %v12542_v55 }
 0x1a1   :  { %v2031_v52 = vadd.f32 %v2030_v51, %v12668_v34  ;;  %v2032_v31 = vpop.f32.mrb[50].mxu0  ;;  %v13090_v0 = vpack.c.bf16 %v3334_v9, %v3320_v62  ;;  %v3697_v50 = vmax.bf16 %v13087_v1, %v12852_v15  ;;  %1237 = vst [vmem:[#allocation2 + $0x350] sm:$0x7f] %v1209_v12  ;;  %v11512_v62 = vld [vmem:[%s15212_s1 + $0xb0] ss:$8 sps:$4 sm:$0xff]   ;;  %v2866_v16 = vadd.f32 %v2865_v25, %v12542_v55 }
 0x1a2   :  { %v3421_v56 = vmax.f32 %v2029_v17, 0.0  ;;  %v2033_v40 = vadd.f32 %v2032_v31, %v12682_v41  ;;  %v2034_v60 = vpop.f32.mrb[51].mxu0  ;;  %1364 = vst [vmem:[#allocation2 + $0x3c8] sm:$0x7f] %v1336_v3  ;;  %v2867_v17 = vpop.f32.mrb[38].mxu1  ;;  %v3687_v51 = vmax.bf16 %v12968_v49, %v12789_v54  ;;  %v3347_v45 = vmax.f32 %v2864_v37, 0.0 }
 0x1a3   :  { %v3422_v47 = vmax.f32 %v2031_v52, 0.0  ;;  %v2035_v57 = vadd.f32 %v2034_v60, %v12682_v41  ;;  %v3698_v61 = vmax.bf16 %v13090_v0, %v12855_v46  ;;  %1363 = vst [vmem:[#allocation2 + $0x3c0] sm:$0x7f] %v1335_v28  ;;  %v11513_v9 = vld [vmem:[%s15212_s1 + $0xc4] ss:$8 sps:$4 sm:$0xff]   ;;  %v2868_v4 = vadd.f32 %v2867_v17, %v12550_v36  ;;  %v2869_v52 = vpop.f32.mrb[39].mxu1 }
 0x1a4   :  { %v3435_v63 = vmax.f32 %v2033_v40, 0.0  ;;  %2363 = vmatmul.mubr.bf16.gmra.mrb[156].mxu0 %v11512_v62  ;;  %v3688_v31 = vmax.bf16 %v12972_v43, %v12791_v35  ;;  %v3348_v3 = vmax.f32 %v2866_v16, 0.0  ;;  %v2870_v40 = vadd.f32 %v2869_v52, %v12550_v36  ;;  %v11033_v43 = vld [vmem:[%s15217_s3 + $0xc0] sm:$0xff]   ;;  %v15327_v15 = vld [vmem:[#allocation31_spill] sm:$0xff] }
 0x1a5   :  { %v3436_v38 = vmax.f32 %v2035_v57, 0.0  ;;  %9187 = vmatprep.mubr.msk.bf16.mxu0 %vm1831_vm0, %v11513_v9  ;;  %v3701_v54 = vmax.bf16 %v13007_v5, %v12804_v21  ;;  %v3361_v28 = vmax.f32 %v2868_v4, 0.0  ;;  %v3702_v37 = vmax.bf16 %v13010_v19, %v12806_v26  ;;  %10178 = vmatprep.mubr.msk.bf16.mxu1 %vm4002_vm1, %v11033_v43  ;;  %v11514_v52 = vld [vmem:[%s15212_s1 + $0xc0] ss:$8 sps:$4 sm:$0xff]  }
 0x1a6   :  { %v13111_v12 = vpack.c.bf16 %v3435_v63, %v3421_v56  ;;  %v13116_v57 = vmax.bf16 %v3688_v31, %v3687_v51  ;;  %v3362_v35 = vmax.f32 %v2870_v40, 0.0  ;;  %v3715_v21 = vmax.bf16 %v13039_v10, %v12822_v42 }
 0x1a7   :  { %v3646_v49 = vpack.c.bf16 %v3436_v38, %v3422_v47  ;;  %v2038_v60 = vpop.f32.mrb[52].mxu0  ;;  %v13127_v47 = vpack.c.bf16 %v3361_v28, %v3347_v45  ;;  %v13129_v63 = vmax.bf16 %v3702_v37, %v3701_v54  ;;  %v3716_v26 = vmax.bf16 %v13043_v13, %v12825_v30  ;;  %v2873_v38 = vpop.f32.mrb[40].mxu1 }
 0x1a8   :  { %v2039_v25 = vadd.f32 %v2038_v60, %v12710_v6  ;;  %v2040_v62 = vpop.f32.mrb[53].mxu0  ;;  %v13134_v51 = vpack.c.bf16 %v3362_v35, %v3348_v3  ;;  %v3729_v42 = vmax.bf16 %v13076_v27, %v12845_v59  ;;  %v2874_v30 = vadd.f32 %v2873_v38, %v12572_v7  ;;  %v2875_v13 = vpop.f32.mrb[41].mxu1 }
 0x1a9   :  { %v2041_v5 = vadd.f32 %v2040_v62, %v12710_v6  ;;  %v2042_v56 = vpop.f32.mrb[54].mxu0  ;;  %v3711_v45 = vmax.bf16 %v13127_v47, %v12875_v48  ;;  %v2876_v59 = vadd.f32 %v2875_v13, %v12572_v7  ;;  %v2877_v27 = vpop.f32.mrb[42].mxu1  ;;  %v13149_v3 = vmax.bf16 %v3716_v26, %v3715_v21  ;;  %v11515_v48 = vld [vmem:[%s15212_s1 + $0xd4] ss:$8 sps:$4 sm:$0xff]  }
 0x1aa   :  { %v3449_v19 = vmax.f32 %v2039_v25, 0.0  ;;  %v2043_v16 = vadd.f32 %v2042_v56, %v12718_v2  ;;  %v2044_v17 = vpop.f32.mrb[55].mxu0  ;;  %v3712_v31 = vmax.bf16 %v13134_v51, %v12878_v18  ;;  %v3375_v54 = vmax.f32 %v2874_v30, 0.0  ;;  %v2879_v28 = vpop.f32.mrb[43].mxu1  ;;  %v15319_v51 = vld [vmem:[#allocation28_spill] sm:$0xff] }
 0x1ab   :  { %v3450_v10 = vmax.f32 %v2041_v5, 0.0  ;;  %v2045_v9 = vadd.f32 %v2044_v17, %v12718_v2  ;;  %v2878_v60 = vadd.f32 %v2877_v27, %v12587_v8  ;;  %v3730_v37 = vmax.bf16 %v13080_v22, %v12848_v53  ;;  %v15324_v30 = vld [vmem:[#allocation4_spill] sm:$0xff] }
 0x1ac   :  { %v3463_v4 = vmax.f32 %v2043_v16, 0.0  ;;  %2373 = vmatmul.mubr.bf16.gmra.mrb[160].mxu0 %v11514_v52  ;;  %v3376_v25 = vmax.f32 %v2876_v59, 0.0  ;;  %v2880_v62 = vadd.f32 %v2879_v28, %v12587_v8  ;;  %v3743_v35 = vmax.bf16 %v13111_v12, %v12868_v29  ;;  %v2883_v59 = vpop.f32.mrb[44].mxu1  ;;  %v11517_v28 = vld [vmem:[%s15212_s1 + $0x4] ss:$8 sps:$4 sm:$0xff]  }
 0x1ad   :  { %v3464_v40 = vmax.f32 %v2045_v9, 0.0  ;;  %9188 = vmatprep.mubr.msk.bf16.mxu0 %vm1831_vm0, %v11515_v48  ;;  %v3389_v5 = vmax.f32 %v2878_v60, 0.0  ;;  %v13161_v56 = vmax.bf16 %v3730_v37, %v3729_v42  ;;  %v3744_v47 = vmax.bf16 %v3646_v49, %v12871_v20  ;;  %v15323_v20 = vld [vmem:[#allocation29_spill] sm:$0xff]  ;;  %v2885_v48 = vpop.f32.mrb[45].mxu1  ;;  %v11516_v60 = vld [vmem:[%s15212_s1 + $0xd0] ss:$8 sps:$4 sm:$0xff]  }
 0x1ae   :  { %v3659_v18 = vpack.c.bf16 %v3463_v4, %v3449_v19  ;;  %v3390_v17 = vmax.f32 %v2880_v62, 0.0  ;;  %v15320_v22 = vmax.bf16 %v13050_v23, %v12829_v39  ;;  %v15321_v19 = vmax.bf16 %v13053_v24, %v12832_v11  ;;  %v15326_v24 = vld [vmem:[#allocation30_spill] sm:$0xff]  ;;  %v2887_v0 = vpop.f32.mrb[46].mxu1 }
 0x1af   :  { %v3660_v43 = vpack.c.bf16 %v3464_v40, %v3450_v10  ;;  %v2081_v21 = vpop.f32.mrb[56].mxu0  ;;  %v3627_v42 = vpack.c.bf16 %v3389_v5, %v3375_v54  ;;  %v13175_v10 = vmax.bf16 %v3744_v47, %v3743_v35  ;;  %v13185_v39 = vmax.bf16 %v3698_v61, %v3697_v50 }
 0x1b0   :  { %v2082_v26 = vadd.f32 %v2081_v21, %v12461_v58  ;;  %v2083_v16 = vpop.f32.mrb[57].mxu0  ;;  %v3757_v53 = vmax.bf16 %v3659_v18, %v15319_v51  ;;  %v13172_v29 = vmax.bf16 %v15321_v19, %v15320_v22  ;;  %v3628_v52 = vpack.c.bf16 %v3390_v17, %v3376_v25  ;;  %v2889_v25 = vpop.f32.mrb[47].mxu1  ;;  %v15330_v17 = vld [vmem:[#allocation6_spill] sm:$0xff] }
 0x1b1   :  { %v2084_v12 = vadd.f32 %v2083_v16, %v12461_v58  ;;  %v2085_v38 = vpop.f32.mrb[58].mxu0  ;;  %v3758_v49 = vmax.bf16 %v3660_v43, %v15323_v20  ;;  %15325 = vst [vmem:[#allocation29_spill] sm:$0xff] %v13185_v39  ;;  %v3725_v27 = vmax.bf16 %v3627_v42, %v15326_v24  ;;  %v2884_v40 = vadd.f32 %v2883_v59, %v12626_v44  ;;  %v1434_v24 = vld [vmem:[#allocation2 + $0xb8] sm:$0xff] }
 0x1b2   :  { %15322 = vst [vmem:[#allocation28_spill] sm:$0xff] %v13172_v29  ;;  %v3087_v9 = vmax.f32 %v2082_v26, 0.0  ;;  %v2086_v13 = vadd.f32 %v2085_v38, %v15324_v30  ;;  %v2087_v4 = vpop.f32.mrb[59].mxu0  ;;  %v3726_v1 = vmax.bf16 %v3628_v52, %v15327_v15  ;;  %v2886_v46 = vadd.f32 %v2885_v48, %v12626_v44  ;;  %v15332_v52 = vld [vmem:[#allocation32_spill] sm:$0xff]  ;;  %v15333_v48 = vld [vmem:[#allocation33_spill] sm:$0xff] }
 0x1b3   :  { %v3088_v11 = vmax.f32 %v2084_v12, 0.0  ;;  %v2088_v23 = vadd.f32 %v2087_v4, %v15324_v30  ;;  %v13195_v50 = vmax.bf16 %v3758_v49, %v3757_v53  ;;  %v3403_v37 = vmax.f32 %v2884_v40, 0.0  ;;  %v2893_v49 = vpop.f32.mrb[48].mxu1  ;;  %v11518_v40 = vld [vmem:[%s15212_s1] ss:$8 sps:$4 sm:$0xff]  }
 0x1b4   :  { %v3101_v54 = vmax.f32 %v2086_v13, 0.0  ;;  %2383 = vmatmul.mubr.bf16.gmra.mrb[164].mxu0 %v11516_v60  ;;  %v2888_v18 = vadd.f32 %v2887_v0, %v12640_v14  ;;  %v13202_v62 = vmax.bf16 %v3712_v31, %v3711_v45  ;;  %v3404_v43 = vmax.f32 %v2886_v46, 0.0  ;;  %v15331_v31 = vld [vmem:[#allocation7_spill] sm:$0xff] }
 0x1b5   :  { %v3102_v61 = vmax.f32 %v2088_v23, 0.0  ;;  %9189 = vmatprep.mubr.msk.bf16.mxu0 %vm1831_vm0, %v11517_v28  ;;  %v2890_v21 = vadd.f32 %v2889_v25, %v12640_v14  ;;  %v13207_v5 = vmax.bf16 %v3726_v1, %v3725_v27  ;;  %v2895_v23 = vpop.f32.mrb[49].mxu1  ;;  %v1433_v1 = vld [vmem:[#allocation2 + $0xb0] sm:$0xff] }
 0x1b6   :  { %15328 = vst [vmem:[#allocation4_spill] sm:$0xff] %v13202_v62  ;;  %v13204_v35 = vpack.c.bf16 %v3101_v54, %v3087_v9  ;;  %v3417_v16 = vmax.f32 %v2888_v18, 0.0  ;;  %v1419_v9 = vld [vmem:[#allocation2 + $0x40] sm:$0xff]  ;;  %v2896_v60 = vadd.f32 %v2895_v23, %v12668_v34  ;;  %v2897_v15 = vpop.f32.mrb[50].mxu1 }
 0x1b7   :  { %15329 = vst [vmem:[#allocation30_spill] sm:$0xff] %v13207_v5  ;;  %v13209_v47 = vpack.c.bf16 %v3102_v61, %v3088_v11  ;;  %v2091_v26 = vpop.f32.mrb[60].mxu0  ;;  %v3418_v22 = vmax.f32 %v2890_v21, 0.0  ;;  %v2894_v11 = vadd.f32 %v2893_v49, %v12668_v34  ;;  %v11519_v61 = vld [vmem:[%s15212_s1 + $0x14] ss:$8 sps:$4 sm:$0xff]   ;;  %v2899_v18 = vpop.f32.mrb[51].mxu1 }
 0x1b8   :  { %v2092_v51 = vadd.f32 %v2091_v26, %v15330_v17  ;;  %v2093_v53 = vpop.f32.mrb[61].mxu0  ;;  %v3641_v45 = vpack.c.bf16 %v3417_v16, %v3403_v37  ;;  %v2898_v37 = vadd.f32 %v2897_v15, %v12682_v41  ;;  %v2900_v21 = vadd.f32 %v2899_v18, %v12682_v41  ;;  %v1448_v26 = vld [vmem:[#allocation2 + $0x128] sm:$0xff] }
 0x1b9   :  { %v2094_v19 = vadd.f32 %v2093_v53, %v15330_v17  ;;  %v2095_v12 = vpop.f32.mrb[62].mxu0  ;;  %v3642_v20 = vpack.c.bf16 %v3418_v22, %v3404_v43  ;;  %v3431_v28 = vmax.f32 %v2894_v11, 0.0  ;;  %v3432_v43 = vmax.f32 %v2896_v60, 0.0  ;;  %v2903_v11 = vpop.f32.mrb[52].mxu1  ;;  %v1462_v60 = vld [vmem:[#allocation2 + $0x198] sm:$0xff] }
 0x1ba   :  { %v2096_v38 = vadd.f32 %v2095_v12, %v15331_v31  ;;  %v2097_v42 = vpop.f32.mrb[63].mxu0  ;;  %v3115_v13 = vmax.f32 %v2092_v51, 0.0  ;;  %v3739_v59 = vmax.bf16 %v3641_v45, %v15332_v52  ;;  %v3445_v22 = vmax.f32 %v2898_v37, 0.0  ;;  %v1461_v37 = vld [vmem:[#allocation2 + $0x190] sm:$0xff] }
 0x1bb   :  { %v2098_v4 = vadd.f32 %v2097_v42, %v15331_v31  ;;  %v3740_v54 = vmax.bf16 %v3642_v20, %v15333_v48  ;;  %v3116_v46 = vmax.f32 %v2094_v19, 0.0  ;;  %v15335_v19 = vld [vmem:[#allocation8_spill] sm:$0xff]  ;;  %v2904_v48 = vadd.f32 %v2903_v11, %v12710_v6 }
 0x1bc   :  { %v3129_v27 = vmax.f32 %v2096_v38, 0.0  ;;  %2426 = vmatmul.mubr.bf16.vlgmr.msra.gmra.mrb[168].mxu0 %v11518_v40  ;;  %v3446_v38 = vmax.f32 %v2900_v21, 0.0  ;;  %v3655_v49 = vpack.c.bf16 %v3445_v22, %v3431_v28  ;;  %v11521_v21 = vld [vmem:[%s15212_s1 + $0x24] ss:$8 sps:$4 sm:$0xff]  }
 0x1bd   :  { %v3130_v0 = vmax.f32 %v2098_v4, 0.0  ;;  %9190 = vmatprep.mubr.msk.bf16.mxu0 %vm1831_vm0, %v11519_v61  ;;  %2567 = vmatpush1.bf16.msra.mxu0 %v1419_v9  ;;  %v13230_v16 = vmax.bf16 %v3740_v54, %v3739_v59  ;;  %v15336_v9 = vld [vmem:[#allocation9_spill] sm:$0xff]  ;;  %v2905_v54 = vpop.f32.mrb[53].mxu1 }
 0x1be   :  { %v13227_v25 = vpack.c.bf16 %v3129_v27, %v3115_v13  ;;  %2568 = vmatprep.subr.bf16.mxu0 %v1434_v24  ;;  %v3656_v52 = vpack.c.bf16 %v3446_v38, %v3432_v43  ;;  %v1447_v59 = vld [vmem:[#allocation2 + $0x120] sm:$0xff]  ;;  %v15337_v27 = vld [vmem:[#allocation35_spill] sm:$0xff]  ;;  %v2906_v61 = vadd.f32 %v2905_v54, %v12710_v6  ;;  %v2907_v28 = vpop.f32.mrb[54].mxu1 }
 0x1bf   :  { %15334 = vst [vmem:[#allocation31_spill] sm:$0xff] %v13230_v16  ;;  %v13232_v51 = vpack.c.bf16 %v3130_v0, %v3116_v46  ;;  %v2101_v53 = vpop.f32.mrb[64].mxu0  ;;  %v3753_v40 = vmax.bf16 %v3655_v49, %v15337_v27  ;;  %v15338_v46 = vld [vmem:[#allocation36_spill] sm:$0xff]  ;;  %v2909_v22 = vpop.f32.mrb[55].mxu1  ;;  %v15341_v54 = vld [vmem:[#allocation11_spill] sm:$0xff] }
 0x1c0   :  { %v2102_v12 = vadd.f32 %v2101_v53, %v15335_v19  ;;  %v2103_v45 = vpop.f32.mrb[65].mxu0  ;;  %v3754_v0 = vmax.bf16 %v3656_v52, %v15338_v46  ;;  %v2908_v53 = vadd.f32 %v2907_v28, %v12718_v2  ;;  %v2910_v38 = vadd.f32 %v2909_v22, %v12718_v2  ;;  %v15340_v52 = vld [vmem:[#allocation10_spill] sm:$0xff]  ;;  %v1490_v28 = vld [vmem:[#allocation2 + $0x278] sm:$0xff] }
 0x1c1   :  { %v2104_v42 = vadd.f32 %v2103_v45, %v15335_v19  ;;  %v2105_v20 = vpop.f32.mrb[66].mxu0  ;;  %2569 = vmatpush1.bf16.msra.mxu0 %v1433_v1  ;;  %v11520_v1 = vld [vmem:[%s15212_s1 + $0x10] ss:$8 sps:$4 sm:$0xff]   ;;  %v3460_v45 = vmax.f32 %v2906_v61, 0.0 }
 0x1c2   :  { %v2106_v13 = vadd.f32 %v2105_v20, %v15336_v9  ;;  %v2107_v4 = vpop.f32.mrb[67].mxu0  ;;  %2570 = vmatprep.subr.bf16.mxu0 %v1448_v26  ;;  %v3143_v23 = vmax.f32 %v2102_v12, 0.0  ;;  %v3459_v26 = vmax.f32 %v2904_v48, 0.0  ;;  %v1476_v20 = vld [vmem:[#allocation2 + $0x208] sm:$0xff]  ;;  %v3474_v27 = vmax.f32 %v2910_v38, 0.0 }
 0x1c3   :  { %v2108_v24 = vadd.f32 %v2107_v4, %v15336_v9  ;;  %v3144_v18 = vmax.f32 %v2104_v42, 0.0  ;;  %v13253_v42 = vmax.bf16 %v3754_v0, %v3753_v40  ;;  %v3473_v4 = vmax.f32 %v2908_v53, 0.0  ;;  %v1475_v40 = vld [vmem:[#allocation2 + $0x200] sm:$0xff] }
 0x1c4   :  { %v3157_v15 = vmax.f32 %v2106_v13, 0.0  ;;  %2436 = vmatmul.mubr.bf16.gmra.mrb[172].mxu0 %v11520_v1  ;;  %v15342_v0 = vld [vmem:[#allocation37_spill] sm:$0xff] }
 0x1c5   :  { %v3158_v43 = vmax.f32 %v2108_v24, 0.0  ;;  %9191 = vmatprep.mubr.msk.bf16.mxu0 %vm1831_vm0, %v11521_v21  ;;  %2571 = vmatpush1.bf16.msra.mxu0 %v1447_v59  ;;  %15339 = vst [vmem:[#allocation6_spill] sm:$0xff] %v13253_v42  ;;  %v11522_v21 = vld [vmem:[%s15212_s1 + $0x20] ss:$8 sps:$4 sm:$0xff]  }
 0x1c6   :  { %v13250_v12 = vpack.c.bf16 %v3157_v15, %v3143_v23  ;;  %2572 = vmatprep.subr.bf16.mxu0 %v1462_v60  ;;  %v3669_v23 = vpack.c.bf16 %v3473_v4, %v3459_v26  ;;  %v3670_v60 = vpack.c.bf16 %v3474_v27, %v3460_v45  ;;  %v15343_v26 = vld [vmem:[#allocation38_spill] sm:$0xff]  ;;  %v11523_v45 = vld [vmem:[%s15212_s1 + $0x34] ss:$8 sps:$4 sm:$0xff]   ;;  %v15345_v27 = vld [vmem:[#allocation13_spill] sm:$0xff] }
 0x1c7   :  { %v13255_v49 = vpack.c.bf16 %v3158_v43, %v3144_v18  ;;  %v2111_v13 = vpop.f32.mrb[68].mxu0 }
 0x1c8   :  { %v2112_v11 = vadd.f32 %v2111_v13, %v15340_v52  ;;  %v2113_v24 = vpop.f32.mrb[69].mxu0  ;;  %v3767_v61 = vmax.bf16 %v3669_v23, %v15342_v0 }
 0x1c9   :  { %v2114_v48 = vadd.f32 %v2113_v24, %v15340_v52  ;;  %v2115_v59 = vpop.f32.mrb[70].mxu0  ;;  %2573 = vmatpush1.bf16.msra.mxu0 %v1461_v37  ;;  %v3768_v37 = vmax.bf16 %v3670_v60, %v15343_v26  ;;  %v1504_v24 = vld [vmem:[#allocation2 + $0x2e8] sm:$0xff] }
 0x1ca   :  { %v2116_v15 = vadd.f32 %v2115_v59, %v15341_v54  ;;  %v2117_v1 = vpop.f32.mrb[71].mxu0  ;;  %2574 = vmatprep.subr.bf16.mxu0 %v1476_v20  ;;  %v3171_v18 = vmax.f32 %v2112_v11, 0.0  ;;  %v1489_v20 = vld [vmem:[#allocation2 + $0x270] sm:$0xff] }
 0x1cb   :  { %v2118_v46 = vadd.f32 %v2117_v1, %v15341_v54  ;;  %v3172_v53 = vmax.f32 %v2114_v48, 0.0  ;;  %v13272_v13 = vmax.bf16 %v3768_v37, %v3767_v61  ;;  %v15346_v1 = vld [vmem:[#allocation14_spill] sm:$0xff]  ;;  %v1518_v61 = vld [vmem:[#allocation2 + $0x358] sm:$0xff] }
 0x1cc   :  { %v3185_v43 = vmax.f32 %v2116_v15, 0.0  ;;  %2446 = vmatmul.mubr.bf16.gmra.mrb[176].mxu0 %v11522_v21  ;;  %v11525_v37 = vld [vmem:[%s15212_s1 + $0x44] ss:$8 sps:$4 sm:$0xff]  }
 0x1cd   :  { %v3186_v22 = vmax.f32 %v2118_v46, 0.0  ;;  %9192 = vmatprep.mubr.msk.bf16.mxu0 %vm1831_vm0, %v11523_v45  ;;  %2575 = vmatpush1.bf16.msra.mxu0 %v1475_v40  ;;  %15344 = vst [vmem:[#allocation7_spill] sm:$0xff] %v13272_v13  ;;  %v1503_v46 = vld [vmem:[#allocation2 + $0x2e0] sm:$0xff] }
 0x1ce   :  { %v13270_v38 = vpack.c.bf16 %v3185_v43, %v3171_v18  ;;  %2576 = vmatprep.subr.bf16.mxu0 %v1490_v28  ;;  %v11524_v43 = vld [vmem:[%s15212_s1 + $0x30] ss:$8 sps:$4 sm:$0xff]  }
 0x1cf   :  { %v13274_v4 = vpack.c.bf16 %v3186_v22, %v3172_v53  ;;  %v2121_v11 = vpop.f32.mrb[72].mxu0  ;;  %v1517_v22 = vld [vmem:[#allocation2 + $0x350] sm:$0xff] }
 0x1d0   :  { %v2122_v48 = vadd.f32 %v2121_v11, %v15345_v27  ;;  %v2123_v59 = vpop.f32.mrb[73].mxu0  ;;  %v1532_v11 = vld [vmem:[#allocation2 + $0x3c8] sm:$0xff] }
 0x1d1   :  { %v2124_v23 = vadd.f32 %v2123_v59, %v15345_v27  ;;  %v2125_v15 = vpop.f32.mrb[74].mxu0  ;;  %2577 = vmatpush1.bf16.msra.mxu0 %v1489_v20 }
 0x1d2   :  { %v2126_v60 = vadd.f32 %v2125_v15, %v15346_v1  ;;  %v2127_v40 = vpop.f32.mrb[75].mxu0  ;;  %2578 = vmatprep.subr.bf16.mxu0 %v1504_v24  ;;  %v3199_v28 = vmax.f32 %v2122_v48, 0.0  ;;  %v15347_v24 = vld [vmem:[#allocation17_spill] sm:$0xff] }
 0x1d3   :  { %v2128_v0 = vadd.f32 %v2127_v40, %v15346_v1  ;;  %v3200_v21 = vmax.f32 %v2124_v23, 0.0 }
 0x1d4   :  { %v3213_v18 = vmax.f32 %v2126_v60, 0.0  ;;  %2456 = vmatmul.mubr.bf16.gmra.mrb[180].mxu0 %v11524_v43  ;;  %v15348_v60 = vld [vmem:[#allocation18_spill] sm:$0xff] }
 0x1d5   :  { %v3214_v26 = vmax.f32 %v2128_v0, 0.0  ;;  %9193 = vmatprep.mubr.msk.bf16.mxu0 %vm1831_vm0, %v11525_v37  ;;  %2579 = vmatpush1.bf16.msra.mxu0 %v1503_v46  ;;  %v1531_v46 = vld [vmem:[#allocation2 + $0x3c0] sm:$0xff]  ;;  %v11527_v37 = vld [vmem:[%s15212_s1 + $0x54] ss:$8 sps:$4 sm:$0xff]  }
 0x1d6   :  { %v13287_v53 = vpack.c.bf16 %v3213_v18, %v3199_v28  ;;  %2580 = vmatprep.subr.bf16.mxu0 %v1518_v61  ;;  %v11526_v43 = vld [vmem:[%s15212_s1 + $0x40] ss:$8 sps:$4 sm:$0xff]  }
 0x1d7   :  { %v13289_v45 = vpack.c.bf16 %v3214_v26, %v3200_v21  ;;  %v2131_v20 = vpop.f32.mrb[76].mxu0 }
 0x1d8   :  { %v2132_v48 = vadd.f32 %v2131_v20, %v15347_v24  ;;  %v2133_v59 = vpop.f32.mrb[77].mxu0 }
 0x1d9   :  { %v2134_v23 = vadd.f32 %v2133_v59, %v15347_v24  ;;  %v2135_v15 = vpop.f32.mrb[78].mxu0  ;;  %2581 = vmatpush1.bf16.msra.mxu0 %v1517_v22 }
 0x1da   :  { %v2136_v40 = vadd.f32 %v2135_v15, %v15348_v60  ;;  %v2137_v0 = vpop.f32.mrb[79].mxu0  ;;  %2582 = vmatprep.subr.bf16.mxu0 %v1532_v11  ;;  %v3227_v61 = vmax.f32 %v2132_v48, 0.0  ;;  %v15349_v48 = vld [vmem:[#allocation19_spill] sm:$0xff] }
 0x1db   :  { %v2138_v28 = vadd.f32 %v2137_v0, %v15348_v60  ;;  %v3228_v21 = vmax.f32 %v2134_v23, 0.0  ;;  %v15350_v23 = vld [vmem:[#allocation20_spill] sm:$0xff] }
 0x1dc   :  { %v3241_v18 = vmax.f32 %v2136_v40, 0.0  ;;  %2466 = vmatmul.mubr.bf16.gmra.mrb[184].mxu0 %v11526_v43 }
 0x1dd   :  { %v3242_v26 = vmax.f32 %v2138_v28, 0.0  ;;  %9194 = vmatprep.mubr.msk.bf16.mxu0 %vm1831_vm0, %v11527_v37  ;;  %2583 = vmatpush1.bf16.msra.mxu0 %v1531_v46  ;;  %v11528_v46 = vld [vmem:[%s15212_s1 + $0x50] ss:$8 sps:$4 sm:$0xff]  }
 0x1de   :  { %v13302_v22 = vpack.c.bf16 %v3241_v18, %v3227_v61 }
 0x1df   :  { %v13304_v20 = vpack.c.bf16 %v3242_v26, %v3228_v21  ;;  %v2141_v11 = vpop.f32.mrb[80].mxu0  ;;  %v11529_v21 = vld [vmem:[%s15212_s1 + $0x64] ss:$8 sps:$4 sm:$0xff]  }
 0x1e0   :  { %v2142_v59 = vadd.f32 %v2141_v11, %v15349_v48  ;;  %v2143_v15 = vpop.f32.mrb[81].mxu0 }
 0x1e1   :  { %v2144_v40 = vadd.f32 %v2143_v15, %v15349_v48  ;;  %v2145_v0 = vpop.f32.mrb[82].mxu0 }
 0x1e2   :  { %v2146_v28 = vadd.f32 %v2145_v0, %v15350_v23  ;;  %v2147_v43 = vpop.f32.mrb[83].mxu0  ;;  %v3255_v42 = vmax.f32 %v2142_v59, 0.0  ;;  %v15351_v59 = vld [vmem:[#allocation3_spill] sm:$0xff] }
 0x1e3   :  { %v2148_v13 = vadd.f32 %v2147_v43, %v15350_v23  ;;  %v3256_v61 = vmax.f32 %v2144_v40, 0.0 }
 0x1e4   :  { %v3269_v16 = vmax.f32 %v2146_v28, 0.0  ;;  %2476 = vmatmul.mubr.bf16.gmra.mrb[188].mxu0 %v11528_v46  ;;  %v15352_v46 = vld [vmem:[#allocation5_spill] sm:$0xff] }
 0x1e5   :  { %v3270_v18 = vmax.f32 %v2148_v13, 0.0  ;;  %9195 = vmatprep.mubr.msk.bf16.mxu0 %vm1831_vm0, %v11529_v21 }
 0x1e6   :  { %v13317_v26 = vpack.c.bf16 %v3269_v16, %v3255_v42  ;;  %v11530_v16 = vld [vmem:[%s15212_s1 + $0x60] ss:$8 sps:$4 sm:$0xff]  }
 0x1e7   :  { %v13319_v37 = vpack.c.bf16 %v3270_v18, %v3256_v61  ;;  %v2151_v11 = vpop.f32.mrb[84].mxu0  ;;  %v11531_v18 = vld [vmem:[%s15212_s1 + $0x74] ss:$8 sps:$4 sm:$0xff]  }
 0x1e8   :  { %v2152_v15 = vadd.f32 %v2151_v11, %v15351_v59  ;;  %v2153_v0 = vpop.f32.mrb[85].mxu0 }
 0x1e9   :  { %v2154_v28 = vadd.f32 %v2153_v0, %v15351_v59  ;;  %v2155_v43 = vpop.f32.mrb[86].mxu0 }
 0x1ea   :  { %v2156_v40 = vadd.f32 %v2155_v43, %v15352_v46  ;;  %v2157_v13 = vpop.f32.mrb[87].mxu0  ;;  %v3283_v62 = vmax.f32 %v2152_v15, 0.0 }
 0x1eb   :  { %v2158_v5 = vadd.f32 %v2157_v13, %v15352_v46  ;;  %v3284_v42 = vmax.f32 %v2154_v28, 0.0 }
 0x1ec   :  { %v3297_v39 = vmax.f32 %v2156_v40, 0.0  ;;  %2486 = vmatmul.mubr.bf16.gmra.mrb[192].mxu0 %v11530_v16 }
 0x1ed   :  { %v3298_v61 = vmax.f32 %v2158_v5, 0.0  ;;  %9196 = vmatprep.mubr.msk.bf16.mxu0 %vm1831_vm0, %v11531_v18 }
 0x1ee   :  { %v3577_v21 = vpack.c.bf16 %v3297_v39, %v3283_v62  ;;  %v11532_v62 = vld [vmem:[%s15212_s1 + $0x70] ss:$8 sps:$4 sm:$0xff]  }
 0x1ef   :  { %v3578_v11 = vpack.c.bf16 %v3298_v61, %v3284_v42  ;;  %v2161_v0 = vpop.f32.mrb[88].mxu0 }
 0x1f0   :  { %v2162_v43 = vadd.f32 %v2161_v0, %v12511_v33  ;;  %v2163_v15 = vpop.f32.mrb[89].mxu0  ;;  %v3675_v40 = vmax.bf16 %v3577_v21, %v13204_v35 }
 0x1f1   :  { %v2164_v13 = vadd.f32 %v2163_v15, %v12511_v33  ;;  %v2165_v29 = vpop.f32.mrb[90].mxu0  ;;  %v3676_v28 = vmax.bf16 %v3578_v11, %v13209_v47  ;;  %v11533_v47 = vld [vmem:[%s15212_s1 + $0x84] ss:$8 sps:$4 sm:$0xff]  }
 0x1f2   :  { %v2166_v5 = vadd.f32 %v2165_v29, %v12521_v32  ;;  %v2167_v16 = vpop.f32.mrb[91].mxu0  ;;  %v3311_v18 = vmax.f32 %v2162_v43, 0.0 }
 0x1f3   :  { %v2168_v46 = vadd.f32 %v2167_v16, %v12521_v32  ;;  %v3826_v59 = vmax.bf16 %v3676_v28, %v3675_v40  ;;  %v3312_v42 = vmax.f32 %v2164_v13, 0.0 }
 0x1f4   :  { %v3325_v39 = vmax.f32 %v2166_v5, 0.0  ;;  %2496 = vmatmul.mubr.bf16.gmra.mrb[196].mxu0 %v11532_v62 }
 0x1f5   :  { %v3326_v35 = vmax.f32 %v2168_v46, 0.0  ;;  %10164 = vmatprep.subr.bf16.mxu1 %v3826_v59  ;;  %9197 = vmatprep.mubr.msk.bf16.mxu0 %vm1831_vm0, %v11533_v47  ;;  %v11535_v47 = vld [vmem:[%s15212_s1 + $0x94] ss:$8 sps:$4 sm:$0xff]  }
 0x1f6   :  { %v3591_v29 = vpack.c.bf16 %v3325_v39, %v3311_v18  ;;  %10165 = vmatpush3.bf16.msra.mxu1 %v3826_v59  ;;  %v13354_v59 = vld [vmem:[%s15210_s0 + $0x30] sm:$0xff] }
 0x1f7   :  { %v3592_v61 = vpack.c.bf16 %v3326_v35, %v3312_v42  ;;  %v2171_v21 = vpop.f32.mrb[92].mxu0 }
 0x1f8   :  { %v2172_v11 = vadd.f32 %v2171_v21, %v12542_v55  ;;  %v2173_v0 = vpop.f32.mrb[93].mxu0  ;;  %v3689_v43 = vmax.bf16 %v3591_v29, %v13227_v25  ;;  %v52_v25 = vld [vmem:[%s15210_s0 + $0x70] sm:$0x77] }
 0x1f9   :  { %v2174_v15 = vadd.f32 %v2173_v0, %v12542_v55  ;;  %v2175_v40 = vpop.f32.mrb[94].mxu0  ;;  %v3690_v46 = vmax.bf16 %v3592_v61, %v13232_v51  ;;  %v11534_v51 = vld [vmem:[%s15212_s1 + $0x80] ss:$8 sps:$4 sm:$0xff]   ;;  %v9006_v62 = vcombine.high %v13354_v59, %v52_v25 }
 0x1fa   :  { %v2176_v13 = vadd.f32 %v2175_v40, %v12550_v36  ;;  %v2177_v28 = vpop.f32.mrb[95].mxu0  ;;  %v3339_v18 = vmax.f32 %v2172_v11, 0.0 }
 0x1fb   :  { %v2178_v5 = vadd.f32 %v2177_v28, %v12550_v36  ;;  %v3827_v16 = vmax.bf16 %v3690_v46, %v3689_v43  ;;  %v3340_v42 = vmax.f32 %v2174_v15, 0.0  ;;  %136 = vst [vmem:[#allocation2 + $0x68] sm:$0x7f] %v9006_v62  ;;  %v9005_v15 = vcombine.low %v13354_v59, %v52_v25  ;;  %v13375_v28 = vld [vmem:[%s15210_s0 + $0x34] sm:$0xff] }
 0x1fc   :  { %v3353_v39 = vmax.f32 %v2176_v13, 0.0  ;;  %2506 = vmatmul.mubr.bf16.gmra.mrb[200].mxu0 %v11534_v51  ;;  %v13387_v62 = vld [vmem:[%s15210_s0 + $0x38] sm:$0xff] }
 0x1fd   :  { %v3354_v35 = vmax.f32 %v2178_v5, 0.0  ;;  %10166 = vmatprep.subr.bf16.mxu1 %v3827_v16  ;;  %9198 = vmatprep.mubr.msk.bf16.mxu0 %vm1831_vm0, %v11535_v47  ;;  %v164_v5 = vld [vmem:[%s15210_s0 + $0x74] sm:$0x77]  ;;  %135 = vst [vmem:[#allocation2 + $0x60] sm:$0x7f] %v9005_v15 }
 0x1fe   :  { %v3605_v29 = vpack.c.bf16 %v3353_v39, %v3339_v18  ;;  %10167 = vmatpush3.bf16.msra.mxu1 %v3827_v16  ;;  %v9019_v25 = vcombine.low %v13375_v28, %v164_v5 }
 0x1ff   :  { %v3606_v61 = vpack.c.bf16 %v3354_v35, %v3340_v42  ;;  %v2181_v21 = vpop.f32.mrb[96].mxu0  ;;  %v276_v42 = vld [vmem:[%s15210_s0 + $0x78] sm:$0x77] }
 0x200   :  { %v2182_v11 = vadd.f32 %v2181_v21, %v12572_v7  ;;  %v2183_v0 = vpop.f32.mrb[97].mxu0  ;;  %v3703_v43 = vmax.bf16 %v3605_v29, %v13250_v12  ;;  %v9020_v12 = vcombine.high %v13375_v28, %v164_v5  ;;  %v11536_v29 = vld [vmem:[%s15212_s1 + $0x90] ss:$8 sps:$4 sm:$0xff]   ;;  %247 = vst [vmem:[#allocation2 + $0xd0] sm:$0x7f] %v9019_v25 }
 0x201   :  { %v2184_v40 = vadd.f32 %v2183_v0, %v12572_v7  ;;  %v2185_v46 = vpop.f32.mrb[98].mxu0  ;;  %v3704_v13 = vmax.bf16 %v3606_v61, %v13255_v49  ;;  %v9034_v61 = vcombine.high %v13387_v62, %v276_v42 }
 0x202   :  { %v2186_v16 = vadd.f32 %v2185_v46, %v12587_v8  ;;  %v2187_v18 = vpop.f32.mrb[99].mxu0  ;;  %v3367_v39 = vmax.f32 %v2182_v11, 0.0  ;;  %248 = vst [vmem:[#allocation2 + $0xd8] sm:$0x7f] %v9020_v12  ;;  %v11537_v11 = vld [vmem:[%s15212_s1 + $0xa4] ss:$8 sps:$4 sm:$0xff]  }
 0x203   :  { %v2188_v49 = vadd.f32 %v2187_v18, %v12587_v8  ;;  %v3828_v51 = vmax.bf16 %v3704_v13, %v3703_v43  ;;  %v3368_v35 = vmax.f32 %v2184_v40, 0.0  ;;  %v1424_v0 = vld [vmem:[#allocation2 + $0x68] sm:$0xff]  ;;  %360 = vst [vmem:[#allocation2 + $0x148] sm:$0x7f] %v9034_v61 }
 0x204   :  { %v3381_v47 = vmax.f32 %v2186_v16, 0.0  ;;  %2516 = vmatmul.mubr.bf16.gmra.mrb[204].mxu0 %v11536_v29  ;;  %2912 = vmatprep.subr.bf16.mxu0 %v1424_v0  ;;  %v9033_v16 = vcombine.low %v13387_v62, %v276_v42 }
 0x205   :  { %v3382_v21 = vmax.f32 %v2188_v49, 0.0  ;;  %10168 = vmatprep.subr.bf16.mxu1 %v3828_v51  ;;  %9199 = vmatprep.mubr.msk.bf16.mxu0 %vm1831_vm0, %v11537_v11  ;;  %v11538_v11 = vld [vmem:[%s15212_s1 + $0xa0] ss:$8 sps:$4 sm:$0xff]  }
 0x206   :  { %v3619_v43 = vpack.c.bf16 %v3381_v47, %v3367_v39  ;;  %10169 = vmatpush3.bf16.msra.mxu1 %v3828_v51  ;;  %v13408_v39 = vld [vmem:[%s15210_s0 + $0x70] sm:$0xff]  ;;  %359 = vst [vmem:[#allocation2 + $0x140] sm:$0x7f] %v9033_v16 }
 0x207   :  { %v3620_v15 = vpack.c.bf16 %v3382_v21, %v3368_v35  ;;  %v2191_v40 = vpop.f32.mrb[100].mxu0  ;;  %v9048_v35 = vcombine.high %v13354_v59, %v13408_v39 }
 0x208   :  { %v2192_v46 = vadd.f32 %v2191_v40, %v12626_v44  ;;  %v2193_v13 = vpop.f32.mrb[101].mxu0  ;;  %v3717_v5 = vmax.bf16 %v3619_v43, %v13270_v38  ;;  %v9047_v38 = vcombine.low %v13354_v59, %v13408_v39  ;;  %v11539_v59 = vld [vmem:[%s15212_s1 + $0xb4] ss:$8 sps:$4 sm:$0xff]  }
 0x209   :  { %v2194_v18 = vadd.f32 %v2193_v13, %v12626_v44  ;;  %v2195_v12 = vpop.f32.mrb[102].mxu0  ;;  %v3718_v25 = vmax.bf16 %v3620_v15, %v13274_v4  ;;  %v13419_v4 = vld [vmem:[%s15210_s0 + $0x74] sm:$0xff]  ;;  %v537_v0 = vshrl.u32 %v9048_v35, 16  ;;  %v539_v43 = vshll.u32 %v9048_v35, 16 }
 0x20a   :  { %v2196_v49 = vadd.f32 %v2195_v12, %v12640_v14  ;;  %v2197_v51 = vpop.f32.mrb[103].mxu0  ;;  %v3395_v42 = vmax.f32 %v2192_v46, 0.0  ;;  %v530_v40 = vshrl.u32 %v9047_v38, 16  ;;  %v532_v46 = vshll.u32 %v9047_v38, 16 }
 0x20b   :  { %v2198_v47 = vadd.f32 %v2197_v51, %v12640_v14  ;;  %v3829_v29 = vmax.bf16 %v3718_v25, %v3717_v5  ;;  %v3396_v61 = vmax.f32 %v2194_v18, 0.0  ;;  %v9062_v13 = vcombine.high %v13375_v28, %v13419_v4 }
 0x20c   :  { %v3409_v21 = vmax.f32 %v2196_v49, 0.0  ;;  %2526 = vmatmul.mubr.bf16.gmra.mrb[208].mxu0 %v11538_v11  ;;  %v541_v16 = vrot.slane %v539_v43, 1  ;;  %v534_v25 = vrot.slane %v532_v46, 1  ;;  %v9061_v38 = vcombine.low %v13375_v28, %v13419_v4 }
 0x20d   :  { %v3410_v15 = vmax.f32 %v2198_v47, 0.0  ;;  %10170 = vmatprep.subr.bf16.mxu1 %v3829_v29  ;;  %9200 = vmatprep.mubr.msk.bf16.mxu0 %vm1831_vm0, %v11539_v59  ;;  %v747_v49 = vshrl.u32 %v9062_v13, 16  ;;  %v749_v51 = vshll.u32 %v9062_v13, 16 }
 0x20e   :  { %v3633_v5 = vpack.c.bf16 %v3409_v21, %v3395_v42  ;;  %10171 = vmatpush3.bf16.msra.mxu1 %v3829_v29  ;;  %v542_v14 = vor.u32 %v541_v16, %v537_v0  ;;  %v535_v29 = vor.u32 %v534_v25, %v530_v40  ;;  %v13439_v21 = vld [vmem:[%s15210_s0 + $0x78] sm:$0xff]  ;;  %v742_v0 = vshll.u32 %v9061_v38, 16 }
 0x20f   :  { %v3634_v18 = vpack.c.bf16 %v3410_v15, %v3396_v61  ;;  %v2201_v12 = vpop.f32.mrb[104].mxu0  ;;  %v751_v61 = vrot.slane %v749_v51, 1  ;;  %v11540_v16 = vld [vmem:[%s15212_s1 + $0xb0] ss:$8 sps:$4 sm:$0xff]  }
 0x210   :  { %v2202_v35 = vadd.f32 %v2201_v12, %v12668_v34  ;;  %v2203_v47 = vpop.f32.mrb[105].mxu0  ;;  %v3731_v11 = vmax.bf16 %v3633_v5, %v13287_v53  ;;  %570 = vst [vmem:[#allocation2 + $0x1b8] sm:$0x7f] %v542_v14  ;;  %v740_v53 = vshrl.u32 %v9061_v38, 16  ;;  %569 = vst [vmem:[#allocation2 + $0x1b0] sm:$0x7f] %v535_v29  ;;  %v9076_v14 = vcombine.high %v13387_v62, %v13439_v21 }
 0x211   :  { %v2204_v59 = vadd.f32 %v2203_v47, %v12668_v34  ;;  %v2205_v44 = vpop.f32.mrb[106].mxu0  ;;  %v3732_v42 = vmax.bf16 %v3634_v18, %v13289_v45  ;;  %v752_v5 = vor.u32 %v751_v61, %v747_v49  ;;  %v1011_v45 = vld [vmem:[%s15210_s0 + $0x30] sm:$0xee]  ;;  %v9075_v18 = vcombine.low %v13387_v62, %v13439_v21  ;;  %v11541_v49 = vld [vmem:[%s15212_s1 + $0xc4] ss:$8 sps:$4 sm:$0xff]  }
 0x212   :  { %v2206_v43 = vadd.f32 %v2205_v44, %v12682_v41  ;;  %v2207_v15 = vpop.f32.mrb[107].mxu0  ;;  %v3423_v46 = vmax.f32 %v2202_v35, 0.0  ;;  %v744_v44 = vrot.slane %v742_v0, 1  ;;  %v9090_v51 = vcombine.high %v1011_v45, %v13408_v39 }
 0x213   :  { %v2208_v28 = vadd.f32 %v2207_v15, %v12682_v41  ;;  %v3830_v13 = vmax.bf16 %v3732_v42, %v3731_v11  ;;  %v3424_v12 = vmax.f32 %v2204_v59, 0.0  ;;  %780 = vst [vmem:[#allocation2 + $0x228] sm:$0x7f] %v752_v5  ;;  %v957_v11 = vshrl.u32 %v9076_v14, 16 }
 0x214   :  { %v3437_v40 = vmax.f32 %v2206_v43, 0.0  ;;  %2536 = vmatmul.mubr.bf16.gmra.mrb[212].mxu0 %v11540_v16  ;;  %v745_v47 = vor.u32 %v744_v44, %v740_v53  ;;  %v959_v38 = vshll.u32 %v9076_v14, 16  ;;  %v950_v62 = vshrl.u32 %v9075_v18, 16  ;;  %v1137_v43 = vld [vmem:[%s15210_s0 + $0x34] sm:$0xee] }
 0x215   :  { %v3438_v25 = vmax.f32 %v2208_v28, 0.0  ;;  %10172 = vmatprep.subr.bf16.mxu1 %v3830_v13  ;;  %9201 = vmatprep.mubr.msk.bf16.mxu0 %vm1831_vm0, %v11541_v49  ;;  %v952_v59 = vshll.u32 %v9075_v18, 16  ;;  %v1088_v61 = vrot.slane %v9090_v51, 1  ;;  %v9089_v53 = vcombine.low %v1011_v45, %v13408_v39  ;;  %v1263_v39 = vld [vmem:[%s15210_s0 + $0x38] sm:$0xee] }
 0x216   :  { %v3647_v35 = vpack.c.bf16 %v3437_v40, %v3423_v46  ;;  %10173 = vmatpush3.bf16.msra.mxu1 %v3830_v13  ;;  %779 = vst [vmem:[#allocation2 + $0x220] sm:$0x7f] %v745_v47  ;;  %v961_v46 = vrot.slane %v959_v38, 1  ;;  %v9104_v44 = vcombine.high %v1137_v43, %v13419_v4  ;;  %v9118_v38 = vcombine.high %v1263_v39, %v13439_v21 }
 0x217   :  { %v3648_v42 = vpack.c.bf16 %v3438_v25, %v3424_v12  ;;  %v2211_v29 = vpop.f32.mrb[108].mxu0  ;;  %v954_v16 = vrot.slane %v952_v59, 1  ;;  %1116 = vst [vmem:[#allocation2 + $0x308] sm:$0x7f] %v1088_v61  ;;  %v1087_v25 = vrot.slane %v9089_v53, 1 }
 0x218   :  { %v2212_v15 = vadd.f32 %v2211_v29, %v12710_v6  ;;  %v2213_v0 = vpop.f32.mrb[109].mxu0  ;;  %v3745_v28 = vmax.bf16 %v3647_v35, %v13302_v22  ;;  %v962_v12 = vor.u32 %v961_v46, %v957_v11  ;;  %v1214_v47 = vrot.slane %v9104_v44, 1 }
 0x219   :  { %v2214_v13 = vadd.f32 %v2213_v0, %v12710_v6  ;;  %v2215_v5 = vpop.f32.mrb[110].mxu0  ;;  %v3746_v40 = vmax.bf16 %v3648_v42, %v13304_v20  ;;  %v955_v35 = vor.u32 %v954_v16, %v950_v62  ;;  %v13475_v20 = vld [vmem:[%s15212_s1 + $0xc0] ss:$8 sps:$4 sm:$0xff]   ;;  %1115 = vst [vmem:[#allocation2 + $0x300] sm:$0x7f] %v1087_v25  ;;  %v9103_v11 = vcombine.low %v1137_v43, %v13419_v4 }
 0x21a   :  { %v2216_v14 = vadd.f32 %v2215_v5, %v12718_v2  ;;  %v2217_v18 = vpop.f32.mrb[111].mxu0  ;;  %v3451_v49 = vmax.f32 %v2212_v15, 0.0  ;;  %990 = vst [vmem:[#allocation2 + $0x298] sm:$0x7f] %v962_v12  ;;  %v13483_v62 = vld [vmem:[%s15212_s1 + $0xd4] ss:$8 sps:$4 sm:$0xff]   ;;  %v9117_v4 = vcombine.low %v1263_v39, %v13439_v21 }
 0x21b   :  { %v2218_v22 = vadd.f32 %v2217_v18, %v12718_v2  ;;  %v3831_v51 = vmax.bf16 %v3746_v40, %v3745_v28  ;;  %v3452_v42 = vmax.f32 %v2214_v13, 0.0  ;;  %989 = vst [vmem:[#allocation2 + $0x290] sm:$0x7f] %v955_v35  ;;  %1242 = vst [vmem:[#allocation2 + $0x378] sm:$0x7f] %v1214_v47  ;;  %v1213_v61 = vrot.slane %v9103_v11, 1 }
 0x21c   :  { %v3465_v45 = vmax.f32 %v2216_v14, 0.0  ;;  %2546 = vmatmul.mubr.bf16.gmra.mrb[216].mxu0 %v13475_v20  ;;  %v1340_v15 = vrot.slane %v9118_v38, 1  ;;  %v1339_v13 = vrot.slane %v9117_v4, 1  ;;  %v11034_v12 = vld [vmem:[%s15217_s3 + $0xc8] sm:$0xff]   ;;  %v11035_v39 = vld [vmem:[%s15217_s3 + $0xd0] sm:$0xff]   ;;  %v1423_v4 = vld [vmem:[#allocation2 + $0x60] sm:$0xff] }
 0x21d   :  { %v3466_v29 = vmax.f32 %v2218_v22, 0.0  ;;  %10174 = vmatprep.subr.bf16.mxu1 %v3831_v51  ;;  %9202 = vmatprep.mubr.msk.bf16.mxu0 %vm1831_vm0, %v13483_v62  ;;  %1241 = vst [vmem:[#allocation2 + $0x370] sm:$0x7f] %v1213_v61  ;;  %v15353_v11 = vld [vmem:[#allocation34_spill] sm:$0xff] }
 0x21e   :  { %v3661_v59 = vpack.c.bf16 %v3465_v45, %v3451_v49  ;;  %10175 = vmatpush3.bf16.msra.mxu1 %v3831_v51  ;;  %1368 = vst [vmem:[#allocation2 + $0x3e8] sm:$0x7f] %v1340_v15  ;;  %1367 = vst [vmem:[#allocation2 + $0x3e0] sm:$0x7f] %v1339_v13  ;;  %v13500_v49 = vld [vmem:[%s15212_s1 + $0xd0] ss:$8 sps:$4 sm:$0xff]  }
 0x21f   :  { %v3662_v43 = vpack.c.bf16 %v3466_v29, %v3452_v42  ;;  %v2254_v0 = vpop.f32.mrb[112].mxu0  ;;  %v13506_v51 = vld [vmem:[%s15212_s1 + $0x4] ss:$8 sps:$4 sm:$0xff]   ;;  %v13532_v13 = vld [vmem:[%s15212_s1] ss:$8 sps:$4 sm:$0xff]  }
 0x220   :  { %v2255_v28 = vadd.f32 %v2254_v0, %v12461_v58  ;;  %v2256_v46 = vpop.f32.mrb[113].mxu0  ;;  %v3759_v53 = vmax.bf16 %v3661_v59, %v13317_v26  ;;  %v11036_v0 = vld [vmem:[%s15217_s3 + $0xd8] sm:$0xff]  }
 0x221   :  { %v2257_v5 = vadd.f32 %v2256_v46, %v12461_v58  ;;  %v2258_v40 = vpop.f32.mrb[114].mxu0  ;;  %v3760_v16 = vmax.bf16 %v3662_v43, %v13319_v37 }
 0x222   :  { %v2259_v44 = vadd.f32 %v2258_v40, %v15324_v30  ;;  %v2260_v14 = vpop.f32.mrb[115].mxu0  ;;  %v3089_v26 = vmax.f32 %v2255_v28, 0.0  ;;  %v1438_v28 = vld [vmem:[#allocation2 + $0xd8] sm:$0xff] }
 0x223   :  { %v2261_v21 = vadd.f32 %v2260_v14, %v15324_v30  ;;  %v3832_v18 = vmax.bf16 %v3760_v16, %v3759_v53  ;;  %v3090_v37 = vmax.f32 %v2257_v5, 0.0  ;;  %v11037_v5 = vld [vmem:[%s15217_s3 + $0xe0] sm:$0xff]  }
 0x224   :  { %v3103_v25 = vmax.f32 %v2259_v44, 0.0  ;;  %2556 = vmatmul.mubr.bf16.gmra.mrb[220].mxu0 %v13500_v49  ;;  %v13541_v44 = vld [vmem:[%s15212_s1 + $0x14] ss:$8 sps:$4 sm:$0xff]  }
 0x225   :  { %v3104_v22 = vmax.f32 %v2261_v21, 0.0  ;;  %10176 = vmatprep.subr.bf16.mxu1 %v3832_v18  ;;  %9203 = vmatprep.mubr.msk.bf16.mxu0 %vm1831_vm0, %v13506_v51  ;;  %v1437_v21 = vld [vmem:[#allocation2 + $0xd0] sm:$0xff] }
 0x226   :  { %v13510_v35 = vpack.c.bf16 %v3103_v25, %v3089_v26  ;;  %10177 = vmatpush3.bf16.msra.mxu1 %v3832_v18 }
 0x227   :  { %v13515_v45 = vpack.c.bf16 %v3104_v22, %v3090_v37  ;;  %v2264_v47 = vpop.f32.mrb[116].mxu0  ;;  %10226 = vmatprep.subr.bf16.mxu1 %v15353_v11  ;;  %v1452_v37 = vld [vmem:[#allocation2 + $0x148] sm:$0xff] }
 0x228   :  { %v2265_v38 = vadd.f32 %v2264_v47, %v15330_v17  ;;  %v2266_v42 = vpop.f32.mrb[117].mxu0 }
 0x229   :  { %v2267_v29 = vadd.f32 %v2266_v42, %v15330_v17  ;;  %v2268_v59 = vpop.f32.mrb[118].mxu0  ;;  %10179 = vmatmul.mubr.msk.bf16.vlgmr.msra.gmra.mrb[56].mxu1 %vm4002_vm1, %v11034_v12  ;;  %v11038_v42 = vld [vmem:[%s15217_s3 + $0xe8] sm:$0xff]  }
 0x22a   :  { %v2269_v61 = vadd.f32 %v2268_v59, %v15331_v31  ;;  %v2270_v15 = vpop.f32.mrb[119].mxu0  ;;  %10227 = vmatpush3.bf16.msra.mxu1 %v15353_v11  ;;  %10182 = vmatprep.mubr.msk.bf16.mxu1 %vm4002_vm1, %v11035_v39  ;;  %v3117_v46 = vmax.f32 %v2265_v38, 0.0  ;;  %v1451_v11 = vld [vmem:[#allocation2 + $0x140] sm:$0xff] }
 0x22b   :  { %v2271_v43 = vadd.f32 %v2270_v15, %v15331_v31  ;;  %10228 = vmatprep.subr.bf16.mxu1 %v13116_v57  ;;  %v3118_v40 = vmax.f32 %v2267_v29, 0.0  ;;  %v1466_v29 = vld [vmem:[#allocation2 + $0x1b8] sm:$0xff] }
 0x22c   :  { %v3131_v53 = vmax.f32 %v2269_v61, 0.0  ;;  %2599 = vmatmul.mubr.bf16.vlgmr.msra.gmra.mrb[224].mxu0 %v13532_v13  ;;  %v13565_v15 = vld [vmem:[%s15212_s1 + $0x10] ss:$8 sps:$4 sm:$0xff]  }
 0x22d   :  { %v3132_v16 = vmax.f32 %v2271_v43, 0.0  ;;  %9204 = vmatprep.mubr.msk.bf16.mxu0 %vm1831_vm0, %v13541_v44  ;;  %2913 = vmatpush1.bf16.msra.mxu0 %v1423_v4 }
 0x22e   :  { %v13545_v14 = vpack.c.bf16 %v3131_v53, %v3117_v46  ;;  %10229 = vmatpush3.bf16.msra.mxu1 %v13116_v57  ;;  %2914 = vmatprep.subr.bf16.mxu0 %v1438_v28  ;;  %v1465_v46 = vld [vmem:[#allocation2 + $0x1b0] sm:$0xff] }
 0x22f   :  { %v13548_v18 = vpack.c.bf16 %v3132_v16, %v3118_v40  ;;  %v2274_v12 = vpop.f32.mrb[120].mxu0  ;;  %10230 = vmatprep.subr.bf16.mxu1 %v13129_v63 }
 0x230   :  { %v2275_v26 = vadd.f32 %v2274_v12, %v15335_v19  ;;  %v2276_v25 = vpop.f32.mrb[121].mxu0 }
 0x231   :  { %v2277_v22 = vadd.f32 %v2276_v25, %v15335_v19  ;;  %v2278_v39 = vpop.f32.mrb[122].mxu0  ;;  %10183 = vmatmul.mubr.msk.bf16.gmra.mrb[60].mxu1 %vm4002_vm1, %v11036_v0  ;;  %2915 = vmatpush1.bf16.msra.mxu0 %v1437_v21  ;;  %v13574_v0 = vld [vmem:[%s15212_s1 + $0x24] ss:$8 sps:$4 sm:$0xff]  }
 0x232   :  { %v2279_v47 = vadd.f32 %v2278_v39, %v15336_v9  ;;  %v2280_v57 = vpop.f32.mrb[123].mxu0  ;;  %10231 = vmatpush3.bf16.msra.mxu1 %v13129_v63  ;;  %10186 = vmatprep.mubr.msk.bf16.mxu1 %vm4002_vm1, %v11037_v5  ;;  %v3145_v59 = vmax.f32 %v2275_v26, 0.0  ;;  %v11039_v63 = vld [vmem:[%s15217_s3 + $0xf0] sm:$0xff]   ;;  %v1480_v21 = vld [vmem:[#allocation2 + $0x228] sm:$0xff]  ;;  %v11040_v39 = vld [vmem:[%s15217_s3 + $0xf8] sm:$0xff]  }
 0x233   :  { %v2281_v38 = vadd.f32 %v2280_v57, %v15336_v9  ;;  %10232 = vmatprep.subr.bf16.mxu1 %v13149_v3  ;;  %2916 = vmatprep.subr.bf16.mxu0 %v1452_v37  ;;  %v3146_v4 = vmax.f32 %v2277_v22, 0.0  ;;  %v1479_v37 = vld [vmem:[#allocation2 + $0x220] sm:$0xff] }
 0x234   :  { %v3159_v61 = vmax.f32 %v2279_v47, 0.0  ;;  %2609 = vmatmul.mubr.bf16.gmra.mrb[228].mxu0 %v13565_v15  ;;  %v1494_v47 = vld [vmem:[#allocation2 + $0x298] sm:$0xff] }
 0x235   :  { %v3160_v43 = vmax.f32 %v2281_v38, 0.0  ;;  %9205 = vmatprep.mubr.msk.bf16.mxu0 %vm1831_vm0, %v13574_v0  ;;  %2917 = vmatpush1.bf16.msra.mxu0 %v1451_v11  ;;  %v13598_v38 = vld [vmem:[%s15212_s1 + $0x20] ss:$8 sps:$4 sm:$0xff]  }
 0x236   :  { %v13578_v28 = vpack.c.bf16 %v3159_v61, %v3145_v59  ;;  %10233 = vmatpush3.bf16.msra.mxu1 %v13149_v3  ;;  %2918 = vmatprep.subr.bf16.mxu0 %v1466_v29  ;;  %v13607_v59 = vld [vmem:[%s15212_s1 + $0x34] ss:$8 sps:$4 sm:$0xff]  }
 0x237   :  { %v13581_v53 = vpack.c.bf16 %v3160_v43, %v3146_v4  ;;  %v2284_v5 = vpop.f32.mrb[124].mxu0  ;;  %10234 = vmatprep.subr.bf16.mxu1 %v13161_v56 }
 0x238   :  { %v2285_v40 = vadd.f32 %v2284_v5, %v15340_v52  ;;  %v2286_v16 = vpop.f32.mrb[125].mxu0 }
 0x239   :  { %v2287_v12 = vadd.f32 %v2286_v16, %v15340_v52  ;;  %v2288_v26 = vpop.f32.mrb[126].mxu0  ;;  %10187 = vmatmul.mubr.msk.bf16.gmra.mrb[64].mxu1 %vm4002_vm1, %v11038_v42  ;;  %2919 = vmatpush1.bf16.msra.mxu0 %v1465_v46 }
 0x23a   :  { %v2289_v25 = vadd.f32 %v2288_v26, %v15341_v54  ;;  %v2290_v3 = vpop.f32.mrb[127].mxu0  ;;  %10235 = vmatpush3.bf16.msra.mxu1 %v13161_v56  ;;  %10190 = vmatprep.mubr.msk.bf16.mxu1 %vm4002_vm1, %v11039_v63  ;;  %v3173_v57 = vmax.f32 %v2285_v40, 0.0  ;;  %v11041_v56 = vld [vmem:[%s15217_s3 + $0x100] sm:$0xff]   ;;  %v1493_v63 = vld [vmem:[#allocation2 + $0x290] sm:$0xff]  ;;  %v1508_v40 = vld [vmem:[#allocation2 + $0x308] sm:$0xff] }
 0x23b   :  { %v2291_v22 = vadd.f32 %v2290_v3, %v15341_v54  ;;  %10236 = vmatprep.subr.bf16.mxu1 %v13175_v10  ;;  %2920 = vmatprep.subr.bf16.mxu0 %v1480_v21  ;;  %v3174_v42 = vmax.f32 %v2287_v12, 0.0  ;;  %v1507_v26 = vld [vmem:[#allocation2 + $0x300] sm:$0xff]  ;;  %v11042_v3 = vld [vmem:[%s15217_s3 + $0x108] sm:$0xff]  }
 0x23c   :  { %v3187_v11 = vmax.f32 %v2289_v25, 0.0  ;;  %2619 = vmatmul.mubr.bf16.gmra.mrb[232].mxu0 %v13598_v38 }
 0x23d   :  { %v3188_v29 = vmax.f32 %v2291_v22, 0.0  ;;  %9206 = vmatprep.mubr.msk.bf16.mxu0 %vm1831_vm0, %v13607_v59  ;;  %2921 = vmatpush1.bf16.msra.mxu0 %v1479_v37  ;;  %v1522_v37 = vld [vmem:[#allocation2 + $0x378] sm:$0xff] }
 0x23e   :  { %v13611_v61 = vpack.c.bf16 %v3187_v11, %v3173_v57  ;;  %10237 = vmatpush3.bf16.msra.mxu1 %v13175_v10  ;;  %2922 = vmatprep.subr.bf16.mxu0 %v1494_v47 }
 0x23f   :  { %v13614_v4 = vpack.c.bf16 %v3188_v29, %v3174_v42  ;;  %v2294_v43 = vpop.f32.mrb[128].mxu0  ;;  %10238 = vmatprep.subr.bf16.mxu1 %v13195_v50  ;;  %v1521_v29 = vld [vmem:[#allocation2 + $0x370] sm:$0xff] }
 0x240   :  { %v2295_v46 = vadd.f32 %v2294_v43, %v15345_v27  ;;  %v2296_v5 = vpop.f32.mrb[129].mxu0 }
 0x241   :  { %v2297_v16 = vadd.f32 %v2296_v5, %v15345_v27  ;;  %v2298_v21 = vpop.f32.mrb[130].mxu0  ;;  %10191 = vmatmul.mubr.msk.bf16.gmra.mrb[68].mxu1 %vm4002_vm1, %v11040_v39  ;;  %2923 = vmatpush1.bf16.msra.mxu0 %v1493_v63  ;;  %v13630_v39 = vld [vmem:[%s15212_s1 + $0x30] ss:$8 sps:$4 sm:$0xff]  }
 0x242   :  { %v2299_v12 = vadd.f32 %v2298_v21, %v15346_v1  ;;  %v2300_v10 = vpop.f32.mrb[131].mxu0  ;;  %10239 = vmatpush3.bf16.msra.mxu1 %v13195_v50  ;;  %10194 = vmatprep.mubr.msk.bf16.mxu1 %vm4002_vm1, %v11041_v56  ;;  %v3201_v22 = vmax.f32 %v2295_v46, 0.0  ;;  %v11043_v50 = vld [vmem:[%s15217_s3 + $0x110] sm:$0xff]   ;;  %v13639_v56 = vld [vmem:[%s15212_s1 + $0x44] ss:$8 sps:$4 sm:$0xff]  }
 0x243   :  { %v2301_v25 = vadd.f32 %v2300_v10, %v15346_v1  ;;  %2924 = vmatprep.subr.bf16.mxu0 %v1508_v40  ;;  %v3202_v57 = vmax.f32 %v2297_v16, 0.0  ;;  %v1536_v46 = vld [vmem:[#allocation2 + $0x3e8] sm:$0xff] }
 0x244   :  { %v3215_v47 = vmax.f32 %v2299_v12, 0.0  ;;  %2629 = vmatmul.mubr.bf16.gmra.mrb[236].mxu0 %v13630_v39 }
 0x245   :  { %v3216_v11 = vmax.f32 %v2301_v25, 0.0  ;;  %9207 = vmatprep.mubr.msk.bf16.mxu0 %vm1831_vm0, %v13639_v56  ;;  %2925 = vmatpush1.bf16.msra.mxu0 %v1507_v26  ;;  %v1535_v26 = vld [vmem:[#allocation2 + $0x3e0] sm:$0xff] }
 0x246   :  { %v13643_v42 = vpack.c.bf16 %v3215_v47, %v3201_v22  ;;  %2926 = vmatprep.subr.bf16.mxu0 %v1522_v37  ;;  %v11044_v37 = vld [vmem:[%s15217_s3 + $0x118] sm:$0xff]  }
 0x247   :  { %v13645_v63 = vpack.c.bf16 %v3216_v11, %v3202_v57  ;;  %v2304_v43 = vpop.f32.mrb[132].mxu0 }
 0x248   :  { %v2305_v5 = vadd.f32 %v2304_v43, %v15347_v24  ;;  %v2306_v40 = vpop.f32.mrb[133].mxu0 }
 0x249   :  { %v2307_v16 = vadd.f32 %v2306_v40, %v15347_v24  ;;  %v2308_v21 = vpop.f32.mrb[134].mxu0  ;;  %10195 = vmatmul.mubr.msk.bf16.gmra.mrb[72].mxu1 %vm4002_vm1, %v11042_v3  ;;  %2927 = vmatpush1.bf16.msra.mxu0 %v1521_v29  ;;  %v13659_v3 = vld [vmem:[%s15212_s1 + $0x40] ss:$8 sps:$4 sm:$0xff]   ;;  %v13668_v29 = vld [vmem:[%s15212_s1 + $0x54] ss:$8 sps:$4 sm:$0xff]  }
 0x24a   :  { %v2309_v12 = vadd.f32 %v2308_v21, %v15348_v60  ;;  %v2310_v10 = vpop.f32.mrb[135].mxu0  ;;  %10198 = vmatprep.mubr.msk.bf16.mxu1 %vm4002_vm1, %v11043_v50  ;;  %2928 = vmatprep.subr.bf16.mxu0 %v1536_v46  ;;  %v3229_v22 = vmax.f32 %v2305_v5, 0.0  ;;  %15354 = vst [vmem:[#allocation32_spill] sm:$0xff] %v13659_v3  ;;  %v11045_v50 = vld [vmem:[%s15217_s3 + $0x120] sm:$0xff]   ;;  %15355 = vst [vmem:[#allocation33_spill] sm:$0xff] %v13668_v29 }
 0x24b   :  { %v2311_v25 = vadd.f32 %v2310_v10, %v15348_v60  ;;  %v3230_v57 = vmax.f32 %v2307_v16, 0.0 }
 0x24c   :  { %v3243_v47 = vmax.f32 %v2309_v12, 0.0  ;;  %2639 = vmatmul.mubr.bf16.gmra.mrb[240].mxu0 %v13659_v3 }
 0x24d   :  { %v3244_v11 = vmax.f32 %v2311_v25, 0.0  ;;  %9208 = vmatprep.mubr.msk.bf16.mxu0 %vm1831_vm0, %v13668_v29  ;;  %2929 = vmatpush1.bf16.msra.mxu0 %v1535_v26 }
 0x24e   :  { %v13672_v43 = vpack.c.bf16 %v3243_v47, %v3229_v22  ;;  %v11046_v22 = vld [vmem:[%s15217_s3 + $0x128] sm:$0xff]  }
 0x24f   :  { %v13674_v46 = vpack.c.bf16 %v3244_v11, %v3230_v57  ;;  %v2314_v5 = vpop.f32.mrb[136].mxu0  ;;  %v13688_v11 = vld [vmem:[%s15212_s1 + $0x50] ss:$8 sps:$4 sm:$0xff]  }
 0x250   :  { %v2315_v40 = vadd.f32 %v2314_v5, %v15349_v48  ;;  %v2316_v21 = vpop.f32.mrb[137].mxu0  ;;  %15356 = vst [vmem:[#allocation8_spill] sm:$0xff] %v13688_v11 }
 0x251   :  { %v2317_v16 = vadd.f32 %v2316_v21, %v15349_v48  ;;  %v2318_v12 = vpop.f32.mrb[138].mxu0  ;;  %10199 = vmatmul.mubr.msk.bf16.gmra.mrb[76].mxu1 %vm4002_vm1, %v11044_v37  ;;  %v11047_v37 = vld [vmem:[%s15217_s3 + $0x130] sm:$0xff]   ;;  %v13697_v21 = vld [vmem:[%s15212_s1 + $0x64] ss:$8 sps:$4 sm:$0xff]  }
 0x252   :  { %v2319_v10 = vadd.f32 %v2318_v12, %v15350_v23  ;;  %v2320_v25 = vpop.f32.mrb[139].mxu0  ;;  %10202 = vmatprep.mubr.msk.bf16.mxu1 %vm4002_vm1, %v11045_v50  ;;  %v3257_v47 = vmax.f32 %v2315_v40, 0.0  ;;  %15357 = vst [vmem:[#allocation9_spill] sm:$0xff] %v13697_v21 }
 0x253   :  { %v2321_v26 = vadd.f32 %v2320_v25, %v15350_v23  ;;  %v3258_v50 = vmax.f32 %v2317_v16, 0.0  ;;  %v15358_v25 = vld [vmem:[#allocation3_spill] sm:$0xff] }
 0x254   :  { %v3271_v57 = vmax.f32 %v2319_v10, 0.0  ;;  %2649 = vmatmul.mubr.bf16.gmra.mrb[244].mxu0 %v13688_v11 }
 0x255   :  { %v3272_v5 = vmax.f32 %v2321_v26, 0.0  ;;  %9209 = vmatprep.mubr.msk.bf16.mxu0 %vm1831_vm0, %v13697_v21  ;;  %v15359_v26 = vld [vmem:[#allocation5_spill] sm:$0xff] }
 0x256   :  { %v13701_v40 = vpack.c.bf16 %v3271_v57, %v3257_v47  ;;  %v11048_v47 = vld [vmem:[%s15217_s3 + $0x138] sm:$0xff]  }
 0x257   :  { %v13703_v12 = vpack.c.bf16 %v3272_v5, %v3258_v50  ;;  %v2324_v10 = vpop.f32.mrb[140].mxu0 }
 0x258   :  { %v2325_v11 = vadd.f32 %v2324_v10, %v15358_v25  ;;  %v2326_v23 = vpop.f32.mrb[141].mxu0 }
 0x259   :  { %v2327_v48 = vadd.f32 %v2326_v23, %v15358_v25  ;;  %v2328_v16 = vpop.f32.mrb[142].mxu0  ;;  %10203 = vmatmul.mubr.msk.bf16.gmra.mrb[80].mxu1 %vm4002_vm1, %v11046_v22  ;;  %v13717_v23 = vld [vmem:[%s15212_s1 + $0x60] ss:$8 sps:$4 sm:$0xff]  }
 0x25a   :  { %v2329_v29 = vadd.f32 %v2328_v16, %v15359_v26  ;;  %v2330_v3 = vpop.f32.mrb[143].mxu0  ;;  %10206 = vmatprep.mubr.msk.bf16.mxu1 %vm4002_vm1, %v11047_v37  ;;  %v3285_v57 = vmax.f32 %v2325_v11, 0.0  ;;  %15360 = vst [vmem:[#allocation35_spill] sm:$0xff] %v13717_v23  ;;  %v11049_v22 = vld [vmem:[%s15217_s3 + $0x140] sm:$0xff]  }
 0x25b   :  { %v2331_v21 = vadd.f32 %v2330_v3, %v15359_v26  ;;  %v3286_v37 = vmax.f32 %v2327_v48, 0.0  ;;  %v13726_v3 = vld [vmem:[%s15212_s1 + $0x74] ss:$8 sps:$4 sm:$0xff]  }
 0x25c   :  { %v3299_v50 = vmax.f32 %v2329_v29, 0.0  ;;  %2659 = vmatmul.mubr.bf16.gmra.mrb[248].mxu0 %v13717_v23 }
 0x25d   :  { %v3300_v5 = vmax.f32 %v2331_v21, 0.0  ;;  %9210 = vmatprep.mubr.msk.bf16.mxu0 %vm1831_vm0, %v13726_v3 }
 0x25e   :  { %v3579_v29 = vpack.c.bf16 %v3299_v50, %v3285_v57 }
 0x25f   :  { %v3580_v11 = vpack.c.bf16 %v3300_v5, %v3286_v37  ;;  %v2334_v10 = vpop.f32.mrb[144].mxu0 }
 0x260   :  { %v3677_v16 = vmax.bf16 %v3579_v29, %v13510_v35  ;;  %v2335_v23 = vadd.f32 %v2334_v10, %v12511_v33  ;;  %v2336_v26 = vpop.f32.mrb[145].mxu0 }
 0x261   :  { %v3678_v25 = vmax.bf16 %v3580_v11, %v13515_v45  ;;  %v2337_v48 = vadd.f32 %v2336_v26, %v12511_v33  ;;  %v2338_v21 = vpop.f32.mrb[146].mxu0  ;;  %10207 = vmatmul.mubr.msk.bf16.gmra.mrb[84].mxu1 %vm4002_vm1, %v11048_v47  ;;  %v13743_v45 = vld [vmem:[%s15212_s1 + $0x70] ss:$8 sps:$4 sm:$0xff]  }
 0x262   :  { %v2339_v60 = vadd.f32 %v2338_v21, %v12521_v32  ;;  %v2340_v24 = vpop.f32.mrb[147].mxu0  ;;  %10210 = vmatprep.mubr.msk.bf16.mxu1 %vm4002_vm1, %v11049_v22  ;;  %v3313_v35 = vmax.f32 %v2335_v23, 0.0  ;;  %v11050_v22 = vld [vmem:[%s15217_s3 + $0x148] sm:$0xff]  }
 0x263   :  { %v2341_v57 = vadd.f32 %v2340_v24, %v12521_v32  ;;  %v13738_v50 = vmax.bf16 %v3678_v25, %v3677_v16  ;;  %v3314_v26 = vmax.f32 %v2337_v48, 0.0  ;;  %v13753_v24 = vld [vmem:[%s15212_s1 + $0x84] ss:$8 sps:$4 sm:$0xff]   ;;  %v11051_v25 = vld [vmem:[%s15217_s3 + $0x150] sm:$0xff]  }
 0x264   :  { %v3327_v37 = vmax.f32 %v2339_v60, 0.0  ;;  %2669 = vmatmul.mubr.bf16.gmra.mrb[252].mxu0 %v13743_v45 }
 0x265   :  { %v3328_v47 = vmax.f32 %v2341_v57, 0.0  ;;  %10288 = vmatprep.subr.bf16.mxu1 %v13738_v50  ;;  %9211 = vmatprep.mubr.msk.bf16.mxu0 %vm1831_vm0, %v13753_v24 }
 0x266   :  { %v3593_v60 = vpack.c.bf16 %v3327_v37, %v3313_v35 }
 0x267   :  { %v3594_v23 = vpack.c.bf16 %v3328_v47, %v3314_v26  ;;  %v2344_v5 = vpop.f32.mrb[148].mxu0 }
 0x268   :  { %v3691_v29 = vmax.bf16 %v3593_v60, %v13545_v14  ;;  %v2345_v11 = vadd.f32 %v2344_v5, %v12542_v55  ;;  %v2346_v10 = vpop.f32.mrb[149].mxu0 }
 0x269   :  { %v3692_v16 = vmax.bf16 %v3594_v23, %v13548_v18  ;;  %v2347_v48 = vadd.f32 %v2346_v10, %v12542_v55  ;;  %v2348_v21 = vpop.f32.mrb[150].mxu0  ;;  %10211 = vmatmul.mubr.msk.bf16.gmra.mrb[88].mxu1 %vm4002_vm1, %v11050_v22  ;;  %v13773_v18 = vld [vmem:[%s15212_s1 + $0x80] ss:$8 sps:$4 sm:$0xff]   ;;  %v11052_v23 = vld [vmem:[%s15217_s3 + $0x158] sm:$0xff]  }
 0x26a   :  { %v2349_v57 = vadd.f32 %v2348_v21, %v12550_v36  ;;  %v2350_v35 = vpop.f32.mrb[151].mxu0  ;;  %10214 = vmatprep.mubr.msk.bf16.mxu1 %vm4002_vm1, %v11051_v25  ;;  %v3341_v14 = vmax.f32 %v2345_v11, 0.0  ;;  %v13782_v25 = vld [vmem:[%s15212_s1 + $0x94] ss:$8 sps:$4 sm:$0xff]  }
 0x26b   :  { %v2351_v37 = vadd.f32 %v2350_v35, %v12550_v36  ;;  %v13768_v26 = vmax.bf16 %v3692_v16, %v3691_v29  ;;  %v3342_v60 = vmax.f32 %v2347_v48, 0.0  ;;  %v11053_v29 = vld [vmem:[%s15217_s3 + $0x160] sm:$0xff]  }
 0x26c   :  { %v3355_v47 = vmax.f32 %v2349_v57, 0.0  ;;  %2679 = vmatmul.mubr.bf16.gmra.mrb[0].mxu0 %v13773_v18 }
 0x26d   :  { %v3356_v22 = vmax.f32 %v2351_v37, 0.0  ;;  %9212 = vmatprep.mubr.msk.bf16.mxu0 %vm1831_vm0, %v13782_v25 }
 0x26e   :  { %v3607_v5 = vpack.c.bf16 %v3355_v47, %v3341_v14 }
 0x26f   :  { %v3608_v11 = vpack.c.bf16 %v3356_v22, %v3342_v60  ;;  %v2354_v10 = vpop.f32.mrb[152].mxu0 }
 0x270   :  { %v3705_v16 = vmax.bf16 %v3607_v5, %v13578_v28  ;;  %v2355_v48 = vadd.f32 %v2354_v10, %v12572_v7  ;;  %v2356_v21 = vpop.f32.mrb[153].mxu0  ;;  %v11054_v10 = vld [vmem:[%s15217_s3 + $0x168] sm:$0xff]  }
 0x271   :  { %v3706_v57 = vmax.bf16 %v3608_v11, %v13581_v53  ;;  %v2357_v35 = vadd.f32 %v2356_v21, %v12572_v7  ;;  %v2358_v37 = vpop.f32.mrb[154].mxu0  ;;  %10215 = vmatmul.mubr.msk.bf16.gmra.mrb[92].mxu1 %vm4002_vm1, %v11052_v23  ;;  %v13802_v53 = vld [vmem:[%s15212_s1 + $0x90] ss:$8 sps:$4 sm:$0xff]  }
 0x272   :  { %v2359_v14 = vadd.f32 %v2358_v37, %v12587_v8  ;;  %v2360_v47 = vpop.f32.mrb[155].mxu0  ;;  %10218 = vmatprep.mubr.msk.bf16.mxu1 %vm4002_vm1, %v11053_v29  ;;  %v3369_v28 = vmax.f32 %v2355_v48, 0.0  ;;  %15361 = vst [vmem:[#allocation36_spill] sm:$0xff] %v13802_v53  ;;  %v13811_v29 = vld [vmem:[%s15212_s1 + $0xa4] ss:$8 sps:$4 sm:$0xff]   ;;  %v11055_v48 = vld [vmem:[%s15217_s3 + $0x170] sm:$0xff]  }
 0x273   :  { %v2361_v60 = vadd.f32 %v2360_v47, %v12587_v8  ;;  %v13797_v22 = vmax.bf16 %v3706_v57, %v3705_v16  ;;  %v3370_v11 = vmax.f32 %v2357_v35, 0.0  ;;  %15362 = vst [vmem:[#allocation10_spill] sm:$0xff] %v13811_v29  ;;  %v15363_v37 = vld [vmem:[#allocation15_spill] sm:$0xff] }
 0x274   :  { %v3383_v5 = vmax.f32 %v2359_v14, 0.0  ;;  %2689 = vmatmul.mubr.bf16.gmra.mrb[4].mxu0 %v13802_v53 }
 0x275   :  { %v3384_v23 = vmax.f32 %v2361_v60, 0.0  ;;  %9213 = vmatprep.mubr.msk.bf16.mxu0 %vm1831_vm0, %v13811_v29  ;;  %v15364_v29 = vld [vmem:[#allocation16_spill] sm:$0xff] }
 0x276   :  { %v3621_v16 = vpack.c.bf16 %v3383_v5, %v3369_v28 }
 0x277   :  { %v3622_v21 = vpack.c.bf16 %v3384_v23, %v3370_v11  ;;  %v2364_v57 = vpop.f32.mrb[156].mxu0 }
 0x278   :  { %v3719_v35 = vmax.bf16 %v3621_v16, %v13611_v61  ;;  %v2365_v14 = vadd.f32 %v2364_v57, %v15363_v37  ;;  %v2366_v47 = vpop.f32.mrb[157].mxu0 }
 0x279   :  { %v3720_v60 = vmax.bf16 %v3622_v21, %v13614_v4  ;;  %v2367_v53 = vadd.f32 %v2366_v47, %v15363_v37  ;;  %v2368_v8 = vpop.f32.mrb[158].mxu0  ;;  %10219 = vmatmul.mubr.msk.bf16.gmra.mrb[96].mxu1 %vm4002_vm1, %v11054_v10  ;;  %v13831_v4 = vld [vmem:[%s15212_s1 + $0xa0] ss:$8 sps:$4 sm:$0xff]  }
 0x27a   :  { %v2369_v28 = vadd.f32 %v2368_v8, %v15364_v29  ;;  %v2370_v5 = vpop.f32.mrb[159].mxu0  ;;  %10222 = vmatprep.mubr.msk.bf16.mxu1 %vm4002_vm1, %v11055_v48  ;;  %v3397_v61 = vmax.f32 %v2365_v14, 0.0  ;;  %15365 = vst [vmem:[#allocation11_spill] sm:$0xff] %v13831_v4  ;;  %v11056_v8 = vld [vmem:[%s15217_s3 + $0x178] sm:$0xff]  }
 0x27b   :  { %v2371_v11 = vadd.f32 %v2370_v5, %v15364_v29  ;;  %v13826_v23 = vmax.bf16 %v3720_v60, %v3719_v35  ;;  %v3398_v21 = vmax.f32 %v2367_v53, 0.0  ;;  %v13840_v48 = vld [vmem:[%s15212_s1 + $0xb4] ss:$8 sps:$4 sm:$0xff]   ;;  %v11057_v35 = vld [vmem:[%s15217_s3] sm:$0xff]  }
 0x27c   :  { %v3411_v16 = vmax.f32 %v2369_v28, 0.0  ;;  %2699 = vmatmul.mubr.bf16.gmra.mrb[8].mxu0 %v13831_v4 }
 0x27d   :  { %v3412_v10 = vmax.f32 %v2371_v11, 0.0  ;;  %9214 = vmatprep.mubr.msk.bf16.mxu0 %vm1831_vm0, %v13840_v48 }
 0x27e   :  { %v3635_v57 = vpack.c.bf16 %v3411_v16, %v3397_v61 }
 0x27f   :  { %v3636_v14 = vpack.c.bf16 %v3412_v10, %v3398_v21  ;;  %v2374_v53 = vpop.f32.mrb[160].mxu0 }
 0x280   :  { %v3733_v47 = vmax.bf16 %v3635_v57, %v13643_v42  ;;  %v2375_v60 = vadd.f32 %v2374_v53, %v12668_v34  ;;  %v2376_v28 = vpop.f32.mrb[161].mxu0 }
 0x281   :  { %v3734_v5 = vmax.bf16 %v3636_v14, %v13645_v63  ;;  %v2377_v11 = vadd.f32 %v2376_v28, %v12668_v34  ;;  %v2378_v4 = vpop.f32.mrb[162].mxu0  ;;  %10223 = vmatmul.mubr.msk.bf16.gmra.mrb[100].mxu1 %vm4002_vm1, %v11056_v8  ;;  %v13860_v63 = vld [vmem:[%s15212_s1 + $0xb0] ss:$8 sps:$4 sm:$0xff]  }
 0x282   :  { %v2379_v61 = vadd.f32 %v2378_v4, %v12682_v41  ;;  %v2380_v16 = vpop.f32.mrb[163].mxu0  ;;  %10240 = vmatprep.mubr.msk.bf16.mxu1 %vm4002_vm1, %v11057_v35  ;;  %v3425_v42 = vmax.f32 %v2375_v60, 0.0  ;;  %15366 = vst [vmem:[#allocation37_spill] sm:$0xff] %v13860_v63  ;;  %v11058_v4 = vld [vmem:[%s15217_s3 + $0x8] sm:$0xff]  }
 0x283   :  { %v2381_v21 = vadd.f32 %v2380_v16, %v12682_v41  ;;  %v13855_v10 = vmax.bf16 %v3734_v5, %v3733_v47  ;;  %v3426_v14 = vmax.f32 %v2377_v11, 0.0  ;;  %v13869_v35 = vld [vmem:[%s15212_s1 + $0xc4] ss:$8 sps:$4 sm:$0xff]   ;;  %v11059_v47 = vld [vmem:[%s15217_s3 + $0x10] sm:$0xff]  }
 0x284   :  { %v3439_v57 = vmax.f32 %v2379_v61, 0.0  ;;  %2709 = vmatmul.mubr.bf16.gmra.mrb[12].mxu0 %v13860_v63 }
 0x285   :  { %v3440_v8 = vmax.f32 %v2381_v21, 0.0  ;;  %9215 = vmatprep.mubr.msk.bf16.mxu0 %vm1831_vm0, %v13869_v35 }
 0x286   :  { %v3649_v53 = vpack.c.bf16 %v3439_v57, %v3425_v42 }
 0x287   :  { %v3650_v60 = vpack.c.bf16 %v3440_v8, %v3426_v14  ;;  %v2384_v28 = vpop.f32.mrb[164].mxu0 }
 0x288   :  { %v3747_v5 = vmax.bf16 %v3649_v53, %v13672_v43  ;;  %v2385_v11 = vadd.f32 %v2384_v28, %v12710_v6  ;;  %v2386_v61 = vpop.f32.mrb[165].mxu0 }
 0x289   :  { %v3748_v16 = vmax.bf16 %v3650_v60, %v13674_v46  ;;  %v2387_v21 = vadd.f32 %v2386_v61, %v12710_v6  ;;  %v2388_v63 = vpop.f32.mrb[166].mxu0  ;;  %10241 = vmatmul.mubr.msk.bf16.vlgmr.msra.gmra.mrb[56].mxu1 %vm4002_vm1, %v11058_v4  ;;  %v11061_v4 = vld [vmem:[%s15217_s3 + $0x20] sm:$0xff]  }
 0x28a   :  { %v2389_v42 = vadd.f32 %v2388_v63, %v12718_v2  ;;  %10289 = vmatpush3.bf16.msra.mxu1 %v13738_v50  ;;  %v2390_v57 = vpop.f32.mrb[167].mxu0  ;;  %10244 = vmatprep.mubr.msk.bf16.mxu1 %vm4002_vm1, %v11059_v47  ;;  %v3453_v8 = vmax.f32 %v2385_v11, 0.0  ;;  %v11060_v63 = vld [vmem:[%s15217_s3 + $0x18] sm:$0xff]  }
 0x28b   :  { %v2391_v14 = vadd.f32 %v2390_v57, %v12718_v2  ;;  %10290 = vmatprep.subr.bf16.mxu1 %v13768_v26  ;;  %v4722_v43 = vmax.bf16 %v3748_v16, %v3747_v5  ;;  %v3454_v46 = vmax.f32 %v2387_v21, 0.0 }
 0x28c   :  { %v3467_v53 = vmax.f32 %v2389_v42, 0.0  ;;  %2719 = vmatmul.mubr.bf16.gmra.mrb[16].mxu0 %v13475_v20 }
 0x28d   :  { %v3468_v60 = vmax.f32 %v2391_v14, 0.0  ;;  %9216 = vmatprep.mubr.msk.bf16.mxu0 %vm1831_vm0, %v13483_v62 }
 0x28e   :  { %v3663_v50 = vpack.c.bf16 %v3467_v53, %v3453_v8  ;;  %10291 = vmatpush3.bf16.msra.mxu1 %v13768_v26  ;;  %v11062_v53 = vld [vmem:[%s15217_s3 + $0x28] sm:$0xff]  }
 0x28f   :  { %v3664_v47 = vpack.c.bf16 %v3468_v60, %v3454_v46  ;;  %10292 = vmatprep.subr.bf16.mxu1 %v13797_v22  ;;  %v2427_v20 = vpop.f32.mrb[168].mxu0  ;;  %v11063_v46 = vld [vmem:[%s15217_s3 + $0x30] sm:$0xff]  }
 0x290   :  { %v3761_v28 = vmax.bf16 %v3663_v50, %v13701_v40  ;;  %v2428_v5 = vadd.f32 %v2427_v20, %v12461_v58  ;;  %v2429_v11 = vpop.f32.mrb[169].mxu0 }
 0x291   :  { %v3762_v61 = vmax.bf16 %v3664_v47, %v13703_v12  ;;  %v2430_v62 = vadd.f32 %v2429_v11, %v12461_v58  ;;  %v2431_v16 = vpop.f32.mrb[170].mxu0  ;;  %10245 = vmatmul.mubr.msk.bf16.gmra.mrb[60].mxu1 %vm4002_vm1, %v11060_v63 }
 0x292   :  { %v2432_v26 = vadd.f32 %v2431_v16, %v15324_v30  ;;  %10293 = vmatpush3.bf16.msra.mxu1 %v13797_v22  ;;  %v2433_v21 = vpop.f32.mrb[171].mxu0  ;;  %10248 = vmatprep.mubr.msk.bf16.mxu1 %vm4002_vm1, %v11061_v4  ;;  %v3091_v57 = vmax.f32 %v2428_v5, 0.0  ;;  %v11065_v16 = vld [vmem:[%s15217_s3 + $0x40] sm:$0xff]  }
 0x293   :  { %v2434_v42 = vadd.f32 %v2433_v21, %v15324_v30  ;;  %10294 = vmatprep.subr.bf16.mxu1 %v13826_v23  ;;  %v4723_v40 = vmax.bf16 %v3762_v61, %v3761_v28  ;;  %v3092_v12 = vmax.f32 %v2430_v62, 0.0  ;;  %v11064_v62 = vld [vmem:[%s15217_s3 + $0x38] sm:$0xff]  }
 0x294   :  { %v3105_v14 = vmax.f32 %v2432_v26, 0.0  ;;  %2729 = vmatmul.mubr.bf16.gmra.mrb[20].mxu0 %v13500_v49 }
 0x295   :  { %v3106_v8 = vmax.f32 %v2434_v42, 0.0  ;;  %9231 = vmatprep.mubr.msk.bf16.mxu0 %vm1831_vm0, %v13506_v51 }
 0x296   :  { %v13913_v22 = vpack.c.bf16 %v3105_v14, %v3091_v57  ;;  %10295 = vmatpush3.bf16.msra.mxu1 %v13826_v23 }
 0x297   :  { %v13919_v60 = vpack.c.bf16 %v3106_v8, %v3092_v12  ;;  %10296 = vmatprep.subr.bf16.mxu1 %v13855_v10  ;;  %v2437_v49 = vpop.f32.mrb[172].mxu0 }
 0x298   :  { %v2438_v63 = vadd.f32 %v2437_v49, %v15330_v17  ;;  %v2439_v50 = vpop.f32.mrb[173].mxu0 }
 0x299   :  { %v2440_v4 = vadd.f32 %v2439_v50, %v15330_v17  ;;  %v2441_v47 = vpop.f32.mrb[174].mxu0  ;;  %10249 = vmatmul.mubr.msk.bf16.gmra.mrb[64].mxu1 %vm4002_vm1, %v11062_v53 }
 0x29a   :  { %v2442_v51 = vadd.f32 %v2441_v47, %v15331_v31  ;;  %10297 = vmatpush3.bf16.msra.mxu1 %v13855_v10  ;;  %v2443_v23 = vpop.f32.mrb[175].mxu0  ;;  %10252 = vmatprep.mubr.msk.bf16.mxu1 %vm4002_vm1, %v11063_v46  ;;  %v3119_v28 = vmax.f32 %v2438_v63, 0.0  ;;  %v11066_v63 = vld [vmem:[%s15217_s3 + $0x48] sm:$0xff]  }
 0x29b   :  { %v2444_v20 = vadd.f32 %v2443_v23, %v15331_v31  ;;  %10298 = vmatprep.subr.bf16.mxu1 %v4722_v43  ;;  %v3120_v11 = vmax.f32 %v2440_v4, 0.0 }
 0x29c   :  { %v3133_v5 = vmax.f32 %v2442_v51, 0.0  ;;  %2945 = vmatmul.mubr.bf16.vlgmr.msra.gmra.mrb[24].mxu0 %v13532_v13 }
 0x29d   :  { %v3134_v61 = vmax.f32 %v2444_v20, 0.0  ;;  %9232 = vmatprep.mubr.msk.bf16.mxu0 %vm1831_vm0, %v13541_v44 }
 0x29e   :  { %v13935_v10 = vpack.c.bf16 %v3133_v5, %v3119_v28  ;;  %10299 = vmatpush3.bf16.msra.mxu1 %v4722_v43 }
 0x29f   :  { %v13940_v26 = vpack.c.bf16 %v3134_v61, %v3120_v11  ;;  %10300 = vmatprep.subr.bf16.mxu1 %v4723_v40  ;;  %v2447_v13 = vpop.f32.mrb[176].mxu0 }
 0x2a0   :  { %v2448_v21 = vadd.f32 %v2447_v13, %v15335_v19  ;;  %v2449_v42 = vpop.f32.mrb[177].mxu0  ;;  %v11068_v13 = vld [vmem:[%s15217_s3 + $0x58] sm:$0xff]  }
 0x2a1   :  { %v2450_v57 = vadd.f32 %v2449_v42, %v15335_v19  ;;  %v2451_v14 = vpop.f32.mrb[178].mxu0  ;;  %10253 = vmatmul.mubr.msk.bf16.gmra.mrb[68].mxu1 %vm4002_vm1, %v11064_v62  ;;  %v11069_v42 = vld [vmem:[%s15217_s3 + $0x60] sm:$0xff]  }
 0x2a2   :  { %v2452_v44 = vadd.f32 %v2451_v14, %v15336_v9  ;;  %10301 = vmatpush3.bf16.msra.mxu1 %v4723_v40  ;;  %v2453_v43 = vpop.f32.mrb[179].mxu0  ;;  %10256 = vmatprep.mubr.msk.bf16.mxu1 %vm4002_vm1, %v11065_v16  ;;  %v3147_v8 = vmax.f32 %v2448_v21, 0.0  ;;  %v11067_v40 = vld [vmem:[%s15217_s3 + $0x50] sm:$0xff]  }
 0x2a3   :  { %v2454_v12 = vadd.f32 %v2453_v43, %v15336_v9  ;;  %v3148_v46 = vmax.f32 %v2450_v57, 0.0 }
 0x2a4   :  { %v3161_v53 = vmax.f32 %v2452_v44, 0.0  ;;  %2955 = vmatmul.mubr.bf16.gmra.mrb[28].mxu0 %v13565_v15 }
 0x2a5   :  { %v3162_v49 = vmax.f32 %v2454_v12, 0.0  ;;  %9233 = vmatprep.mubr.msk.bf16.mxu0 %vm1831_vm0, %v13574_v0 }
 0x2a6   :  { %v13954_v50 = vpack.c.bf16 %v3161_v53, %v3147_v8 }
 0x2a7   :  { %v13959_v4 = vpack.c.bf16 %v3162_v49, %v3148_v46  ;;  %v2457_v47 = vpop.f32.mrb[180].mxu0 }
 0x2a8   :  { %v2458_v15 = vadd.f32 %v2457_v47, %v15340_v52  ;;  %v2459_v51 = vpop.f32.mrb[181].mxu0  ;;  %v11070_v47 = vld [vmem:[%s15217_s3 + $0x68] sm:$0xff]  }
 0x2a9   :  { %v2460_v23 = vadd.f32 %v2459_v51, %v15340_v52  ;;  %v2461_v20 = vpop.f32.mrb[182].mxu0  ;;  %10257 = vmatmul.mubr.msk.bf16.gmra.mrb[72].mxu1 %vm4002_vm1, %v11066_v63  ;;  %v11071_v51 = vld [vmem:[%s15217_s3 + $0x70] sm:$0xff]  }
 0x2aa   :  { %v2462_v28 = vadd.f32 %v2461_v20, %v15341_v54  ;;  %v2463_v0 = vpop.f32.mrb[183].mxu0  ;;  %10260 = vmatprep.mubr.msk.bf16.mxu1 %vm4002_vm1, %v11067_v40  ;;  %v3175_v11 = vmax.f32 %v2458_v15, 0.0 }
 0x2ab   :  { %v2464_v5 = vadd.f32 %v2463_v0, %v15341_v54  ;;  %v3176_v62 = vmax.f32 %v2460_v23, 0.0 }
 0x2ac   :  { %v3189_v61 = vmax.f32 %v2462_v28, 0.0  ;;  %2965 = vmatmul.mubr.bf16.gmra.mrb[32].mxu0 %v13598_v38  ;;  %v15367_v28 = vld [vmem:[#allocation17_spill] sm:$0xff] }
 0x2ad   :  { %v3190_v16 = vmax.f32 %v2464_v5, 0.0  ;;  %9234 = vmatprep.mubr.msk.bf16.mxu0 %vm1831_vm0, %v13607_v59 }
 0x2ae   :  { %v13973_v21 = vpack.c.bf16 %v3189_v61, %v3175_v11  ;;  %v15368_v61 = vld [vmem:[#allocation18_spill] sm:$0xff] }
 0x2af   :  { %v13978_v57 = vpack.c.bf16 %v3190_v16, %v3176_v62  ;;  %v2467_v14 = vpop.f32.mrb[184].mxu0 }
 0x2b0   :  { %v2468_v38 = vadd.f32 %v2467_v14, %v15345_v27  ;;  %v2469_v44 = vpop.f32.mrb[185].mxu0  ;;  %v15369_v14 = vld [vmem:[#allocation32_spill] sm:$0xff] }
 0x2b1   :  { %v2470_v43 = vadd.f32 %v2469_v44, %v15345_v27  ;;  %v2471_v12 = vpop.f32.mrb[186].mxu0  ;;  %10261 = vmatmul.mubr.msk.bf16.gmra.mrb[76].mxu1 %vm4002_vm1, %v11068_v13 }
 0x2b2   :  { %v2472_v8 = vadd.f32 %v2471_v12, %v15346_v1  ;;  %v2473_v59 = vpop.f32.mrb[187].mxu0  ;;  %10264 = vmatprep.mubr.msk.bf16.mxu1 %vm4002_vm1, %v11069_v42  ;;  %v3203_v46 = vmax.f32 %v2468_v38, 0.0  ;;  %v15370_v12 = vld [vmem:[#allocation33_spill] sm:$0xff] }
 0x2b3   :  { %v2474_v53 = vadd.f32 %v2473_v59, %v15346_v1  ;;  %v3204_v63 = vmax.f32 %v2470_v43, 0.0  ;;  %v11072_v43 = vld [vmem:[%s15217_s3 + $0x78] sm:$0xff]   ;;  %v11073_v59 = vld [vmem:[%s15217_s3 + $0x80] sm:$0xff]  }
 0x2b4   :  { %v3217_v49 = vmax.f32 %v2472_v8, 0.0  ;;  %2975 = vmatmul.mubr.bf16.gmra.mrb[36].mxu0 %v13630_v39 }
 0x2b5   :  { %v3218_v40 = vmax.f32 %v2474_v53, 0.0  ;;  %9235 = vmatprep.mubr.msk.bf16.mxu0 %vm1831_vm0, %v13639_v56 }
 0x2b6   :  { %v13992_v15 = vpack.c.bf16 %v3217_v49, %v3203_v46  ;;  %v15371_v49 = vld [vmem:[#allocation19_spill] sm:$0xff] }
 0x2b7   :  { %v13997_v23 = vpack.c.bf16 %v3218_v40, %v3204_v63  ;;  %v2477_v20 = vpop.f32.mrb[188].mxu0 }
 0x2b8   :  { %v2478_v39 = vadd.f32 %v2477_v20, %v15367_v28  ;;  %v2479_v0 = vpop.f32.mrb[189].mxu0  ;;  %v15372_v20 = vld [vmem:[#allocation20_spill] sm:$0xff] }
 0x2b9   :  { %v2480_v5 = vadd.f32 %v2479_v0, %v15367_v28  ;;  %v2481_v11 = vpop.f32.mrb[190].mxu0  ;;  %10265 = vmatmul.mubr.msk.bf16.gmra.mrb[80].mxu1 %vm4002_vm1, %v11070_v47 }
 0x2ba   :  { %v2482_v62 = vadd.f32 %v2481_v11, %v15368_v61  ;;  %v2483_v56 = vpop.f32.mrb[191].mxu0  ;;  %10268 = vmatprep.mubr.msk.bf16.mxu1 %vm4002_vm1, %v11071_v51  ;;  %v3231_v13 = vmax.f32 %v2478_v39, 0.0 }
 0x2bb   :  { %v2484_v16 = vadd.f32 %v2483_v56, %v15368_v61  ;;  %v3232_v38 = vmax.f32 %v2480_v5, 0.0  ;;  %v15373_v56 = vld [vmem:[#allocation8_spill] sm:$0xff] }
 0x2bc   :  { %v3245_v42 = vmax.f32 %v2482_v62, 0.0  ;;  %2985 = vmatmul.mubr.bf16.gmra.mrb[40].mxu0 %v15369_v14  ;;  %v15374_v14 = vld [vmem:[#allocation9_spill] sm:$0xff] }
 0x2bd   :  { %v3246_v44 = vmax.f32 %v2484_v16, 0.0  ;;  %9236 = vmatprep.mubr.msk.bf16.mxu0 %vm1831_vm0, %v15370_v12 }
 0x2be   :  { %v14011_v8 = vpack.c.bf16 %v3245_v42, %v3231_v13  ;;  %v11074_v42 = vld [vmem:[%s15217_s3 + $0x88] sm:$0xff]  }
 0x2bf   :  { %v14016_v53 = vpack.c.bf16 %v3246_v44, %v3232_v38  ;;  %v2487_v46 = vpop.f32.mrb[192].mxu0  ;;  %v11075_v44 = vld [vmem:[%s15217_s3 + $0x90] sm:$0xff]  }
 0x2c0   :  { %v2488_v63 = vadd.f32 %v2487_v46, %v15371_v49  ;;  %v2489_v40 = vpop.f32.mrb[193].mxu0 }
 0x2c1   :  { %v2490_v47 = vadd.f32 %v2489_v40, %v15371_v49  ;;  %v2491_v51 = vpop.f32.mrb[194].mxu0  ;;  %10269 = vmatmul.mubr.msk.bf16.gmra.mrb[84].mxu1 %vm4002_vm1, %v11072_v43 }
 0x2c2   :  { %v2492_v39 = vadd.f32 %v2491_v51, %v15372_v20  ;;  %v2493_v0 = vpop.f32.mrb[195].mxu0  ;;  %10272 = vmatprep.mubr.msk.bf16.mxu1 %vm4002_vm1, %v11073_v59  ;;  %v3259_v11 = vmax.f32 %v2488_v63, 0.0  ;;  %v15375_v59 = vld [vmem:[#allocation3_spill] sm:$0xff]  ;;  %v15376_v51 = vld [vmem:[#allocation5_spill] sm:$0xff] }
 0x2c3   :  { %v2494_v5 = vadd.f32 %v2493_v0, %v15372_v20  ;;  %v3260_v16 = vmax.f32 %v2490_v47, 0.0 }
 0x2c4   :  { %v3273_v62 = vmax.f32 %v2492_v39, 0.0  ;;  %2995 = vmatmul.mubr.bf16.gmra.mrb[44].mxu0 %v15373_v56  ;;  %v15377_v56 = vld [vmem:[#allocation35_spill] sm:$0xff] }
 0x2c5   :  { %v3274_v13 = vmax.f32 %v2494_v5, 0.0  ;;  %9237 = vmatprep.mubr.msk.bf16.mxu0 %vm1831_vm0, %v15374_v14  ;;  %v11076_v14 = vld [vmem:[%s15217_s3 + $0x98] sm:$0xff]  }
 0x2c6   :  { %v14030_v38 = vpack.c.bf16 %v3273_v62, %v3259_v11 }
 0x2c7   :  { %v14035_v43 = vpack.c.bf16 %v3274_v13, %v3260_v16  ;;  %v2497_v12 = vpop.f32.mrb[196].mxu0 }
 0x2c8   :  { %v2498_v46 = vadd.f32 %v2497_v12, %v15375_v59  ;;  %v2499_v63 = vpop.f32.mrb[197].mxu0 }
 0x2c9   :  { %v2500_v40 = vadd.f32 %v2499_v63, %v15375_v59  ;;  %v2501_v47 = vpop.f32.mrb[198].mxu0  ;;  %10273 = vmatmul.mubr.msk.bf16.gmra.mrb[88].mxu1 %vm4002_vm1, %v11074_v42 }
 0x2ca   :  { %v2502_v39 = vadd.f32 %v2501_v47, %v15376_v51  ;;  %v2503_v0 = vpop.f32.mrb[199].mxu0  ;;  %10276 = vmatprep.mubr.msk.bf16.mxu1 %vm4002_vm1, %v11075_v44  ;;  %v3287_v11 = vmax.f32 %v2498_v46, 0.0  ;;  %v11077_v44 = vld [vmem:[%s15217_s3 + $0xa0] sm:$0xff]  }
 0x2cb   :  { %v2504_v5 = vadd.f32 %v2503_v0, %v15376_v51  ;;  %v3288_v16 = vmax.f32 %v2500_v40, 0.0 }
 0x2cc   :  { %v3301_v62 = vmax.f32 %v2502_v39, 0.0  ;;  %3005 = vmatmul.mubr.bf16.gmra.mrb[48].mxu0 %v15377_v56 }
 0x2cd   :  { %v3302_v13 = vmax.f32 %v2504_v5, 0.0  ;;  %9238 = vmatprep.mubr.msk.bf16.mxu0 %vm1831_vm0, %v13726_v3 }
 0x2ce   :  { %v3581_v42 = vpack.c.bf16 %v3301_v62, %v3287_v11 }
 0x2cf   :  { %v3582_v12 = vpack.c.bf16 %v3302_v13, %v3288_v16  ;;  %v2507_v63 = vpop.f32.mrb[200].mxu0 }
 0x2d0   :  { %v3679_v46 = vmax.bf16 %v3581_v42, %v13913_v22  ;;  %v2508_v47 = vadd.f32 %v2507_v63, %v12511_v33  ;;  %v2509_v40 = vpop.f32.mrb[201].mxu0 }
 0x2d1   :  { %v3680_v39 = vmax.bf16 %v3582_v12, %v13919_v60  ;;  %v2510_v0 = vadd.f32 %v2509_v40, %v12511_v33  ;;  %v2511_v5 = vpop.f32.mrb[202].mxu0  ;;  %10277 = vmatmul.mubr.msk.bf16.gmra.mrb[92].mxu1 %vm4002_vm1, %v11076_v14  ;;  %v11078_v14 = vld [vmem:[%s15217_s3 + $0xa8] sm:$0xff]  }
 0x2d2   :  { %v2512_v3 = vadd.f32 %v2511_v5, %v12521_v32  ;;  %v2513_v11 = vpop.f32.mrb[203].mxu0  ;;  %10280 = vmatprep.mubr.msk.bf16.mxu1 %vm4002_vm1, %v11077_v44  ;;  %v3315_v22 = vmax.f32 %v2508_v47, 0.0  ;;  %v11079_v44 = vld [vmem:[%s15217_s3 + $0xb0] sm:$0xff]  }
 0x2d3   :  { %v2514_v62 = vadd.f32 %v2513_v11, %v12521_v32  ;;  %v14060_v56 = vmax.bf16 %v3680_v39, %v3679_v46  ;;  %v3316_v13 = vmax.f32 %v2510_v0, 0.0 }
 0x2d4   :  { %v3329_v16 = vmax.f32 %v2512_v3, 0.0  ;;  %3015 = vmatmul.mubr.bf16.gmra.mrb[52].mxu0 %v13743_v45 }
 0x2d5   :  { %v3330_v60 = vmax.f32 %v2514_v62, 0.0  ;;  %10350 = vmatprep.subr.bf16.mxu1 %v14060_v56  ;;  %9239 = vmatprep.mubr.msk.bf16.mxu0 %vm1831_vm0, %v13753_v24 }
 0x2d6   :  { %v3595_v42 = vpack.c.bf16 %v3329_v16, %v3315_v22 }
 0x2d7   :  { %v3596_v12 = vpack.c.bf16 %v3330_v60, %v3316_v13  ;;  %v2517_v63 = vpop.f32.mrb[204].mxu0  ;;  %v11081_v60 = vld [vmem:[%s15217_s3 + $0x180] sm:$0xff]  }
 0x2d8   :  { %v3693_v45 = vmax.bf16 %v3595_v42, %v13935_v10  ;;  %v2518_v46 = vadd.f32 %v2517_v63, %v12542_v55  ;;  %v2519_v47 = vpop.f32.mrb[205].mxu0 }
 0x2d9   :  { %v3694_v40 = vmax.bf16 %v3596_v12, %v13940_v26  ;;  %v2520_v39 = vadd.f32 %v2519_v47, %v12542_v55  ;;  %v2521_v0 = vpop.f32.mrb[206].mxu0  ;;  %10281 = vmatmul.mubr.msk.bf16.gmra.mrb[96].mxu1 %vm4002_vm1, %v11078_v14  ;;  %v11080_v26 = vld [vmem:[%s15217_s3 + $0xb8] sm:$0xff]  }
 0x2da   :  { %v2522_v24 = vadd.f32 %v2521_v0, %v12550_v36  ;;  %v2523_v5 = vpop.f32.mrb[207].mxu0  ;;  %10284 = vmatprep.mubr.msk.bf16.mxu1 %vm4002_vm1, %v11079_v44  ;;  %v3343_v62 = vmax.f32 %v2518_v46, 0.0 }
 0x2db   :  { %v2524_v3 = vadd.f32 %v2523_v5, %v12550_v36  ;;  %v5239_v11 = vmax.bf16 %v3694_v40, %v3693_v45  ;;  %v3344_v22 = vmax.f32 %v2520_v39, 0.0  ;;  %v15379_v5 = vld [vmem:[#allocation36_spill] sm:$0xff] }
 0x2dc   :  { %v3357_v10 = vmax.f32 %v2522_v24, 0.0  ;;  %3025 = vmatmul.mubr.bf16.gmra.mrb[56].mxu0 %v13773_v18 }
 0x2dd   :  { %v3358_v16 = vmax.f32 %v2524_v3, 0.0  ;;  %9240 = vmatprep.mubr.msk.bf16.mxu0 %vm1831_vm0, %v13782_v25  ;;  %v15378_v25 = vld [vmem:[#allocation12_spill] sm:$0xff] }
 0x2de   :  { %v3609_v13 = vpack.c.bf16 %v3357_v10, %v3343_v62  ;;  %v15380_v10 = vld [vmem:[#allocation10_spill] sm:$0xff] }
 0x2df   :  { %v3610_v14 = vpack.c.bf16 %v3358_v16, %v3344_v22  ;;  %v2527_v42 = vpop.f32.mrb[208].mxu0  ;;  %v11083_v16 = vld [vmem:[%s15217_s3 + $0x190] sm:$0xff]  }
 0x2e0   :  { %v3707_v44 = vmax.bf16 %v3609_v13, %v13954_v50  ;;  %v2528_v18 = vadd.f32 %v2527_v42, %v12572_v7  ;;  %v2529_v12 = vpop.f32.mrb[209].mxu0 }
 0x2e1   :  { %v3708_v63 = vmax.bf16 %v3610_v14, %v13959_v4  ;;  %v2530_v45 = vadd.f32 %v2529_v12, %v12572_v7  ;;  %v2531_v46 = vpop.f32.mrb[210].mxu0  ;;  %10285 = vmatmul.mubr.msk.bf16.gmra.mrb[100].mxu1 %vm4002_vm1, %v11080_v26  ;;  %v11082_v4 = vld [vmem:[%s15217_s3 + $0x188] sm:$0xff]  }
 0x2e2   :  { %v2532_v47 = vadd.f32 %v2531_v46, %v15378_v25  ;;  %v2533_v40 = vpop.f32.mrb[211].mxu0  ;;  %10302 = vmatprep.mubr.msk.bf16.mxu1 %vm4002_vm1, %v11081_v60  ;;  %v3371_v24 = vmax.f32 %v2528_v18, 0.0 }
 0x2e3   :  { %v2534_v39 = vadd.f32 %v2533_v40, %v15378_v25  ;;  %v5240_v0 = vmax.bf16 %v3708_v63, %v3707_v44  ;;  %v3372_v3 = vmax.f32 %v2530_v45, 0.0 }
 0x2e4   :  { %v3385_v50 = vmax.f32 %v2532_v47, 0.0  ;;  %3035 = vmatmul.mubr.bf16.gmra.mrb[60].mxu0 %v15379_v5  ;;  %v11085_v5 = vld [vmem:[%s15217_s3 + $0x1a0] sm:$0xff]  }
 0x2e5   :  { %v3386_v62 = vmax.f32 %v2534_v39, 0.0  ;;  %9241 = vmatprep.mubr.msk.bf16.mxu0 %vm1831_vm0, %v15380_v10  ;;  %v15381_v39 = vld [vmem:[#allocation11_spill] sm:$0xff] }
 0x2e6   :  { %v3623_v22 = vpack.c.bf16 %v3385_v50, %v3371_v24  ;;  %v11084_v50 = vld [vmem:[%s15217_s3 + $0x198] sm:$0xff]  }
 0x2e7   :  { %v3624_v26 = vpack.c.bf16 %v3386_v62, %v3372_v3  ;;  %v2537_v13 = vpop.f32.mrb[212].mxu0 }
 0x2e8   :  { %v3721_v60 = vmax.bf16 %v3623_v22, %v13973_v21  ;;  %v2538_v14 = vadd.f32 %v2537_v13, %v15363_v37  ;;  %v2539_v42 = vpop.f32.mrb[213].mxu0 }
 0x2e9   :  { %v3722_v44 = vmax.bf16 %v3624_v26, %v13978_v57  ;;  %v2540_v18 = vadd.f32 %v2539_v42, %v15363_v37  ;;  %v2541_v12 = vpop.f32.mrb[214].mxu0  ;;  %10303 = vmatmul.mubr.msk.bf16.vlgmr.msra.gmra.mrb[56].mxu1 %vm4002_vm1, %v11082_v4 }
 0x2ea   :  { %v2542_v63 = vadd.f32 %v2541_v12, %v15364_v29  ;;  %10351 = vmatpush3.bf16.msra.mxu1 %v14060_v56  ;;  %v2543_v45 = vpop.f32.mrb[215].mxu0  ;;  %10306 = vmatprep.mubr.msk.bf16.mxu1 %vm4002_vm1, %v11083_v16  ;;  %v3399_v47 = vmax.f32 %v2538_v14, 0.0  ;;  %v11086_v12 = vld [vmem:[%s15217_s3 + $0x1a8] sm:$0xff]  }
 0x2eb   :  { %v2544_v46 = vadd.f32 %v2543_v45, %v15364_v29  ;;  %10352 = vmatprep.subr.bf16.mxu1 %v5239_v11  ;;  %v5241_v21 = vmax.bf16 %v3722_v44, %v3721_v60  ;;  %v3400_v57 = vmax.f32 %v2540_v18, 0.0  ;;  %v15382_v44 = vld [vmem:[#allocation37_spill] sm:$0xff] }
 0x2ec   :  { %v3413_v40 = vmax.f32 %v2542_v63, 0.0  ;;  %3045 = vmatmul.mubr.bf16.gmra.mrb[64].mxu0 %v15381_v39  ;;  %v11087_v63 = vld [vmem:[%s15217_s3 + $0x1b0] sm:$0xff]  }
 0x2ed   :  { %v3414_v24 = vmax.f32 %v2544_v46, 0.0  ;;  %9242 = vmatprep.mubr.msk.bf16.mxu0 %vm1831_vm0, %v13840_v48 }
 0x2ee   :  { %v3637_v56 = vpack.c.bf16 %v3413_v40, %v3399_v47  ;;  %10353 = vmatpush3.bf16.msra.mxu1 %v5239_v11 }
 0x2ef   :  { %v3638_v3 = vpack.c.bf16 %v3414_v24, %v3400_v57  ;;  %10354 = vmatprep.subr.bf16.mxu1 %v5240_v0  ;;  %v2547_v62 = vpop.f32.mrb[216].mxu0 }
 0x2f0   :  { %v3735_v4 = vmax.bf16 %v3637_v56, %v13992_v15  ;;  %v2548_v10 = vadd.f32 %v2547_v62, %v12668_v34  ;;  %v2549_v22 = vpop.f32.mrb[217].mxu0 }
 0x2f1   :  { %v3736_v16 = vmax.bf16 %v3638_v3, %v13997_v23  ;;  %v2550_v26 = vadd.f32 %v2549_v22, %v12668_v34  ;;  %v2551_v13 = vpop.f32.mrb[218].mxu0  ;;  %10307 = vmatmul.mubr.msk.bf16.gmra.mrb[60].mxu1 %vm4002_vm1, %v11084_v50  ;;  %v11571_v22 = vld [vmem:[%s15212_s1 + $0xd4] ss:$8 sps:$4 sm:$0xff]  }
 0x2f2   :  { %v2552_v48 = vadd.f32 %v2551_v13, %v12682_v41  ;;  %10355 = vmatpush3.bf16.msra.mxu1 %v5240_v0  ;;  %v2553_v11 = vpop.f32.mrb[219].mxu0  ;;  %10310 = vmatprep.mubr.msk.bf16.mxu1 %vm4002_vm1, %v11085_v5  ;;  %v3427_v14 = vmax.f32 %v2548_v10, 0.0  ;;  %v11088_v10 = vld [vmem:[%s15217_s3 + $0x1b8] sm:$0xff]  }
 0x2f3   :  { %v2554_v60 = vadd.f32 %v2553_v11, %v12682_v41  ;;  %10356 = vmatprep.subr.bf16.mxu1 %v5241_v21  ;;  %v5242_v15 = vmax.bf16 %v3736_v16, %v3735_v4  ;;  %v3428_v23 = vmax.f32 %v2550_v26, 0.0  ;;  %v11089_v26 = vld [vmem:[%s15217_s3 + $0x1c0] sm:$0xff]  }
 0x2f4   :  { %v3441_v42 = vmax.f32 %v2552_v48, 0.0  ;;  %3055 = vmatmul.mubr.bf16.gmra.mrb[68].mxu0 %v15382_v44 }
 0x2f5   :  { %v3442_v18 = vmax.f32 %v2554_v60, 0.0  ;;  %9243 = vmatprep.mubr.msk.bf16.mxu0 %vm1831_vm0, %v13869_v35 }
 0x2f6   :  { %v3651_v0 = vpack.c.bf16 %v3441_v42, %v3427_v14  ;;  %10357 = vmatpush3.bf16.msra.mxu1 %v5241_v21 }
 0x2f7   :  { %v3652_v45 = vpack.c.bf16 %v3442_v18, %v3428_v23  ;;  %10358 = vmatprep.subr.bf16.mxu1 %v5242_v15  ;;  %v2557_v46 = vpop.f32.mrb[220].mxu0 }
 0x2f8   :  { %v3749_v47 = vmax.bf16 %v3651_v0, %v14011_v8  ;;  %v2558_v40 = vadd.f32 %v2557_v46, %v12710_v6  ;;  %v2559_v39 = vpop.f32.mrb[221].mxu0 }
 0x2f9   :  { %v3750_v57 = vmax.bf16 %v3652_v45, %v14016_v53  ;;  %v2560_v24 = vadd.f32 %v2559_v39, %v12710_v6  ;;  %v2561_v50 = vpop.f32.mrb[222].mxu0  ;;  %10311 = vmatmul.mubr.msk.bf16.gmra.mrb[64].mxu1 %vm4002_vm1, %v11086_v12  ;;  %v11570_v53 = vld [vmem:[%s15212_s1 + $0xc0] ss:$8 sps:$4 sm:$0xff]   ;;  %v11572_v45 = vld [vmem:[%s15212_s1 + $0xd0] ss:$8 sps:$4 sm:$0xff]  }
 0x2fa   :  { %v2562_v35 = vadd.f32 %v2561_v50, %v12718_v2  ;;  %10359 = vmatpush3.bf16.msra.mxu1 %v5242_v15  ;;  %v2563_v21 = vpop.f32.mrb[223].mxu0  ;;  %10314 = vmatprep.mubr.msk.bf16.mxu1 %vm4002_vm1, %v11087_v63  ;;  %v3455_v8 = vmax.f32 %v2558_v40, 0.0  ;;  %v11091_v39 = vld [vmem:[%s15217_s3 + $0x1d0] sm:$0xff]  }
 0x2fb   :  { %v2564_v56 = vadd.f32 %v2563_v21, %v12718_v2  ;;  %v5243_v5 = vmax.bf16 %v3750_v57, %v3749_v47  ;;  %v3456_v62 = vmax.f32 %v2560_v24, 0.0  ;;  %v11090_v47 = vld [vmem:[%s15217_s3 + $0x1c8] sm:$0xff]  }
 0x2fc   :  { %v3469_v3 = vmax.f32 %v2562_v35, 0.0  ;;  %3065 = vmatmul.mubr.bf16.gmra.mrb[72].mxu0 %v11570_v53 }
 0x2fd   :  { %v3470_v4 = vmax.f32 %v2564_v56, 0.0  ;;  %10360 = vmatprep.subr.bf16.mxu1 %v5243_v5  ;;  %9244 = vmatprep.mubr.msk.bf16.mxu0 %vm1831_vm0, %v11571_v22  ;;  %v11092_v22 = vld [vmem:[%s15217_s3 + $0x1d8] sm:$0xff]  }
 0x2fe   :  { %v3665_v16 = vpack.c.bf16 %v3469_v3, %v3455_v8  ;;  %10361 = vmatpush3.bf16.msra.mxu1 %v5243_v5 }
 0x2ff   :  { %v3666_v13 = vpack.c.bf16 %v3470_v4, %v3456_v62  ;;  %v2600_v48 = vpop.f32.mrb[224].mxu0 }
 0x300   :  { %v3763_v11 = vmax.bf16 %v3665_v16, %v14030_v38  ;;  %v2601_v60 = vadd.f32 %v2600_v48, %v12461_v58  ;;  %v2602_v15 = vpop.f32.mrb[225].mxu0 }
 0x301   :  { %v3764_v14 = vmax.bf16 %v3666_v13, %v14035_v43  ;;  %v2603_v42 = vadd.f32 %v2602_v15, %v12461_v58  ;;  %v2604_v44 = vpop.f32.mrb[226].mxu0  ;;  %10315 = vmatmul.mubr.msk.bf16.gmra.mrb[68].mxu1 %vm4002_vm1, %v11088_v10 }
 0x302   :  { %v2605_v23 = vadd.f32 %v2604_v44, %v15324_v30  ;;  %v2606_v18 = vpop.f32.mrb[227].mxu0  ;;  %10318 = vmatprep.mubr.msk.bf16.mxu1 %vm4002_vm1, %v11089_v26  ;;  %v3093_v63 = vmax.f32 %v2601_v60, 0.0  ;;  %v11093_v26 = vld [vmem:[%s15217_s3 + $0x1e0] sm:$0xff]  }
 0x303   :  { %v2607_v12 = vadd.f32 %v2606_v18, %v15324_v30  ;;  %v5244_v0 = vmax.bf16 %v3764_v14, %v3763_v11  ;;  %v3094_v43 = vmax.f32 %v2603_v42, 0.0 }
 0x304   :  { %v3107_v38 = vmax.f32 %v2605_v23, 0.0  ;;  %3075 = vmatmul.mubr.bf16.gmra.mrb[76].mxu0 %v11572_v45 }
 0x305   :  { %v3108_v46 = vmax.f32 %v2607_v12, 0.0  ;;  %10362 = vmatprep.subr.bf16.mxu1 %v5244_v0 }
 0x306   :  { %v14176_v40 = vpack.c.bf16 %v3107_v38, %v3093_v63  ;;  %10363 = vmatpush3.bf16.msra.mxu1 %v5244_v0  ;;  %v11094_v38 = vld [vmem:[%s15217_s3 + $0x1e8] sm:$0xff]  }
 0x307   :  { %v14181_v57 = vpack.c.bf16 %v3108_v46, %v3094_v43  ;;  %v2610_v24 = vpop.f32.mrb[228].mxu0  ;;  %v11095_v43 = vld [vmem:[%s15217_s3 + $0x1f0] sm:$0xff]  }
 0x308   :  { %v2611_v50 = vadd.f32 %v2610_v24, %v15330_v17  ;;  %v2612_v35 = vpop.f32.mrb[229].mxu0 }
 0x309   :  { %v2613_v21 = vadd.f32 %v2612_v35, %v15330_v17  ;;  %v2614_v56 = vpop.f32.mrb[230].mxu0  ;;  %10319 = vmatmul.mubr.msk.bf16.gmra.mrb[72].mxu1 %vm4002_vm1, %v11090_v47 }
 0x30a   :  { %v2615_v5 = vadd.f32 %v2614_v56, %v15331_v31  ;;  %v2616_v8 = vpop.f32.mrb[231].mxu0  ;;  %10322 = vmatprep.mubr.msk.bf16.mxu1 %vm4002_vm1, %v11091_v39  ;;  %v3121_v53 = vmax.f32 %v2611_v50, 0.0 }
 0x30b   :  { %v2617_v3 = vadd.f32 %v2616_v8, %v15331_v31  ;;  %v3122_v4 = vmax.f32 %v2613_v21, 0.0 }
 0x30c   :  { %v3135_v62 = vmax.f32 %v2615_v5, 0.0 }
 0x30d   :  { %v3136_v10 = vmax.f32 %v2617_v3, 0.0 }
 0x30e   :  { %v14192_v16 = vpack.c.bf16 %v3135_v62, %v3121_v53 }
 0x30f   :  { %v14197_v13 = vpack.c.bf16 %v3136_v10, %v3122_v4  ;;  %v2620_v48 = vpop.f32.mrb[232].mxu0  ;;  %v11096_v4 = vld [vmem:[%s15217_s3 + $0x1f8] sm:$0xff]  }
 0x310   :  { %v2621_v11 = vadd.f32 %v2620_v48, %v15335_v19  ;;  %v2622_v60 = vpop.f32.mrb[233].mxu0 }
 0x311   :  { %v2623_v15 = vadd.f32 %v2622_v60, %v15335_v19  ;;  %v2624_v14 = vpop.f32.mrb[234].mxu0  ;;  %10323 = vmatmul.mubr.msk.bf16.gmra.mrb[76].mxu1 %vm4002_vm1, %v11092_v22  ;;  %v11097_v22 = vld [vmem:[%s15217_s3 + $0x200] sm:$0xff]  }
 0x312   :  { %v2625_v42 = vadd.f32 %v2624_v14, %v15336_v9  ;;  %v2626_v44 = vpop.f32.mrb[235].mxu0  ;;  %10326 = vmatprep.mubr.msk.bf16.mxu1 %vm4002_vm1, %v11093_v26  ;;  %v3149_v18 = vmax.f32 %v2621_v11, 0.0 }
 0x313   :  { %v2627_v23 = vadd.f32 %v2626_v44, %v15336_v9  ;;  %v3150_v0 = vmax.f32 %v2623_v15, 0.0 }
 0x314   :  { %v3163_v12 = vmax.f32 %v2625_v42, 0.0 }
 0x315   :  { %v3164_v63 = vmax.f32 %v2627_v23, 0.0 }
 0x316   :  { %v14208_v45 = vpack.c.bf16 %v3163_v12, %v3149_v18 }
 0x317   :  { %v14213_v46 = vpack.c.bf16 %v3164_v63, %v3150_v0  ;;  %v2630_v47 = vpop.f32.mrb[236].mxu0 }
 0x318   :  { %v2631_v39 = vadd.f32 %v2630_v47, %v15340_v52  ;;  %v2632_v24 = vpop.f32.mrb[237].mxu0  ;;  %v11099_v47 = vld [vmem:[%s15217_s3 + $0x210] sm:$0xff]  }
 0x319   :  { %v2633_v50 = vadd.f32 %v2632_v24, %v15340_v52  ;;  %v2634_v35 = vpop.f32.mrb[238].mxu0  ;;  %10327 = vmatmul.mubr.msk.bf16.gmra.mrb[80].mxu1 %vm4002_vm1, %v11094_v38  ;;  %v11098_v38 = vld [vmem:[%s15217_s3 + $0x208] sm:$0xff]  }
 0x31a   :  { %v2635_v21 = vadd.f32 %v2634_v35, %v15341_v54  ;;  %v2636_v56 = vpop.f32.mrb[239].mxu0  ;;  %10330 = vmatprep.mubr.msk.bf16.mxu1 %vm4002_vm1, %v11095_v43  ;;  %v3177_v8 = vmax.f32 %v2631_v39, 0.0 }
 0x31b   :  { %v2637_v5 = vadd.f32 %v2636_v56, %v15341_v54  ;;  %v3178_v53 = vmax.f32 %v2633_v50, 0.0 }
 0x31c   :  { %v3191_v3 = vmax.f32 %v2635_v21, 0.0 }
 0x31d   :  { %v3192_v62 = vmax.f32 %v2637_v5, 0.0 }
 0x31e   :  { %v14224_v10 = vpack.c.bf16 %v3191_v3, %v3177_v8 }
 0x31f   :  { %v14229_v26 = vpack.c.bf16 %v3192_v62, %v3178_v53  ;;  %v2640_v48 = vpop.f32.mrb[240].mxu0 }
 0x320   :  { %v2641_v11 = vadd.f32 %v2640_v48, %v15345_v27  ;;  %v2642_v60 = vpop.f32.mrb[241].mxu0  ;;  %v11100_v48 = vld [vmem:[%s15217_s3 + $0x218] sm:$0xff]  }
 0x321   :  { %v2643_v15 = vadd.f32 %v2642_v60, %v15345_v27  ;;  %v2644_v14 = vpop.f32.mrb[242].mxu0  ;;  %10331 = vmatmul.mubr.msk.bf16.gmra.mrb[84].mxu1 %vm4002_vm1, %v11096_v4  ;;  %v11101_v60 = vld [vmem:[%s15217_s3 + $0x220] sm:$0xff]  }
 0x322   :  { %v2645_v42 = vadd.f32 %v2644_v14, %v15346_v1  ;;  %v2646_v44 = vpop.f32.mrb[243].mxu0  ;;  %10334 = vmatprep.mubr.msk.bf16.mxu1 %vm4002_vm1, %v11097_v22  ;;  %v3205_v18 = vmax.f32 %v2641_v11, 0.0 }
 0x323   :  { %v2647_v23 = vadd.f32 %v2646_v44, %v15346_v1  ;;  %v3206_v0 = vmax.f32 %v2643_v15, 0.0 }
 0x324   :  { %v3219_v12 = vmax.f32 %v2645_v42, 0.0 }
 0x325   :  { %v3220_v63 = vmax.f32 %v2647_v23, 0.0 }
 0x326   :  { %v14240_v43 = vpack.c.bf16 %v3219_v12, %v3205_v18 }
 0x327   :  { %v14245_v39 = vpack.c.bf16 %v3220_v63, %v3206_v0  ;;  %v2650_v24 = vpop.f32.mrb[244].mxu0 }
 0x328   :  { %v2651_v50 = vadd.f32 %v2650_v24, %v15367_v28  ;;  %v2652_v35 = vpop.f32.mrb[245].mxu0 }
 0x329   :  { %v2653_v21 = vadd.f32 %v2652_v35, %v15367_v28  ;;  %v2654_v56 = vpop.f32.mrb[246].mxu0  ;;  %10335 = vmatmul.mubr.msk.bf16.gmra.mrb[88].mxu1 %vm4002_vm1, %v11098_v38  ;;  %v11102_v35 = vld [vmem:[%s15217_s3 + $0x228] sm:$0xff]  }
 0x32a   :  { %v2655_v5 = vadd.f32 %v2654_v56, %v15368_v61  ;;  %v2656_v8 = vpop.f32.mrb[247].mxu0  ;;  %10338 = vmatprep.mubr.msk.bf16.mxu1 %vm4002_vm1, %v11099_v47  ;;  %v3233_v53 = vmax.f32 %v2651_v50, 0.0  ;;  %v11103_v56 = vld [vmem:[%s15217_s3 + $0x230] sm:$0xff]  }
 0x32b   :  { %v2657_v3 = vadd.f32 %v2656_v8, %v15368_v61  ;;  %v3234_v4 = vmax.f32 %v2653_v21, 0.0 }
 0x32c   :  { %v3247_v62 = vmax.f32 %v2655_v5, 0.0 }
 0x32d   :  { %v3248_v22 = vmax.f32 %v2657_v3, 0.0 }
 0x32e   :  { %v14256_v11 = vpack.c.bf16 %v3247_v62, %v3233_v53 }
 0x32f   :  { %v14261_v15 = vpack.c.bf16 %v3248_v22, %v3234_v4  ;;  %v2660_v14 = vpop.f32.mrb[248].mxu0 }
 0x330   :  { %v2661_v42 = vadd.f32 %v2660_v14, %v15371_v49  ;;  %v2662_v44 = vpop.f32.mrb[249].mxu0 }
 0x331   :  { %v2663_v23 = vadd.f32 %v2662_v44, %v15371_v49  ;;  %v2664_v18 = vpop.f32.mrb[250].mxu0  ;;  %10339 = vmatmul.mubr.msk.bf16.gmra.mrb[92].mxu1 %vm4002_vm1, %v11100_v48 }
 0x332   :  { %v2665_v12 = vadd.f32 %v2664_v18, %v15372_v20  ;;  %v2666_v0 = vpop.f32.mrb[251].mxu0  ;;  %10342 = vmatprep.mubr.msk.bf16.mxu1 %vm4002_vm1, %v11101_v60  ;;  %v3261_v38 = vmax.f32 %v2661_v42, 0.0  ;;  %v11104_v18 = vld [vmem:[%s15217_s3 + $0x238] sm:$0xff]  }
 0x333   :  { %v2667_v63 = vadd.f32 %v2666_v0, %v15372_v20  ;;  %v3262_v24 = vmax.f32 %v2663_v23, 0.0  ;;  %v11105_v0 = vld [vmem:[%s15217_s3 + $0x240] sm:$0xff]  }
 0x334   :  { %v3275_v47 = vmax.f32 %v2665_v12, 0.0 }
 0x335   :  { %v3276_v50 = vmax.f32 %v2667_v63, 0.0 }
 0x336   :  { %v14272_v21 = vpack.c.bf16 %v3275_v47, %v3261_v38 }
 0x337   :  { %v14277_v5 = vpack.c.bf16 %v3276_v50, %v3262_v24  ;;  %v2670_v8 = vpop.f32.mrb[252].mxu0 }
 0x338   :  { %v2671_v3 = vadd.f32 %v2670_v8, %v15375_v59  ;;  %v2672_v53 = vpop.f32.mrb[253].mxu0 }
 0x339   :  { %v2673_v62 = vadd.f32 %v2672_v53, %v15375_v59  ;;  %v2674_v4 = vpop.f32.mrb[254].mxu0  ;;  %10343 = vmatmul.mubr.msk.bf16.gmra.mrb[96].mxu1 %vm4002_vm1, %v11102_v35 }
 0x33a   :  { %v2675_v22 = vadd.f32 %v2674_v4, %v15376_v51  ;;  %v2676_v48 = vpop.f32.mrb[255].mxu0  ;;  %10346 = vmatprep.mubr.msk.bf16.mxu1 %vm4002_vm1, %v11103_v56  ;;  %v3289_v14 = vmax.f32 %v2671_v3, 0.0 }
 0x33b   :  { %v2677_v60 = vadd.f32 %v2676_v48, %v15376_v51  ;;  %v3290_v44 = vmax.f32 %v2673_v62, 0.0 }
 0x33c   :  { %v3303_v42 = vmax.f32 %v2675_v22, 0.0 }
 0x33d   :  { %v3304_v23 = vmax.f32 %v2677_v60, 0.0 }
 0x33e   :  { %v3583_v12 = vpack.c.bf16 %v3303_v42, %v3289_v14  ;;  %v11107_v42 = vld [vmem:[%s15217_s3 + $0x250] sm:$0xff]  }
 0x33f   :  { %v3584_v63 = vpack.c.bf16 %v3304_v23, %v3290_v44  ;;  %v2680_v38 = vpop.f32.mrb[0].mxu0 }
 0x340   :  { %v3681_v47 = vmax.bf16 %v3583_v12, %v14176_v40  ;;  %v2681_v24 = vadd.f32 %v2680_v38, %v12511_v33  ;;  %v2682_v50 = vpop.f32.mrb[1].mxu0 }
 0x341   :  { %v3682_v35 = vmax.bf16 %v3584_v63, %v14181_v57  ;;  %v2683_v56 = vadd.f32 %v2682_v50, %v12511_v33  ;;  %v2684_v8 = vpop.f32.mrb[2].mxu0  ;;  %10347 = vmatmul.mubr.msk.bf16.gmra.mrb[100].mxu1 %vm4002_vm1, %v11104_v18  ;;  %v11106_v57 = vld [vmem:[%s15217_s3 + $0x248] sm:$0xff]  }
 0x342   :  { %v2685_v3 = vadd.f32 %v2684_v8, %v12521_v32  ;;  %v2686_v53 = vpop.f32.mrb[3].mxu0  ;;  %10364 = vmatprep.mubr.msk.bf16.mxu1 %vm4002_vm1, %v11105_v0  ;;  %v3317_v22 = vmax.f32 %v2681_v24, 0.0 }
 0x343   :  { %v2687_v62 = vadd.f32 %v2686_v53, %v12521_v32  ;;  %v5759_v4 = vmax.bf16 %v3682_v35, %v3681_v47  ;;  %v3318_v48 = vmax.f32 %v2683_v56, 0.0 }
 0x344   :  { %v3331_v40 = vmax.f32 %v2685_v3, 0.0 }
 0x345   :  { %v3332_v60 = vmax.f32 %v2687_v62, 0.0  ;;  %10412 = vmatprep.subr.bf16.mxu1 %v5759_v4 }
 0x346   :  { %v3597_v14 = vpack.c.bf16 %v3331_v40, %v3317_v22 }
 0x347   :  { %v3598_v44 = vpack.c.bf16 %v3332_v60, %v3318_v48  ;;  %v2690_v23 = vpop.f32.mrb[4].mxu0 }
 0x348   :  { %v3695_v18 = vmax.bf16 %v3597_v14, %v14192_v16  ;;  %v2691_v12 = vadd.f32 %v2690_v23, %v12542_v55  ;;  %v2692_v0 = vpop.f32.mrb[5].mxu0 }
 0x349   :  { %v3696_v63 = vmax.bf16 %v3598_v44, %v14197_v13  ;;  %v2693_v38 = vadd.f32 %v2692_v0, %v12542_v55  ;;  %v2694_v47 = vpop.f32.mrb[6].mxu0  ;;  %10365 = vmatmul.mubr.msk.bf16.vlgmr.msra.gmra.mrb[56].mxu1 %vm4002_vm1, %v11106_v57  ;;  %v11108_v13 = vld [vmem:[%s15217_s3 + $0x258] sm:$0xff]  }
 0x34a   :  { %v2695_v24 = vadd.f32 %v2694_v47, %v12550_v36  ;;  %10413 = vmatpush3.bf16.msra.mxu1 %v5759_v4  ;;  %v2696_v50 = vpop.f32.mrb[7].mxu0  ;;  %10368 = vmatprep.mubr.msk.bf16.mxu1 %vm4002_vm1, %v11107_v42  ;;  %v3345_v16 = vmax.f32 %v2691_v12, 0.0  ;;  %v11109_v4 = vld [vmem:[%s15217_s3 + $0x260] sm:$0xff]  }
 0x34b   :  { %v2697_v35 = vadd.f32 %v2696_v50, %v12550_v36  ;;  %v5760_v56 = vmax.bf16 %v3696_v63, %v3695_v18  ;;  %v3346_v3 = vmax.f32 %v2693_v38, 0.0  ;;  %v11111_v50 = vld [vmem:[%s15217_s3 + $0x270] sm:$0xff]  }
 0x34c   :  { %v3359_v8 = vmax.f32 %v2695_v24, 0.0 }
 0x34d   :  { %v3360_v53 = vmax.f32 %v2697_v35, 0.0  ;;  %10414 = vmatprep.subr.bf16.mxu1 %v5760_v56 }
 0x34e   :  { %v3611_v62 = vpack.c.bf16 %v3359_v8, %v3345_v16  ;;  %10415 = vmatpush3.bf16.msra.mxu1 %v5760_v56 }
 0x34f   :  { %v3612_v22 = vpack.c.bf16 %v3360_v53, %v3346_v3  ;;  %v2700_v40 = vpop.f32.mrb[8].mxu0 }
 0x350   :  { %v3709_v48 = vmax.bf16 %v3611_v62, %v14208_v45  ;;  %v2701_v60 = vadd.f32 %v2700_v40, %v12572_v7  ;;  %v2702_v57 = vpop.f32.mrb[9].mxu0 }
 0x351   :  { %v3710_v14 = vmax.bf16 %v3612_v22, %v14213_v46  ;;  %v2703_v42 = vadd.f32 %v2702_v57, %v12572_v7  ;;  %v2704_v44 = vpop.f32.mrb[10].mxu0  ;;  %10369 = vmatmul.mubr.msk.bf16.gmra.mrb[60].mxu1 %vm4002_vm1, %v11108_v13  ;;  %v11110_v46 = vld [vmem:[%s15217_s3 + $0x268] sm:$0xff]  }
 0x352   :  { %v2705_v23 = vadd.f32 %v2704_v44, %v15378_v25  ;;  %v2706_v18 = vpop.f32.mrb[11].mxu0  ;;  %10372 = vmatprep.mubr.msk.bf16.mxu1 %vm4002_vm1, %v11109_v4  ;;  %v3373_v63 = vmax.f32 %v2701_v60, 0.0  ;;  %v11113_v44 = vld [vmem:[%s15217_s3 + $0x280] sm:$0xff]  }
 0x353   :  { %v2707_v12 = vadd.f32 %v2706_v18, %v15378_v25  ;;  %v5761_v0 = vmax.bf16 %v3710_v14, %v3709_v48  ;;  %v3374_v38 = vmax.f32 %v2703_v42, 0.0 }
 0x354   :  { %v3387_v45 = vmax.f32 %v2705_v23, 0.0 }
 0x355   :  { %v3388_v47 = vmax.f32 %v2707_v12, 0.0  ;;  %10416 = vmatprep.subr.bf16.mxu1 %v5761_v0 }
 0x356   :  { %v3625_v24 = vpack.c.bf16 %v3387_v45, %v3373_v63  ;;  %10417 = vmatpush3.bf16.msra.mxu1 %v5761_v0 }
 0x357   :  { %v3626_v35 = vpack.c.bf16 %v3388_v47, %v3374_v38  ;;  %v2710_v56 = vpop.f32.mrb[12].mxu0 }
 0x358   :  { %v3723_v16 = vmax.bf16 %v3625_v24, %v14224_v10  ;;  %v2711_v8 = vadd.f32 %v2710_v56, %v15363_v37  ;;  %v2712_v3 = vpop.f32.mrb[13].mxu0 }
 0x359   :  { %v3724_v53 = vmax.bf16 %v3626_v35, %v14229_v26  ;;  %v2713_v13 = vadd.f32 %v2712_v3, %v15363_v37  ;;  %v2714_v62 = vpop.f32.mrb[14].mxu0  ;;  %10373 = vmatmul.mubr.msk.bf16.gmra.mrb[64].mxu1 %vm4002_vm1, %v11110_v46  ;;  %v11112_v26 = vld [vmem:[%s15217_s3 + $0x278] sm:$0xff]  }
 0x35a   :  { %v2715_v4 = vadd.f32 %v2714_v62, %v15364_v29  ;;  %v2716_v22 = vpop.f32.mrb[15].mxu0  ;;  %10376 = vmatprep.mubr.msk.bf16.mxu1 %vm4002_vm1, %v11111_v50  ;;  %v3401_v60 = vmax.f32 %v2711_v8, 0.0 }
 0x35b   :  { %v2717_v40 = vadd.f32 %v2716_v22, %v15364_v29  ;;  %v5762_v48 = vmax.bf16 %v3724_v53, %v3723_v16  ;;  %v3402_v57 = vmax.f32 %v2713_v13, 0.0  ;;  %v11115_v53 = vld [vmem:[%s15217_s3 + $0x290] sm:$0xff]  }
 0x35c   :  { %v3415_v10 = vmax.f32 %v2715_v4, 0.0 }
 0x35d   :  { %v3416_v14 = vmax.f32 %v2717_v40, 0.0  ;;  %10418 = vmatprep.subr.bf16.mxu1 %v5762_v48 }
 0x35e   :  { %v3639_v42 = vpack.c.bf16 %v3415_v10, %v3401_v60  ;;  %10419 = vmatpush3.bf16.msra.mxu1 %v5762_v48 }
 0x35f   :  { %v3640_v23 = vpack.c.bf16 %v3416_v14, %v3402_v57  ;;  %v2720_v18 = vpop.f32.mrb[16].mxu0 }
 0x360   :  { %v3737_v12 = vmax.bf16 %v3639_v42, %v14240_v43  ;;  %v2721_v0 = vadd.f32 %v2720_v18, %v12668_v34  ;;  %v2722_v63 = vpop.f32.mrb[17].mxu0 }
 0x361   :  { %v3738_v45 = vmax.bf16 %v3640_v23, %v14245_v39  ;;  %v2723_v38 = vadd.f32 %v2722_v63, %v12668_v34  ;;  %v2724_v47 = vpop.f32.mrb[18].mxu0  ;;  %10377 = vmatmul.mubr.msk.bf16.gmra.mrb[68].mxu1 %vm4002_vm1, %v11112_v26  ;;  %v11114_v39 = vld [vmem:[%s15217_s3 + $0x288] sm:$0xff]  }
 0x362   :  { %v2725_v46 = vadd.f32 %v2724_v47, %v12682_v41  ;;  %v2726_v24 = vpop.f32.mrb[19].mxu0  ;;  %10380 = vmatprep.mubr.msk.bf16.mxu1 %vm4002_vm1, %v11113_v44  ;;  %v3429_v56 = vmax.f32 %v2721_v0, 0.0  ;;  %v11117_v0 = vld [vmem:[%s15217_s3 + $0x2a0] sm:$0xff]  }
 0x363   :  { %v2727_v50 = vadd.f32 %v2726_v24, %v12682_v41  ;;  %v5763_v35 = vmax.bf16 %v3738_v45, %v3737_v12  ;;  %v3430_v16 = vmax.f32 %v2723_v38, 0.0 }
 0x364   :  { %v3443_v43 = vmax.f32 %v2725_v46, 0.0 }
 0x365   :  { %v3444_v8 = vmax.f32 %v2727_v50, 0.0  ;;  %10420 = vmatprep.subr.bf16.mxu1 %v5763_v35 }
 0x366   :  { %v3653_v3 = vpack.c.bf16 %v3443_v43, %v3429_v56  ;;  %10421 = vmatpush3.bf16.msra.mxu1 %v5763_v35 }
 0x367   :  { %v3654_v13 = vpack.c.bf16 %v3444_v8, %v3430_v16  ;;  %v2730_v62 = vpop.f32.mrb[20].mxu0 }
 0x368   :  { %v3751_v4 = vmax.bf16 %v3653_v3, %v14256_v11  ;;  %v2731_v22 = vadd.f32 %v2730_v62, %v12710_v6  ;;  %v2732_v40 = vpop.f32.mrb[21].mxu0 }
 0x369   :  { %v3752_v48 = vmax.bf16 %v3654_v13, %v14261_v15  ;;  %v2733_v60 = vadd.f32 %v2732_v40, %v12710_v6  ;;  %v2734_v10 = vpop.f32.mrb[22].mxu0  ;;  %10381 = vmatmul.mubr.msk.bf16.gmra.mrb[72].mxu1 %vm4002_vm1, %v11114_v39  ;;  %v11116_v15 = vld [vmem:[%s15217_s3 + $0x298] sm:$0xff]   ;;  %v11119_v13 = vld [vmem:[%s15217_s3 + $0x2b0] sm:$0xff]  }
 0x36a   :  { %v2735_v57 = vadd.f32 %v2734_v10, %v12718_v2  ;;  %v2736_v14 = vpop.f32.mrb[23].mxu0  ;;  %10384 = vmatprep.mubr.msk.bf16.mxu1 %vm4002_vm1, %v11115_v53  ;;  %v3457_v44 = vmax.f32 %v2731_v22, 0.0 }
 0x36b   :  { %v2737_v26 = vadd.f32 %v2736_v14, %v12718_v2  ;;  %v5764_v42 = vmax.bf16 %v3752_v48, %v3751_v4  ;;  %v3458_v23 = vmax.f32 %v2733_v60, 0.0  ;;  %v15383_v4 = vld [vmem:[#allocation28_spill] sm:$0xff] }
 0x36c   :  { %v3471_v11 = vmax.f32 %v2735_v57, 0.0 }
 0x36d   :  { %v3472_v18 = vmax.f32 %v2737_v26, 0.0  ;;  %10422 = vmatprep.subr.bf16.mxu1 %v5764_v42 }
 0x36e   :  { %v3667_v12 = vpack.c.bf16 %v3471_v11, %v3457_v44  ;;  %10423 = vmatpush3.bf16.msra.mxu1 %v5764_v42 }
 0x36f   :  { %v3668_v63 = vpack.c.bf16 %v3472_v18, %v3458_v23  ;;  %v2946_v45 = vpop.f32.mrb[24].mxu0  ;;  %v11120_v23 = vld [vmem:[%s15217_s3 + $0x2b8] sm:$0xff]  }
 0x370   :  { %v3765_v38 = vmax.bf16 %v3667_v12, %v14272_v21  ;;  %v2947_v47 = vadd.f32 %v2946_v45, %v12461_v58  ;;  %v2948_v46 = vpop.f32.mrb[25].mxu0 }
 0x371   :  { %v3766_v24 = vmax.bf16 %v3668_v63, %v14277_v5  ;;  %v2949_v50 = vadd.f32 %v2948_v46, %v12461_v58  ;;  %v2950_v35 = vpop.f32.mrb[26].mxu0  ;;  %10385 = vmatmul.mubr.msk.bf16.gmra.mrb[76].mxu1 %vm4002_vm1, %v11116_v15  ;;  %v11118_v58 = vld [vmem:[%s15217_s3 + $0x2a8] sm:$0xff]  }
 0x372   :  { %v2951_v56 = vadd.f32 %v2950_v35, %v15324_v30  ;;  %v2952_v43 = vpop.f32.mrb[27].mxu0  ;;  %10388 = vmatprep.mubr.msk.bf16.mxu1 %vm4002_vm1, %v11117_v0  ;;  %v3097_v39 = vmax.f32 %v2947_v47, 0.0 }
 0x373   :  { %v2953_v16 = vadd.f32 %v2952_v43, %v15324_v30  ;;  %v5765_v8 = vmax.bf16 %v3766_v24, %v3765_v38  ;;  %v3098_v3 = vmax.f32 %v2949_v50, 0.0  ;;  %v11122_v43 = vld [vmem:[%s15217_s3 + $0x2c8] sm:$0xff]  }
 0x374   :  { %v3111_v21 = vmax.f32 %v2951_v56, 0.0 }
 0x375   :  { %v3112_v53 = vmax.f32 %v2953_v16, 0.0  ;;  %10424 = vmatprep.subr.bf16.mxu1 %v5765_v8 }
 0x376   :  { %v14386_v5 = vpack.c.bf16 %v3111_v21, %v3097_v39  ;;  %10425 = vmatpush3.bf16.msra.mxu1 %v5765_v8 }
 0x377   :  { %v14391_v62 = vpack.c.bf16 %v3112_v53, %v3098_v3  ;;  %v2956_v30 = vpop.f32.mrb[28].mxu0  ;;  %10474 = vmatprep.subr.bf16.mxu1 %v15383_v4 }
 0x378   :  { %v2957_v22 = vadd.f32 %v2956_v30, %v15330_v17  ;;  %v2958_v40 = vpop.f32.mrb[29].mxu0 }
 0x379   :  { %v2959_v48 = vadd.f32 %v2958_v40, %v15330_v17  ;;  %v2960_v60 = vpop.f32.mrb[30].mxu0  ;;  %10389 = vmatmul.mubr.msk.bf16.gmra.mrb[80].mxu1 %vm4002_vm1, %v11118_v58  ;;  %v11121_v17 = vld [vmem:[%s15217_s3 + $0x2c0] sm:$0xff]  }
 0x37a   :  { %v2961_v10 = vadd.f32 %v2960_v60, %v15331_v31  ;;  %v2962_v57 = vpop.f32.mrb[31].mxu0  ;;  %10392 = vmatprep.mubr.msk.bf16.mxu1 %vm4002_vm1, %v11119_v13  ;;  %v3125_v26 = vmax.f32 %v2957_v22, 0.0 }
 0x37b   :  { %v2963_v14 = vadd.f32 %v2962_v57, %v15331_v31  ;;  %v3126_v44 = vmax.f32 %v2959_v48, 0.0 }
 0x37c   :  { %v3139_v42 = vmax.f32 %v2961_v10, 0.0  ;;  %v11124_v10 = vld [vmem:[%s15217_s3 + $0x2d8] sm:$0xff]  }
 0x37d   :  { %v3140_v11 = vmax.f32 %v2963_v14, 0.0 }
 0x37e   :  { %v14403_v18 = vpack.c.bf16 %v3139_v42, %v3125_v26 }
 0x37f   :  { %v14408_v15 = vpack.c.bf16 %v3140_v11, %v3126_v44  ;;  %v2966_v12 = vpop.f32.mrb[32].mxu0 }
 0x380   :  { %v2967_v0 = vadd.f32 %v2966_v12, %v15335_v19  ;;  %v2968_v31 = vpop.f32.mrb[33].mxu0 }
 0x381   :  { %v2969_v63 = vadd.f32 %v2968_v31, %v15335_v19  ;;  %v2970_v45 = vpop.f32.mrb[34].mxu0  ;;  %10393 = vmatmul.mubr.msk.bf16.gmra.mrb[84].mxu1 %vm4002_vm1, %v11120_v23  ;;  %v11123_v19 = vld [vmem:[%s15217_s3 + $0x2d0] sm:$0xff]  }
 0x382   :  { %v2971_v38 = vadd.f32 %v2970_v45, %v15336_v9  ;;  %v2972_v47 = vpop.f32.mrb[35].mxu0  ;;  %10396 = vmatprep.mubr.msk.bf16.mxu1 %vm4002_vm1, %v11121_v17  ;;  %v3153_v24 = vmax.f32 %v2967_v0, 0.0 }
 0x383   :  { %v2973_v46 = vadd.f32 %v2972_v47, %v15336_v9  ;;  %v3154_v35 = vmax.f32 %v2969_v63, 0.0 }
 0x384   :  { %v3167_v50 = vmax.f32 %v2971_v38, 0.0  ;;  %v11126_v38 = vld [vmem:[%s15217_s3 + $0x2e8] sm:$0xff]  }
 0x385   :  { %v3168_v56 = vmax.f32 %v2973_v46, 0.0 }
 0x386   :  { %v14419_v16 = vpack.c.bf16 %v3167_v50, %v3153_v24 }
 0x387   :  { %v14424_v8 = vpack.c.bf16 %v3168_v56, %v3154_v35  ;;  %v2976_v39 = vpop.f32.mrb[36].mxu0 }
 0x388   :  { %v2977_v21 = vadd.f32 %v2976_v39, %v15340_v52  ;;  %v2978_v9 = vpop.f32.mrb[37].mxu0 }
 0x389   :  { %v2979_v3 = vadd.f32 %v2978_v9, %v15340_v52  ;;  %v2980_v53 = vpop.f32.mrb[38].mxu0  ;;  %10397 = vmatmul.mubr.msk.bf16.gmra.mrb[88].mxu1 %vm4002_vm1, %v11122_v43  ;;  %v11125_v52 = vld [vmem:[%s15217_s3 + $0x2e0] sm:$0xff]  }
 0x38a   :  { %v2981_v58 = vadd.f32 %v2980_v53, %v15341_v54  ;;  %v2982_v13 = vpop.f32.mrb[39].mxu0  ;;  %10400 = vmatprep.mubr.msk.bf16.mxu1 %vm4002_vm1, %v11123_v19  ;;  %v3181_v22 = vmax.f32 %v2977_v21, 0.0 }
 0x38b   :  { %v2983_v30 = vadd.f32 %v2982_v13, %v15341_v54  ;;  %v3182_v48 = vmax.f32 %v2979_v3, 0.0 }
 0x38c   :  { %v3195_v40 = vmax.f32 %v2981_v58, 0.0  ;;  %v11128_v58 = vld [vmem:[%s15217_s3 + $0x2f8] sm:$0xff]  }
 0x38d   :  { %v3196_v60 = vmax.f32 %v2983_v30, 0.0 }
 0x38e   :  { %v14435_v57 = vpack.c.bf16 %v3195_v40, %v3181_v22 }
 0x38f   :  { %v14440_v14 = vpack.c.bf16 %v3196_v60, %v3182_v48  ;;  %v2986_v26 = vpop.f32.mrb[40].mxu0 }
 0x390   :  { %v2987_v42 = vadd.f32 %v2986_v26, %v15345_v27  ;;  %v2988_v54 = vpop.f32.mrb[41].mxu0 }
 0x391   :  { %v2989_v44 = vadd.f32 %v2988_v54, %v15345_v27  ;;  %v2990_v11 = vpop.f32.mrb[42].mxu0  ;;  %10401 = vmatmul.mubr.msk.bf16.gmra.mrb[92].mxu1 %vm4002_vm1, %v11124_v10  ;;  %v11127_v27 = vld [vmem:[%s15217_s3 + $0x2f0] sm:$0xff]  }
 0x392   :  { %v2991_v23 = vadd.f32 %v2990_v11, %v15346_v1  ;;  %v2992_v17 = vpop.f32.mrb[43].mxu0  ;;  %10404 = vmatprep.mubr.msk.bf16.mxu1 %vm4002_vm1, %v11125_v52  ;;  %v3209_v0 = vmax.f32 %v2987_v42, 0.0 }
 0x393   :  { %v2993_v12 = vadd.f32 %v2992_v17, %v15346_v1  ;;  %v3210_v63 = vmax.f32 %v2989_v44, 0.0 }
 0x394   :  { %v3223_v31 = vmax.f32 %v2991_v23, 0.0  ;;  %v11130_v23 = vld [vmem:[%s15217_s3 + $0x308] sm:$0xff]  }
 0x395   :  { %v3224_v45 = vmax.f32 %v2993_v12, 0.0 }
 0x396   :  { %v14451_v47 = vpack.c.bf16 %v3223_v31, %v3209_v0 }
 0x397   :  { %v14456_v46 = vpack.c.bf16 %v3224_v45, %v3210_v63  ;;  %v2996_v24 = vpop.f32.mrb[44].mxu0 }
 0x398   :  { %v2997_v50 = vadd.f32 %v2996_v24, %v15367_v28  ;;  %v2998_v1 = vpop.f32.mrb[45].mxu0 }
 0x399   :  { %v2999_v35 = vadd.f32 %v2998_v1, %v15367_v28  ;;  %v3000_v56 = vpop.f32.mrb[46].mxu0  ;;  %10405 = vmatmul.mubr.msk.bf16.gmra.mrb[96].mxu1 %vm4002_vm1, %v11126_v38  ;;  %v11129_v28 = vld [vmem:[%s15217_s3 + $0x300] sm:$0xff]  }
 0x39a   :  { %v3001_v43 = vadd.f32 %v3000_v56, %v15368_v61  ;;  %v3002_v19 = vpop.f32.mrb[47].mxu0  ;;  %10408 = vmatprep.mubr.msk.bf16.mxu1 %vm4002_vm1, %v11127_v27  ;;  %v3237_v21 = vmax.f32 %v2997_v50, 0.0  ;;  %v15384_v50 = vld [vmem:[#allocation29_spill] sm:$0xff] }
 0x39b   :  { %v3003_v39 = vadd.f32 %v3002_v19, %v15368_v61  ;;  %v3238_v3 = vmax.f32 %v2999_v35, 0.0 }
 0x39c   :  { %v3251_v9 = vmax.f32 %v3001_v43, 0.0 }
 0x39d   :  { %v3252_v53 = vmax.f32 %v3003_v39, 0.0 }
 0x39e   :  { %v14467_v13 = vpack.c.bf16 %v3251_v9, %v3237_v21  ;;  %v15385_v21 = vld [vmem:[#allocation4_spill] sm:$0xff] }
 0x39f   :  { %v14472_v30 = vpack.c.bf16 %v3252_v53, %v3238_v3  ;;  %v3006_v22 = vpop.f32.mrb[48].mxu0 }
 0x3a0   :  { %v3007_v40 = vadd.f32 %v3006_v22, %v15371_v49  ;;  %v3008_v61 = vpop.f32.mrb[49].mxu0 }
 0x3a1   :  { %v3009_v48 = vadd.f32 %v3008_v61, %v15371_v49  ;;  %v3010_v60 = vpop.f32.mrb[50].mxu0  ;;  %10409 = vmatmul.mubr.msk.bf16.gmra.mrb[100].mxu1 %vm4002_vm1, %v11128_v58  ;;  %v11131_v49 = vld [vmem:[%s15217_s3 + $0x310] sm:$0xff]  }
 0x3a2   :  { %v3011_v10 = vadd.f32 %v3010_v60, %v15372_v20  ;;  %v3012_v52 = vpop.f32.mrb[51].mxu0  ;;  %10426 = vmatprep.mubr.msk.bf16.mxu1 %vm4002_vm1, %v11129_v28  ;;  %v3265_v42 = vmax.f32 %v3007_v40, 0.0 }
 0x3a3   :  { %v3013_v26 = vadd.f32 %v3012_v52, %v15372_v20  ;;  %v3266_v44 = vmax.f32 %v3009_v48, 0.0 }
 0x3a4   :  { %v3279_v54 = vmax.f32 %v3011_v10, 0.0 }
 0x3a5   :  { %v3280_v11 = vmax.f32 %v3013_v26, 0.0  ;;  %v11134_v26 = vld [vmem:[%s15217_s3 + $0x328] sm:$0xff]  }
 0x3a6   :  { %v14483_v17 = vpack.c.bf16 %v3279_v54, %v3265_v42  ;;  %v11135_v54 = vld [vmem:[%s15217_s3 + $0x330] sm:$0xff]  }
 0x3a7   :  { %v14488_v12 = vpack.c.bf16 %v3280_v11, %v3266_v44  ;;  %v3016_v0 = vpop.f32.mrb[52].mxu0  ;;  %v15387_v44 = vld [vmem:[#allocation31_spill] sm:$0xff] }
 0x3a8   :  { %v3017_v31 = vadd.f32 %v3016_v0, %v15375_v59  ;;  %v3018_v20 = vpop.f32.mrb[53].mxu0 }
 0x3a9   :  { %v3019_v63 = vadd.f32 %v3018_v20, %v15375_v59  ;;  %v3020_v45 = vpop.f32.mrb[54].mxu0  ;;  %10427 = vmatmul.mubr.msk.bf16.vlgmr.msra.gmra.mrb[56].mxu1 %vm4002_vm1, %v11130_v23  ;;  %v11132_v59 = vld [vmem:[%s15217_s3 + $0x318] sm:$0xff]  }
 0x3aa   :  { %v3021_v38 = vadd.f32 %v3020_v45, %v15376_v51  ;;  %10475 = vmatpush3.bf16.msra.mxu1 %v15383_v4  ;;  %v3022_v27 = vpop.f32.mrb[55].mxu0  ;;  %10430 = vmatprep.mubr.msk.bf16.mxu1 %vm4002_vm1, %v11131_v49  ;;  %v3293_v1 = vmax.f32 %v3017_v31, 0.0  ;;  %v11133_v4 = vld [vmem:[%s15217_s3 + $0x320] sm:$0xff]  }
 0x3ab   :  { %v3023_v24 = vadd.f32 %v3022_v27, %v15376_v51  ;;  %10476 = vmatprep.subr.bf16.mxu1 %v15384_v50  ;;  %v3294_v56 = vmax.f32 %v3019_v63, 0.0 }
 0x3ac   :  { %v3307_v35 = vmax.f32 %v3021_v38, 0.0 }
 0x3ad   :  { %v3308_v43 = vmax.f32 %v3023_v24, 0.0 }
 0x3ae   :  { %v3587_v19 = vpack.c.bf16 %v3307_v35, %v3293_v1  ;;  %10477 = vmatpush3.bf16.msra.mxu1 %v15384_v50  ;;  %v11136_v35 = vld [vmem:[%s15217_s3 + $0x338] sm:$0xff]  }
 0x3af   :  { %v3588_v39 = vpack.c.bf16 %v3308_v43, %v3294_v56  ;;  %10478 = vmatprep.subr.bf16.mxu1 %v15385_v21  ;;  %v3026_v51 = vpop.f32.mrb[56].mxu0  ;;  %v11137_v43 = vld [vmem:[%s15217_s3 + $0x340] sm:$0xff]  }
 0x3b0   :  { %v3685_v9 = vmax.bf16 %v3587_v19, %v14386_v5  ;;  %v3027_v3 = vadd.f32 %v3026_v51, %v12511_v33  ;;  %v3028_v53 = vpop.f32.mrb[57].mxu0  ;;  %v15386_v5 = vld [vmem:[#allocation30_spill] sm:$0xff] }
 0x3b1   :  { %v3686_v58 = vmax.bf16 %v3588_v39, %v14391_v62  ;;  %v3029_v28 = vadd.f32 %v3028_v53, %v12511_v33  ;;  %v3030_v22 = vpop.f32.mrb[58].mxu0  ;;  %10431 = vmatmul.mubr.msk.bf16.gmra.mrb[60].mxu1 %vm4002_vm1, %v11132_v59  ;;  %v15389_v59 = vld [vmem:[#allocation7_spill] sm:$0xff] }
 0x3b2   :  { %v3031_v40 = vadd.f32 %v3030_v22, %v12521_v32  ;;  %10479 = vmatpush3.bf16.msra.mxu1 %v15385_v21  ;;  %v3032_v61 = vpop.f32.mrb[59].mxu0  ;;  %10434 = vmatprep.mubr.msk.bf16.mxu1 %vm4002_vm1, %v11133_v4  ;;  %v3321_v10 = vmax.f32 %v3027_v3, 0.0 }
 0x3b3   :  { %v3033_v48 = vadd.f32 %v3032_v61, %v12521_v32  ;;  %10480 = vmatprep.subr.bf16.mxu1 %v15386_v5  ;;  %v14516_v60 = vmax.bf16 %v3686_v58, %v3685_v9  ;;  %v3322_v52 = vmax.f32 %v3029_v28, 0.0  ;;  %v11138_v61 = vld [vmem:[%s15217_s3 + $0x348] sm:$0xff]  }
 0x3b4   :  { %v3335_v62 = vmax.f32 %v3031_v40, 0.0 }
 0x3b5   :  { %v3336_v33 = vmax.f32 %v3033_v48, 0.0 }
 0x3b6   :  { %v3601_v42 = vpack.c.bf16 %v3335_v62, %v3321_v10  ;;  %10481 = vmatpush3.bf16.msra.mxu1 %v15386_v5  ;;  %v11139_v5 = vld [vmem:[%s15217_s3 + $0x350] sm:$0xff]  }
 0x3b7   :  { %v3602_v32 = vpack.c.bf16 %v3336_v33, %v3322_v52  ;;  %10482 = vmatprep.subr.bf16.mxu1 %v15387_v44  ;;  %v3036_v11 = vpop.f32.mrb[60].mxu0 }
 0x3b8   :  { %v3699_v23 = vmax.bf16 %v3601_v42, %v14403_v18  ;;  %v3037_v49 = vadd.f32 %v3036_v11, %v12542_v55  ;;  %v3038_v0 = vpop.f32.mrb[61].mxu0  ;;  %v15388_v18 = vld [vmem:[#allocation6_spill] sm:$0xff] }
 0x3b9   :  { %v3700_v31 = vmax.bf16 %v3602_v32, %v14408_v15  ;;  %v3039_v20 = vadd.f32 %v3038_v0, %v12542_v55  ;;  %v3040_v63 = vpop.f32.mrb[62].mxu0  ;;  %10435 = vmatmul.mubr.msk.bf16.gmra.mrb[64].mxu1 %vm4002_vm1, %v11134_v26 }
 0x3ba   :  { %v3041_v45 = vadd.f32 %v3040_v63, %v12550_v36  ;;  %10483 = vmatpush3.bf16.msra.mxu1 %v15387_v44  ;;  %v3042_v38 = vpop.f32.mrb[63].mxu0  ;;  %10438 = vmatprep.mubr.msk.bf16.mxu1 %vm4002_vm1, %v11135_v54  ;;  %v3349_v50 = vmax.f32 %v3037_v49, 0.0 }
 0x3bb   :  { %v3043_v27 = vadd.f32 %v3042_v38, %v12550_v36  ;;  %10484 = vmatprep.subr.bf16.mxu1 %v15388_v18  ;;  %v14536_v24 = vmax.bf16 %v3700_v31, %v3699_v23  ;;  %v3350_v1 = vmax.f32 %v3039_v20, 0.0  ;;  %v11141_v20 = vld [vmem:[%s15217_s3 + $0x360] sm:$0xff]  }
 0x3bc   :  { %v3363_v15 = vmax.f32 %v3041_v45, 0.0 }
 0x3bd   :  { %v3364_v55 = vmax.f32 %v3043_v27, 0.0 }
 0x3be   :  { %v3615_v56 = vpack.c.bf16 %v3363_v15, %v3349_v50  ;;  %10485 = vmatpush3.bf16.msra.mxu1 %v15388_v18 }
 0x3bf   :  { %v3616_v36 = vpack.c.bf16 %v3364_v55, %v3350_v1  ;;  %10486 = vmatprep.subr.bf16.mxu1 %v15389_v59  ;;  %v3046_v19 = vpop.f32.mrb[64].mxu0 }
 0x3c0   :  { %v3713_v4 = vmax.bf16 %v3615_v56, %v14419_v16  ;;  %v3047_v39 = vadd.f32 %v3046_v19, %v12572_v7  ;;  %v3048_v21 = vpop.f32.mrb[65].mxu0  ;;  %v11143_v19 = vld [vmem:[%s15217_s3 + $0x370] sm:$0xff]  }
 0x3c1   :  { %v3714_v51 = vmax.bf16 %v3616_v36, %v14424_v8  ;;  %v3049_v9 = vadd.f32 %v3048_v21, %v12572_v7  ;;  %v3050_v3 = vpop.f32.mrb[66].mxu0  ;;  %10439 = vmatmul.mubr.msk.bf16.gmra.mrb[68].mxu1 %vm4002_vm1, %v11136_v35 }
 0x3c2   :  { %v3051_v53 = vadd.f32 %v3050_v3, %v15378_v25  ;;  %10487 = vmatpush3.bf16.msra.mxu1 %v15389_v59  ;;  %v3052_v58 = vpop.f32.mrb[67].mxu0  ;;  %10442 = vmatprep.mubr.msk.bf16.mxu1 %vm4002_vm1, %v11137_v43  ;;  %v3377_v22 = vmax.f32 %v3047_v39, 0.0 }
 0x3c3   :  { %v3053_v28 = vadd.f32 %v3052_v58, %v15378_v25  ;;  %10536 = vmatprep.subr.bf16.mxu1 %v14516_v60  ;;  %v14556_v16 = vmax.bf16 %v3714_v51, %v3713_v4  ;;  %v3378_v40 = vmax.f32 %v3049_v9, 0.0 }
 0x3c4   :  { %v3391_v8 = vmax.f32 %v3051_v53, 0.0 }
 0x3c5   :  { %v3392_v7 = vmax.f32 %v3053_v28, 0.0 }
 0x3c6   :  { %v3629_v48 = vpack.c.bf16 %v3391_v8, %v3377_v22 }
 0x3c7   :  { %v3630_v10 = vpack.c.bf16 %v3392_v7, %v3378_v40  ;;  %v3056_v62 = vpop.f32.mrb[68].mxu0 }
 0x3c8   :  { %v3727_v25 = vmax.bf16 %v3629_v48, %v14435_v57  ;;  %v3057_v52 = vadd.f32 %v3056_v62, %v15363_v37  ;;  %v3058_v33 = vpop.f32.mrb[69].mxu0  ;;  %v11145_v48 = vld [vmem:[%s15217_s3 + $0x380] sm:$0xff]  }
 0x3c9   :  { %v3728_v26 = vmax.bf16 %v3630_v10, %v14440_v14  ;;  %v3059_v42 = vadd.f32 %v3058_v33, %v15363_v37  ;;  %v3060_v54 = vpop.f32.mrb[70].mxu0  ;;  %10443 = vmatmul.mubr.msk.bf16.gmra.mrb[72].mxu1 %vm4002_vm1, %v11138_v61  ;;  %v11140_v37 = vld [vmem:[%s15217_s3 + $0x358] sm:$0xff]   ;;  %v11150_v33 = vld [vmem:[%s15217_s3 + $0x3a8] sm:$0xff]  }
 0x3ca   :  { %v3061_v32 = vadd.f32 %v3060_v54, %v15364_v29  ;;  %v3062_v44 = vpop.f32.mrb[71].mxu0  ;;  %10446 = vmatprep.mubr.msk.bf16.mxu1 %vm4002_vm1, %v11139_v5  ;;  %v3405_v57 = vmax.f32 %v3057_v52, 0.0  ;;  %v11147_v52 = vld [vmem:[%s15217_s3 + $0x390] sm:$0xff]   ;;  %v11153_v54 = vld [vmem:[%s15217_s3 + $0x3c0] sm:$0xff]  }
 0x3cb   :  { %v3063_v11 = vadd.f32 %v3062_v44, %v15364_v29  ;;  %v14572_v23 = vmax.bf16 %v3728_v26, %v3727_v25  ;;  %v3406_v0 = vmax.f32 %v3059_v42, 0.0  ;;  %v11146_v25 = vld [vmem:[%s15217_s3 + $0x388] sm:$0xff]   ;;  %v11151_v26 = vld [vmem:[%s15217_s3 + $0x3b0] sm:$0xff]   ;;  %v11152_v42 = vld [vmem:[%s15217_s3 + $0x3b8] sm:$0xff]  }
 0x3cc   :  { %v3419_v49 = vmax.f32 %v3061_v32, 0.0  ;;  %v11154_v32 = vld [vmem:[%s15217_s3 + $0x3c8] sm:$0xff]   ;;  %v11155_v44 = vld [vmem:[%s15217_s3 + $0x3d0] sm:$0xff]  }
 0x3cd   :  { %v3420_v31 = vmax.f32 %v3063_v11, 0.0  ;;  %v11156_v11 = vld [vmem:[%s15217_s3 + $0x3d8] sm:$0xff]  }
 0x3ce   :  { %v3643_v14 = vpack.c.bf16 %v3419_v49, %v3405_v57  ;;  %v11157_v57 = vld [vmem:[%s15217_s3 + $0x3e0] sm:$0xff]   ;;  %v11162_v49 = vld [vmem:[%s15217_s3 + $0x408] sm:$0xff]  }
 0x3cf   :  { %v3644_v63 = vpack.c.bf16 %v3420_v31, %v3406_v0  ;;  %v3066_v45 = vpop.f32.mrb[72].mxu0  ;;  %v11163_v0 = vld [vmem:[%s15217_s3 + $0x410] sm:$0xff]   ;;  %v11164_v31 = vld [vmem:[%s15217_s3 + $0x418] sm:$0xff]  }
 0x3d0   :  { %v3741_v38 = vmax.bf16 %v3643_v14, %v14451_v47  ;;  %v3067_v29 = vadd.f32 %v3066_v45, %v12668_v34  ;;  %v3068_v27 = vpop.f32.mrb[73].mxu0  ;;  %v11166_v14 = vld [vmem:[%s15217_s3 + $0x428] sm:$0xff]   ;;  %v11169_v45 = vld [vmem:[%s15217_s3 + $0x440] sm:$0xff]  }
 0x3d1   :  { %v3742_v18 = vmax.bf16 %v3644_v63, %v14456_v46  ;;  %v3069_v50 = vadd.f32 %v3068_v27, %v12668_v34  ;;  %v3070_v15 = vpop.f32.mrb[74].mxu0  ;;  %10447 = vmatmul.mubr.msk.bf16.gmra.mrb[76].mxu1 %vm4002_vm1, %v11140_v37  ;;  %v11142_v34 = vld [vmem:[%s15217_s3 + $0x368] sm:$0xff]   ;;  %v11165_v37 = vld [vmem:[%s15217_s3 + $0x420] sm:$0xff]   ;;  %v11168_v63 = vld [vmem:[%s15217_s3 + $0x438] sm:$0xff]  }
 0x3d2   :  { %v3071_v1 = vadd.f32 %v3070_v15, %v12682_v41  ;;  %v3072_v55 = vpop.f32.mrb[75].mxu0  ;;  %10450 = vmatprep.mubr.msk.bf16.mxu1 %vm4002_vm1, %v11141_v20  ;;  %v3433_v47 = vmax.f32 %v3067_v29, 0.0  ;;  %v11167_v20 = vld [vmem:[%s15217_s3 + $0x430] sm:$0xff]   ;;  %v11172_v27 = vld [vmem:[%s15217_s3 + $0x458] sm:$0xff]  }
 0x3d3   :  { %v3073_v35 = vadd.f32 %v3072_v55, %v12682_v41  ;;  %v14588_v56 = vmax.bf16 %v3742_v18, %v3741_v38  ;;  %v3434_v36 = vmax.f32 %v3069_v50, 0.0  ;;  %v11170_v38 = vld [vmem:[%s15217_s3 + $0x448] sm:$0xff]   ;;  %v11171_v29 = vld [vmem:[%s15217_s3 + $0x450] sm:$0xff]   ;;  %v11173_v18 = vld [vmem:[%s15217_s3 + $0x460] sm:$0xff]  }
 0x3d4   :  { %v3447_v43 = vmax.f32 %v3071_v1, 0.0  ;;  %v11174_v50 = vld [vmem:[%s15217_s3 + $0x468] sm:$0xff]   ;;  %v11175_v15 = vld [vmem:[%s15217_s3 + $0x470] sm:$0xff]   ;;  %v11176_v1 = vld [vmem:[%s15217_s3 + $0x478] sm:$0xff]  }
 0x3d5   :  { %v3448_v59 = vmax.f32 %v3073_v35, 0.0  ;;  %v11177_v55 = vld [vmem:[%s15217_s3 + $0x480] sm:$0xff]   ;;  %v11178_v35 = vld [vmem:[%s15217_s3 + $0x488] sm:$0xff]  }
 0x3d6   :  { %v3657_v46 = vpack.c.bf16 %v3447_v43, %v3433_v47  ;;  %v11180_v47 = vld [vmem:[%s15217_s3 + $0x498] sm:$0xff]   ;;  %v11181_v43 = vld [vmem:[%s15217_s3 + $0x4a0] sm:$0xff]  }
 0x3d7   :  { %v3658_v4 = vpack.c.bf16 %v3448_v59, %v3434_v36  ;;  %v3076_v39 = vpop.f32.mrb[76].mxu0  ;;  %v11182_v36 = vld [vmem:[%s15217_s3 + $0x4a8] sm:$0xff]   ;;  %v11183_v59 = vld [vmem:[%s15217_s3 + $0x4b0] sm:$0xff]  }
 0x3d8   :  { %v3755_v21 = vmax.bf16 %v3657_v46, %v14467_v13  ;;  %v3077_v41 = vadd.f32 %v3076_v39, %v12710_v6  ;;  %v3078_v51 = vpop.f32.mrb[77].mxu0  ;;  %v11185_v46 = vld [vmem:[%s15217_s3 + $0x4c0] sm:$0xff]   ;;  %v11188_v39 = vld [vmem:[%s15217_s3 + $0x4d8] sm:$0xff]  }
 0x3d9   :  { %v3756_v9 = vmax.bf16 %v3658_v4, %v14472_v30  ;;  %v3079_v3 = vadd.f32 %v3078_v51, %v12710_v6  ;;  %v3080_v53 = vpop.f32.mrb[78].mxu0  ;;  %10451 = vmatmul.mubr.msk.bf16.gmra.mrb[80].mxu1 %vm4002_vm1, %v11142_v34  ;;  %v11144_v30 = vld [vmem:[%s15217_s3 + $0x378] sm:$0xff]   ;;  %v11187_v4 = vld [vmem:[%s15217_s3 + $0x4d0] sm:$0xff]  }
 0x3da   :  { %v3081_v58 = vadd.f32 %v3080_v53, %v12718_v2  ;;  %v3082_v28 = vpop.f32.mrb[79].mxu0  ;;  %10454 = vmatprep.mubr.msk.bf16.mxu1 %vm4002_vm1, %v11143_v19  ;;  %v3461_v40 = vmax.f32 %v3077_v41, 0.0  ;;  %v11184_v34 = vld [vmem:[%s15217_s3 + $0x4b8] sm:$0xff]   ;;  %v11186_v19 = vld [vmem:[%s15217_s3 + $0x4c8] sm:$0xff]   ;;  %v11191_v51 = vld [vmem:[%s15217_s3 + $0x4f0] sm:$0xff]  }
 0x3db   :  { %v3083_v22 = vadd.f32 %v3082_v28, %v12718_v2  ;;  %v6806_v8 = vmax.bf16 %v3756_v9, %v3755_v21  ;;  %v3462_v7 = vmax.f32 %v3079_v3, 0.0  ;;  %v11189_v21 = vld [vmem:[%s15217_s3 + $0x4e0] sm:$0xff]   ;;  %v11190_v41 = vld [vmem:[%s15217_s3 + $0x4e8] sm:$0xff]   ;;  %v11192_v9 = vld [vmem:[%s15217_s3 + $0x4f8] sm:$0xff]  }
 0x3dc   :  { %v3475_v13 = vmax.f32 %v3081_v58, 0.0  ;;  %v11193_v3 = vld [vmem:[%s15217_s3 + $0x500] sm:$0xff]   ;;  %v11194_v53 = vld [vmem:[%s15217_s3 + $0x508] sm:$0xff]   ;;  %v11195_v58 = vld [vmem:[%s15217_s3 + $0x510] sm:$0xff]  }
 0x3dd   :  { %v3476_v61 = vmax.f32 %v3083_v22, 0.0  ;;  %v11196_v28 = vld [vmem:[%s15217_s3 + $0x518] sm:$0xff]   ;;  %v11197_v22 = vld [vmem:[%s15217_s3 + $0x520] sm:$0xff]  }
 0x3de   :  { %v3671_v6 = vpack.c.bf16 %v3475_v13, %v3461_v40  ;;  %v11199_v40 = vld [vmem:[%s15217_s3 + $0x530] sm:$0xff]   ;;  %v11200_v13 = vld [vmem:[%s15217_s3 + $0x538] sm:$0xff]  }
 0x3df   :  { %v3672_v5 = vpack.c.bf16 %v3476_v61, %v3462_v7  ;;  %v7398_v7 = vpop.permute.xlu1 %7397  ;;  %v14843_v61 = vpop.permute.xlu0 %7462 }
 0x3e0   :  { %v3769_v10 = vmax.bf16 %v3671_v6, %v14483_v17  ;;  %v11148_v17 = vld [vmem:[%s15217_s3 + $0x398] sm:$0xff]  }
 0x3e1   :  { %v3770_v62 = vmax.bf16 %v3672_v5, %v14488_v12  ;;  %10455 = vmatmul.mubr.msk.bf16.gmra.mrb[84].mxu1 %vm4002_vm1, %v11144_v30  ;;  %v11149_v12 = vld [vmem:[%s15217_s3 + $0x3a0] sm:$0xff]  }
 0x3e2   :  { %10458 = vmatprep.mubr.msk.bf16.mxu1 %vm4002_vm1, %v11145_v48 }
 0x3e3   :  { %v6807_v2 = vmax.bf16 %v3770_v62, %v3769_v10  ;;  %v14845_v30 = vpop.permute.xlu1 %7467  ;;  %v7403_v6 = vpop.permute.xlu0 %7402 }
 0x3e7   :  { %v7408_v48 = vpop.permute.xlu1 %7407  ;;  %v14847_v5 = vpop.permute.xlu0 %7532 }
 0x3e9   :  { %10459 = vmatmul.mubr.msk.bf16.gmra.mrb[88].mxu1 %vm4002_vm1, %v11146_v25 }
 0x3ea   :  { %10462 = vmatprep.mubr.msk.bf16.mxu1 %vm4002_vm1, %v11147_v52 }
 0x3eb   :  { %v14849_v10 = vpop.permute.xlu1 %7537  ;;  %v14851_v62 = vpop.permute.xlu0 %7472 }
 0x3ef   :  { %v14855_v25 = vpop.permute.xlu0 %7412 }
 0x3f1   :  { %10463 = vmatmul.mubr.msk.bf16.gmra.mrb[92].mxu1 %vm4002_vm1, %v11148_v17 }
 0x3f2   :  { %10466 = vmatprep.mubr.msk.bf16.mxu1 %vm4002_vm1, %v11149_v12 }
 0x3f3   :  { %v14859_v17 = vpop.permute.xlu0 %7542 }
 0x3f9   :  { %10467 = vmatmul.mubr.msk.bf16.gmra.mrb[96].mxu1 %vm4002_vm1, %v11150_v33  ;;  %v14863_v33 = vpop.permute.xlu0 %7482 }
 0x3fa   :  { %10470 = vmatprep.mubr.msk.bf16.mxu1 %vm4002_vm1, %v11151_v26 }
 0x401   :  { %10471 = vmatmul.mubr.msk.bf16.gmra.mrb[100].mxu1 %vm4002_vm1, %v11152_v42  ;;  %v11201_v42 = vld [vmem:[%s15218_s5] sm:$0xff]  }
 0x402   :  { %10488 = vmatprep.mubr.msk.bf16.mxu1 %vm4002_vm1, %v11153_v54  ;;  %10614 = vmatprep.mubr.bf16.mxu0 %v11201_v42  ;;  %v7423_v54 = vpop.permute.xlu0 %7422 }
 0x409   :  { %10489 = vmatmul.mubr.msk.bf16.vlgmr.msra.gmra.mrb[56].mxu1 %vm4002_vm1, %v11154_v32 }
 0x40a   :  { %10537 = vmatpush3.bf16.msra.mxu1 %v14516_v60  ;;  %10492 = vmatprep.mubr.msk.bf16.mxu1 %vm4002_vm1, %v11155_v44  ;;  %v11158_v60 = vld [vmem:[%s15217_s3 + $0x3e8] sm:$0xff]  }
 0x40b   :  { %10538 = vmatprep.subr.bf16.mxu1 %v14536_v24 }
 0x40e   :  { %10539 = vmatpush3.bf16.msra.mxu1 %v14536_v24  ;;  %v11159_v24 = vld [vmem:[%s15217_s3 + $0x3f0] sm:$0xff]  }
 0x40f   :  { %10540 = vmatprep.subr.bf16.mxu1 %v14556_v16 }
 0x411   :  { %10493 = vmatmul.mubr.msk.bf16.gmra.mrb[60].mxu1 %vm4002_vm1, %v11156_v11 }
 0x412   :  { %10541 = vmatpush3.bf16.msra.mxu1 %v14556_v16  ;;  %10496 = vmatprep.mubr.msk.bf16.mxu1 %vm4002_vm1, %v11157_v57  ;;  %v11160_v16 = vld [vmem:[%s15217_s3 + $0x3f8] sm:$0xff]   ;;  %v14870_v57 = vpop.permute.xlu0 %7552 }
 0x413   :  { %10542 = vmatprep.subr.bf16.mxu1 %v14572_v23 }
 0x416   :  { %10543 = vmatpush3.bf16.msra.mxu1 %v14572_v23  ;;  %v11161_v23 = vld [vmem:[%s15217_s3 + $0x400] sm:$0xff]  }
 0x417   :  { %10544 = vmatprep.subr.bf16.mxu1 %v14588_v56 }
 0x419   :  { %10497 = vmatmul.mubr.msk.bf16.gmra.mrb[64].mxu1 %vm4002_vm1, %v11158_v60 }
 0x41a   :  { %10545 = vmatpush3.bf16.msra.mxu1 %v14588_v56  ;;  %10500 = vmatprep.mubr.msk.bf16.mxu1 %vm4002_vm1, %v11159_v24  ;;  %v11179_v56 = vld [vmem:[%s15217_s3 + $0x490] sm:$0xff]  }
 0x41b   :  { %10546 = vmatprep.subr.bf16.mxu1 %v6806_v8 }
 0x41e   :  { %10547 = vmatpush3.bf16.msra.mxu1 %v6806_v8  ;;  %v11198_v8 = vld [vmem:[%s15217_s3 + $0x528] sm:$0xff]  }
 0x41f   :  { %10548 = vmatprep.subr.bf16.mxu1 %v6807_v2 }
 0x421   :  { %10501 = vmatmul.mubr.msk.bf16.gmra.mrb[68].mxu1 %vm4002_vm1, %v11160_v16 }
 0x422   :  { %10549 = vmatpush3.bf16.msra.mxu1 %v6807_v2  ;;  %10504 = vmatprep.mubr.msk.bf16.mxu1 %vm4002_vm1, %v11161_v23  ;;  %v14853_v2 = vpop.permute.xlu1 %7477  ;;  %v14874_v23 = vpop.permute.xlu0 %7492 }
 0x426   :  { %v14857_v52 = vpop.permute.xlu1 %7417 }
 0x429   :  { %10505 = vmatmul.mubr.msk.bf16.gmra.mrb[72].mxu1 %vm4002_vm1, %v11162_v49 }
 0x42a   :  { %10508 = vmatprep.mubr.msk.bf16.mxu1 %vm4002_vm1, %v11163_v0  ;;  %v14861_v12 = vpop.permute.xlu1 %7547 }
 0x42e   :  { %v14865_v26 = vpop.permute.xlu1 %7487 }
 0x431   :  { %10509 = vmatmul.mubr.msk.bf16.gmra.mrb[76].mxu1 %vm4002_vm1, %v11164_v31 }
 0x432   :  { %10512 = vmatprep.mubr.msk.bf16.mxu1 %vm4002_vm1, %v11165_v37  ;;  %v7428_v32 = vpop.permute.xlu1 %7427 }
 0x436   :  { %v14872_v16 = vpop.permute.xlu1 %7557 }
 0x439   :  { %10513 = vmatmul.mubr.msk.bf16.gmra.mrb[80].mxu1 %vm4002_vm1, %v11166_v14 }
 0x43a   :  { %10516 = vmatprep.mubr.msk.bf16.mxu1 %vm4002_vm1, %v11167_v20  ;;  %v14876_v31 = vpop.permute.xlu1 %7497  ;;  %v14878_v20 = vpop.permute.xlu0 %7432 }
 0x441   :  { %10517 = vmatmul.mubr.msk.bf16.gmra.mrb[84].mxu1 %vm4002_vm1, %v11168_v63  ;;  %v14880_v63 = vpop.permute.xlu1 %7437 }
 0x442   :  { %10520 = vmatprep.mubr.msk.bf16.mxu1 %vm4002_vm1, %v11169_v45 }
 0x449   :  { %10521 = vmatmul.mubr.msk.bf16.gmra.mrb[88].mxu1 %vm4002_vm1, %v11170_v38 }
 0x44a   :  { %10524 = vmatprep.mubr.msk.bf16.mxu1 %vm4002_vm1, %v11171_v29  ;;  %v15390_v29 = vld [vmem:[#allocation23_spill] sm:$0xff] }
 0x451   :  { %10525 = vmatmul.mubr.msk.bf16.gmra.mrb[92].mxu1 %vm4002_vm1, %v11172_v27 }
 0x452   :  { %10528 = vmatprep.mubr.msk.bf16.mxu1 %vm4002_vm1, %v11173_v18 }
 0x459   :  { %10529 = vmatmul.mubr.msk.bf16.gmra.mrb[96].mxu1 %vm4002_vm1, %v11174_v50  ;;  %v15391_v50 = vld [vmem:[#allocation21_spill] sm:$0xff] }
 0x45a   :  { %10532 = vmatprep.mubr.msk.bf16.mxu1 %vm4002_vm1, %v11175_v15 }
 0x461   :  { %10533 = vmatmul.mubr.msk.bf16.gmra.mrb[100].mxu1 %vm4002_vm1, %v11176_v1 }
 0x462   :  { %10550 = vmatprep.mubr.msk.bf16.mxu1 %vm4002_vm1, %v11177_v55  ;;  %v14884_v55 = vpop.permute.xlu0 %7562 }
 0x469   :  { %10551 = vmatmul.mubr.msk.bf16.vlgmr.msra.gmra.mrb[56].mxu1 %vm4002_vm1, %v11178_v35  ;;  %v15392_v35 = vld [vmem:[#allocation24_spill] sm:$0xff] }
 0x46a   :  { %10554 = vmatprep.mubr.msk.bf16.mxu1 %vm4002_vm1, %v11179_v56 }
 0x471   :  { %10555 = vmatmul.mubr.msk.bf16.gmra.mrb[60].mxu1 %vm4002_vm1, %v11180_v47  ;;  %v15393_v47 = vld [vmem:[#allocation22_spill] sm:$0xff] }
 0x472   :  { %10558 = vmatprep.mubr.msk.bf16.mxu1 %vm4002_vm1, %v11181_v43 }
 0x479   :  { %10559 = vmatmul.mubr.msk.bf16.gmra.mrb[64].mxu1 %vm4002_vm1, %v11182_v36  ;;  %v14888_v36 = vpop.permute.xlu1 %7567 }
 0x47a   :  { %10562 = vmatprep.mubr.msk.bf16.mxu1 %vm4002_vm1, %v11183_v59 }
 0x481   :  { %10563 = vmatmul.mubr.msk.bf16.gmra.mrb[68].mxu1 %vm4002_vm1, %v11184_v34 }
 0x482   :  { %10566 = vmatprep.mubr.msk.bf16.mxu1 %vm4002_vm1, %v11185_v46 }
 0x489   :  { %10567 = vmatmul.mubr.msk.bf16.gmra.mrb[72].mxu1 %vm4002_vm1, %v11186_v19 }
 0x48a   :  { %10570 = vmatprep.mubr.msk.bf16.mxu1 %vm4002_vm1, %v11187_v4  ;;  %v15394_v4 = vld [vmem:[#allocation27_spill] sm:$0xff] }
 0x491   :  { %10571 = vmatmul.mubr.msk.bf16.gmra.mrb[76].mxu1 %vm4002_vm1, %v11188_v39 }
 0x492   :  { %10574 = vmatprep.mubr.msk.bf16.mxu1 %vm4002_vm1, %v11189_v21 }
 0x499   :  { %10575 = vmatmul.mubr.msk.bf16.gmra.mrb[80].mxu1 %vm4002_vm1, %v11190_v41 }
 0x49a   :  { %10578 = vmatprep.mubr.msk.bf16.mxu1 %vm4002_vm1, %v11191_v51 }
 0x4a1   :  { %10579 = vmatmul.mubr.msk.bf16.gmra.mrb[84].mxu1 %vm4002_vm1, %v11192_v9 }
 0x4a2   :  { %10582 = vmatprep.mubr.msk.bf16.mxu1 %vm4002_vm1, %v11193_v3  ;;  %v14891_v3 = vpop.permute.xlu0 %7502 }
 0x4a6   :  { %v7443_v42 = vpop.permute.xlu0 %7442 }
 0x4a9   :  { %10583 = vmatmul.mubr.msk.bf16.gmra.mrb[88].mxu1 %vm4002_vm1, %v11194_v53 }
 0x4aa   :  { %10586 = vmatprep.mubr.msk.bf16.mxu1 %vm4002_vm1, %v11195_v58 }
 0x4b1   :  { %10587 = vmatmul.mubr.msk.bf16.gmra.mrb[92].mxu1 %vm4002_vm1, %v11196_v28 }
 0x4b2   :  { %10590 = vmatprep.mubr.msk.bf16.mxu1 %vm4002_vm1, %v11197_v22 }
 0x4b9   :  { %10591 = vmatmul.mubr.msk.bf16.gmra.mrb[96].mxu1 %vm4002_vm1, %v11198_v8  ;;  %v14893_v8 = vpop.permute.xlu1 %7507 }
 0x4ba   :  { %10594 = vmatprep.mubr.msk.bf16.mxu1 %vm4002_vm1, %v11199_v40 }
 0x4c1   :  { %10595 = vmatmul.mubr.msk.bf16.gmra.mrb[100].mxu1 %vm4002_vm1, %v11200_v13 }
 0x53c   :  { %v10552_v44 = vpop.f32.mrb[56].mxu1 }
 0x53d   :  { %v7083_v11 = vpop.f32.mrb[57].mxu1  ;;  %v7612_v27 = vadd.f32 %v10552_v44, %v15390_v29 }
 0x53e   :  { %v10553_v60 = vpop.f32.mrb[58].mxu1  ;;  %v7610_v15 = vadd.f32 %v15391_v50, %v7083_v11 }
 0x53f   :  { %v7086_v24 = vpop.f32.mrb[59].mxu1  ;;  %v7613_v56 = vadd.f32 %v10553_v60, %v15392_v35  ;;  %v7660_v59 = vmul.f32 0.5, %v7612_v27 }
 0x540   :  { %v7611_v43 = vadd.f32 %v15393_v47, %v7086_v24  ;;  %v7658_v34 = vmul.f32 0.5, %v7610_v15  ;;  %v7448_v24 = vpop.permute.xlu1 %7447 }
 0x541   :  { %v7661_v19 = vmul.f32 0.5, %v7613_v56  ;;  %11229 = vtanh.f32 %v7660_v59 }
 0x542   :  { %v7659_v41 = vmul.f32 0.5, %v7611_v43  ;;  %11231 = vtanh.f32 %v7658_v34 }
 0x543   :  { %11233 = vtanh.f32 %v7661_v19 }
 0x544   :  { %v10556_v49 = vpop.f32.mrb[60].mxu1  ;;  %11235 = vtanh.f32 %v7659_v41  ;;  %v14903_v47 = vpop.permute.xlu1 %7577 }
 0x545   :  { %v7099_v0 = vpop.f32.mrb[61].mxu1  ;;  %v7616_v46 = vadd.f32 %v10556_v49, %v7403_v6 }
 0x546   :  { %v10557_v37 = vpop.f32.mrb[62].mxu1  ;;  %v7614_v39 = vadd.f32 %v15394_v4, %v7099_v0  ;;  %v15395_v0 = vld [vmem:[#allocation25_spill] sm:$0xff] }
 0x547   :  { %v7102_v14 = vpop.f32.mrb[63].mxu1  ;;  %v7617_v51 = vadd.f32 %v10557_v37, %v7408_v48  ;;  %v7664_v28 = vmul.f32 0.5, %v7616_v46 }
 0x548   :  { %v7615_v53 = vadd.f32 %v7398_v7, %v7102_v14  ;;  %v7662_v40 = vmul.f32 0.5, %v7614_v39 }
 0x549   :  { %v7665_v13 = vmul.f32 0.5, %v7617_v51  ;;  %11237 = vtanh.f32 %v7664_v28 }
 0x54a   :  { %v7663_v6 = vmul.f32 0.5, %v7615_v53  ;;  %11239 = vtanh.f32 %v7662_v40 }
 0x54b   :  { %11241 = vtanh.f32 %v7665_v13  ;;  %v11230_v50 = vpop.eup %11229 }
 0x54c   :  { %v10560_v45 = vpop.f32.mrb[64].mxu1  ;;  %11243 = vtanh.f32 %v7663_v6  ;;  %v11232_v35 = vpop.eup %11231 }
 0x54d   :  { %v7115_v38 = vpop.f32.mrb[65].mxu1  ;;  %v7620_v48 = vadd.f32 %v10560_v45, %v7423_v54  ;;  %v15396_v54 = vld [vmem:[#allocation26_spill] sm:$0xff]  ;;  %v7690_v43 = vmul.f32 0.5, %v11232_v35 }
 0x54e   :  { %v10561_v18 = vpop.f32.mrb[66].mxu1  ;;  %v7618_v11 = vadd.f32 %v14855_v25, %v7115_v38  ;;  %v14900_v38 = vpop.permute.xlu0 %7572 }
 0x54f   :  { %v7118_v1 = vpop.f32.mrb[67].mxu1  ;;  %v7621_v49 = vadd.f32 %v10561_v18, %v7428_v32  ;;  %v7668_v15 = vmul.f32 0.5, %v7620_v48 }
 0x550   :  { %v7666_v25 = vmul.f32 0.5, %v7618_v11  ;;  %v7619_v18 = vadd.f32 %v14857_v52, %v7118_v1  ;;  %v7706_v11 = vadd.f32 0.5, %v7690_v43 }
 0x551   :  { %v7669_v56 = vmul.f32 0.5, %v7621_v49 }
 0x552   :  { %v7667_v13 = vmul.f32 0.5, %v7619_v18 }
 0x554   :  { %v10564_v21 = vpop.f32.mrb[68].mxu1 }
 0x555   :  { %v7131_v9 = vpop.f32.mrb[69].mxu1  ;;  %v7624_v59 = vadd.f32 %v10564_v21, %v7443_v42 }
 0x556   :  { %v10565_v58 = vpop.f32.mrb[70].mxu1  ;;  %v7622_v4 = vadd.f32 %v14878_v20, %v7131_v9  ;;  %v14910_v20 = vpop.permute.xlu0 %7512 }
 0x557   :  { %v7134_v22 = vpop.f32.mrb[71].mxu1  ;;  %v7625_v28 = vadd.f32 %v10565_v58, %v7448_v24  ;;  %v7672_v9 = vmul.f32 0.5, %v7624_v59 }
 0x558   :  { %v7623_v21 = vadd.f32 %v14880_v63, %v7134_v22 }
 0x559   :  { %v7673_v22 = vmul.f32 0.5, %v7625_v28 }
 0x55c   :  { %v10568_v44 = vpop.f32.mrb[72].mxu1 }
 0x55d   :  { %v7628_v7 = vadd.f32 %v10568_v44, %v14843_v61  ;;  %v7147_v60 = vpop.f32.mrb[73].mxu1  ;;  %v11234_v61 = vpop.eup %11233 }
 0x55e   :  { %v7626_v37 = vadd.f32 %v15395_v0, %v7147_v60  ;;  %v10569_v14 = vpop.f32.mrb[74].mxu1  ;;  %v11236_v32 = vpop.eup %11235  ;;  %v7693_v19 = vmul.f32 0.5, %v11234_v61  ;;  %v7671_v0 = vmul.f32 0.5, %v7623_v21 }
 0x55f   :  { %11245 = vtanh.f32 %v7628_v7  ;;  %v7629_v29 = vadd.f32 %v10569_v14, %v14845_v30  ;;  %v7150_v27 = vpop.f32.mrb[75].mxu1  ;;  %v7692_v30 = vmul.f32 0.5, %v11230_v50  ;;  %v11238_v46 = vpop.eup %11237  ;;  %v7691_v53 = vmul.f32 0.5, %v11236_v32 }
 0x560   :  { %11247 = vtanh.f32 %v7626_v37  ;;  %v7627_v45 = vadd.f32 %v15396_v54, %v7150_v27  ;;  %v11240_v51 = vpop.eup %11239  ;;  %v14913_v60 = vpop.permute.xlu1 %7517  ;;  %v7709_v63 = vadd.f32 0.5, %v7693_v19 }
 0x561   :  { %11249 = vtanh.f32 %v7629_v29  ;;  %v11242_v40 = vpop.eup %11241  ;;  %v7707_v49 = vadd.f32 0.5, %v7691_v53  ;;  %v7694_v50 = vmul.f32 0.5, %v11240_v51 }
 0x562   :  { %11251 = vtanh.f32 %v7627_v45  ;;  %v11244_v48 = vpop.eup %11243  ;;  %v7697_v61 = vmul.f32 0.5, %v11242_v40 }
 0x563   :  { %11253 = vtanh.f32 %v7668_v15 }
 0x564   :  { %v10572_v34 = vpop.f32.mrb[76].mxu1  ;;  %11255 = vtanh.f32 %v7666_v25  ;;  %v14924_v25 = vpop.permute.xlu0 %7582  ;;  %v7713_v51 = vadd.f32 0.5, %v7697_v61 }
 0x565   :  { %v7632_v39 = vadd.f32 %v10572_v34, %v14863_v33  ;;  %v7163_v41 = vpop.f32.mrb[77].mxu1  ;;  %11257 = vtanh.f32 %v7669_v56  ;;  %v7708_v33 = vadd.f32 0.5, %v7692_v30  ;;  %v7695_v30 = vmul.f32 0.5, %v11244_v48 }
 0x566   :  { %v7630_v52 = vadd.f32 %v14851_v62, %v7163_v41  ;;  %v10573_v1 = vpop.f32.mrb[78].mxu1  ;;  %v7670_v62 = vmul.f32 0.5, %v7622_v4 }
 0x567   :  { %11259 = vtanh.f32 %v7632_v39  ;;  %v7633_v6 = vadd.f32 %v10573_v1, %v14865_v26  ;;  %v7166_v42 = vpop.f32.mrb[79].mxu1  ;;  %v7710_v39 = vadd.f32 0.5, %v7694_v50  ;;  %v7711_v28 = vadd.f32 0.5, %v7695_v30 }
 0x568   :  { %11261 = vtanh.f32 %v7630_v52  ;;  %v7631_v44 = vadd.f32 %v14853_v2, %v7166_v42  ;;  %v7696_v2 = vmul.f32 0.5, %v11238_v46  ;;  %v14928_v46 = vpop.permute.xlu1 %7587  ;;  %v7523_v1 = vpop.permute.xlu0 %7522 }
 0x569   :  { %v11246_v58 = vpop.eup %11245  ;;  %11263 = vtanh.f32 %v7633_v6 }
 0x56a   :  { %v11248_v7 = vpop.eup %11247  ;;  %v14915_v24 = vmul.f32 %v11246_v58, %v7708_v33  ;;  %11265 = vtanh.f32 %v7631_v44  ;;  %v7712_v19 = vadd.f32 0.5, %v7696_v2 }
 0x56b   :  { %v11250_v26 = vpop.eup %11249  ;;  %11267 = vtanh.f32 %v7667_v13  ;;  %v14917_v37 = vmul.f32 %v11248_v7, %v7706_v11 }
 0x56c   :  { %v11252_v14 = vpop.eup %11251  ;;  %11269 = vtanh.f32 %v7672_v9  ;;  %v14919_v29 = vmul.f32 %v11250_v26, %v7709_v63  ;;  %v10576_v27 = vpop.f32.mrb[80].mxu1 }
 0x56d   :  { %11271 = vtanh.f32 %v7670_v62  ;;  %v14921_v15 = vmul.f32 %v11252_v14, %v7707_v49  ;;  %v7636_v54 = vadd.f32 %v10576_v27, %v14891_v3  ;;  %v7179_v45 = vpop.f32.mrb[81].mxu1  ;;  %v11254_v35 = vpop.eup %11253 }
 0x56e   :  { %11273 = vtanh.f32 %v7673_v22  ;;  %v7634_v56 = vadd.f32 %v14874_v23, %v7179_v45  ;;  %v10577_v32 = vpop.f32.mrb[82].mxu1  ;;  %v11256_v18 = vpop.eup %11255 }
 0x56f   :  { %11275 = vtanh.f32 %v7671_v0  ;;  %v7637_v43 = vadd.f32 %v10577_v32, %v14893_v8  ;;  %v7182_v59 = vpop.f32.mrb[83].mxu1  ;;  %v11258_v34 = vpop.eup %11257  ;;  %v7698_v44 = vmul.f32 0.5, %v11256_v18 }
 0x570   :  { %11277 = vtanh.f32 %v7636_v54  ;;  %v7635_v3 = vadd.f32 %v14876_v31, %v7182_v59  ;;  %v7700_v31 = vmul.f32 0.5, %v11254_v35  ;;  %v7528_v9 = vpop.permute.xlu1 %7527  ;;  %v7701_v7 = vmul.f32 0.5, %v11258_v34 }
 0x571   :  { %v11260_v4 = vpop.eup %11259  ;;  %11279 = vtanh.f32 %v7634_v56  ;;  %v7714_v50 = vadd.f32 0.5, %v7698_v44 }
 0x572   :  { %v11262_v41 = vpop.eup %11261  ;;  %v14931_v23 = vmul.f32 %v11260_v4, %v7712_v19  ;;  %11281 = vtanh.f32 %v7637_v43  ;;  %v7716_v2 = vadd.f32 0.5, %v7700_v31  ;;  %v7717_v45 = vadd.f32 0.5, %v7701_v7 }
 0x573   :  { %v11264_v53 = vpop.eup %11263  ;;  %v14933_v52 = vmul.f32 %v11262_v41, %v7710_v39  ;;  %11283 = vtanh.f32 %v7635_v3 }
 0x574   :  { %v11266_v8 = vpop.eup %11265  ;;  %v14935_v40 = vmul.f32 %v11264_v53, %v7713_v51  ;;  %v10580_v13 = vpop.f32.mrb[84].mxu1 }
 0x575   :  { %v11268_v21 = vpop.eup %11267  ;;  %v14937_v6 = vmul.f32 %v11266_v8, %v7711_v28  ;;  %v7640_v42 = vadd.f32 %v10580_v13, %v7523_v1  ;;  %v7195_v48 = vpop.f32.mrb[85].mxu1 }
 0x576   :  { %v11270_v33 = vpop.eup %11269  ;;  %v7638_v58 = vadd.f32 %v14910_v20, %v7195_v48  ;;  %v10581_v11 = vpop.f32.mrb[86].mxu1  ;;  %v7699_v49 = vmul.f32 0.5, %v11268_v21 }
 0x577   :  { %v11272_v62 = vpop.eup %11271  ;;  %v7641_v63 = vadd.f32 %v10581_v11, %v7528_v9  ;;  %v7198_v22 = vpop.f32.mrb[87].mxu1  ;;  %11285 = vtanh.f32 %v7640_v42  ;;  %v7704_v30 = vmul.f32 0.5, %v11270_v33 }
 0x578   :  { %v11274_v26 = vpop.eup %11273  ;;  %v7639_v0 = vadd.f32 %v14913_v60, %v7198_v22  ;;  %11287 = vtanh.f32 %v7638_v58  ;;  %v7715_v61 = vadd.f32 0.5, %v7699_v49  ;;  %v7702_v34 = vmul.f32 0.5, %v11272_v62 }
 0x579   :  { %v11276_v14 = vpop.eup %11275  ;;  %11289 = vtanh.f32 %v7641_v63  ;;  %v7705_v39 = vmul.f32 0.5, %v11274_v26  ;;  %v7720_v8 = vadd.f32 0.5, %v7704_v30 }
 0x57a   :  { %v11278_v27 = vpop.eup %11277  ;;  %11291 = vtanh.f32 %v7639_v0  ;;  %v7703_v53 = vmul.f32 0.5, %v11276_v14  ;;  %v7718_v13 = vadd.f32 0.5, %v7702_v34 }
 0x57b   :  { %v11280_v54 = vpop.eup %11279  ;;  %v14941_v35 = vmul.f32 %v11278_v27, %v7716_v2  ;;  %11293 = vtanh.f32 %v14915_v24  ;;  %v7721_v31 = vadd.f32 0.5, %v7705_v39 }
 0x57c   :  { %v11282_v20 = vpop.eup %11281  ;;  %v14943_v56 = vmul.f32 %v11280_v54, %v7714_v50  ;;  %v10584_v32 = vpop.f32.mrb[88].mxu1  ;;  %11295 = vtanh.f32 %v14917_v37  ;;  %v7719_v42 = vadd.f32 0.5, %v7703_v53 }
 0x57d   :  { %v11284_v18 = vpop.eup %11283  ;;  %v14946_v60 = vmul.f32 %v11282_v20, %v7717_v45  ;;  %v7644_v43 = vadd.f32 %v10584_v32, %v14859_v17  ;;  %v7211_v59 = vpop.f32.mrb[89].mxu1  ;;  %11297 = vtanh.f32 %v14919_v29 }
 0x57e   :  { %v14950_v19 = vmul.f32 %v11284_v18, %v7715_v61  ;;  %v7642_v3 = vadd.f32 %v14847_v5, %v7211_v59  ;;  %v10585_v4 = vpop.f32.mrb[90].mxu1  ;;  %11299 = vtanh.f32 %v14921_v15  ;;  %v7593_v20 = vpop.permute.xlu0 %7592 }
 0x57f   :  { %v7756_v41 = vmul.f32 0.5, %v7644_v43  ;;  %v7645_v51 = vadd.f32 %v10585_v4, %v14861_v12  ;;  %v7214_v24 = vpop.f32.mrb[91].mxu1 }
 0x580   :  { %v7754_v17 = vmul.f32 0.5, %v7642_v3  ;;  %v7643_v28 = vadd.f32 %v14849_v10, %v7214_v24 }
 0x581   :  { %11301 = vtanh.f32 %v7756_v41  ;;  %v7757_v37 = vmul.f32 0.5, %v7645_v51  ;;  %v11286_v1 = vpop.eup %11285  ;;  %v7598_v41 = vpop.permute.xlu1 %7597 }
 0x582   :  { %11303 = vtanh.f32 %v7754_v17  ;;  %v7755_v5 = vmul.f32 0.5, %v7643_v28  ;;  %v11288_v21 = vpop.eup %11287  ;;  %v14957_v29 = vmul.f32 %v11286_v1, %v7720_v8 }
 0x583   :  { %11305 = vtanh.f32 %v7757_v37  ;;  %v11290_v12 = vpop.eup %11289  ;;  %v14959_v48 = vmul.f32 %v11288_v21, %v7718_v13  ;;  %v7603_v21 = vpop.permute.xlu0 %7602 }
 0x584   :  { %11307 = vtanh.f32 %v7755_v5  ;;  %v10588_v15 = vpop.f32.mrb[92].mxu1  ;;  %v11292_v33 = vpop.eup %11291  ;;  %v14962_v10 = vmul.f32 %v11290_v12, %v7721_v31 }
 0x585   :  { %11309 = vtanh.f32 %v14931_v23  ;;  %v7648_v9 = vadd.f32 %v10588_v15, %v14884_v55  ;;  %v7227_v44 = vpop.f32.mrb[93].mxu1  ;;  %v14966_v58 = vmul.f32 %v11292_v33, %v7719_v42  ;;  %v11294_v7 = vpop.eup %11293 }
 0x586   :  { %11311 = vtanh.f32 %v14933_v52  ;;  %v7646_v11 = vadd.f32 %v14870_v57, %v7227_v44  ;;  %v10589_v62 = vpop.f32.mrb[94].mxu1  ;;  %v11296_v23 = vpop.eup %11295 }
 0x587   :  { %11313 = vtanh.f32 %v14935_v40  ;;  %v7760_v63 = vmul.f32 0.5, %v7648_v9  ;;  %v7649_v22 = vadd.f32 %v10589_v62, %v14888_v36  ;;  %v7230_v26 = vpop.f32.mrb[95].mxu1  ;;  %v11298_v0 = vpop.eup %11297 }
 0x588   :  { %11315 = vtanh.f32 %v14937_v6  ;;  %v7758_v49 = vmul.f32 0.5, %v7646_v11  ;;  %v7647_v55 = vadd.f32 %v14872_v16, %v7230_v26  ;;  %v11300_v14 = vpop.eup %11299  ;;  %v7608_v62 = vpop.permute.xlu1 %7607 }
 0x589   :  { %11317 = vtanh.f32 %v7760_v63  ;;  %v7761_v52 = vmul.f32 0.5, %v7649_v22 }
 0x58a   :  { %11319 = vtanh.f32 %v7758_v49  ;;  %v7759_v57 = vmul.f32 0.5, %v7647_v55 }
 0x58b   :  { %v11302_v2 = vpop.eup %11301  ;;  %11321 = vtanh.f32 %v7761_v52 }
 0x58c   :  { %v11304_v27 = vpop.eup %11303  ;;  %v7788_v40 = vmul.f32 0.5, %v11302_v2  ;;  %11323 = vtanh.f32 %v7759_v57  ;;  %v10592_v50 = vpop.f32.mrb[96].mxu1 }
 0x58d   :  { %v11306_v36 = vpop.eup %11305  ;;  %11325 = vtanh.f32 %v14941_v35  ;;  %v7786_v54 = vmul.f32 0.5, %v11304_v27  ;;  %v7652_v6 = vadd.f32 %v10592_v50, %v14924_v25  ;;  %v7243_v45 = vpop.f32.mrb[97].mxu1 }
 0x58e   :  { %v11308_v16 = vpop.eup %11307  ;;  %11327 = vtanh.f32 %v14943_v56  ;;  %v7804_v61 = vadd.f32 0.5, %v7788_v40  ;;  %v7789_v32 = vmul.f32 0.5, %v11306_v36  ;;  %v7650_v18 = vadd.f32 %v14900_v38, %v7243_v45  ;;  %v10593_v30 = vpop.f32.mrb[98].mxu1 }
 0x58f   :  { %v11310_v43 = vpop.eup %11309  ;;  %v7802_v59 = vadd.f32 0.5, %v7786_v54  ;;  %v7787_v34 = vmul.f32 0.5, %v11308_v16  ;;  %v7764_v3 = vmul.f32 0.5, %v7652_v6  ;;  %v7653_v4 = vadd.f32 %v10593_v30, %v14928_v46  ;;  %v7246_v35 = vpop.f32.mrb[99].mxu1 }
 0x590   :  { %v11312_v39 = vpop.eup %11311  ;;  %v7805_v25 = vadd.f32 0.5, %v7789_v32  ;;  %v7762_v51 = vmul.f32 0.5, %v7650_v18  ;;  %v7651_v24 = vadd.f32 %v14903_v47, %v7246_v35  ;;  %v7836_v53 = vmul.f32 %v11294_v7, %v7804_v61 }
 0x591   :  { %v11314_v56 = vpop.eup %11313  ;;  %v7803_v17 = vadd.f32 0.5, %v7787_v34  ;;  %11329 = vtanh.f32 %v7764_v3  ;;  %v7765_v28 = vmul.f32 0.5, %v7653_v4  ;;  %v7834_v38 = vmul.f32 %v11296_v23, %v7802_v59 }
 0x592   :  { %v11316_v8 = vpop.eup %11315  ;;  %11331 = vtanh.f32 %v7762_v51  ;;  %v7763_v37 = vmul.f32 0.5, %v7651_v24  ;;  %v7837_v1 = vmul.f32 %v11298_v0, %v7805_v25 }
 0x593   :  { %v11318_v13 = vpop.eup %11317  ;;  %11333 = vtanh.f32 %v7765_v28  ;;  %v7835_v46 = vmul.f32 %v11300_v14, %v7803_v17 }
 0x594   :  { %v11320_v5 = vpop.eup %11319  ;;  %v7792_v31 = vmul.f32 0.5, %v11318_v13  ;;  %11335 = vtanh.f32 %v7763_v37  ;;  %v10596_v12 = vpop.f32.mrb[100].mxu1  ;;  %v7899_v42 = vpack.c.bf16 %v7837_v1, %v7836_v53 }
 0x595   :  { %v11322_v47 = vpop.eup %11321  ;;  %11337 = vtanh.f32 %v14946_v60  ;;  %v7790_v15 = vmul.f32 0.5, %v11320_v5  ;;  %v7656_v33 = vadd.f32 %v10596_v12, %v7603_v21  ;;  %v7259_v9 = vpop.f32.mrb[101].mxu1  ;;  %v7898_v44 = vpack.c.bf16 %v7835_v46, %v7834_v38 }
 0x596   :  { %v11324_v11 = vpop.eup %11323  ;;  %11339 = vtanh.f32 %v14950_v19  ;;  %v7808_v7 = vadd.f32 0.5, %v7792_v31  ;;  %v7793_v63 = vmul.f32 0.5, %v11322_v47  ;;  %v7654_v22 = vadd.f32 %v7593_v20, %v7259_v9  ;;  %v10597_v26 = vpop.f32.mrb[102].mxu1 }
 0x597   :  { %v11326_v23 = vpop.eup %11325  ;;  %v7806_v49 = vadd.f32 0.5, %v7790_v15  ;;  %v7791_v55 = vmul.f32 0.5, %v11324_v11  ;;  %v7768_v0 = vmul.f32 0.5, %v7656_v33  ;;  %v7657_v52 = vadd.f32 %v10597_v26, %v7608_v62  ;;  %v7262_v14 = vpop.f32.mrb[103].mxu1  ;;  %10598 = vmatprep.subr.bf16.mxu0 %v7898_v44  ;;  %v11204_v26 = vld [vmem:[%s15218_s5 + $0x18] sm:$0xff]  }
 0x598   :  { %v11328_v60 = vpop.eup %11327  ;;  %v7809_v57 = vadd.f32 0.5, %v7793_v63  ;;  %v7766_v2 = vmul.f32 0.5, %v7654_v22  ;;  %v7655_v27 = vadd.f32 %v7598_v41, %v7262_v14  ;;  %10599 = vmatpush3.bf16.msra.mxu0 %v7898_v44  ;;  %v7840_v40 = vmul.f32 %v11310_v43, %v7808_v7  ;;  %v11202_v63 = vld [vmem:[%s15218_s5 + $0x8] sm:$0xff]   ;;  %v11203_v22 = vld [vmem:[%s15218_s5 + $0x10] sm:$0xff]  }
 0x599   :  { %v7807_v50 = vadd.f32 0.5, %v7791_v55  ;;  %11341 = vtanh.f32 %v7768_v0  ;;  %v7769_v19 = vmul.f32 0.5, %v7657_v52  ;;  %10600 = vmatprep.subr.bf16.mxu0 %v7899_v42  ;;  %v7838_v36 = vmul.f32 %v11312_v39, %v7806_v49  ;;  %v11206_v49 = vld [vmem:[%s15218_s5 + $0x28] sm:$0xff]   ;;  %v11207_v55 = vld [vmem:[%s15218_s5 + $0x30] sm:$0xff]   ;;  %v11208_v0 = vld [vmem:[%s15218_s5 + $0x38] sm:$0xff]  }
 0x59a   :  { %11343 = vtanh.f32 %v7766_v2  ;;  %v7767_v54 = vmul.f32 0.5, %v7655_v27  ;;  %v7841_v6 = vmul.f32 %v11314_v56, %v7809_v57  ;;  %v11209_v52 = vld [vmem:[%s15218_s5 + $0x40] sm:$0xff]   ;;  %v11210_v14 = vld [vmem:[%s15218_s5 + $0x48] sm:$0xff]   ;;  %v11212_v57 = vld [vmem:[%s15218_s5 + $0x58] sm:$0xff]  }
 0x59b   :  { %v11330_v45 = vpop.eup %11329  ;;  %11345 = vtanh.f32 %v7769_v19  ;;  %v7839_v16 = vmul.f32 %v11316_v8, %v7807_v50  ;;  %v11213_v2 = vld [vmem:[%s15218_s5 + $0x60] sm:$0xff]   ;;  %v11214_v27 = vld [vmem:[%s15218_s5 + $0x68] sm:$0xff]   ;;  %v11216_v50 = vld [vmem:[%s15218_s5 + $0x78] sm:$0xff]  }
 0x59c   :  { %v11332_v20 = vpop.eup %11331  ;;  %v7796_v61 = vmul.f32 0.5, %v11330_v45  ;;  %11347 = vtanh.f32 %v7767_v54  ;;  %10601 = vmatpush3.bf16.msra.mxu0 %v7899_v42  ;;  %v7901_v32 = vpack.c.bf16 %v7841_v6, %v7840_v40  ;;  %v11215_v40 = vld [vmem:[%s15218_s5 + $0x70] sm:$0xff]   ;;  %v11217_v19 = vld [vmem:[%s15218_s5 + $0x80] sm:$0xff]   ;;  %v11220_v6 = vld [vmem:[%s15218_s5 + $0x98] sm:$0xff]  }
 0x59d   :  { %v11334_v18 = vpop.eup %11333  ;;  %11349 = vtanh.f32 %v14957_v29  ;;  %v7794_v30 = vmul.f32 0.5, %v11332_v20  ;;  %v7900_v43 = vpack.c.bf16 %v7839_v16, %v7838_v36  ;;  %v11218_v36 = vld [vmem:[%s15218_s5 + $0x88] sm:$0xff]   ;;  %v11219_v54 = vld [vmem:[%s15218_s5 + $0x90] sm:$0xff]   ;;  %v11221_v45 = vld [vmem:[%s15218_s5 + $0xa0] sm:$0xff]  }
 0x59e   :  { %v11336_v59 = vpop.eup %11335  ;;  %11351 = vtanh.f32 %v14959_v48  ;;  %v7812_v34 = vadd.f32 0.5, %v7796_v61  ;;  %v7797_v3 = vmul.f32 0.5, %v11334_v18  ;;  %v11222_v16 = vld [vmem:[%s15218_s5 + $0xa8] sm:$0xff]   ;;  %v11223_v20 = vld [vmem:[%s15218_s5 + $0xb0] sm:$0xff]   ;;  %v11224_v61 = vld [vmem:[%s15218_s5 + $0xb8] sm:$0xff]   ;;  %v7962_v18 = vpop.permute.xlu1 %7961 }
 0x59f   :  { %v11338_v4 = vpop.eup %11337  ;;  %11353 = vtanh.f32 %v14962_v10  ;;  %v7810_v35 = vadd.f32 0.5, %v7794_v30  ;;  %v7795_v39 = vmul.f32 0.5, %v11336_v59  ;;  %10602 = vmatprep.subr.bf16.mxu0 %v7900_v43 }
 0x5a0   :  { %v11340_v41 = vpop.eup %11339  ;;  %11355 = vtanh.f32 %v14966_v58  ;;  %v7813_v25 = vadd.f32 0.5, %v7797_v3  ;;  %10603 = vmatpush3.bf16.msra.mxu0 %v7900_v43  ;;  %v7844_v51 = vmul.f32 %v11326_v23, %v7812_v34  ;;  %v11205_v23 = vld [vmem:[%s15218_s5 + $0x20] sm:$0xff]  }
 0x5a1   :  { %v7811_v29 = vadd.f32 0.5, %v7795_v39  ;;  %10604 = vmatprep.subr.bf16.mxu0 %v7901_v32  ;;  %v7842_v24 = vmul.f32 %v11328_v60, %v7810_v35  ;;  %v11211_v60 = vld [vmem:[%s15218_s5 + $0x50] sm:$0xff]  }
 0x5a2   :  { %v7845_v53 = vmul.f32 %v11338_v4, %v7813_v25  ;;  %v7972_v43 = vpop.permute.xlu1 %7971 }
 0x5a3   :  { %v11342_v56 = vpop.eup %11341  ;;  %v7843_v48 = vmul.f32 %v11340_v41, %v7811_v29 }
 0x5a4   :  { %v11344_v17 = vpop.eup %11343  ;;  %v7800_v28 = vmul.f32 0.5, %v11342_v56  ;;  %10605 = vmatpush3.bf16.msra.mxu0 %v7901_v32  ;;  %v7903_v38 = vpack.c.bf16 %v7845_v53, %v7844_v51  ;;  %v7957_v32 = vpop.permute.xlu0 %7956 }
 0x5a5   :  { %v11346_v10 = vpop.eup %11345  ;;  %v7798_v8 = vmul.f32 0.5, %v11344_v17  ;;  %v7902_v37 = vpack.c.bf16 %v7843_v48, %v7842_v24 }
 0x5a6   :  { %v11348_v1 = vpop.eup %11347  ;;  %v7816_v13 = vadd.f32 0.5, %v7800_v28  ;;  %v7801_v46 = vmul.f32 0.5, %v11346_v10  ;;  %v15056_v34 = vpop.permute.xlu1 %8041 }
 0x5a7   :  { %v11350_v58 = vpop.eup %11349  ;;  %v7814_v5 = vadd.f32 0.5, %v7798_v8  ;;  %v7799_v21 = vmul.f32 0.5, %v11348_v1  ;;  %10606 = vmatprep.subr.bf16.mxu0 %v7902_v37  ;;  %v11225_v8 = vld [vmem:[%s15219_s7] sm:$0xff]  }
 0x5a8   :  { %v11352_v31 = vpop.eup %11351  ;;  %v7817_v12 = vadd.f32 0.5, %v7801_v46  ;;  %10607 = vmatpush3.bf16.msra.mxu0 %v7902_v37  ;;  %v7848_v42 = vmul.f32 %v11350_v58, %v7816_v13  ;;  %v7967_v30 = vpop.permute.xlu0 %7966 }
 0x5a9   :  { %v11354_v47 = vpop.eup %11353  ;;  %v7815_v15 = vadd.f32 0.5, %v7799_v21  ;;  %10608 = vmatprep.subr.bf16.mxu0 %v7903_v38  ;;  %v7846_v33 = vmul.f32 %v11352_v31, %v7814_v5 }
 0x5aa   :  { %v11356_v9 = vpop.eup %11355  ;;  %v7849_v44 = vmul.f32 %v11354_v47, %v7817_v12  ;;  %v7982_v4 = vpop.permute.xlu1 %7981 }
 0x5ab   :  { %v7847_v11 = vmul.f32 %v11356_v9, %v7815_v15 }
 0x5ac   :  { %10609 = vmatpush3.bf16.msra.mxu0 %v7903_v38  ;;  %v7905_v62 = vpack.c.bf16 %v7849_v44, %v7848_v42  ;;  %v15054_v59 = vpop.permute.xlu0 %8036 }
 0x5ad   :  { %v7904_v7 = vpack.c.bf16 %v7847_v11, %v7846_v33 }
 0x5ae   :  { %v15060_v39 = vpop.permute.xlu1 %8051 }
 0x5af   :  { %10610 = vmatprep.subr.bf16.mxu0 %v7904_v7 }
 0x5b0   :  { %10611 = vmatpush3.bf16.msra.mxu0 %v7904_v7  ;;  %v7977_v3 = vpop.permute.xlu0 %7976 }
 0x5b1   :  { %10612 = vmatprep.subr.bf16.mxu0 %v7905_v62 }
 0x5b2   :  { %v7992_v25 = vpop.permute.xlu1 %7991 }
 0x5b4   :  { %10613 = vmatpush3.bf16.msra.mxu0 %v7905_v62  ;;  %v15058_v35 = vpop.permute.xlu0 %8046 }
 0x5b6   :  { %v15064_v29 = vpop.permute.xlu1 %8121 }
 0x5b7   :  { %10615 = vmatmul.mubr.bf16.vlgmr.msra.gmra.mrb[80].mxu0 %v11202_v63 }
 0x5b8   :  { %10618 = vmatprep.mubr.bf16.mxu0 %v11203_v22  ;;  %v7987_v41 = vpop.permute.xlu0 %7986 }
 0x5ba   :  { %v15068_v53 = vpop.permute.xlu1 %8061 }
 0x5bc   :  { %v15062_v51 = vpop.permute.xlu0 %8116 }
 0x5be   :  { %v15072_v48 = vpop.permute.xlu1 %8001 }
 0x5bf   :  { %10619 = vmatmul.mubr.bf16.gmra.mrb[84].mxu0 %v11204_v26 }
 0x5c0   :  { %10622 = vmatprep.mubr.bf16.mxu0 %v11205_v23  ;;  %v15066_v24 = vpop.permute.xlu0 %8056 }
 0x5c2   :  { %v15076_v28 = vpop.permute.xlu1 %8131 }
 0x5c4   :  { %v15070_v56 = vpop.permute.xlu0 %7996 }
 0x5c6   :  { %v15080_v10 = vpop.permute.xlu1 %8071 }
 0x5c7   :  { %10623 = vmatmul.mubr.bf16.gmra.mrb[88].mxu0 %v11206_v49 }
 0x5c8   :  { %10626 = vmatprep.mubr.bf16.mxu0 %v11207_v55  ;;  %v15074_v17 = vpop.permute.xlu0 %8126 }
 0x5ca   :  { %v8012_v1 = vpop.permute.xlu1 %8011 }
 0x5cc   :  { %v15078_v38 = vpop.permute.xlu0 %8066 }
 0x5ce   :  { %v15087_v31 = vpop.permute.xlu1 %8141 }
 0x5cf   :  { %10627 = vmatmul.mubr.bf16.gmra.mrb[92].mxu0 %v11208_v0 }
 0x5d0   :  { %10630 = vmatprep.mubr.bf16.mxu0 %v11209_v52  ;;  %v8007_v37 = vpop.permute.xlu0 %8006 }
 0x5d2   :  { %v15091_v15 = vpop.permute.xlu1 %8081 }
 0x5d4   :  { %v15085_v58 = vpop.permute.xlu0 %8136 }
 0x5d6   :  { %v15095_v11 = vpop.permute.xlu1 %8021 }
 0x5d7   :  { %10631 = vmatmul.mubr.bf16.gmra.mrb[96].mxu0 %v11210_v14 }
 0x5d8   :  { %10634 = vmatprep.mubr.bf16.mxu0 %v11211_v60  ;;  %v15089_v12 = vpop.permute.xlu0 %8076 }
 0x5da   :  { %v15099_v52 = vpop.permute.xlu1 %8151 }
 0x5dc   :  { %v15093_v44 = vpop.permute.xlu0 %8016 }
 0x5df   :  { %10635 = vmatmul.mubr.bf16.gmra.mrb[100].mxu0 %v11212_v57 }
 0x5e0   :  { %10638 = vmatprep.mubr.bf16.mxu0 %v11213_v2  ;;  %v15097_v49 = vpop.permute.xlu0 %8146 }
 0x5e7   :  { %10639 = vmatmul.mubr.bf16.gmra.mrb[104].mxu0 %v11214_v27 }
 0x5e8   :  { %10642 = vmatprep.mubr.bf16.mxu0 %v11215_v40 }
 0x5ef   :  { %10643 = vmatmul.mubr.bf16.gmra.mrb[108].mxu0 %v11216_v50 }
 0x5f0   :  { %10646 = vmatprep.mubr.bf16.mxu0 %v11217_v19 }
 0x5f7   :  { %10647 = vmatmul.mubr.bf16.gmra.mrb[112].mxu0 %v11218_v36 }
 0x5f8   :  { %10650 = vmatprep.mubr.bf16.mxu0 %v11219_v54  ;;  %v15101_v54 = vpop.permute.xlu0 %8086 }
 0x5ff   :  { %10651 = vmatmul.mubr.bf16.gmra.mrb[116].mxu0 %v11220_v6 }
 0x600   :  { %10654 = vmatprep.mubr.bf16.mxu0 %v11221_v45 }
 0x607   :  { %10655 = vmatmul.mubr.bf16.gmra.mrb[120].mxu0 %v11222_v16 }
 0x608   :  { %10658 = vmatprep.mubr.bf16.mxu0 %v11223_v20 }
 0x60f   :  { %10659 = vmatmul.mubr.bf16.gmra.mrb[124].mxu0 %v11224_v61  ;;  %v15103_v61 = vpop.permute.xlu1 %8091 }
 0x610   :  { %10678 = vmatprep.mubr.bf16.mxu0 %v11225_v8 }
 0x68a   :  { %v10616_v13 = vpop.f32.mrb[80].mxu0 }
 0x68b   :  { %v8372_v46 = vpop.f32.mrb[81].mxu0  ;;  %v8381_v63 = vadd.f32 %v10616_v13, %v7967_v30  ;;  %v8032_v13 = vpop.permute.xlu1 %8031 }
 0x68c   :  { %v10617_v5 = vpop.f32.mrb[82].mxu0  ;;  %v8373_v26 = vadd.f32 %v8372_v46, %v7957_v32 }
 0x68d   :  { %v8375_v21 = vpop.f32.mrb[83].mxu0  ;;  %v8384_v55 = vadd.f32 %v10617_v5, %v7972_v43  ;;  %v8565_v14 = vmul.f32 0.5, %v8381_v63  ;;  %v8027_v43 = vpop.permute.xlu0 %8026 }
 0x68e   :  { %v8376_v0 = vadd.f32 %v8375_v21, %v7962_v18  ;;  %v8563_v60 = vmul.f32 0.5, %v8373_v26 }
 0x68f   :  { %v8566_v2 = vmul.f32 0.5, %v8384_v55  ;;  %11357 = vtanh.f32 %v8565_v14 }
 0x690   :  { %v8564_v50 = vmul.f32 0.5, %v8376_v0  ;;  %11359 = vtanh.f32 %v8563_v60 }
 0x691   :  { %11361 = vtanh.f32 %v8566_v2 }
 0x692   :  { %v10620_v42 = vpop.f32.mrb[84].mxu0  ;;  %11363 = vtanh.f32 %v8564_v50 }
 0x693   :  { %v8388_v47 = vpop.f32.mrb[85].mxu0  ;;  %v8397_v57 = vadd.f32 %v10620_v42, %v7987_v41 }
 0x694   :  { %v10621_v33 = vpop.f32.mrb[86].mxu0  ;;  %v8389_v27 = vadd.f32 %v8388_v47, %v7977_v3 }
 0x695   :  { %v8391_v9 = vpop.f32.mrb[87].mxu0  ;;  %v8400_v19 = vadd.f32 %v10621_v33, %v7992_v25  ;;  %v8569_v16 = vmul.f32 0.5, %v8397_v57 }
 0x696   :  { %v8392_v6 = vadd.f32 %v8391_v9, %v7982_v4  ;;  %v8567_v32 = vmul.f32 0.5, %v8389_v27 }
 0x697   :  { %v8570_v18 = vmul.f32 0.5, %v8400_v19  ;;  %11365 = vtanh.f32 %v8569_v16 }
 0x698   :  { %v8568_v30 = vmul.f32 0.5, %v8392_v6  ;;  %11367 = vtanh.f32 %v8567_v32 }
 0x699   :  { %11369 = vtanh.f32 %v8570_v18  ;;  %v11358_v33 = vpop.eup %11357 }
 0x69a   :  { %v10624_v62 = vpop.f32.mrb[88].mxu0  ;;  %11371 = vtanh.f32 %v8568_v30 }
 0x69b   :  { %v8404_v7 = vpop.f32.mrb[89].mxu0  ;;  %v8413_v3 = vadd.f32 %v10624_v62, %v8007_v37  ;;  %v11360_v62 = vpop.eup %11359 }
 0x69c   :  { %v10625_v22 = vpop.f32.mrb[90].mxu0  ;;  %v8405_v25 = vadd.f32 %v8404_v7, %v15070_v56  ;;  %v15110_v7 = vpop.permute.xlu0 %8156  ;;  %v8595_v26 = vmul.f32 0.5, %v11360_v62 }
 0x69d   :  { %v8407_v23 = vpop.f32.mrb[91].mxu0  ;;  %v8416_v46 = vadd.f32 %v10625_v22, %v8012_v1  ;;  %v8573_v9 = vmul.f32 0.5, %v8413_v3  ;;  %v15113_v22 = vpop.permute.xlu1 %8161 }
 0x69e   :  { %v8571_v56 = vmul.f32 0.5, %v8405_v25  ;;  %v8611_v3 = vadd.f32 0.5, %v8595_v26 }
 0x69f   :  { %v8574_v63 = vmul.f32 0.5, %v8416_v46 }
 0x6a1   :  { %v15123_v25 = vpop.permute.xlu1 %8101 }
 0x6a2   :  { %v10628_v40 = vpop.f32.mrb[92].mxu0 }
 0x6a3   :  { %v8420_v36 = vpop.f32.mrb[93].mxu0  ;;  %v8429_v55 = vadd.f32 %v10628_v40, %v8027_v43 }
 0x6a4   :  { %v10629_v45 = vpop.f32.mrb[94].mxu0  ;;  %v8421_v60 = vadd.f32 %v8420_v36, %v15093_v44  ;;  %v15120_v44 = vpop.permute.xlu0 %8096 }
 0x6a5   :  { %v8423_v20 = vpop.f32.mrb[95].mxu0  ;;  %v8432_v19 = vadd.f32 %v10629_v45, %v8032_v13  ;;  %v8577_v36 = vmul.f32 0.5, %v8429_v55 }
 0x6a6   :  { %v8424_v40 = vadd.f32 %v8423_v20, %v15095_v11 }
 0x6a7   :  { %v8578_v20 = vmul.f32 0.5, %v8432_v19 }
 0x6a8   :  { %v8576_v13 = vmul.f32 0.5, %v8424_v40 }
 0x6aa   :  { %v10632_v41 = vpop.f32.mrb[96].mxu0 }
 0x6ab   :  { %v8445_v4 = vadd.f32 %v10632_v41, %v15058_v35  ;;  %v8436_v8 = vpop.f32.mrb[97].mxu0  ;;  %v11362_v35 = vpop.eup %11361 }
 0x6ac   :  { %v8437_v5 = vadd.f32 %v8436_v8, %v15054_v59  ;;  %v10633_v21 = vpop.f32.mrb[98].mxu0  ;;  %v11364_v1 = vpop.eup %11363  ;;  %v8408_v59 = vadd.f32 %v8407_v23, %v15072_v48 }
 0x6ad   :  { %11373 = vtanh.f32 %v8445_v4  ;;  %v8448_v42 = vadd.f32 %v10633_v21, %v15060_v39  ;;  %v8439_v47 = vpop.f32.mrb[99].mxu0  ;;  %v8597_v39 = vmul.f32 0.5, %v11358_v33  ;;  %v11366_v14 = vpop.eup %11365  ;;  %v8596_v50 = vmul.f32 0.5, %v11364_v1 }
 0x6ae   :  { %11375 = vtanh.f32 %v8437_v5  ;;  %v8440_v37 = vadd.f32 %v8439_v47, %v15056_v34  ;;  %v8598_v34 = vmul.f32 0.5, %v11362_v35  ;;  %v11368_v27 = vpop.eup %11367  ;;  %v8572_v16 = vmul.f32 0.5, %v8408_v59 }
 0x6af   :  { %11377 = vtanh.f32 %v8448_v42  ;;  %v11370_v6 = vpop.eup %11369  ;;  %v8612_v8 = vadd.f32 0.5, %v8596_v50  ;;  %v8599_v47 = vmul.f32 0.5, %v11368_v27 }
 0x6b0   :  { %11379 = vtanh.f32 %v8440_v37  ;;  %v11372_v30 = vpop.eup %11371  ;;  %v8614_v11 = vadd.f32 0.5, %v8598_v34  ;;  %v8602_v35 = vmul.f32 0.5, %v11370_v6 }
 0x6b1   :  { %11381 = vtanh.f32 %v8573_v9 }
 0x6b2   :  { %v10636_v0 = vpop.f32.mrb[100].mxu0  ;;  %11383 = vtanh.f32 %v8571_v56  ;;  %v15134_v56 = vpop.permute.xlu0 %8166  ;;  %v8618_v27 = vadd.f32 0.5, %v8602_v35 }
 0x6b3   :  { %v8461_v57 = vadd.f32 %v10636_v0, %v15078_v38  ;;  %v8452_v2 = vpop.f32.mrb[101].mxu0  ;;  %11385 = vtanh.f32 %v8574_v63  ;;  %v8613_v38 = vadd.f32 0.5, %v8597_v39  ;;  %v8600_v39 = vmul.f32 0.5, %v11372_v30 }
 0x6b4   :  { %v8453_v48 = vadd.f32 %v8452_v2, %v15066_v24  ;;  %v10637_v23 = vpop.f32.mrb[102].mxu0  ;;  %v8575_v24 = vmul.f32 0.5, %v8421_v60 }
 0x6b5   :  { %11387 = vtanh.f32 %v8461_v57  ;;  %v8464_v32 = vadd.f32 %v10637_v23, %v15080_v10  ;;  %v8455_v18 = vpop.f32.mrb[103].mxu0  ;;  %v8615_v57 = vadd.f32 0.5, %v8599_v47  ;;  %v8616_v19 = vadd.f32 0.5, %v8600_v39 }
 0x6b6   :  { %11389 = vtanh.f32 %v8453_v48  ;;  %v8456_v43 = vadd.f32 %v8455_v18, %v15068_v53  ;;  %v8601_v53 = vmul.f32 0.5, %v11366_v14  ;;  %v15138_v14 = vpop.permute.xlu1 %8171  ;;  %v8107_v23 = vpop.permute.xlu0 %8106 }
 0x6b7   :  { %v11374_v45 = vpop.eup %11373  ;;  %11391 = vtanh.f32 %v8464_v32 }
 0x6b8   :  { %v11376_v41 = vpop.eup %11375  ;;  %v15125_v4 = vmul.f32 %v11374_v45, %v8613_v38  ;;  %11393 = vtanh.f32 %v8456_v43  ;;  %v8617_v34 = vadd.f32 0.5, %v8601_v53 }
 0x6b9   :  { %v11378_v10 = vpop.eup %11377  ;;  %11395 = vtanh.f32 %v8572_v16  ;;  %v15127_v46 = vmul.f32 %v11376_v41, %v8611_v3 }
 0x6ba   :  { %v11380_v5 = vpop.eup %11379  ;;  %11397 = vtanh.f32 %v8577_v36  ;;  %v15129_v21 = vmul.f32 %v11378_v10, %v8614_v11  ;;  %v10640_v42 = vpop.f32.mrb[104].mxu0 }
 0x6bb   :  { %11399 = vtanh.f32 %v8575_v24  ;;  %v15131_v33 = vmul.f32 %v11380_v5, %v8612_v8  ;;  %v8477_v9 = vadd.f32 %v10640_v42, %v15101_v54  ;;  %v8468_v37 = vpop.f32.mrb[105].mxu0  ;;  %v11382_v62 = vpop.eup %11381 }
 0x6bc   :  { %11401 = vtanh.f32 %v8578_v20  ;;  %v8469_v63 = vadd.f32 %v8468_v37, %v15089_v12  ;;  %v10641_v1 = vpop.f32.mrb[106].mxu0  ;;  %v11384_v59 = vpop.eup %11383 }
 0x6bd   :  { %11403 = vtanh.f32 %v8576_v13  ;;  %v8480_v26 = vadd.f32 %v10641_v1, %v15103_v61  ;;  %v8471_v55 = vpop.f32.mrb[107].mxu0  ;;  %v11386_v0 = vpop.eup %11385  ;;  %v8603_v43 = vmul.f32 0.5, %v11384_v59 }
 0x6be   :  { %11405 = vtanh.f32 %v8477_v9  ;;  %v8472_v54 = vadd.f32 %v8471_v55, %v15091_v15  ;;  %v8605_v15 = vmul.f32 0.5, %v11382_v62  ;;  %v8112_v36 = vpop.permute.xlu1 %8111  ;;  %v8606_v41 = vmul.f32 0.5, %v11386_v0 }
 0x6bf   :  { %v11388_v60 = vpop.eup %11387  ;;  %11407 = vtanh.f32 %v8469_v63  ;;  %v8619_v47 = vadd.f32 0.5, %v8603_v43 }
 0x6c0   :  { %v11390_v2 = vpop.eup %11389  ;;  %v15141_v12 = vmul.f32 %v11388_v60, %v8617_v34  ;;  %11409 = vtanh.f32 %v8480_v26  ;;  %v8621_v53 = vadd.f32 0.5, %v8605_v15  ;;  %v8622_v37 = vadd.f32 0.5, %v8606_v41 }
 0x6c1   :  { %v11392_v50 = vpop.eup %11391  ;;  %v15143_v48 = vmul.f32 %v11390_v2, %v8615_v57  ;;  %11411 = vtanh.f32 %v8472_v54 }
 0x6c2   :  { %v11394_v61 = vpop.eup %11393  ;;  %v15145_v6 = vmul.f32 %v11392_v50, %v8618_v27  ;;  %v10644_v16 = vpop.f32.mrb[108].mxu0 }
 0x6c3   :  { %v11396_v40 = vpop.eup %11395  ;;  %v15147_v32 = vmul.f32 %v11394_v61, %v8616_v19  ;;  %v8493_v18 = vadd.f32 %v10644_v16, %v8107_v23  ;;  %v8484_v30 = vpop.f32.mrb[109].mxu0 }
 0x6c4   :  { %v11398_v38 = vpop.eup %11397  ;;  %v8485_v45 = vadd.f32 %v8484_v30, %v15120_v44  ;;  %v10645_v3 = vpop.f32.mrb[110].mxu0  ;;  %v8604_v8 = vmul.f32 0.5, %v11396_v40 }
 0x6c5   :  { %v11400_v24 = vpop.eup %11399  ;;  %v8496_v11 = vadd.f32 %v10645_v3, %v8112_v36  ;;  %v8487_v20 = vpop.f32.mrb[111].mxu0  ;;  %11413 = vtanh.f32 %v8493_v18  ;;  %v8609_v39 = vmul.f32 0.5, %v11398_v38 }
 0x6c6   :  { %v11402_v10 = vpop.eup %11401  ;;  %v8488_v13 = vadd.f32 %v8487_v20, %v15123_v25  ;;  %11415 = vtanh.f32 %v8485_v45  ;;  %v8620_v35 = vadd.f32 0.5, %v8604_v8  ;;  %v8607_v0 = vmul.f32 0.5, %v11400_v24 }
 0x6c7   :  { %v11404_v5 = vpop.eup %11403  ;;  %11417 = vtanh.f32 %v8496_v11  ;;  %v8610_v57 = vmul.f32 0.5, %v11402_v10  ;;  %v8625_v61 = vadd.f32 0.5, %v8609_v39 }
 0x6c8   :  { %v11406_v42 = vpop.eup %11405  ;;  %11419 = vtanh.f32 %v8488_v13  ;;  %v8608_v50 = vmul.f32 0.5, %v11404_v5  ;;  %v8623_v16 = vadd.f32 0.5, %v8607_v0 }
 0x6c9   :  { %v11408_v9 = vpop.eup %11407  ;;  %v15151_v62 = vmul.f32 %v11406_v42, %v8621_v53  ;;  %11421 = vtanh.f32 %v15125_v4  ;;  %v8626_v15 = vadd.f32 0.5, %v8610_v57 }
 0x6ca   :  { %v11410_v44 = vpop.eup %11409  ;;  %v15153_v63 = vmul.f32 %v11408_v9, %v8619_v47  ;;  %v10648_v1 = vpop.f32.mrb[112].mxu0  ;;  %11423 = vtanh.f32 %v15127_v46  ;;  %v8624_v18 = vadd.f32 0.5, %v8608_v50 }
 0x6cb   :  { %v11412_v59 = vpop.eup %11411  ;;  %v15156_v25 = vmul.f32 %v11410_v44, %v8622_v37  ;;  %v8509_v26 = vadd.f32 %v10648_v1, %v15074_v17  ;;  %v8500_v55 = vpop.f32.mrb[113].mxu0  ;;  %11425 = vtanh.f32 %v15129_v21 }
 0x6cc   :  { %v15160_v34 = vmul.f32 %v11412_v59, %v8620_v35  ;;  %v8501_v54 = vadd.f32 %v8500_v55, %v15062_v51  ;;  %v10649_v60 = vpop.f32.mrb[114].mxu0  ;;  %11427 = vtanh.f32 %v15131_v33  ;;  %v8177_v44 = vpop.permute.xlu0 %8176 }
 0x6cd   :  { %v8661_v2 = vmul.f32 0.5, %v8509_v26  ;;  %v8512_v27 = vadd.f32 %v10649_v60, %v15076_v28  ;;  %v8503_v4 = vpop.f32.mrb[115].mxu0 }
 0x6ce   :  { %v8659_v17 = vmul.f32 0.5, %v8501_v54  ;;  %v8504_v19 = vadd.f32 %v8503_v4, %v15064_v29 }
 0x6cf   :  { %11429 = vtanh.f32 %v8661_v2  ;;  %v8662_v46 = vmul.f32 0.5, %v8512_v27  ;;  %v11414_v23 = vpop.eup %11413  ;;  %v8182_v2 = vpop.permute.xlu1 %8181 }
 0x6d0   :  { %11431 = vtanh.f32 %v8659_v17  ;;  %v8660_v51 = vmul.f32 0.5, %v8504_v19  ;;  %v11416_v40 = vpop.eup %11415  ;;  %v15167_v21 = vmul.f32 %v11414_v23, %v8625_v61 }
 0x6d1   :  { %11433 = vtanh.f32 %v8662_v46  ;;  %v11418_v28 = vpop.eup %11417  ;;  %v15169_v30 = vmul.f32 %v11416_v40, %v8623_v16  ;;  %v8187_v40 = vpop.permute.xlu0 %8186 }
 0x6d2   :  { %11435 = vtanh.f32 %v8660_v51  ;;  %v10652_v33 = vpop.f32.mrb[116].mxu0  ;;  %v11420_v38 = vpop.eup %11419  ;;  %v15172_v29 = vmul.f32 %v11418_v28, %v8626_v15 }
 0x6d3   :  { %11437 = vtanh.f32 %v15141_v12  ;;  %v8525_v36 = vadd.f32 %v10652_v33, %v15097_v49  ;;  %v8516_v43 = vpop.f32.mrb[117].mxu0  ;;  %v15176_v45 = vmul.f32 %v11420_v38, %v8624_v18  ;;  %v11422_v41 = vpop.eup %11421 }
 0x6d4   :  { %11439 = vtanh.f32 %v15143_v48  ;;  %v8517_v3 = vadd.f32 %v8516_v43, %v15085_v58  ;;  %v10653_v24 = vpop.f32.mrb[118].mxu0  ;;  %v11424_v12 = vpop.eup %11423 }
 0x6d5   :  { %11441 = vtanh.f32 %v15145_v6  ;;  %v8665_v11 = vmul.f32 0.5, %v8525_v36  ;;  %v8528_v20 = vadd.f32 %v10653_v24, %v15099_v52  ;;  %v8519_v10 = vpop.f32.mrb[119].mxu0  ;;  %v11426_v13 = vpop.eup %11425 }
 0x6d6   :  { %11443 = vtanh.f32 %v15147_v32  ;;  %v8663_v8 = vmul.f32 0.5, %v8517_v3  ;;  %v8520_v49 = vadd.f32 %v8519_v10, %v15087_v31  ;;  %v11428_v5 = vpop.eup %11427  ;;  %v8192_v24 = vpop.permute.xlu1 %8191 }
 0x6d7   :  { %11445 = vtanh.f32 %v8665_v11  ;;  %v8666_v48 = vmul.f32 0.5, %v8528_v20 }
 0x6d8   :  { %11447 = vtanh.f32 %v8663_v8  ;;  %v8664_v58 = vmul.f32 0.5, %v8520_v49 }
 0x6d9   :  { %v11430_v53 = vpop.eup %11429  ;;  %11449 = vtanh.f32 %v8666_v48 }
 0x6da   :  { %v11432_v42 = vpop.eup %11431  ;;  %v8693_v6 = vmul.f32 0.5, %v11430_v53  ;;  %11451 = vtanh.f32 %v8664_v58  ;;  %v10656_v47 = vpop.f32.mrb[120].mxu0 }
 0x6db   :  { %v11434_v52 = vpop.eup %11433  ;;  %11453 = vtanh.f32 %v15151_v62  ;;  %v8691_v9 = vmul.f32 0.5, %v11432_v42  ;;  %v8541_v32 = vadd.f32 %v10656_v47, %v15134_v56  ;;  %v8532_v37 = vpop.f32.mrb[121].mxu0 }
 0x6dc   :  { %v11436_v31 = vpop.eup %11435  ;;  %11455 = vtanh.f32 %v15153_v63  ;;  %v8709_v35 = vadd.f32 0.5, %v8693_v6  ;;  %v8694_v1 = vmul.f32 0.5, %v11434_v52  ;;  %v8533_v59 = vadd.f32 %v8532_v37, %v15110_v7  ;;  %v10657_v39 = vpop.f32.mrb[122].mxu0 }
 0x6dd   :  { %v11438_v26 = vpop.eup %11437  ;;  %v8707_v55 = vadd.f32 0.5, %v8691_v9  ;;  %v8692_v0 = vmul.f32 0.5, %v11436_v31  ;;  %v8669_v54 = vmul.f32 0.5, %v8541_v32  ;;  %v8544_v60 = vadd.f32 %v10657_v39, %v15138_v14  ;;  %v8535_v62 = vpop.f32.mrb[123].mxu0 }
 0x6de   :  { %v11440_v57 = vpop.eup %11439  ;;  %v8710_v56 = vadd.f32 0.5, %v8694_v1  ;;  %v8667_v27 = vmul.f32 0.5, %v8533_v59  ;;  %v8536_v4 = vadd.f32 %v8535_v62, %v15113_v22  ;;  %v8741_v50 = vmul.f32 %v11422_v41, %v8709_v35 }
 0x6df   :  { %v11442_v63 = vpop.eup %11441  ;;  %v8708_v17 = vadd.f32 0.5, %v8692_v0  ;;  %11457 = vtanh.f32 %v8669_v54  ;;  %v8670_v19 = vmul.f32 0.5, %v8544_v60  ;;  %v8739_v7 = vmul.f32 %v11424_v12, %v8707_v55 }
 0x6e0   :  { %v11444_v61 = vpop.eup %11443  ;;  %11459 = vtanh.f32 %v8667_v27  ;;  %v8668_v46 = vmul.f32 0.5, %v8536_v4  ;;  %v8742_v23 = vmul.f32 %v11426_v13, %v8710_v56 }
 0x6e1   :  { %v11446_v16 = vpop.eup %11445  ;;  %11461 = vtanh.f32 %v8670_v19  ;;  %v8740_v14 = vmul.f32 %v11428_v5, %v8708_v17 }
 0x6e2   :  { %v11448_v51 = vpop.eup %11447  ;;  %v8697_v15 = vmul.f32 0.5, %v11446_v16  ;;  %11463 = vtanh.f32 %v8668_v46  ;;  %v10660_v28 = vpop.f32.mrb[124].mxu0  ;;  %v8764_v18 = vpack.c.bf16 %v8742_v23, %v8741_v50 }
 0x6e3   :  { %v11450_v22 = vpop.eup %11449  ;;  %11465 = vtanh.f32 %v15156_v25  ;;  %v8695_v33 = vmul.f32 0.5, %v11448_v51  ;;  %v8557_v38 = vadd.f32 %v10660_v28, %v8187_v40  ;;  %v8548_v36 = vpop.f32.mrb[125].mxu0  ;;  %v8763_v43 = vpack.c.bf16 %v8740_v14, %v8739_v7 }
 0x6e4   :  { %v11452_v3 = vpop.eup %11451  ;;  %11467 = vtanh.f32 %v15160_v34  ;;  %v8713_v41 = vadd.f32 0.5, %v8697_v15  ;;  %v8698_v11 = vmul.f32 0.5, %v11450_v22  ;;  %v8549_v20 = vadd.f32 %v8548_v36, %v8177_v44  ;;  %v10661_v10 = vpop.f32.mrb[126].mxu0 }
 0x6e5   :  { %v11454_v12 = vpop.eup %11453  ;;  %v8711_v8 = vadd.f32 0.5, %v8695_v33  ;;  %v8696_v49 = vmul.f32 0.5, %v11452_v3  ;;  %v8673_v13 = vmul.f32 0.5, %v8557_v38  ;;  %v8560_v48 = vadd.f32 %v10661_v10, %v8192_v24  ;;  %v8551_v5 = vpop.f32.mrb[127].mxu0  ;;  %10662 = vmatprep.subr.bf16.mxu0 %v8763_v43  ;;  %v11228_v10 = vld [vmem:[%s15219_s7 + $0x18] sm:$0xff]  }
 0x6e6   :  { %v11456_v25 = vpop.eup %11455  ;;  %v8714_v58 = vadd.f32 0.5, %v8698_v11  ;;  %v8671_v53 = vmul.f32 0.5, %v8549_v20  ;;  %v8552_v42 = vadd.f32 %v8551_v5, %v8182_v2  ;;  %10663 = vmatpush3.bf16.msra.mxu0 %v8763_v43  ;;  %v8745_v6 = vmul.f32 %v11438_v26, %v8713_v41  ;;  %v11226_v11 = vld [vmem:[%s15219_s7 + $0x8] sm:$0xff]   ;;  %v11227_v20 = vld [vmem:[%s15219_s7 + $0x10] sm:$0xff]  }
 0x6e7   :  { %v8712_v47 = vadd.f32 0.5, %v8696_v49  ;;  %11469 = vtanh.f32 %v8673_v13  ;;  %v8674_v34 = vmul.f32 0.5, %v8560_v48  ;;  %10664 = vmatprep.subr.bf16.mxu0 %v8764_v18  ;;  %v8743_v52 = vmul.f32 %v11440_v57, %v8711_v8  ;;  %v8782_v8 = vpop.permute.xlu0 %8781  ;;  %v8787_v49 = vpop.permute.xlu1 %8786 }
 0x6e8   :  { %11471 = vtanh.f32 %v8671_v53  ;;  %v8672_v9 = vmul.f32 0.5, %v8552_v42  ;;  %v8746_v32 = vmul.f32 %v11442_v63, %v8714_v58 }
 0x6e9   :  { %v11458_v37 = vpop.eup %11457  ;;  %11473 = vtanh.f32 %v8674_v34  ;;  %v8744_v31 = vmul.f32 %v11444_v61, %v8712_v47 }
 0x6ea   :  { %v11460_v44 = vpop.eup %11459  ;;  %v8701_v35 = vmul.f32 0.5, %v11458_v37  ;;  %11475 = vtanh.f32 %v8672_v9  ;;  %10665 = vmatpush3.bf16.msra.mxu0 %v8764_v18  ;;  %v8766_v1 = vpack.c.bf16 %v8746_v32, %v8745_v6 }
 0x6eb   :  { %v11462_v59 = vpop.eup %11461  ;;  %11477 = vtanh.f32 %v15167_v21  ;;  %v8699_v39 = vmul.f32 0.5, %v11460_v44  ;;  %v8765_v26 = vpack.c.bf16 %v8744_v31, %v8743_v52  ;;  %v8792_v13 = vpop.permute.xlu0 %8791 }
 0x6ec   :  { %v11464_v55 = vpop.eup %11463  ;;  %11479 = vtanh.f32 %v15169_v30  ;;  %v8717_v0 = vadd.f32 0.5, %v8701_v35  ;;  %v8702_v54 = vmul.f32 0.5, %v11462_v59  ;;  %v8797_v48 = vpop.permute.xlu1 %8796 }
 0x6ed   :  { %v11466_v60 = vpop.eup %11465  ;;  %11481 = vtanh.f32 %v15172_v29  ;;  %v8715_v62 = vadd.f32 0.5, %v8699_v39  ;;  %v8700_v57 = vmul.f32 0.5, %v11464_v55  ;;  %10666 = vmatprep.subr.bf16.mxu0 %v8765_v26 }
 0x6ee   :  { %v11468_v2 = vpop.eup %11467  ;;  %11483 = vtanh.f32 %v15176_v45  ;;  %v8718_v56 = vadd.f32 0.5, %v8702_v54  ;;  %10667 = vmatpush3.bf16.msra.mxu0 %v8765_v26  ;;  %v8749_v27 = vmul.f32 %v11454_v12, %v8717_v0  ;;  %v11574_v12 = vmov 0.0  }
 0x6ef   :  { %v8716_v21 = vadd.f32 0.5, %v8700_v57  ;;  %10668 = vmatprep.subr.bf16.mxu0 %v8766_v1  ;;  %v8747_v4 = vmul.f32 %v11456_v25, %v8715_v62  ;;  %v8802_v53 = vpop.permute.xlu0 %8801 }
 0x6f0   :  { %v8750_v50 = vmul.f32 %v11466_v60, %v8718_v56  ;;  %v8807_v52 = vpop.permute.xlu1 %8806 }
 0x6f1   :  { %v11470_v63 = vpop.eup %11469  ;;  %v8748_v30 = vmul.f32 %v11468_v2, %v8716_v21 }
 0x6f2   :  { %v11472_v17 = vpop.eup %11471  ;;  %v8705_v19 = vmul.f32 0.5, %v11470_v63  ;;  %10669 = vmatpush3.bf16.msra.mxu0 %v8766_v1  ;;  %v8768_v7 = vpack.c.bf16 %v8750_v50, %v8749_v27 }
 0x6f3   :  { %v11474_v29 = vpop.eup %11473  ;;  %v8703_v61 = vmul.f32 0.5, %v11472_v17  ;;  %v8767_v46 = vpack.c.bf16 %v8748_v30, %v8747_v4  ;;  %v8812_v1 = vpop.permute.xlu0 %8811  ;;  %v8916_v30 = vld [vmem:[%s15220_s9] sm:$0xf] }
 0x6f4   :  { %v11476_v23 = vpop.eup %11475  ;;  %v8721_v16 = vadd.f32 0.5, %v8705_v19  ;;  %v8706_v14 = vmul.f32 0.5, %v11474_v29  ;;  %v8817_v0 = vpop.permute.xlu1 %8816 }
 0x6f5   :  { %v11478_v45 = vpop.eup %11477  ;;  %v8719_v51 = vadd.f32 0.5, %v8703_v61  ;;  %v8704_v40 = vmul.f32 0.5, %v11476_v23  ;;  %10670 = vmatprep.subr.bf16.mxu0 %v8767_v46 }
 0x6f6   :  { %v11480_v15 = vpop.eup %11479  ;;  %v8722_v28 = vadd.f32 0.5, %v8706_v14  ;;  %10671 = vmatpush3.bf16.msra.mxu0 %v8767_v46  ;;  %v8753_v18 = vmul.f32 %v11478_v45, %v8721_v16 }
 0x6f7   :  { %v11482_v22 = vpop.eup %11481  ;;  %v8720_v33 = vadd.f32 0.5, %v8704_v40  ;;  %10672 = vmatprep.subr.bf16.mxu0 %v8768_v7  ;;  %v8751_v38 = vmul.f32 %v11480_v15, %v8719_v51  ;;  %v8925_v17 = vpop.permute.xlu0 %8924 }
 0x6f8   :  { %v11484_v36 = vpop.eup %11483  ;;  %v8754_v43 = vmul.f32 %v11482_v22, %v8722_v28 }
 0x6f9   :  { %v8752_v3 = vmul.f32 %v11484_v36, %v8720_v33 }
 0x6fa   :  { %10673 = vmatpush3.bf16.msra.mxu0 %v8768_v7  ;;  %v8770_v24 = vpack.c.bf16 %v8754_v43, %v8753_v18 }
 0x6fb   :  { %v8769_v41 = vpack.c.bf16 %v8752_v3, %v8751_v38 }
 0x6fd   :  { %10674 = vmatprep.subr.bf16.mxu0 %v8769_v41 }
 0x6fe   :  { %10675 = vmatpush3.bf16.msra.mxu0 %v8769_v41 }
 0x6ff   :  { %10676 = vmatprep.subr.bf16.mxu0 %v8770_v24 }
 0x702   :  { %10677 = vmatpush3.bf16.msra.mxu0 %v8770_v24 }
 0x703   :  { %10686 = vmatprep.subr.bf16.mxu0 %v11574_v12 }
 0x705   :  { %10679 = vmatmul.mubr.bf16.vlgmr.msra.gmra.mrb[128].mxu0 %v11226_v11 }
 0x706   :  { %10682 = vmatprep.mubr.bf16.mxu0 %v11227_v20 }
 0x70d   :  { %10683 = vmatmul.mubr.bf16.gmra.mrb[132].mxu0 %v11228_v10 }
 0x70e   :  { %10694 = vmatprep.mubr.msk.bf16.mxu0 %vm11575_vm2, %v11574_v12 }
 0x7d8   :  { %v10680_v5 = vpop.f32.mrb[128].mxu0 }
 0x7d9   :  { %v8886_v25 = vadd.f32 %v10680_v5, %v8792_v13  ;;  %v8877_v58 = vpop.f32.mrb[129].mxu0 }
 0x7da   :  { %v8878_v42 = vadd.f32 %v8877_v58, %v8782_v8  ;;  %v10681_v6 = vpop.f32.mrb[130].mxu0 }
 0x7db   :  { %v8889_v47 = vadd.f32 %v10681_v6, %v8797_v48  ;;  %v8880_v34 = vpop.f32.mrb[131].mxu0  ;;  %v8910_v32 = vmax.f32 %v8886_v25, 0.0 }
 0x7dc   :  { %v8881_v9 = vadd.f32 %v8880_v34, %v8787_v49  ;;  %v8908_v31 = vmax.f32 %v8878_v42, 0.0 }
 0x7dd   :  { %v8911_v37 = vmax.f32 %v8889_v47, 0.0 }
 0x7de   :  { %v8909_v44 = vmax.f32 %v8881_v9, 0.0 }
 0x7df   :  { %v8918_v35 = vpack.c.bf16 %v8911_v37, %v8910_v32 }
 0x7e0   :  { %v8917_v59 = vpack.c.bf16 %v8909_v44, %v8908_v31  ;;  %v10684_v39 = vpop.f32.mrb[132].mxu0 }
 0x7e1   :  { %v8902_v26 = vadd.f32 %v10684_v39, %v8812_v1  ;;  %v8893_v55 = vpop.f32.mrb[133].mxu0 }
 0x7e2   :  { %v8894_v54 = vadd.f32 %v8893_v55, %v8802_v53  ;;  %v10685_v60 = vpop.f32.mrb[134].mxu0  ;;  %10687 = vmatpush3.bf16.msra.mxu0 %v8917_v59 }
 0x7e3   :  { %v8905_v62 = vadd.f32 %v10685_v60, %v8817_v0  ;;  %v8896_v57 = vpop.f32.mrb[135].mxu0  ;;  %10688 = vmatprep.subr.bf16.mxu0 %v11574_v12  ;;  %v8914_v56 = vmax.f32 %v8902_v26, 0.0 }
 0x7e4   :  { %v8897_v2 = vadd.f32 %v8896_v57, %v8807_v52  ;;  %v8912_v21 = vmax.f32 %v8894_v54, 0.0 }
 0x7e5   :  { %v8915_v27 = vmax.f32 %v8905_v62, 0.0 }
 0x7e6   :  { %v8913_v4 = vmax.f32 %v8897_v2, 0.0  ;;  %10689 = vmatpush3.bf16.msra.mxu0 %v8918_v35 }
 0x7e7   :  { %v8920_v50 = vpack.c.bf16 %v8915_v27, %v8914_v56  ;;  %10690 = vmatprep.subr.bf16.mxu0 %v11574_v12 }
 0x7e8   :  { %v8919_v63 = vpack.c.bf16 %v8913_v4, %v8912_v21 }
 0x7ea   :  { %10691 = vmatpush3.bf16.msra.mxu0 %v8919_v63 }
 0x7eb   :  { %10692 = vmatprep.subr.bf16.mxu0 %v11574_v12 }
 0x7ee   :  { %10693 = vmatpush3.bf16.msra.mxu0 %v8920_v50 }
 0x7f1   :  { %10695 = vmatmul.mubr.msk.bf16.vlgmr.msra.gmra.mrb[136].mxu0 %vm8927_vm3, %v8916_v30 }
 0x8c4   :  { %v8965_v19 = vpop.f32.mrb[136].mxu0 }
 0x8c5   :  { %v8966_v7 = vadd.f32 %v8965_v19, %v8925_v17  ;;  %v10696_v29 = vpop.f32.mrb[137].mxu0 }
 0x8c6   :  { %v8968_v61 = vpop.f32.mrb[138].mxu0 }
 0x8c7   :  { %v8971_v46 = vrot.slane %v8966_v7, 4  ;;  %v10697_v23 = vpop.f32.mrb[139].mxu0 }
 0x8c9   :  { %v8972_v16 = vmax.f32 %v8966_v7, %v8971_v46 }
 0x8cb   :  { %v8973_v14 = vrot.slane %v8972_v16, 2 }
 0x8cd   :  { %v8974_v45 = vmax.f32 %v8972_v16, %v8973_v14 }
 0x8cf   :  { %v8975_v51 = vrot.slane %v8974_v45, 1 }
 0x8d1   :  { %v8976_v40 = vmax.f32 %v8974_v45, %v8975_v51 }
 0x8d3   :  { %v8977_v15 = vsub.f32 %v8966_v7, %v8976_v40 }
 0x8d5   :  { %v8978_v28 = vmul.f32 1.442695, %v8977_v15 }
 0x8d7   :  { %11485 = vpow2.f32 %v8978_v28 }
 0x8e1   :  { %v11486_v18 = vpop.eup %11485 }
 0x8e2   :  { %v8980_v22 = vrot.slane %v11486_v18, 4 }
 0x8e4   :  { %v8981_v33 = vadd.f32 %v11486_v18, %v8980_v22 }
 0x8e6   :  { %v8982_v38 = vrot.slane %v8981_v33, 2 }
 0x8e8   :  { %v8983_v36 = vadd.f32 %v8982_v38, %v8981_v33 }
 0x8ea   :  { %v8984_v43 = vrot.slane %v8983_v36, 1 }
 0x8ec   :  { %v8985_v3 = vadd.f32 %v8984_v43, %v8983_v36 }
 0x8ee   :  { %11487 = vrcp.f32 %v8985_v3 }
 0x8f8   :  { %v11488_v24 = vpop.eup %11487 }
 0x8f9   :  { %v8987_v41 = vmul.f32 %v11488_v24, %v11486_v18 }
 0x8fb   :  { %8988 = vst [vmem:[%s15221_s11] sm:$0xff] %v8987_v41 }

</bundles_post_ra>
